<compile_context>
chip_gen: v5e
topology: v5e:2x2
jax: 0.10.0
libtpu: 0.0.40
codegen_flags: <defaults>
</compile_context>

<pallas_src>
import functools

import jax
import jax.numpy as jnp
from jax.experimental import pallas as pl
from jax.experimental.pallas import tpu as pltpu

NEG_INF = -1e30  # large finite negative instead of -inf (safe for fully-masked rows)


def _pick_tile(dim, candidates):
    for c in candidates:
        if dim % c == 0:
            return c
    return dim  # full extent is always a legal block size


# --------------------------- tiled bf16 matmul kernel ---------------------------

def _matmul_kernel(x_ref, w_ref, o_ref, acc_ref):
    @pl.when(pl.program_id(2) == 0)
    def _():
        acc_ref[...] = jnp.zeros_like(acc_ref)

    acc_ref[...] += jnp.dot(x_ref[...], w_ref[...],
                            preferred_element_type=jnp.float32)

    @pl.when(pl.program_id(2) == pl.num_programs(2) - 1)
    def _():
        o_ref[...] = acc_ref[...].astype(o_ref.dtype)


def pallas_matmul(x, w, out_dtype=jnp.float32):
    """(M,K)@(K,N): bf16 operands on the MXU, f32 accumulation in VMEM scratch."""
    M, K = x.shape
    K2, N = w.shape
    assert K == K2
    tm = _pick_tile(M, (256, 128))
    tn = _pick_tile(N, (256, 128))
    tk = _pick_tile(K, (512, 256, 128))
    grid = (M // tm, N // tn, K // tk)
    return pl.pallas_call(
        _matmul_kernel,
        out_shape=jax.ShapeDtypeStruct((M, N), out_dtype),
        grid_spec=pltpu.PrefetchScalarGridSpec(
            num_scalar_prefetch=0,
            grid=grid,
            in_specs=[pl.BlockSpec((tm, tk), lambda i, j, k: (i, k)),
                      pl.BlockSpec((tk, tn), lambda i, j, k: (k, j))],
            out_specs=pl.BlockSpec((tm, tn), lambda i, j, k: (i, j)),
            scratch_shapes=[pltpu.VMEM((tm, tn), jnp.float32)]),
        compiler_params=pltpu.CompilerParams(
            dimension_semantics=("parallel", "parallel", "arbitrary")),
    )(x.astype(jnp.bfloat16), w.astype(jnp.bfloat16))


# ------------------- fused relative-attention kernel (per b, q-tile) -------------------

def _rel_attn_kernel(q_ref, k_ref, v_ref, rk_ref, rwb_ref, rrb_ref, o_ref, *, scale):
    H, TQ, Dh = q_ref.shape
    T = k_ref.shape[1]
    R = rk_ref.shape[1]          # R == T (asserted in the wrapper)
    q_start = pl.program_id(1) * TQ

    # Causal mask generated in-kernel (no HBM mask tensor).
    rows = q_start + jax.lax.broadcasted_iota(jnp.int32, (TQ, T), 0)
    cols = jax.lax.broadcasted_iota(jnp.int32, (TQ, T), 1)
    causal = rows >= cols

    outs = []
    for h in range(H):  # H is small & static: unrolled
        qh = q_ref[h].astype(jnp.float32)                       # (TQ, Dh)
        rw_q = (qh + rwb_ref[h]).astype(jnp.bfloat16)
        rr_q = (qh + rrb_ref[h]).astype(jnp.bfloat16)

        # AC[i,j] = (q_i + r_w_bias) . k_j
        ac = jax.lax.dot_general(rw_q, k_ref[h],
                                 (((1,), (1,)), ((), ())),
                                 preferred_element_type=jnp.float32)   # (TQ, T)
        # BD_raw[i,m] = (q_i + r_r_bias) . r_m
        bd = jax.lax.dot_general(rr_q, rk_ref[h],
                                 (((1,), (1,)), ((), ())),
                                 preferred_element_type=jnp.float32)   # (TQ, R)
        # Transformer-XL _rel_shift, fully in VMEM:
        #   shifted[i, j] = raw[i, (j - i - 1) mod R]
        # (j > i entries are wrap-around garbage, exactly like the PyTorch
        #  view-trick's upper triangle; both are masked below.)
        bd = pltpu.roll(bd, q_start + 1, 1, stride=1, stride_axis=0)

        s = (ac + bd) * scale
        s = jnp.where(causal, s, NEG_INF)
        s = s - jnp.max(s, axis=-1, keepdims=True)      # softmax over the key axis, f32
        p = jnp.exp(s)
        p = p / jnp.sum(p, axis=-1, keepdims=True)
        outs.append(jax.lax.dot_general(p.astype(jnp.bfloat16), v_ref[h],
                                        (((1,), (0,)), ((), ())),
                                        preferred_element_type=jnp.float32))  # (TQ, Dh)

    # Lane-dense (TQ, H*Dh) store.
    o_ref[...] = jnp.concatenate(outs, axis=-1).astype(o_ref.dtype)


def pallas_rel_attention(q, k, v, rk, rwb, rrb, scale):
    """q,k,v: (B,H,T,Dh) bf16; rk: (H,R,Dh) bf16; biases: (H,1,Dh) f32 -> (B,T,H*Dh) bf16."""
    B, H, T, Dh = q.shape
    R = rk.shape[1]
    # TODO(synk): the rel_shift assumes rlen == klen (no mems / mem_len).
    assert R == T, "rel-shift path requires rlen == klen (no mems)"
    tq = _pick_tile(T, (256, 128))
    grid = (B, T // tq)
    return pl.pallas_call(
        functools.partial(_rel_attn_kernel, scale=scale),
        out_shape=jax.ShapeDtypeStruct((B, T, H * Dh), jnp.bfloat16),
        grid_spec=pltpu.PrefetchScalarGridSpec(
            num_scalar_prefetch=0,
            grid=grid,
            in_specs=[
                pl.BlockSpec((None, H, tq, Dh), lambda b, qi: (b, 0, qi, 0)),
                pl.BlockSpec((None, H, T, Dh), lambda b, qi: (b, 0, 0, 0)),
                pl.BlockSpec((None, H, T, Dh), lambda b, qi: (b, 0, 0, 0)),
                pl.BlockSpec((H, R, Dh), lambda b, qi: (0, 0, 0)),
                pl.BlockSpec((H, 1, Dh), lambda b, qi: (0, 0, 0)),
                pl.BlockSpec((H, 1, Dh), lambda b, qi: (0, 0, 0)),
            ],
            out_specs=pl.BlockSpec((None, tq, H * Dh), lambda b, qi: (b, qi, 0)),
        ),
        compiler_params=pltpu.CompilerParams(
            dimension_semantics=("parallel", "parallel")),
    )(q, k, v, rk, rwb, rrb)


# ----------------- fused o_net + residual-add + LayerNorm epilogue -----------------

def _o_residual_ln_kernel(a_ref, wo_ref, res_ref, g_ref, b_ref, o_ref, *, eps):
    y = jnp.dot(a_ref[...], wo_ref[...], preferred_element_type=jnp.float32)
    y = y + res_ref[...]
    mu = jnp.mean(y, axis=-1, keepdims=True)
    var = jnp.mean(jnp.square(y - mu), axis=-1, keepdims=True)
    o_ref[...] = (y - mu) * jax.lax.rsqrt(var + eps) * g_ref[...] + b_ref[...]


def pallas_o_residual_layernorm(attn_vec, wo, residual, g, b, eps=1e-5):
    M, HD = attn_vec.shape
    D = wo.shape[1]
    tm = _pick_tile(M, (256, 128))
    return pl.pallas_call(
        functools.partial(_o_residual_ln_kernel, eps=eps),
        out_shape=jax.ShapeDtypeStruct((M, D), jnp.float32),
        grid_spec=pltpu.PrefetchScalarGridSpec(
            num_scalar_prefetch=0,
            grid=(M // tm,),
            in_specs=[pl.BlockSpec((tm, HD), lambda i: (i, 0)),
                      pl.BlockSpec((HD, D), lambda i: (0, 0)),
                      pl.BlockSpec((tm, D), lambda i: (i, 0)),
                      pl.BlockSpec((1, D), lambda i: (0, 0)),
                      pl.BlockSpec((1, D), lambda i: (0, 0))],
            out_specs=pl.BlockSpec((tm, D), lambda i: (i, 0)),
        ),
        compiler_params=pltpu.CompilerParams(dimension_semantics=("parallel",)),
    )(attn_vec.astype(jnp.bfloat16), wo.astype(jnp.bfloat16),
      residual.astype(jnp.float32),
      g.reshape(1, D).astype(jnp.float32), b.reshape(1, D).astype(jnp.float32))


# --------------------------------- module forward ---------------------------------

def rel_partial_learnable_mha_forward(w, r, r_w_bias, r_r_bias, params):
    """RelPartialLearnableMultiHeadAttn.forward (post-lnorm, no mems, causal mask,
    dropout=identity).  w: (qlen, bsz, d_model), r: (rlen, d_model) -> (qlen, bsz, d_model)."""
    T, B, D = w.shape
    R = r.shape[0]
    H, Dh = r_w_bias.shape
    HD = H * Dh
    scale = 1.0 / (Dh ** 0.5)

    x2 = w.reshape(T * B, D)

    # qkv_net / r_net (bias-free) as tiled bf16 matmuls.
    w_heads = pallas_matmul(x2, params["w_qkv"], out_dtype=jnp.bfloat16)   # (T*B, 3*H*Dh)
    r_head_k = pallas_matmul(r, params["w_r"], out_dtype=jnp.bfloat16)     # (R, H*Dh)

    heads = w_heads.reshape(T, B, 3, H, Dh)
    q = heads[:, :, 0].transpose(1, 2, 0, 3)          # (B, H, T, Dh) bf16
    k = heads[:, :, 1].transpose(1, 2, 0, 3)
    v = heads[:, :, 2].transpose(1, 2, 0, 3)
    rk = r_head_k.reshape(R, H, Dh).transpose(1, 0, 2)  # (H, R, Dh) bf16

    rwb = r_w_bias.reshape(H, 1, Dh).astype(jnp.float32)
    rrb = r_r_bias.reshape(H, 1, Dh).astype(jnp.float32)

    attn = pallas_rel_attention(q, k, v, rk, rwb, rrb, scale)   # (B, T, H*Dh) bf16
    attn2 = attn.transpose(1, 0, 2).reshape(T * B, HD)

    out = pallas_o_residual_layernorm(attn2, params["w_o"], x2,
                                      params["ln_g"], params["ln_b"])
    return out.reshape(T, B, D)


# ---------------------- pure-JAX reference (matched precision) ----------------------

def ref_forward(w, r, r_w_bias, r_r_bias, params):
    bf = jnp.bfloat16
    T, B, D = w.shape
    R = r.shape[0]
    H, Dh = r_w_bias.shape
    HD = H * Dh
    scale = 1.0 / (Dh ** 0.5)

    wh = jnp.dot(w.reshape(T * B, D).astype(bf), params["w_qkv"].astype(bf),
                 preferred_element_type=jnp.float32).astype(bf).reshape(T, B, 3, H, Dh)
    rk = jnp.dot(r.astype(bf), params["w_r"].astype(bf),
                 preferred_element_type=jnp.float32).astype(bf).reshape(R, H, Dh)
    q, k, v = wh[:, :, 0], wh[:, :, 1], wh[:, :, 2]          # (T, B, H, Dh)

    rw_q = (q.astype(jnp.float32) + r_w_bias).astype(bf)
    rr_q = (q.astype(jnp.float32) + r_r_bias).astype(bf)
    AC = jnp.einsum('ibnd,jbnd->bnij', rw_q, k, preferred_element_type=jnp.float32)
    BD = jnp.einsum('ibnd,jnd->bnij', rr_q, rk, preferred_element_type=jnp.float32)
    # torch-style _rel_shift via the zero-pad / reshape view trick
    zp = jnp.zeros((B, H, T, 1), BD.dtype)
    BD = jnp.concatenate([zp, BD], axis=-1).reshape(B, H, R + 1, T)[:, :, 1:, :]
    BD = BD.reshape(B, H, T, R)

    s = (AC + BD) * scale
    causal = jnp.arange(T)[:, None] >= jnp.arange(T)[None, :]
    s = jnp.where(causal[None, None], s, NEG_INF)
    p = jax.nn.softmax(s, axis=-1)
    av = jnp.einsum('bnij,jbnd->ibnd', p.astype(bf), v,
                    preferred_element_type=jnp.float32).astype(bf)
    av = av.reshape(T * B, HD)
    y = jnp.dot(av, params["w_o"].astype(bf), preferred_element_type=jnp.float32)
    y = y + w.reshape(T * B, D).astype(jnp.float32)
    mu = y.mean(-1, keepdims=True)
    var = ((y - mu) ** 2).mean(-1, keepdims=True)
    out = (y - mu) * jax.lax.rsqrt(var + 1e-5) * params["ln_g"] + params["ln_b"]
    return out.reshape(T, B, D)


# ---------------------------------------- main ----------------------------------------

if __name__ == "__main__":
    T, B, D, H, Dh = 128, 2, 256, 4, 64   # qlen, bsz, d_model, n_head, d_head
    HD = H * Dh

    key = jax.random.PRNGKey(0)
    k_w, k_b1, k_b2, k_qkv, k_wr, k_wo = jax.random.split(key, 6)

    w = jax.random.normal(k_w, (T, B, D), jnp.float32)
    # Transformer-XL sinusoidal relative positional embedding (descending positions)
    pos_seq = jnp.arange(T - 1, -1, -1.0, dtype=jnp.float32)
    inv_freq = 1.0 / (10000.0 ** (jnp.arange(0, D, 2, dtype=jnp.float32) / D))
    sinusoid = jnp.outer(pos_seq, inv_freq)
    r = jnp.concatenate([jnp.sin(sinusoid), jnp.cos(sinusoid)], axis=-1)   # (rlen, D)

    r_w_bias = 0.1 * jax.random.normal(k_b1, (H, Dh), jnp.float32)
    r_r_bias = 0.1 * jax.random.normal(k_b2, (H, Dh), jnp.float32)
    params = {
        "w_qkv": jax.random.normal(k_qkv, (D, 3 * HD), jnp.float32) / (D ** 0.5),
        "w_r":   jax.random.normal(k_wr, (D, HD), jnp.float32) / (D ** 0.5),
        "w_o":   jax.random.normal(k_wo, (HD, D), jnp.float32) / (HD ** 0.5),
        "ln_g":  jnp.ones((D,), jnp.float32),
        "ln_b":  jnp.zeros((D,), jnp.float32),
    }

    fwd = jax.jit(rel_partial_learnable_mha_forward)
    out = jax.block_until_ready(fwd(w, r, r_w_bias, r_r_bias, params))
    assert out.shape == (T, B, D)
    assert bool(jnp.all(jnp.isfinite(out)))

    ref = jax.block_until_ready(jax.jit(ref_forward)(w, r, r_w_bias, r_r_bias, params))
    err = float(jnp.max(jnp.abs(out - ref)))
    assert err < 5e-2, f"mismatch vs matched-precision reference: max abs err = {err}"

    print("KERNEL_OK")
</pallas_src>

<mosaic_0001>
module attributes {stable_mosaic.version = 11 : i64} {
  func.func @_matmul_kernel(%arg0: i32, %arg1: i32, %arg2: i32, %arg3: memref<256x256xbf16, #tpu.memory_space<vmem>>, %arg4: memref<256x256xbf16, #tpu.memory_space<vmem>>, %arg5: memref<256x256xbf16, #tpu.memory_space<vmem>>, %arg6: memref<256x256xf32, #tpu.memory_space<vmem>>) attributes {dimension_semantics = [#tpu.dimension_semantics<parallel>, #tpu.dimension_semantics<parallel>, #tpu.dimension_semantics<arbitrary>], iteration_bounds = array<i64: 1, 3, 1>, scalar_prefetch = 0 : i64, scratch_operands = 1 : i64, tpu.core_type = #tpu.core_type<tc>, window_params = [{transform_indices = @transform_0, window_bounds = array<i64: 256, 256>}, {transform_indices = @transform_1, window_bounds = array<i64: 256, 256>}, {transform_indices = @transform_2, window_bounds = array<i64: 256, 256>}]} {
    %c0_i32 = arith.constant 0 : i32
    %0 = arith.cmpi eq, %arg2, %c0_i32 : i32
    %1 = arith.extui %0 : i1 to i32
    %c0_i32_0 = arith.constant 0 : i32
    %2 = arith.cmpi ne, %1, %c0_i32_0 : i32
    scf.if %2 {
      %cst_10 = arith.constant 0.000000e+00 : f32
      %12 = vector.broadcast %cst_10 : f32 to vector<256x256xf32>
      %c0_11 = arith.constant 0 : index
      %c0_12 = arith.constant 0 : index
      %13 = vector.load %arg6[%c0_11, %c0_12] : memref<256x256xf32, #tpu.memory_space<vmem>>, vector<256x256xf32>
      tpu.vector_store %arg6[%c0_11, %c0_12], %12 {strides = array<i32>} : memref<256x256xf32, #tpu.memory_space<vmem>>, vector<256x256xf32>,
    } else {
    }
    %c0 = arith.constant 0 : index
    %c0_1 = arith.constant 0 : index
    %3 = vector.load %arg6[%c0, %c0_1] : memref<256x256xf32, #tpu.memory_space<vmem>>, vector<256x256xf32>
    %c0_2 = arith.constant 0 : index
    %c0_3 = arith.constant 0 : index
    %4 = vector.load %arg3[%c0_2, %c0_3] : memref<256x256xbf16, #tpu.memory_space<vmem>>, vector<256x256xbf16>
    %c0_4 = arith.constant 0 : index
    %c0_5 = arith.constant 0 : index
    %5 = vector.load %arg4[%c0_4, %c0_5] : memref<256x256xbf16, #tpu.memory_space<vmem>>, vector<256x256xbf16>
    %cst = arith.constant dense<0.000000e+00> : vector<256x256xf32>
    %6 = tpu.matmul %4, %5, %cst {dimension_numbers = #tpu.dot_dimension_numbers<[1], [0], [0], [1], [0, 0, 1, 1], [], []>} : vector<256x256xbf16>, vector<256x256xbf16>, vector<256x256xf32> -> vector<256x256xf32>
    %7 = arith.addf %3, %6 : vector<256x256xf32>
    %c0_6 = arith.constant 0 : index
    %c0_7 = arith.constant 0 : index
    %8 = vector.load %arg6[%c0_6, %c0_7] : memref<256x256xf32, #tpu.memory_space<vmem>>, vector<256x256xf32>
    tpu.vector_store %arg6[%c0_6, %c0_7], %7 {strides = array<i32>} : memref<256x256xf32, #tpu.memory_space<vmem>>, vector<256x256xf32>,
    %c0_i32_8 = arith.constant 0 : i32
    %9 = arith.cmpi eq, %arg2, %c0_i32_8 : i32
    %10 = arith.extui %9 : i1 to i32
    %c0_i32_9 = arith.constant 0 : i32
    %11 = arith.cmpi ne, %10, %c0_i32_9 : i32
    scf.if %11 {
      %c0_10 = arith.constant 0 : index
      %c0_11 = arith.constant 0 : index
      %12 = vector.load %arg6[%c0_10, %c0_11] : memref<256x256xf32, #tpu.memory_space<vmem>>, vector<256x256xf32>
      %13 = arith.truncf %12 : vector<256x256xf32> to vector<256x256xbf16>
      %c0_12 = arith.constant 0 : index
      %c0_13 = arith.constant 0 : index
      %14 = vector.load %arg5[%c0_12, %c0_13] : memref<256x256xbf16, #tpu.memory_space<vmem>>, vector<256x256xbf16>
      tpu.vector_store %arg5[%c0_12, %c0_13], %13 {strides = array<i32>} : memref<256x256xbf16, #tpu.memory_space<vmem>>, vector<256x256xbf16>,
    } else {
    }
    return
  }
  func.func @transform_0(%arg0: i32, %arg1: i32, %arg2: i32) -> (i32, i32) {
    %c0_i32 = arith.constant 0 : i32
    return %arg0, %arg2 : i32, i32
  }
  func.func @transform_1(%arg0: i32, %arg1: i32, %arg2: i32) -> (i32, i32) {
    %c0_i32 = arith.constant 0 : i32
    return %arg2, %arg1 : i32, i32
  }
  func.func @transform_2(%arg0: i32, %arg1: i32, %arg2: i32) -> (i32, i32) {
    %c0_i32 = arith.constant 0 : i32
    return %arg0, %arg1 : i32, i32
  }
}

module attributes {stable_mosaic.version = 11 : i64} {
  func.func @_matmul_kernel(%arg0: i32, %arg1: i32, %arg2: i32, %arg3: memref<128x256xbf16, #tpu.memory_space<vmem>>, %arg4: memref<256x256xbf16, #tpu.memory_space<vmem>>, %arg5: memref<128x256xbf16, #tpu.memory_space<vmem>>, %arg6: memref<128x256xf32, #tpu.memory_space<vmem>>) attributes {dimension_semantics = [#tpu.dimension_semantics<parallel>, #tpu.dimension_semantics<parallel>, #tpu.dimension_semantics<arbitrary>], iteration_bounds = array<i64: 1, 1, 1>, scalar_prefetch = 0 : i64, scratch_operands = 1 : i64, tpu.core_type = #tpu.core_type<tc>, window_params = [{transform_indices = @transform_0, window_bounds = array<i64: 128, 256>}, {transform_indices = @transform_1, window_bounds = array<i64: 256, 256>}, {transform_indices = @transform_2, window_bounds = array<i64: 128, 256>}]} {
    %c0_i32 = arith.constant 0 : i32
    %0 = arith.cmpi eq, %arg2, %c0_i32 : i32
    %1 = arith.extui %0 : i1 to i32
    %c0_i32_0 = arith.constant 0 : i32
    %2 = arith.cmpi ne, %1, %c0_i32_0 : i32
    scf.if %2 {
      %cst_10 = arith.constant 0.000000e+00 : f32
      %12 = vector.broadcast %cst_10 : f32 to vector<128x256xf32>
      %c0_11 = arith.constant 0 : index
      %c0_12 = arith.constant 0 : index
      %13 = vector.load %arg6[%c0_11, %c0_12] : memref<128x256xf32, #tpu.memory_space<vmem>>, vector<128x256xf32>
      tpu.vector_store %arg6[%c0_11, %c0_12], %12 {strides = array<i32>} : memref<128x256xf32, #tpu.memory_space<vmem>>, vector<128x256xf32>,
    } else {
    }
    %c0 = arith.constant 0 : index
    %c0_1 = arith.constant 0 : index
    %3 = vector.load %arg6[%c0, %c0_1] : memref<128x256xf32, #tpu.memory_space<vmem>>, vector<128x256xf32>
    %c0_2 = arith.constant 0 : index
    %c0_3 = arith.constant 0 : index
    %4 = vector.load %arg3[%c0_2, %c0_3] : memref<128x256xbf16, #tpu.memory_space<vmem>>, vector<128x256xbf16>
    %c0_4 = arith.constant 0 : index
    %c0_5 = arith.constant 0 : index
    %5 = vector.load %arg4[%c0_4, %c0_5] : memref<256x256xbf16, #tpu.memory_space<vmem>>, vector<256x256xbf16>
    %cst = arith.constant dense<0.000000e+00> : vector<128x256xf32>
    %6 = tpu.matmul %4, %5, %cst {dimension_numbers = #tpu.dot_dimension_numbers<[1], [0], [0], [1], [0, 0, 1, 1], [], []>} : vector<128x256xbf16>, vector<256x256xbf16>, vector<128x256xf32> -> vector<128x256xf32>
    %7 = arith.addf %3, %6 : vector<128x256xf32>
    %c0_6 = arith.constant 0 : index
    %c0_7 = arith.constant 0 : index
    %8 = vector.load %arg6[%c0_6, %c0_7] : memref<128x256xf32, #tpu.memory_space<vmem>>, vector<128x256xf32>
    tpu.vector_store %arg6[%c0_6, %c0_7], %7 {strides = array<i32>} : memref<128x256xf32, #tpu.memory_space<vmem>>, vector<128x256xf32>,
    %c0_i32_8 = arith.constant 0 : i32
    %9 = arith.cmpi eq, %arg2, %c0_i32_8 : i32
    %10 = arith.extui %9 : i1 to i32
    %c0_i32_9 = arith.constant 0 : i32
    %11 = arith.cmpi ne, %10, %c0_i32_9 : i32
    scf.if %11 {
      %c0_10 = arith.constant 0 : index
      %c0_11 = arith.constant 0 : index
      %12 = vector.load %arg6[%c0_10, %c0_11] : memref<128x256xf32, #tpu.memory_space<vmem>>, vector<128x256xf32>
      %13 = arith.truncf %12 : vector<128x256xf32> to vector<128x256xbf16>
      %c0_12 = arith.constant 0 : index
      %c0_13 = arith.constant 0 : index
      %14 = vector.load %arg5[%c0_12, %c0_13] : memref<128x256xbf16, #tpu.memory_space<vmem>>, vector<128x256xbf16>
      tpu.vector_store %arg5[%c0_12, %c0_13], %13 {strides = array<i32>} : memref<128x256xbf16, #tpu.memory_space<vmem>>, vector<128x256xbf16>,
    } else {
    }
    return
  }
  func.func @transform_0(%arg0: i32, %arg1: i32, %arg2: i32) -> (i32, i32) {
    %c0_i32 = arith.constant 0 : i32
    return %arg0, %arg2 : i32, i32
  }
  func.func @transform_1(%arg0: i32, %arg1: i32, %arg2: i32) -> (i32, i32) {
    %c0_i32 = arith.constant 0 : i32
    return %arg2, %arg1 : i32, i32
  }
  func.func @transform_2(%arg0: i32, %arg1: i32, %arg2: i32) -> (i32, i32) {
    %c0_i32 = arith.constant 0 : i32
    return %arg0, %arg1 : i32, i32
  }
}

module attributes {stable_mosaic.version = 11 : i64} {
  func.func @_rel_attn_kernel(%arg0: i32, %arg1: i32, %arg2: memref<1x4x128x64xbf16, #tpu.memory_space<vmem>>, %arg3: memref<1x4x128x64xbf16, #tpu.memory_space<vmem>>, %arg4: memref<1x4x128x64xbf16, #tpu.memory_space<vmem>>, %arg5: memref<4x128x64xbf16, #tpu.memory_space<vmem>>, %arg6: memref<4x1x64xf32, #tpu.memory_space<vmem>>, %arg7: memref<4x1x64xf32, #tpu.memory_space<vmem>>, %arg8: memref<1x128x256xbf16, #tpu.memory_space<vmem>>) attributes {dimension_semantics = [#tpu.dimension_semantics<parallel>, #tpu.dimension_semantics<parallel>], iteration_bounds = array<i64: 2, 1>, scalar_prefetch = 0 : i64, scratch_operands = 0 : i64, tpu.core_type = #tpu.core_type<tc>, window_params = [{transform_indices = @transform_0, window_bounds = array<i64: 1, 4, 128, 64>}, {transform_indices = @transform_1, window_bounds = array<i64: 1, 4, 128, 64>}, {transform_indices = @transform_2, window_bounds = array<i64: 1, 4, 128, 64>}, {pipeline_mode = #tpu.pipeline_mode<synchronous>, transform_indices = @transform_3, window_bounds = array<i64: 4, 128, 64>}, {pipeline_mode = #tpu.pipeline_mode<synchronous>, transform_indices = @transform_4, window_bounds = array<i64: 4, 1, 64>}, {pipeline_mode = #tpu.pipeline_mode<synchronous>, transform_indices = @transform_5, window_bounds = array<i64: 4, 1, 64>}, {transform_indices = @transform_6, window_bounds = array<i64: 1, 128, 256>}]} {
    %c128_i32 = arith.constant 128 : i32
    %0 = arith.muli %arg1, %c128_i32 : i32
    %1 = tpu.iota {dimensions = array<i32: 0>} : vector<128x128xi32>
    %2 = vector.broadcast %0 : i32 to vector<128x128xi32>
    %3 = arith.addi %2, %1 : vector<128x128xi32>
    %4 = tpu.iota {dimensions = array<i32: 1>} : vector<128x128xi32>
    %5 = arith.cmpi sge, %3, %4 : vector<128x128xi32>
    %c0 = arith.constant 0 : index
    %c0_0 = arith.constant 0 : index
    %c0_1 = arith.constant 0 : index
    %c0_2 = arith.constant 0 : index
    %6 = vector.load %arg2[%c0, %c0_0, %c0_1, %c0_2] : memref<1x4x128x64xbf16, #tpu.memory_space<vmem>>, vector<1x1x128x64xbf16>
    %7 = vector.shape_cast %6 : vector<1x1x128x64xbf16> to vector<128x64xbf16>
    %8 = arith.extf %7 : vector<128x64xbf16> to vector<128x64xf32>
    %c0_3 = arith.constant 0 : index
    %c0_4 = arith.constant 0 : index
    %c0_5 = arith.constant 0 : index
    %9 = vector.load %arg6[%c0_3, %c0_4, %c0_5] : memref<4x1x64xf32, #tpu.memory_space<vmem>>, vector<1x1x64xf32>
    %10 = vector.shape_cast %9 : vector<1x1x64xf32> to vector<1x64xf32>
    %11 = vector.broadcast %10 : vector<1x64xf32> to vector<128x64xf32>
    %12 = arith.addf %8, %11 : vector<128x64xf32>
    %13 = arith.truncf %12 : vector<128x64xf32> to vector<128x64xbf16>
    %c0_6 = arith.constant 0 : index
    %c0_7 = arith.constant 0 : index
    %c0_8 = arith.constant 0 : index
    %14 = vector.load %arg7[%c0_6, %c0_7, %c0_8] : memref<4x1x64xf32, #tpu.memory_space<vmem>>, vector<1x1x64xf32>
    %15 = vector.shape_cast %14 : vector<1x1x64xf32> to vector<1x64xf32>
    %16 = vector.broadcast %15 : vector<1x64xf32> to vector<128x64xf32>
    %17 = arith.addf %8, %16 : vector<128x64xf32>
    %18 = arith.truncf %17 : vector<128x64xf32> to vector<128x64xbf16>
    %c0_9 = arith.constant 0 : index
    %c0_10 = arith.constant 0 : index
    %c0_11 = arith.constant 0 : index
    %c0_12 = arith.constant 0 : index
    %19 = vector.load %arg3[%c0_9, %c0_10, %c0_11, %c0_12] : memref<1x4x128x64xbf16, #tpu.memory_space<vmem>>, vector<1x1x128x64xbf16>
    %20 = vector.shape_cast %19 : vector<1x1x128x64xbf16> to vector<128x64xbf16>
    %cst = arith.constant dense<0.000000e+00> : vector<128x128xf32>
    %21 = tpu.matmul %13, %20, %cst {dimension_numbers = #tpu.dot_dimension_numbers<[1], [1], [0], [0], [0, 0, 1, 0], [], []>} : vector<128x64xbf16>, vector<128x64xbf16>, vector<128x128xf32> -> vector<128x128xf32>
    %c0_13 = arith.constant 0 : index
    %c0_14 = arith.constant 0 : index
    %c0_15 = arith.constant 0 : index
    %22 = vector.load %arg5[%c0_13, %c0_14, %c0_15] : memref<4x128x64xbf16, #tpu.memory_space<vmem>>, vector<1x128x64xbf16>
    %23 = vector.shape_cast %22 : vector<1x128x64xbf16> to vector<128x64xbf16>
    %cst_16 = arith.constant dense<0.000000e+00> : vector<128x128xf32>
    %24 = tpu.matmul %18, %23, %cst_16 {dimension_numbers = #tpu.dot_dimension_numbers<[1], [1], [0], [0], [0, 0, 1, 0], [], []>} : vector<128x64xbf16>, vector<128x64xbf16>, vector<128x128xf32> -> vector<128x128xf32>
    %c1_i32 = arith.constant 1 : i32
    %25 = arith.addi %0, %c1_i32 : i32
    %26 = tpu.dynamic_rotate %24 by %25 dim 1 {stride = 1 : si32, stride_dimension = 0 : si32} : vector<128x128xf32>, i32 -> vector<128x128xf32>
    %27 = arith.addf %21, %26 : vector<128x128xf32>
    %cst_17 = arith.constant 1.250000e-01 : f32
    %28 = vector.broadcast %cst_17 : f32 to vector<128x128xf32>
    %29 = arith.mulf %27, %28 : vector<128x128xf32>
    %cst_18 = arith.constant -1.000000e+30 : f32
    %30 = vector.broadcast %cst_18 : f32 to vector<128x128xf32>
    %31 = arith.select %5, %29, %30 : vector<128x128xi1>, vector<128x128xf32>
    %cst_19 = arith.constant dense<0xFF800000> : vector<128xf32>
    %32 = vector.multi_reduction <maximumf>, %31, %cst_19 [1] : vector<128x128xf32> to vector<128xf32>
    %33 = vector.shape_cast %32 : vector<128xf32> to vector<128x1xf32>
    %34 = vector.broadcast %33 : vector<128x1xf32> to vector<128x128xf32>
    %35 = arith.subf %31, %34 : vector<128x128xf32>
    %36 = math.exp %35 : vector<128x128xf32>
    %cst_20 = arith.constant dense<0.000000e+00> : vector<128xf32>
    %37 = vector.multi_reduction <add>, %36, %cst_20 [1] : vector<128x128xf32> to vector<128xf32>
    %38 = vector.shape_cast %37 : vector<128xf32> to vector<128x1xf32>
    %39 = vector.broadcast %38 : vector<128x1xf32> to vector<128x128xf32>
    %40 = arith.divf %36, %39 : vector<128x128xf32>
    %41 = arith.truncf %40 : vector<128x128xf32> to vector<128x128xbf16>
    %c0_21 = arith.constant 0 : index
    %c0_22 = arith.constant 0 : index
    %c0_23 = arith.constant 0 : index
    %c0_24 = arith.constant 0 : index
    %42 = vector.load %arg4[%c0_21, %c0_22, %c0_23, %c0_24] : memref<1x4x128x64xbf16, #tpu.memory_space<vmem>>, vector<1x1x128x64xbf16>
    %43 = vector.shape_cast %42 : vector<1x1x128x64xbf16> to vector<128x64xbf16>
    %cst_25 = arith.constant dense<0.000000e+00> : vector<128x64xf32>
    %44 = tpu.matmul %41, %43, %cst_25 {dimension_numbers = #tpu.dot_dimension_numbers<[1], [0], [0], [1], [0, 0, 1, 1], [], []>} : vector<128x128xbf16>, vector<128x64xbf16>, vector<128x64xf32> -> vector<128x64xf32>
    %c0_26 = arith.constant 0 : index
    %c1 = arith.constant 1 : index
    %c0_27 = arith.constant 0 : index
    %c0_28 = arith.constant 0 : index
    %45 = vector.load %arg2[%c0_26, %c1, %c0_27, %c0_28] : memref<1x4x128x64xbf16, #tpu.memory_space<vmem>>, vector<1x1x128x64xbf16>
    %46 = vector.shape_cast %45 : vector<1x1x128x64xbf16> to vector<128x64xbf16>
    %47 = arith.extf %46 : vector<128x64xbf16> to vector<128x64xf32>
    %c1_29 = arith.constant 1 : index
    %c0_30 = arith.constant 0 : index
    %c0_31 = arith.constant 0 : index
    %48 = vector.load %arg6[%c1_29, %c0_30, %c0_31] : memref<4x1x64xf32, #tpu.memory_space<vmem>>, vector<1x1x64xf32>
    %49 = vector.shape_cast %48 : vector<1x1x64xf32> to vector<1x64xf32>
    %50 = vector.broadcast %49 : vector<1x64xf32> to vector<128x64xf32>
    %51 = arith.addf %47, %50 : vector<128x64xf32>
    %52 = arith.truncf %51 : vector<128x64xf32> to vector<128x64xbf16>
    %c1_32 = arith.constant 1 : index
    %c0_33 = arith.constant 0 : index
    %c0_34 = arith.constant 0 : index
    %53 = vector.load %arg7[%c1_32, %c0_33, %c0_34] : memref<4x1x64xf32, #tpu.memory_space<vmem>>, vector<1x1x64xf32>
    %54 = vector.shape_cast %53 : vector<1x1x64xf32> to vector<1x64xf32>
    %55 = vector.broadcast %54 : vector<1x64xf32> to vector<128x64xf32>
    %56 = arith.addf %47, %55 : vector<128x64xf32>
    %57 = arith.truncf %56 : vector<128x64xf32> to vector<128x64xbf16>
    %c0_35 = arith.constant 0 : index
    %c1_36 = arith.constant 1 : index
    %c0_37 = arith.constant 0 : index
    %c0_38 = arith.constant 0 : index
    %58 = vector.load %arg3[%c0_35, %c1_36, %c0_37, %c0_38] : memref<1x4x128x64xbf16, #tpu.memory_space<vmem>>, vector<1x1x128x64xbf16>
    %59 = vector.shape_cast %58 : vector<1x1x128x64xbf16> to vector<128x64xbf16>
    %cst_39 = arith.constant dense<0.000000e+00> : vector<128x128xf32>
    %60 = tpu.matmul %52, %59, %cst_39 {dimension_numbers = #tpu.dot_dimension_numbers<[1], [1], [0], [0], [0, 0, 1, 0], [], []>} : vector<128x64xbf16>, vector<128x64xbf16>, vector<128x128xf32> -> vector<128x128xf32>
    %c1_40 = arith.constant 1 : index
    %c0_41 = arith.constant 0 : index
    %c0_42 = arith.constant 0 : index
    %61 = vector.load %arg5[%c1_40, %c0_41, %c0_42] : memref<4x128x64xbf16, #tpu.memory_space<vmem>>, vector<1x128x64xbf16>
    %62 = vector.shape_cast %61 : vector<1x128x64xbf16> to vector<128x64xbf16>
    %cst_43 = arith.constant dense<0.000000e+00> : vector<128x128xf32>
    %63 = tpu.matmul %57, %62, %cst_43 {dimension_numbers = #tpu.dot_dimension_numbers<[1], [1], [0], [0], [0, 0, 1, 0], [], []>} : vector<128x64xbf16>, vector<128x64xbf16>, vector<128x128xf32> -> vector<128x128xf32>
    %c1_i32_44 = arith.constant 1 : i32
    %64 = arith.addi %0, %c1_i32_44 : i32
    %65 = tpu.dynamic_rotate %63 by %64 dim 1 {stride = 1 : si32, stride_dimension = 0 : si32} : vector<128x128xf32>, i32 -> vector<128x128xf32>
    %66 = arith.addf %60, %65 : vector<128x128xf32>
    %cst_45 = arith.constant 1.250000e-01 : f32
    %67 = vector.broadcast %cst_45 : f32 to vector<128x128xf32>
    %68 = arith.mulf %66, %67 : vector<128x128xf32>
    %cst_46 = arith.constant -1.000000e+30 : f32
    %69 = vector.broadcast %cst_46 : f32 to vector<128x128xf32>
    %70 = arith.select %5, %68, %69 : vector<128x128xi1>, vector<128x128xf32>
    %cst_47 = arith.constant dense<0xFF800000> : vector<128xf32>
    %71 = vector.multi_reduction <maximumf>, %70, %cst_47 [1] : vector<128x128xf32> to vector<128xf32>
    %72 = vector.shape_cast %71 : vector<128xf32> to vector<128x1xf32>
    %73 = vector.broadcast %72 : vector<128x1xf32> to vector<128x128xf32>
    %74 = arith.subf %70, %73 : vector<128x128xf32>
    %75 = math.exp %74 : vector<128x128xf32>
    %cst_48 = arith.constant dense<0.000000e+00> : vector<128xf32>
    %76 = vector.multi_reduction <add>, %75, %cst_48 [1] : vector<128x128xf32> to vector<128xf32>
    %77 = vector.shape_cast %76 : vector<128xf32> to vector<128x1xf32>
    %78 = vector.broadcast %77 : vector<128x1xf32> to vector<128x128xf32>
    %79 = arith.divf %75, %78 : vector<128x128xf32>
    %80 = arith.truncf %79 : vector<128x128xf32> to vector<128x128xbf16>
    %c0_49 = arith.constant 0 : index
    %c1_50 = arith.constant 1 : index
    %c0_51 = arith.constant 0 : index
    %c0_52 = arith.constant 0 : index
    %81 = vector.load %arg4[%c0_49, %c1_50, %c0_51, %c0_52] : memref<1x4x128x64xbf16, #tpu.memory_space<vmem>>, vector<1x1x128x64xbf16>
    %82 = vector.shape_cast %81 : vector<1x1x128x64xbf16> to vector<128x64xbf16>
    %cst_53 = arith.constant dense<0.000000e+00> : vector<128x64xf32>
    %83 = tpu.matmul %80, %82, %cst_53 {dimension_numbers = #tpu.dot_dimension_numbers<[1], [0], [0], [1], [0, 0, 1, 1], [], []>} : vector<128x128xbf16>, vector<128x64xbf16>, vector<128x64xf32> -> vector<128x64xf32>
    %c0_54 = arith.constant 0 : index
    %c2 = arith.constant 2 : index
    %c0_55 = arith.constant 0 : index
    %c0_56 = arith.constant 0 : index
    %84 = vector.load %arg2[%c0_54, %c2, %c0_55, %c0_56] : memref<1x4x128x64xbf16, #tpu.memory_space<vmem>>, vector<1x1x128x64xbf16>
    %85 = vector.shape_cast %84 : vector<1x1x128x64xbf16> to vector<128x64xbf16>
    %86 = arith.extf %85 : vector<128x64xbf16> to vector<128x64xf32>
    %c2_57 = arith.constant 2 : index
    %c0_58 = arith.constant 0 : index
    %c0_59 = arith.constant 0 : index
    %87 = vector.load %arg6[%c2_57, %c0_58, %c0_59] : memref<4x1x64xf32, #tpu.memory_space<vmem>>, vector<1x1x64xf32>
    %88 = vector.shape_cast %87 : vector<1x1x64xf32> to vector<1x64xf32>
    %89 = vector.broadcast %88 : vector<1x64xf32> to vector<128x64xf32>
    %90 = arith.addf %86, %89 : vector<128x64xf32>
    %91 = arith.truncf %90 : vector<128x64xf32> to vector<128x64xbf16>
    %c2_60 = arith.constant 2 : index
    %c0_61 = arith.constant 0 : index
    %c0_62 = arith.constant 0 : index
    %92 = vector.load %arg7[%c2_60, %c0_61, %c0_62] : memref<4x1x64xf32, #tpu.memory_space<vmem>>, vector<1x1x64xf32>
    %93 = vector.shape_cast %92 : vector<1x1x64xf32> to vector<1x64xf32>
    %94 = vector.broadcast %93 : vector<1x64xf32> to vector<128x64xf32>
    %95 = arith.addf %86, %94 : vector<128x64xf32>
    %96 = arith.truncf %95 : vector<128x64xf32> to vector<128x64xbf16>
    %c0_63 = arith.constant 0 : index
    %c2_64 = arith.constant 2 : index
    %c0_65 = arith.constant 0 : index
    %c0_66 = arith.constant 0 : index
    %97 = vector.load %arg3[%c0_63, %c2_64, %c0_65, %c0_66] : memref<1x4x128x64xbf16, #tpu.memory_space<vmem>>, vector<1x1x128x64xbf16>
    %98 = vector.shape_cast %97 : vector<1x1x128x64xbf16> to vector<128x64xbf16>
    %cst_67 = arith.constant dense<0.000000e+00> : vector<128x128xf32>
    %99 = tpu.matmul %91, %98, %cst_67 {dimension_numbers = #tpu.dot_dimension_numbers<[1], [1], [0], [0], [0, 0, 1, 0], [], []>} : vector<128x64xbf16>, vector<128x64xbf16>, vector<128x128xf32> -> vector<128x128xf32>
    %c2_68 = arith.constant 2 : index
    %c0_69 = arith.constant 0 : index
    %c0_70 = arith.constant 0 : index
    %100 = vector.load %arg5[%c2_68, %c0_69, %c0_70] : memref<4x128x64xbf16, #tpu.memory_space<vmem>>, vector<1x128x64xbf16>
    %101 = vector.shape_cast %100 : vector<1x128x64xbf16> to vector<128x64xbf16>
    %cst_71 = arith.constant dense<0.000000e+00> : vector<128x128xf32>
    %102 = tpu.matmul %96, %101, %cst_71 {dimension_numbers = #tpu.dot_dimension_numbers<[1], [1], [0], [0], [0, 0, 1, 0], [], []>} : vector<128x64xbf16>, vector<128x64xbf16>, vector<128x128xf32> -> vector<128x128xf32>
    %c1_i32_72 = arith.constant 1 : i32
    %103 = arith.addi %0, %c1_i32_72 : i32
    %104 = tpu.dynamic_rotate %102 by %103 dim 1 {stride = 1 : si32, stride_dimension = 0 : si32} : vector<128x128xf32>, i32 -> vector<128x128xf32>
    %105 = arith.addf %99, %104 : vector<128x128xf32>
    %cst_73 = arith.constant 1.250000e-01 : f32
    %106 = vector.broadcast %cst_73 : f32 to vector<128x128xf32>
    %107 = arith.mulf %105, %106 : vector<128x128xf32>
    %cst_74 = arith.constant -1.000000e+30 : f32
    %108 = vector.broadcast %cst_74 : f32 to vector<128x128xf32>
    %109 = arith.select %5, %107, %108 : vector<128x128xi1>, vector<128x128xf32>
    %cst_75 = arith.constant dense<0xFF800000> : vector<128xf32>
    %110 = vector.multi_reduction <maximumf>, %109, %cst_75 [1] : vector<128x128xf32> to vector<128xf32>
    %111 = vector.shape_cast %110 : vector<128xf32> to vector<128x1xf32>
    %112 = vector.broadcast %111 : vector<128x1xf32> to vector<128x128xf32>
    %113 = arith.subf %109, %112 : vector<128x128xf32>
    %114 = math.exp %113 : vector<128x128xf32>
    %cst_76 = arith.constant dense<0.000000e+00> : vector<128xf32>
    %115 = vector.multi_reduction <add>, %114, %cst_76 [1] : vector<128x128xf32> to vector<128xf32>
    %116 = vector.shape_cast %115 : vector<128xf32> to vector<128x1xf32>
    %117 = vector.broadcast %116 : vector<128x1xf32> to vector<128x128xf32>
    %118 = arith.divf %114, %117 : vector<128x128xf32>
    %119 = arith.truncf %118 : vector<128x128xf32> to vector<128x128xbf16>
    %c0_77 = arith.constant 0 : index
    %c2_78 = arith.constant 2 : index
    %c0_79 = arith.constant 0 : index
    %c0_80 = arith.constant 0 : index
    %120 = vector.load %arg4[%c0_77, %c2_78, %c0_79, %c0_80] : memref<1x4x128x64xbf16, #tpu.memory_space<vmem>>, vector<1x1x128x64xbf16>
    %121 = vector.shape_cast %120 : vector<1x1x128x64xbf16> to vector<128x64xbf16>
    %cst_81 = arith.constant dense<0.000000e+00> : vector<128x64xf32>
    %122 = tpu.matmul %119, %121, %cst_81 {dimension_numbers = #tpu.dot_dimension_numbers<[1], [0], [0], [1], [0, 0, 1, 1], [], []>} : vector<128x128xbf16>, vector<128x64xbf16>, vector<128x64xf32> -> vector<128x64xf32>
    %c0_82 = arith.constant 0 : index
    %c3 = arith.constant 3 : index
    %c0_83 = arith.constant 0 : index
    %c0_84 = arith.constant 0 : index
    %123 = vector.load %arg2[%c0_82, %c3, %c0_83, %c0_84] : memref<1x4x128x64xbf16, #tpu.memory_space<vmem>>, vector<1x1x128x64xbf16>
    %124 = vector.shape_cast %123 : vector<1x1x128x64xbf16> to vector<128x64xbf16>
    %125 = arith.extf %124 : vector<128x64xbf16> to vector<128x64xf32>
    %c3_85 = arith.constant 3 : index
    %c0_86 = arith.constant 0 : index
    %c0_87 = arith.constant 0 : index
    %126 = vector.load %arg6[%c3_85, %c0_86, %c0_87] : memref<4x1x64xf32, #tpu.memory_space<vmem>>, vector<1x1x64xf32>
    %127 = vector.shape_cast %126 : vector<1x1x64xf32> to vector<1x64xf32>
    %128 = vector.broadcast %127 : vector<1x64xf32> to vector<128x64xf32>
    %129 = arith.addf %125, %128 : vector<128x64xf32>
    %130 = arith.truncf %129 : vector<128x64xf32> to vector<128x64xbf16>
    %c3_88 = arith.constant 3 : index
    %c0_89 = arith.constant 0 : index
    %c0_90 = arith.constant 0 : index
    %131 = vector.load %arg7[%c3_88, %c0_89, %c0_90] : memref<4x1x64xf32, #tpu.memory_space<vmem>>, vector<1x1x64xf32>
    %132 = vector.shape_cast %131 : vector<1x1x64xf32> to vector<1x64xf32>
    %133 = vector.broadcast %132 : vector<1x64xf32> to vector<128x64xf32>
    %134 = arith.addf %125, %133 : vector<128x64xf32>
    %135 = arith.truncf %134 : vector<128x64xf32> to vector<128x64xbf16>
    %c0_91 = arith.constant 0 : index
    %c3_92 = arith.constant 3 : index
    %c0_93 = arith.constant 0 : index
    %c0_94 = arith.constant 0 : index
    %136 = vector.load %arg3[%c0_91, %c3_92, %c0_93, %c0_94] : memref<1x4x128x64xbf16, #tpu.memory_space<vmem>>, vector<1x1x128x64xbf16>
    %137 = vector.shape_cast %136 : vector<1x1x128x64xbf16> to vector<128x64xbf16>
    %cst_95 = arith.constant dense<0.000000e+00> : vector<128x128xf32>
    %138 = tpu.matmul %130, %137, %cst_95 {dimension_numbers = #tpu.dot_dimension_numbers<[1], [1], [0], [0], [0, 0, 1, 0], [], []>} : vector<128x64xbf16>, vector<128x64xbf16>, vector<128x128xf32> -> vector<128x128xf32>
    %c3_96 = arith.constant 3 : index
    %c0_97 = arith.constant 0 : index
    %c0_98 = arith.constant 0 : index
    %139 = vector.load %arg5[%c3_96, %c0_97, %c0_98] : memref<4x128x64xbf16, #tpu.memory_space<vmem>>, vector<1x128x64xbf16>
    %140 = vector.shape_cast %139 : vector<1x128x64xbf16> to vector<128x64xbf16>
    %cst_99 = arith.constant dense<0.000000e+00> : vector<128x128xf32>
    %141 = tpu.matmul %135, %140, %cst_99 {dimension_numbers = #tpu.dot_dimension_numbers<[1], [1], [0], [0], [0, 0, 1, 0], [], []>} : vector<128x64xbf16>, vector<128x64xbf16>, vector<128x128xf32> -> vector<128x128xf32>
    %c1_i32_100 = arith.constant 1 : i32
    %142 = arith.addi %0, %c1_i32_100 : i32
    %143 = tpu.dynamic_rotate %141 by %142 dim 1 {stride = 1 : si32, stride_dimension = 0 : si32} : vector<128x128xf32>, i32 -> vector<128x128xf32>
    %144 = arith.addf %138, %143 : vector<128x128xf32>
    %cst_101 = arith.constant 1.250000e-01 : f32
    %145 = vector.broadcast %cst_101 : f32 to vector<128x128xf32>
    %146 = arith.mulf %144, %145 : vector<128x128xf32>
    %cst_102 = arith.constant -1.000000e+30 : f32
    %147 = vector.broadcast %cst_102 : f32 to vector<128x128xf32>
    %148 = arith.select %5, %146, %147 : vector<128x128xi1>, vector<128x128xf32>
    %cst_103 = arith.constant dense<0xFF800000> : vector<128xf32>
    %149 = vector.multi_reduction <maximumf>, %148, %cst_103 [1] : vector<128x128xf32> to vector<128xf32>
    %150 = vector.shape_cast %149 : vector<128xf32> to vector<128x1xf32>
    %151 = vector.broadcast %150 : vector<128x1xf32> to vector<128x128xf32>
    %152 = arith.subf %148, %151 : vector<128x128xf32>
    %153 = math.exp %152 : vector<128x128xf32>
    %cst_104 = arith.constant dense<0.000000e+00> : vector<128xf32>
    %154 = vector.multi_reduction <add>, %153, %cst_104 [1] : vector<128x128xf32> to vector<128xf32>
    %155 = vector.shape_cast %154 : vector<128xf32> to vector<128x1xf32>
    %156 = vector.broadcast %155 : vector<128x1xf32> to vector<128x128xf32>
    %157 = arith.divf %153, %156 : vector<128x128xf32>
    %158 = arith.truncf %157 : vector<128x128xf32> to vector<128x128xbf16>
    %c0_105 = arith.constant 0 : index
    %c3_106 = arith.constant 3 : index
    %c0_107 = arith.constant 0 : index
    %c0_108 = arith.constant 0 : index
    %159 = vector.load %arg4[%c0_105, %c3_106, %c0_107, %c0_108] : memref<1x4x128x64xbf16, #tpu.memory_space<vmem>>, vector<1x1x128x64xbf16>
    %160 = vector.shape_cast %159 : vector<1x1x128x64xbf16> to vector<128x64xbf16>
    %cst_109 = arith.constant dense<0.000000e+00> : vector<128x64xf32>
    %161 = tpu.matmul %158, %160, %cst_109 {dimension_numbers = #tpu.dot_dimension_numbers<[1], [0], [0], [1], [0, 0, 1, 1], [], []>} : vector<128x128xbf16>, vector<128x64xbf16>, vector<128x64xf32> -> vector<128x64xf32>
    %162 = tpu.concatenate %44, %83, %122, %161 in 1 : vector<128x64xf32>, vector<128x64xf32>, vector<128x64xf32>, vector<128x64xf32> -> vector<128x256xf32>
    %163 = arith.truncf %162 : vector<128x256xf32> to vector<128x256xbf16>
    %c0_110 = arith.constant 0 : index
    %c0_111 = arith.constant 0 : index
    %c0_112 = arith.constant 0 : index
    %164 = vector.load %arg8[%c0_110, %c0_111, %c0_112] : memref<1x128x256xbf16, #tpu.memory_space<vmem>>, vector<1x128x256xbf16>
    %165 = vector.shape_cast %164 : vector<1x128x256xbf16> to vector<128x256xbf16>
    %166 = vector.shape_cast %163 : vector<128x256xbf16> to vector<1x128x256xbf16>
    tpu.vector_store %arg8[%c0_110, %c0_111, %c0_112], %166 {strides = array<i32>} : memref<1x128x256xbf16, #tpu.memory_space<vmem>>, vector<1x128x256xbf16>,
    return
  }
  func.func @transform_0(%arg0: i32, %arg1: i32) -> (i32, i32, i32, i32) {
    %c0_i32 = arith.constant 0 : i32
    %c0_i32_0 = arith.constant 0 : i32
    %c0_i32_1 = arith.constant 0 : i32
    return %arg0, %c0_i32, %arg1, %c0_i32_0 : i32, i32, i32, i32
  }
  func.func @transform_1(%arg0: i32, %arg1: i32) -> (i32, i32, i32, i32) {
    %c0_i32 = arith.constant 0 : i32
    %c0_i32_0 = arith.constant 0 : i32
    %c0_i32_1 = arith.constant 0 : i32
    %c0_i32_2 = arith.constant 0 : i32
    return %arg0, %c0_i32, %c0_i32_0, %c0_i32_1 : i32, i32, i32, i32
  }
  func.func @transform_2(%arg0: i32, %arg1: i32) -> (i32, i32, i32, i32) {
    %c0_i32 = arith.constant 0 : i32
    %c0_i32_0 = arith.constant 0 : i32
    %c0_i32_1 = arith.constant 0 : i32
    %c0_i32_2 = arith.constant 0 : i32
    return %arg0, %c0_i32, %c0_i32_0, %c0_i32_1 : i32, i32, i32, i32
  }
  func.func @transform_3(%arg0: i32, %arg1: i32) -> (i32, i32, i32) {
    %c0_i32 = arith.constant 0 : i32
    %c0_i32_0 = arith.constant 0 : i32
    %c0_i32_1 = arith.constant 0 : i32
    %c0_i32_2 = arith.constant 0 : i32
    return %c0_i32, %c0_i32_0, %c0_i32_1 : i32, i32, i32
  }
  func.func @transform_4(%arg0: i32, %arg1: i32) -> (i32, i32, i32) {
    %c0_i32 = arith.constant 0 : i32
    %c0_i32_0 = arith.constant 0 : i32
    %c0_i32_1 = arith.constant 0 : i32
    %c0_i32_2 = arith.constant 0 : i32
    return %c0_i32, %c0_i32_0, %c0_i32_1 : i32, i32, i32
  }
  func.func @transform_5(%arg0: i32, %arg1: i32) -> (i32, i32, i32) {
    %c0_i32 = arith.constant 0 : i32
    %c0_i32_0 = arith.constant 0 : i32
    %c0_i32_1 = arith.constant 0 : i32
    %c0_i32_2 = arith.constant 0 : i32
    return %c0_i32, %c0_i32_0, %c0_i32_1 : i32, i32, i32
  }
  func.func @transform_6(%arg0: i32, %arg1: i32) -> (i32, i32, i32) {
    %c0_i32 = arith.constant 0 : i32
    %c0_i32_0 = arith.constant 0 : i32
    return %arg0, %arg1, %c0_i32 : i32, i32, i32
  }
}

module attributes {stable_mosaic.version = 11 : i64} {
  func.func @_o_residual_ln_kernel(%arg0: i32, %arg1: memref<256x256xbf16, #tpu.memory_space<vmem>>, %arg2: memref<256x256xbf16, #tpu.memory_space<vmem>>, %arg3: memref<256x256xf32, #tpu.memory_space<vmem>>, %arg4: memref<1x256xf32, #tpu.memory_space<vmem>>, %arg5: memref<1x256xf32, #tpu.memory_space<vmem>>, %arg6: memref<256x256xf32, #tpu.memory_space<vmem>>) attributes {dimension_semantics = [#tpu.dimension_semantics<parallel>], iteration_bounds = array<i64: 1>, scalar_prefetch = 0 : i64, scratch_operands = 0 : i64, tpu.core_type = #tpu.core_type<tc>, window_params = [{transform_indices = @transform_0, window_bounds = array<i64: 256, 256>}, {pipeline_mode = #tpu.pipeline_mode<synchronous>, transform_indices = @transform_1, window_bounds = array<i64: 256, 256>}, {transform_indices = @transform_2, window_bounds = array<i64: 256, 256>}, {pipeline_mode = #tpu.pipeline_mode<synchronous>, transform_indices = @transform_3, window_bounds = array<i64: 1, 256>}, {pipeline_mode = #tpu.pipeline_mode<synchronous>, transform_indices = @transform_4, window_bounds = array<i64: 1, 256>}, {transform_indices = @transform_5, window_bounds = array<i64: 256, 256>}]} {
    %c0 = arith.constant 0 : index
    %c0_0 = arith.constant 0 : index
    %0 = vector.load %arg1[%c0, %c0_0] : memref<256x256xbf16, #tpu.memory_space<vmem>>, vector<256x256xbf16>
    %c0_1 = arith.constant 0 : index
    %c0_2 = arith.constant 0 : index
    %1 = vector.load %arg2[%c0_1, %c0_2] : memref<256x256xbf16, #tpu.memory_space<vmem>>, vector<256x256xbf16>
    %cst = arith.constant dense<0.000000e+00> : vector<256x256xf32>
    %2 = tpu.matmul %0, %1, %cst {dimension_numbers = #tpu.dot_dimension_numbers<[1], [0], [0], [1], [0, 0, 1, 1], [], []>} : vector<256x256xbf16>, vector<256x256xbf16>, vector<256x256xf32> -> vector<256x256xf32>
    %c0_3 = arith.constant 0 : index
    %c0_4 = arith.constant 0 : index
    %3 = vector.load %arg3[%c0_3, %c0_4] : memref<256x256xf32, #tpu.memory_space<vmem>>, vector<256x256xf32>
    %4 = arith.addf %2, %3 : vector<256x256xf32>
    %cst_5 = arith.constant dense<0.000000e+00> : vector<256xf32>
    %5 = vector.multi_reduction <add>, %4, %cst_5 [1] : vector<256x256xf32> to vector<256xf32>
    %6 = vector.shape_cast %5 : vector<256xf32> to vector<256x1xf32>
    %cst_6 = arith.constant 2.560000e+02 : f32
    %7 = vector.broadcast %cst_6 : f32 to vector<256x1xf32>
    %8 = arith.divf %6, %7 : vector<256x1xf32>
    %9 = vector.broadcast %8 : vector<256x1xf32> to vector<256x256xf32>
    %10 = arith.subf %4, %9 : vector<256x256xf32>
    %11 = arith.mulf %10, %10 : vector<256x256xf32>
    %cst_7 = arith.constant dense<0.000000e+00> : vector<256xf32>
    %12 = vector.multi_reduction <add>, %11, %cst_7 [1] : vector<256x256xf32> to vector<256xf32>
    %13 = vector.shape_cast %12 : vector<256xf32> to vector<256x1xf32>
    %cst_8 = arith.constant 2.560000e+02 : f32
    %14 = vector.broadcast %cst_8 : f32 to vector<256x1xf32>
    %15 = arith.divf %13, %14 : vector<256x1xf32>
    %16 = vector.broadcast %8 : vector<256x1xf32> to vector<256x256xf32>
    %17 = arith.subf %4, %16 : vector<256x256xf32>
    %cst_9 = arith.constant 9.99999974E-6 : f32
    %18 = vector.broadcast %cst_9 : f32 to vector<256x1xf32>
    %19 = arith.addf %15, %18 : vector<256x1xf32>
    %20 = math.rsqrt %19 : vector<256x1xf32>
    %21 = vector.broadcast %20 : vector<256x1xf32> to vector<256x256xf32>
    %22 = arith.mulf %17, %21 : vector<256x256xf32>
    %c0_10 = arith.constant 0 : index
    %c0_11 = arith.constant 0 : index
    %23 = vector.load %arg4[%c0_10, %c0_11] : memref<1x256xf32, #tpu.memory_space<vmem>>, vector<1x256xf32>
    %24 = vector.broadcast %23 : vector<1x256xf32> to vector<256x256xf32>
    %25 = arith.mulf %22, %24 : vector<256x256xf32>
    %c0_12 = arith.constant 0 : index
    %c0_13 = arith.constant 0 : index
    %26 = vector.load %arg5[%c0_12, %c0_13] : memref<1x256xf32, #tpu.memory_space<vmem>>, vector<1x256xf32>
    %27 = vector.broadcast %26 : vector<1x256xf32> to vector<256x256xf32>
    %28 = arith.addf %25, %27 : vector<256x256xf32>
    %c0_14 = arith.constant 0 : index
    %c0_15 = arith.constant 0 : index
    %29 = vector.load %arg6[%c0_14, %c0_15] : memref<256x256xf32, #tpu.memory_space<vmem>>, vector<256x256xf32>
    tpu.vector_store %arg6[%c0_14, %c0_15], %28 {strides = array<i32>} : memref<256x256xf32, #tpu.memory_space<vmem>>, vector<256x256xf32>,
    return
  }
  func.func @transform_0(%arg0: i32) -> (i32, i32) {
    %c0_i32 = arith.constant 0 : i32
    %c0_i32_0 = arith.constant 0 : i32
    return %arg0, %c0_i32 : i32, i32
  }
  func.func @transform_1(%arg0: i32) -> (i32, i32) {
    %c0_i32 = arith.constant 0 : i32
    %c0_i32_0 = arith.constant 0 : i32
    %c0_i32_1 = arith.constant 0 : i32
    return %c0_i32, %c0_i32_0 : i32, i32
  }
  func.func @transform_2(%arg0: i32) -> (i32, i32) {
    %c0_i32 = arith.constant 0 : i32
    %c0_i32_0 = arith.constant 0 : i32
    return %arg0, %c0_i32 : i32, i32
  }
  func.func @transform_3(%arg0: i32) -> (i32, i32) {
    %c0_i32 = arith.constant 0 : i32
    %c0_i32_0 = arith.constant 0 : i32
    %c0_i32_1 = arith.constant 0 : i32
    return %c0_i32, %c0_i32_0 : i32, i32
  }
  func.func @transform_4(%arg0: i32) -> (i32, i32) {
    %c0_i32 = arith.constant 0 : i32
    %c0_i32_0 = arith.constant 0 : i32
    %c0_i32_1 = arith.constant 0 : i32
    return %c0_i32, %c0_i32_0 : i32, i32
  }
  func.func @transform_5(%arg0: i32) -> (i32, i32) {
    %c0_i32 = arith.constant 0 : i32
    %c0_i32_0 = arith.constant 0 : i32
    return %arg0, %c0_i32 : i32, i32
  }
}

</mosaic_0001>

<bundles_post_ra>
// kernel: rel_partial_learnable_mha_forward.4
= control target key start
LH: loop header
LB: loop body
LE: loop exit
PB: predicated region body
PF: predicated region fallthrough
CT: control target
= control target key end

     0   :  { %s2198_s9 = smov 0   ;;  %s2200_s10 = smov 0   ;;  %s2700_s0 = inlined_call_operand.vmem [shape: bf16[256,256], index: 0, kind: input, shape index: {}]   ;;  %s2701_s1 = inlined_call_operand.vmem [shape: bf16[256,768], index: 1, kind: input, shape index: {}]   ;;  %s2702_s2 = inlined_call_operand.vmem [shape: bf16[256,768], index: 2, kind: output, shape index: {}]  }
   0x1   :  { %s2202_s11 = smov 0   ;;  %s2204_s12 = smov 0  }
   0x2   :  { %s2206_s13 = smov 0  }
   0x3 LB: > { %s27_s14 = sadd.s32 1, %s2177_s12  ;;  %s1765_s15 = sadd.s32 4294967295, %s2181_s13   ;;  %s2181_s13 = sphi %s2206_s13, %s12_s13   ;;  %s2177_s12 = sphi %s2204_s12, %s2707_s12   ;;  %s2173_s11 = sphi %s2202_s11, %s2706_s11   ;;  %s2169_s10 = sphi %s2200_s10, %s2705_s10   ;;  %s2165_s9 = sphi %s2198_s9, %s2704_s9  }
   0x4   : > { %p29_p0 = scmp.ge.s32.totalorder %s27_s14, 3  ;;  %p75_p1 = scmp.ne.s32.totalorder %s2169_s10, %s2165_s9 }
   0x5   : > { %p76_p2 = scmp.eq.s32.totalorder %s2181_s13, 0  ;;  %p107_p4 = scmp.eq.s32.totalorder %s1765_s15, 2 }
   0x6   : > { %s2709_s14 = smov (%p29_p0, %s27_s14), 0  ;;  %s68_s17 = sadd.s32 1, %s2169_s10 }
   0x7   : > { %p77_p3 = por %p76_p2, %p75_p1  ;;  %s64_s16 = ssub.s32 %s2177_s12, %s2709_s14 }
   0x8   : > { %p66_p5 = scmp.eq.s32.totalorder %s64_s16, 0  ;;  %p2233_p6 = por %p107_p4, %p75_p1 }
   0x9   : > { %p1769_p7 = scmp.ge.s32.totalorder %s2181_s13, 3 }
   0xa   : > { %s2238_s19 = scalar_select %p66_p5, %s2169_s10, %s68_s17  }
   0xb   : > { %144 = sbr.rel (%p1769_p7) target bundleno = 52 (0x34), region = 20 }
  0x10   : > { %147 = sbr.rel (!%p77_p3) target bundleno = 52 (0x34), region = 24  ;;  %s149_s20 = sand.u32 (%p77_p3), 1, %s2169_s10  }
  0x11   : > { %s2037_s21 = sshll.u32 (%p77_p3), %s2177_s12, 3  ;;  %s1770_s22 = sshll.u32 (%p77_p3), %s149_s20, 8 }
  0x12   : > { %s2246_s25 = scalar_lea.vmem (%p77_p3), %s2701_s1, %s2037_s21  ;;  %s2251_s26 = scalar_lea.vmem (%p77_p3), [#allocation3], %s1770_s22 }
  0x13   : > { %v248_v0 = vld [vmem:[%s2246_s25] sm:$0xff] (%p77_p3)  ;;  %v250_v1 = vld [vmem:[%s2246_s25 + $0x18] sm:$0xff] (%p77_p3)  ;;  %v252_v2 = vld [vmem:[%s2246_s25 + $0x30] sm:$0xff] (%p77_p3) }
  0x14   : > { %249 = vst [vmem:[%s2251_s26] sm:$0xff] (%p77_p3), %v248_v0  ;;  %v254_v3 = vld [vmem:[%s2246_s25 + $0x48] sm:$0xff] (%p77_p3)  ;;  %v256_v4 = vld [vmem:[%s2246_s25 + $0x60] sm:$0xff] (%p77_p3)  ;;  %v258_v5 = vld [vmem:[%s2246_s25 + $0x78] sm:$0xff] (%p77_p3) }
  0x15   : > { %251 = vst [vmem:[%s2251_s26 + $0x8] sm:$0xff] %v250_v1  ;;  %v260_v6 = vld [vmem:[%s2246_s25 + $0x90] sm:$0xff]  ;;  %v262_v7 = vld [vmem:[%s2246_s25 + $0xa8] sm:$0xff]  ;;  %v264_v8 = vld [vmem:[%s2246_s25 + $0xc0] sm:$0xff] }
  0x16   : > { %253 = vst [vmem:[%s2251_s26 + $0x10] sm:$0xff] %v252_v2  ;;  %v266_v9 = vld [vmem:[%s2246_s25 + $0xd8] sm:$0xff]  ;;  %v268_v10 = vld [vmem:[%s2246_s25 + $0xf0] sm:$0xff]  ;;  %v270_v11 = vld [vmem:[%s2246_s25 + $0x108] sm:$0xff] }
  0x17   : > { %255 = vst [vmem:[%s2251_s26 + $0x18] sm:$0xff] %v254_v3  ;;  %v272_v12 = vld [vmem:[%s2246_s25 + $0x120] sm:$0xff]  ;;  %v274_v13 = vld [vmem:[%s2246_s25 + $0x138] sm:$0xff]  ;;  %v276_v14 = vld [vmem:[%s2246_s25 + $0x150] sm:$0xff] }
  0x18   : > { %257 = vst [vmem:[%s2251_s26 + $0x20] sm:$0xff] %v256_v4  ;;  %v278_v15 = vld [vmem:[%s2246_s25 + $0x168] sm:$0xff]  ;;  %v280_v16 = vld [vmem:[%s2246_s25 + $0x180] sm:$0xff]  ;;  %v282_v17 = vld [vmem:[%s2246_s25 + $0x198] sm:$0xff] }
  0x19   : > { %259 = vst [vmem:[%s2251_s26 + $0x28] sm:$0xff] %v258_v5  ;;  %v284_v18 = vld [vmem:[%s2246_s25 + $0x1b0] sm:$0xff]  ;;  %v286_v19 = vld [vmem:[%s2246_s25 + $0x1c8] sm:$0xff]  ;;  %v288_v20 = vld [vmem:[%s2246_s25 + $0x1e0] sm:$0xff] }
  0x1a   : > { %261 = vst [vmem:[%s2251_s26 + $0x30] sm:$0xff] %v260_v6  ;;  %v290_v21 = vld [vmem:[%s2246_s25 + $0x1f8] sm:$0xff]  ;;  %v292_v22 = vld [vmem:[%s2246_s25 + $0x210] sm:$0xff]  ;;  %v294_v23 = vld [vmem:[%s2246_s25 + $0x228] sm:$0xff] }
  0x1b   : > { %263 = vst [vmem:[%s2251_s26 + $0x38] sm:$0xff] %v262_v7  ;;  %v296_v24 = vld [vmem:[%s2246_s25 + $0x240] sm:$0xff]  ;;  %v298_v25 = vld [vmem:[%s2246_s25 + $0x258] sm:$0xff]  ;;  %v300_v26 = vld [vmem:[%s2246_s25 + $0x270] sm:$0xff] }
  0x1c   : > { %265 = vst [vmem:[%s2251_s26 + $0x40] sm:$0xff] %v264_v8  ;;  %v302_v27 = vld [vmem:[%s2246_s25 + $0x288] sm:$0xff]  ;;  %v304_v28 = vld [vmem:[%s2246_s25 + $0x2a0] sm:$0xff]  ;;  %v306_v29 = vld [vmem:[%s2246_s25 + $0x2b8] sm:$0xff] }
  0x1d   : > { %267 = vst [vmem:[%s2251_s26 + $0x48] sm:$0xff] %v266_v9  ;;  %v308_v30 = vld [vmem:[%s2246_s25 + $0x2d0] sm:$0xff]  ;;  %v310_v31 = vld [vmem:[%s2246_s25 + $0x2e8] sm:$0xff] }
  0x1e   : > { %269 = vst [vmem:[%s2251_s26 + $0x50] sm:$0xff] %v268_v10 }
  0x1f   : > { %271 = vst [vmem:[%s2251_s26 + $0x58] sm:$0xff] %v270_v11 }
  0x20   : > { %273 = vst [vmem:[%s2251_s26 + $0x60] sm:$0xff] %v272_v12 }
  0x21   : > { %275 = vst [vmem:[%s2251_s26 + $0x68] sm:$0xff] %v274_v13 }
  0x22   : > { %277 = vst [vmem:[%s2251_s26 + $0x70] sm:$0xff] %v276_v14 }
  0x23   : > { %279 = vst [vmem:[%s2251_s26 + $0x78] sm:$0xff] %v278_v15 }
  0x24   : > { %281 = vst [vmem:[%s2251_s26 + $0x80] sm:$0xff] %v280_v16 }
  0x25   : > { %283 = vst [vmem:[%s2251_s26 + $0x88] sm:$0xff] %v282_v17 }
  0x26   : > { %285 = vst [vmem:[%s2251_s26 + $0x90] sm:$0xff] %v284_v18 }
  0x27   : > { %287 = vst [vmem:[%s2251_s26 + $0x98] sm:$0xff] %v286_v19 }
  0x28   : > { %289 = vst [vmem:[%s2251_s26 + $0xa0] sm:$0xff] %v288_v20 }
  0x29   : > { %291 = vst [vmem:[%s2251_s26 + $0xa8] sm:$0xff] %v290_v21 }
  0x2a   : > { %293 = vst [vmem:[%s2251_s26 + $0xb0] sm:$0xff] %v292_v22 }
  0x2b   : > { %295 = vst [vmem:[%s2251_s26 + $0xb8] sm:$0xff] %v294_v23 }
  0x2c   : > { %297 = vst [vmem:[%s2251_s26 + $0xc0] sm:$0xff] %v296_v24 }
  0x2d   : > { %299 = vst [vmem:[%s2251_s26 + $0xc8] sm:$0xff] %v298_v25 }
  0x2e   : > { %301 = vst [vmem:[%s2251_s26 + $0xd0] sm:$0xff] %v300_v26 }
  0x2f   : > { %303 = vst [vmem:[%s2251_s26 + $0xd8] sm:$0xff] %v302_v27 }
  0x30   : > { %305 = vst [vmem:[%s2251_s26 + $0xe0] sm:$0xff] %v304_v28 }
  0x31   : > { %307 = vst [vmem:[%s2251_s26 + $0xe8] sm:$0xff] %v306_v29 }
  0x32   : > { %309 = vst [vmem:[%s2251_s26 + $0xf0] sm:$0xff] %v308_v30 }
  0x33   : > { %311 = vst [vmem:[%s2251_s26 + $0xf8] sm:$0xff] %v310_v31 }
  0x34 PF: > { %p1773_p8 = scmp.ge.s32.totalorder %s2181_s13, 1  ;;  %p316_p9 = scmp.lt.s32.totalorder %s2181_s13, 4 }
  0x36   : > { %p317_p10 = pnand %p1773_p8, %p316_p9 }
  0x37   : > { %s323_s27 = sand.u32 (!%p317_p10), 1, %s2165_s9  }
  0x38   : > { %320 = sbr.rel (%p317_p10) target bundleno = 490 (0x1ea), region = 62  ;;  %s2317_s28 = sshll.u32 (!%p317_p10), %s323_s27, 8 }
  0x39   : > { %s2320_s29 = scalar_lea.vmem (!%p317_p10), [#allocation3], %s2317_s28  ;;  %s2501_s25 = scalar_lea.vmem (!%p317_p10), [#allocation4], %s2317_s28 }
  0x3d   : > { %v1962_v32 = vld [vmem:[%s2320_s29 + $0x70] sm:$0xf]  ;;  %v2085_v33 = vld [vmem:[%s2320_s29 + $0x74] sm:$0xf0]  ;;  %v2084_v37 = vld [vmem:[%s2320_s29 + $0x74] sm:$0xf] }
  0x3e   : > { %v2026_v34 = vld [vmem:[%s2320_s29 + $0xf0] sm:$0xf]  ;;  %v1963_v35 = vor.u32 %v2085_v33, %v1962_v32  ;;  %v2101_v36 = vld [vmem:[%s2320_s29 + $0xf4] sm:$0xf0]  ;;  %v1964_v38 = vld [vmem:[%s2320_s29 + $0x78] sm:$0xf0] }
  0x3f   : > { %v2027_v39 = vor.u32 %v2101_v36, %v2026_v34  ;;  %v1967_v40 = vor.u32 %v2084_v37, %v1964_v38  ;;  %v2100_v41 = vld [vmem:[%s2320_s29 + $0xf4] sm:$0xf]  ;;  %v2028_v42 = vld [vmem:[%s2320_s29 + $0xf8] sm:$0xf0]  ;;  %v1954_v43 = vld [vmem:[%s2320_s29 + $0x60] sm:$0xf] }
  0x40   : > { %885 = vmatpush.bf16.msra.mxu0 %v1963_v35  ;;  %v2031_v44 = vor.u32 %v2100_v41, %v2028_v42  ;;  %v2083_v45 = vld [vmem:[%s2320_s29 + $0x64] sm:$0xf0]  ;;  %v2018_v46 = vld [vmem:[%s2320_s29 + $0xe0] sm:$0xf]  ;;  %v2082_v50 = vld [vmem:[%s2320_s29 + $0x64] sm:$0xf] }
  0x41   : > { %v2099_v47 = vld [vmem:[%s2320_s29 + $0xe4] sm:$0xf0]  ;;  %974 = vmatpush.bf16.msra.mxu1 %v2027_v39  ;;  %1063 = vmatpush.bf16.msra.mxu2 %v1967_v40  ;;  %v1955_v48 = vor.u32 %v2083_v45, %v1954_v43  ;;  %v1956_v51 = vld [vmem:[%s2320_s29 + $0x68] sm:$0xf0]  ;;  %v2098_v52 = vld [vmem:[%s2320_s29 + $0xe4] sm:$0xf] }
  0x42   : > { %v2019_v49 = vor.u32 %v2099_v47, %v2018_v46  ;;  %1152 = vmatpush.bf16.msra.mxu3 %v2031_v44  ;;  %v1959_v53 = vor.u32 %v2082_v50, %v1956_v51  ;;  %v2020_v54 = vld [vmem:[%s2320_s29 + $0xe8] sm:$0xf0]  ;;  %v1946_v55 = vld [vmem:[%s2320_s29 + $0x50] sm:$0xf]  ;;  %v2081_v56 = vld [vmem:[%s2320_s29 + $0x54] sm:$0xf0] }
  0x43   : > { %v2023_v57 = vor.u32 %v2098_v52, %v2020_v54  ;;  %v2010_v58 = vld [vmem:[%s2320_s29 + $0xd0] sm:$0xf]  ;;  %v2097_v59 = vld [vmem:[%s2320_s29 + $0xd4] sm:$0xf0]  ;;  %v2080_v60 = vld [vmem:[%s2320_s29 + $0x54] sm:$0xf]  ;;  %v1947_v61 = vor.u32 %v2081_v56, %v1946_v55 }
  0x44   : > { %886 = vmatpush.bf16.msra.mxu0 %v1955_v48  ;;  %v1948_v62 = vld [vmem:[%s2320_s29 + $0x58] sm:$0xf0]  ;;  %v2096_v63 = vld [vmem:[%s2320_s29 + $0xd4] sm:$0xf]  ;;  %v2011_v1 = vor.u32 %v2097_v59, %v2010_v58  ;;  %v1938_v3 = vld [vmem:[%s2320_s29 + $0x40] sm:$0xf] }
  0x45   : > { %v2012_v0 = vld [vmem:[%s2320_s29 + $0xd8] sm:$0xf0]  ;;  %975 = vmatpush.bf16.msra.mxu1 %v2019_v49  ;;  %1064 = vmatpush.bf16.msra.mxu2 %v1959_v53  ;;  %v1951_v2 = vor.u32 %v2080_v60, %v1948_v62  ;;  %v2079_v4 = vld [vmem:[%s2320_s29 + $0x44] sm:$0xf0]  ;;  %v2002_v5 = vld [vmem:[%s2320_s29 + $0xc0] sm:$0xf] }
  0x46   : > { %1153 = vmatpush.bf16.msra.mxu3 %v2023_v57  ;;  %v2015_v6 = vor.u32 %v2096_v63, %v2012_v0  ;;  %v2095_v7 = vld [vmem:[%s2320_s29 + $0xc4] sm:$0xf0]  ;;  %v2078_v8 = vld [vmem:[%s2320_s29 + $0x44] sm:$0xf]  ;;  %v1940_v9 = vld [vmem:[%s2320_s29 + $0x48] sm:$0xf0]  ;;  %v1939_v12 = vor.u32 %v2079_v4, %v1938_v3 }
  0x47   : > { %v2094_v10 = vld [vmem:[%s2320_s29 + $0xc4] sm:$0xf]  ;;  %v2004_v11 = vld [vmem:[%s2320_s29 + $0xc8] sm:$0xf0]  ;;  %v2003_v13 = vor.u32 %v2095_v7, %v2002_v5  ;;  %v1943_v14 = vor.u32 %v2078_v8, %v1940_v9  ;;  %v1930_v15 = vld [vmem:[%s2320_s29 + $0x30] sm:$0xf] }
  0x48   : > { %887 = vmatpush.bf16.msra.mxu0 %v1947_v61  ;;  %v2077_v16 = vld [vmem:[%s2320_s29 + $0x34] sm:$0xf0]  ;;  %v1994_v17 = vld [vmem:[%s2320_s29 + $0xb0] sm:$0xf]  ;;  %v2007_v18 = vor.u32 %v2094_v10, %v2004_v11  ;;  %v2076_v20 = vld [vmem:[%s2320_s29 + $0x34] sm:$0xf] }
  0x49   : > { %976 = vmatpush.bf16.msra.mxu1 %v2011_v1  ;;  %1065 = vmatpush.bf16.msra.mxu2 %v1951_v2  ;;  %v2093_v19 = vld [vmem:[%s2320_s29 + $0xb4] sm:$0xf0]  ;;  %v1932_v21 = vld [vmem:[%s2320_s29 + $0x38] sm:$0xf0]  ;;  %v2092_v22 = vld [vmem:[%s2320_s29 + $0xb4] sm:$0xf]  ;;  %v1931_v24 = vor.u32 %v2077_v16, %v1930_v15 }
  0x4a   : > { %1154 = vmatpush.bf16.msra.mxu3 %v2015_v6  ;;  %v1996_v23 = vld [vmem:[%s2320_s29 + $0xb8] sm:$0xf0]  ;;  %v1995_v25 = vor.u32 %v2093_v19, %v1994_v17  ;;  %v1935_v26 = vor.u32 %v2076_v20, %v1932_v21  ;;  %v1922_v27 = vld [vmem:[%s2320_s29 + $0x20] sm:$0xf]  ;;  %v2075_v28 = vld [vmem:[%s2320_s29 + $0x24] sm:$0xf0] }
  0x4b   : > { %v1986_v29 = vld [vmem:[%s2320_s29 + $0xa0] sm:$0xf]  ;;  %v1999_v30 = vor.u32 %v2092_v22, %v1996_v23  ;;  %v2091_v31 = vld [vmem:[%s2320_s29 + $0xa4] sm:$0xf0]  ;;  %v2074_v32 = vld [vmem:[%s2320_s29 + $0x24] sm:$0xf]  ;;  %v1923_v36 = vor.u32 %v2075_v28, %v1922_v27 }
  0x4c   : > { %888 = vmatpush.bf16.msra.mxu0 %v1939_v12  ;;  %v1924_v33 = vld [vmem:[%s2320_s29 + $0x28] sm:$0xf0]  ;;  %v2090_v34 = vld [vmem:[%s2320_s29 + $0xa4] sm:$0xf]  ;;  %v1987_v37 = vor.u32 %v2091_v31, %v1986_v29  ;;  %v1914_v39 = vld [vmem:[%s2320_s29 + $0x10] sm:$0xf] }
  0x4d   : > { %977 = vmatpush.bf16.msra.mxu1 %v2003_v13  ;;  %1066 = vmatpush.bf16.msra.mxu2 %v1943_v14  ;;  %v1988_v35 = vld [vmem:[%s2320_s29 + $0xa8] sm:$0xf0]  ;;  %v1927_v38 = vor.u32 %v2074_v32, %v1924_v33  ;;  %v2073_v40 = vld [vmem:[%s2320_s29 + $0x14] sm:$0xf0]  ;;  %v1978_v41 = vld [vmem:[%s2320_s29 + $0x90] sm:$0xf] }
  0x4e   : > { %1155 = vmatpush.bf16.msra.mxu3 %v2007_v18  ;;  %v1991_v42 = vor.u32 %v2090_v34, %v1988_v35  ;;  %v2089_v43 = vld [vmem:[%s2320_s29 + $0x94] sm:$0xf0]  ;;  %v2072_v44 = vld [vmem:[%s2320_s29 + $0x14] sm:$0xf]  ;;  %v1916_v45 = vld [vmem:[%s2320_s29 + $0x18] sm:$0xf0]  ;;  %v1915_v48 = vor.u32 %v2073_v40, %v1914_v39 }
  0x4f   : > { %v2088_v46 = vld [vmem:[%s2320_s29 + $0x94] sm:$0xf]  ;;  %v1980_v47 = vld [vmem:[%s2320_s29 + $0x98] sm:$0xf0]  ;;  %v1979_v49 = vor.u32 %v2089_v43, %v1978_v41  ;;  %v1919_v50 = vor.u32 %v2072_v44, %v1916_v45  ;;  %v1906_v51 = vld [vmem:[%s2320_s29] sm:$0xf] }
  0x50   : > { %889 = vmatpush.bf16.msra.mxu0 %v1931_v24  ;;  %v2071_v52 = vld [vmem:[%s2320_s29 + $0x4] sm:$0xf0]  ;;  %v1970_v53 = vld [vmem:[%s2320_s29 + $0x80] sm:$0xf]  ;;  %v1983_v54 = vor.u32 %v2088_v46, %v1980_v47  ;;  %v2070_v56 = vld [vmem:[%s2320_s29 + $0x4] sm:$0xf] }
  0x51   : > { %978 = vmatpush.bf16.msra.mxu1 %v1995_v25  ;;  %1067 = vmatpush.bf16.msra.mxu2 %v1935_v26  ;;  %v2087_v55 = vld [vmem:[%s2320_s29 + $0x84] sm:$0xf0]  ;;  %v1908_v57 = vld [vmem:[%s2320_s29 + $0x8] sm:$0xf0]  ;;  %v2086_v58 = vld [vmem:[%s2320_s29 + $0x84] sm:$0xf]  ;;  %v1907_v60 = vor.u32 %v2071_v52, %v1906_v51 }
  0x52   : > { %1156 = vmatpush.bf16.msra.mxu3 %v1999_v30  ;;  %v1972_v59 = vld [vmem:[%s2320_s29 + $0x88] sm:$0xf0]  ;;  %v1778_v61 = vld [vmem:[%s2700_s0] sm:$0xf]  ;;  %v2039_v62 = vld [vmem:[%s2700_s0 + $0x4] sm:$0xf0]  ;;  %v1971_v63 = vor.u32 %v2087_v55, %v1970_v53  ;;  %v1911_v0 = vor.u32 %v2070_v56, %v1908_v57 }
  0x53   : > { %v2038_v1 = vld [vmem:[%s2700_s0 + $0x4] sm:$0xf]  ;;  %v1780_v2 = vld [vmem:[%s2700_s0 + $0x8] sm:$0xf0]  ;;  %v1975_v3 = vor.u32 %v2086_v58, %v1972_v59  ;;  %v1779_v4 = vor.u32 %v2039_v62, %v1778_v61  ;;  %v1786_v6 = vld [vmem:[%s2700_s0 + $0x10] sm:$0xf] }
  0x54   : > { %890 = vmatpush.bf16.msra.mxu0 %v1923_v36  ;;  %v1783_v5 = vor.u32 %v2038_v1, %v1780_v2  ;;  %v2041_v7 = vld [vmem:[%s2700_s0 + $0x14] sm:$0xf0]  ;;  %v2040_v8 = vld [vmem:[%s2700_s0 + $0x14] sm:$0xf]  ;;  %v1788_v9 = vld [vmem:[%s2700_s0 + $0x18] sm:$0xf0] }
  0x55   : > { %979 = vmatpush.bf16.msra.mxu1 %v1987_v37  ;;  %1068 = vmatpush.bf16.msra.mxu2 %v1927_v38  ;;  %v1787_v10 = vor.u32 %v2041_v7, %v1786_v6  ;;  %v1791_v11 = vor.u32 %v2040_v8, %v1788_v9  ;;  %v1794_v12 = vld [vmem:[%s2700_s0 + $0x20] sm:$0xf]  ;;  %v2043_v13 = vld [vmem:[%s2700_s0 + $0x24] sm:$0xf0]  ;;  %v2042_v14 = vld [vmem:[%s2700_s0 + $0x24] sm:$0xf] }
  0x56   : > { %1157 = vmatpush.bf16.msra.mxu3 %v1991_v42  ;;  %v1796_v15 = vld [vmem:[%s2700_s0 + $0x28] sm:$0xf0]  ;;  %v1795_v16 = vor.u32 %v2043_v13, %v1794_v12  ;;  %v1802_v18 = vld [vmem:[%s2700_s0 + $0x30] sm:$0xf]  ;;  %v2045_v19 = vld [vmem:[%s2700_s0 + $0x34] sm:$0xf0] }
  0x57   : > { %v1799_v17 = vor.u32 %v2042_v14, %v1796_v15  ;;  %v2044_v20 = vld [vmem:[%s2700_s0 + $0x34] sm:$0xf]  ;;  %v1804_v21 = vld [vmem:[%s2700_s0 + $0x38] sm:$0xf0]  ;;  %v1803_v22 = vor.u32 %v2045_v19, %v1802_v18  ;;  %v1810_v24 = vld [vmem:[%s2700_s0 + $0x40] sm:$0xf] }
  0x58   : > { %891 = vmatpush.bf16.msra.mxu0 %v1915_v48  ;;  %v1807_v23 = vor.u32 %v2044_v20, %v1804_v21  ;;  %v2047_v25 = vld [vmem:[%s2700_s0 + $0x44] sm:$0xf0]  ;;  %v2046_v26 = vld [vmem:[%s2700_s0 + $0x44] sm:$0xf]  ;;  %v1812_v27 = vld [vmem:[%s2700_s0 + $0x48] sm:$0xf0] }
  0x59   : > { %980 = vmatpush.bf16.msra.mxu1 %v1979_v49  ;;  %1069 = vmatpush.bf16.msra.mxu2 %v1919_v50  ;;  %v1811_v28 = vor.u32 %v2047_v25, %v1810_v24  ;;  %v1815_v29 = vor.u32 %v2046_v26, %v1812_v27  ;;  %v1818_v30 = vld [vmem:[%s2700_s0 + $0x50] sm:$0xf]  ;;  %v2049_v31 = vld [vmem:[%s2700_s0 + $0x54] sm:$0xf0]  ;;  %v2048_v32 = vld [vmem:[%s2700_s0 + $0x54] sm:$0xf] }
  0x5a   : > { %1158 = vmatpush.bf16.msra.mxu3 %v1983_v54  ;;  %v1820_v33 = vld [vmem:[%s2700_s0 + $0x58] sm:$0xf0]  ;;  %v1819_v34 = vor.u32 %v2049_v31, %v1818_v30  ;;  %v1826_v36 = vld [vmem:[%s2700_s0 + $0x60] sm:$0xf]  ;;  %v2051_v37 = vld [vmem:[%s2700_s0 + $0x64] sm:$0xf0] }
  0x5b   : > { %v1823_v35 = vor.u32 %v2048_v32, %v1820_v33  ;;  %v2050_v38 = vld [vmem:[%s2700_s0 + $0x64] sm:$0xf]  ;;  %v1828_v39 = vld [vmem:[%s2700_s0 + $0x68] sm:$0xf0]  ;;  %v1827_v40 = vor.u32 %v2051_v37, %v1826_v36  ;;  %v1834_v42 = vld [vmem:[%s2700_s0 + $0x70] sm:$0xf] }
  0x5c   : > { %892 = vmatpush.bf16.msra.mxu0 %v1907_v60  ;;  %v1831_v41 = vor.u32 %v2050_v38, %v1828_v39  ;;  %v2053_v43 = vld [vmem:[%s2700_s0 + $0x74] sm:$0xf0]  ;;  %v2052_v44 = vld [vmem:[%s2700_s0 + $0x74] sm:$0xf]  ;;  %v1836_v45 = vld [vmem:[%s2700_s0 + $0x78] sm:$0xf0] }
  0x5d   : > { %981 = vmatpush.bf16.msra.mxu1 %v1971_v63  ;;  %1070 = vmatpush.bf16.msra.mxu2 %v1911_v0  ;;  %v1835_v46 = vor.u32 %v2053_v43, %v1834_v42  ;;  %v1839_v47 = vor.u32 %v2052_v44, %v1836_v45  ;;  %v1842_v48 = vld [vmem:[%s2700_s0 + $0x80] sm:$0xf]  ;;  %v2055_v49 = vld [vmem:[%s2700_s0 + $0x84] sm:$0xf0]  ;;  %v2054_v50 = vld [vmem:[%s2700_s0 + $0x84] sm:$0xf] }
  0x5e   : > { %1159 = vmatpush.bf16.msra.mxu3 %v1975_v3  ;;  %v1844_v51 = vld [vmem:[%s2700_s0 + $0x88] sm:$0xf0]  ;;  %v1843_v52 = vor.u32 %v2055_v49, %v1842_v48  ;;  %v1850_v63 = vld [vmem:[%s2700_s0 + $0x90] sm:$0xf]  ;;  %v2057_v0 = vld [vmem:[%s2700_s0 + $0x94] sm:$0xf0] }
  0x5f   : > { %893 = vmatmul.bf16.vlgmr.msra.gmra.mxu0 %v1779_v4  ;;  %v1847_v54 = vor.u32 %v2054_v50, %v1844_v51  ;;  %v2056_v1 = vld [vmem:[%s2700_s0 + $0x94] sm:$0xf]  ;;  %v1852_v2 = vld [vmem:[%s2700_s0 + $0x98] sm:$0xf0]  ;;  %v1858_v19 = vld [vmem:[%s2700_s0 + $0xa0] sm:$0xf] }
  0x60   : > { %982 = vmatmul.bf16.vlgmr.msra.gmra.mxu1 %v1783_v5  ;;  %1071 = vmatmul.bf16.vlgmr.msra.gmra.mxu2 %v1779_v4  ;;  %v1851_v4 = vor.u32 %v2057_v0, %v1850_v63  ;;  %v1855_v7 = vor.u32 %v2056_v1, %v1852_v2  ;;  %v2059_v20 = vld [vmem:[%s2700_s0 + $0xa4] sm:$0xf0]  ;;  %v2058_v21 = vld [vmem:[%s2700_s0 + $0xa4] sm:$0xf]  ;;  %v1866_v39 = vld [vmem:[%s2700_s0 + $0xb0] sm:$0xf] }
  0x61   : > { %1160 = vmatmul.bf16.vlgmr.msra.gmra.mxu3 %v1783_v5  ;;  %v1859_v24 = vor.u32 %v2059_v20, %v1858_v19  ;;  %v1868_v42 = vld [vmem:[%s2700_s0 + $0xb8] sm:$0xf0]  ;;  %s2102_s15 = sshll.u32 (%p2233_p6), %s2173_s11, 3 }
  0x62   : > { %s2621_s20 = scalar_lea.vmem (%p2233_p6), %s2702_s2, %s2102_s15 }
  0x6f   : > { %898 = vmatmul.bf16.gmra.mxu0 %v1787_v10 }
  0x70   : > { %987 = vmatmul.bf16.gmra.mxu1 %v1791_v11  ;;  %1076 = vmatmul.bf16.gmra.mxu2 %v1787_v10 }
  0x71   : > { %1165 = vmatmul.bf16.gmra.mxu3 %v1791_v11 }
  0x7f   : > { %903 = vmatmul.bf16.gmra.mxu0 %v1795_v16 }
  0x80   : > { %992 = vmatmul.bf16.gmra.mxu1 %v1799_v17  ;;  %1081 = vmatmul.bf16.gmra.mxu2 %v1795_v16 }
  0x81   : > { %1170 = vmatmul.bf16.gmra.mxu3 %v1799_v17 }
  0x8f   : > { %908 = vmatmul.bf16.gmra.mxu0 %v1803_v22 }
  0x90   : > { %997 = vmatmul.bf16.gmra.mxu1 %v1807_v23  ;;  %1086 = vmatmul.bf16.gmra.mxu2 %v1803_v22  ;;  %v1860_v22 = vld [vmem:[%s2700_s0 + $0xa8] sm:$0xf0] }
  0x91   : > { %1175 = vmatmul.bf16.gmra.mxu3 %v1807_v23  ;;  %v1863_v27 = vor.u32 %v2058_v21, %v1860_v22 }
  0x9f   : > { %913 = vmatmul.bf16.gmra.mxu0 %v1811_v28 }
  0xa0   : > { %1002 = vmatmul.bf16.gmra.mxu1 %v1815_v29  ;;  %1091 = vmatmul.bf16.gmra.mxu2 %v1811_v28 }
  0xa1   : > { %1180 = vmatmul.bf16.gmra.mxu3 %v1815_v29 }
  0xaf   : > { %918 = vmatmul.bf16.gmra.mxu0 %v1819_v34 }
  0xb0   : > { %1007 = vmatmul.bf16.gmra.mxu1 %v1823_v35  ;;  %1096 = vmatmul.bf16.gmra.mxu2 %v1819_v34 }
  0xb1   : > { %1185 = vmatmul.bf16.gmra.mxu3 %v1823_v35 }
  0xbf   : > { %923 = vmatmul.bf16.gmra.mxu0 %v1827_v40 }
  0xc0   : > { %1012 = vmatmul.bf16.gmra.mxu1 %v1831_v41  ;;  %1101 = vmatmul.bf16.gmra.mxu2 %v1827_v40  ;;  %v2061_v40 = vld [vmem:[%s2700_s0 + $0xb4] sm:$0xf0] }
  0xc1   : > { %1190 = vmatmul.bf16.gmra.mxu3 %v1831_v41  ;;  %v2060_v41 = vld [vmem:[%s2700_s0 + $0xb4] sm:$0xf]  ;;  %v1867_v44 = vor.u32 %v2061_v40, %v1866_v39 }
  0xcf   : > { %928 = vmatmul.bf16.gmra.mxu0 %v1835_v46 }
  0xd0   : > { %1017 = vmatmul.bf16.gmra.mxu1 %v1839_v47  ;;  %1106 = vmatmul.bf16.gmra.mxu2 %v1835_v46 }
  0xd1   : > { %1195 = vmatmul.bf16.gmra.mxu3 %v1839_v47  ;;  %v1871_v47 = vor.u32 %v2060_v41, %v1868_v42 }
  0xdc   : > { %v894_v53 = vpop.f32.mrf.mxu0 }
  0xdd   : > { %v983_v55 = vpop.f32.mrf.mxu1 }
  0xde   : > { %v984_v56 = vadd.f32 %v983_v55, %v894_v53 }
  0xdf   : > { %933 = vmatmul.bf16.gmra.mxu0 %v1843_v52 }
  0xe0   : > { %1022 = vmatmul.bf16.gmra.mxu1 %v1847_v54  ;;  %1111 = vmatmul.bf16.gmra.mxu2 %v1843_v52 }
  0xe1   : > { %1200 = vmatmul.bf16.gmra.mxu3 %v1847_v54 }
  0xe3   : > { %v1072_v57 = vpop.f32.mrf.mxu2 }
  0xe4   : > { %v1161_v58 = vpop.f32.mrf.mxu3  ;;  %v896_v59 = vpop.f32.mrf.mxu0 }
  0xe5   : > { %v1162_v60 = vadd.f32 %v1161_v58, %v1072_v57  ;;  %v985_v61 = vpop.f32.mrf.mxu1 }
  0xe6   : > { %v986_v8 = vadd.f32 %v985_v61, %v896_v59  ;;  %v1874_v59 = vld [vmem:[%s2700_s0 + $0xc0] sm:$0xf]  ;;  %v2062_v61 = vld [vmem:[%s2700_s0 + $0xc4] sm:$0xf] }
  0xe7   : > { %v1436_v62 = vpack.c.bf16 %v1162_v60, %v984_v56  ;;  %v2063_v60 = vld [vmem:[%s2700_s0 + $0xc4] sm:$0xf0] }
  0xe8   : > { %v1875_v0 = vor.u32 %v2063_v60, %v1874_v59 }
  0xe9   : > { %1468 = vst [vmem:[%s2501_s25] sm:$0xff] %v1436_v62  ;;  %v1876_v62 = vld [vmem:[%s2700_s0 + $0xc8] sm:$0xf0] }
  0xeb   : > { %v1074_v3 = vpop.f32.mrf.mxu2 }
  0xec   : > { %v1163_v5 = vpop.f32.mrf.mxu3  ;;  %v899_v6 = vpop.f32.mrf.mxu0 }
  0xed   : > { %v1164_v9 = vadd.f32 %v1163_v5, %v1074_v3  ;;  %v988_v10 = vpop.f32.mrf.mxu1  ;;  %v1879_v3 = vor.u32 %v2062_v61, %v1876_v62 }
  0xee   : > { %v989_v12 = vadd.f32 %v988_v10, %v899_v6 }
  0xef   : > { %v1437_v11 = vpack.c.bf16 %v1164_v9, %v986_v8  ;;  %938 = vmatmul.bf16.gmra.mxu0 %v1851_v4 }
  0xf0   : > { %1027 = vmatmul.bf16.gmra.mxu1 %v1855_v7  ;;  %1116 = vmatmul.bf16.gmra.mxu2 %v1851_v4 }
  0xf1   : > { %1469 = vst [vmem:[%s2501_s25 + $0x8] sm:$0xff] %v1437_v11  ;;  %1205 = vmatmul.bf16.gmra.mxu3 %v1855_v7 }
  0xf3   : > { %v1077_v13 = vpop.f32.mrf.mxu2 }
  0xf4   : > { %v1166_v14 = vpop.f32.mrf.mxu3  ;;  %v901_v15 = vpop.f32.mrf.mxu0 }
  0xf5   : > { %v1167_v16 = vadd.f32 %v1166_v14, %v1077_v13  ;;  %v990_v17 = vpop.f32.mrf.mxu1 }
  0xf6   : > { %v991_v28 = vadd.f32 %v990_v17, %v901_v15  ;;  %v1882_v15 = vld [vmem:[%s2700_s0 + $0xd0] sm:$0xf]  ;;  %v2064_v17 = vld [vmem:[%s2700_s0 + $0xd4] sm:$0xf] }
  0xf7   : > { %v1438_v18 = vpack.c.bf16 %v1167_v16, %v989_v12  ;;  %v2065_v16 = vld [vmem:[%s2700_s0 + $0xd4] sm:$0xf0] }
  0xf8   : > { %v1883_v20 = vor.u32 %v2065_v16, %v1882_v15 }
  0xf9   : > { %1470 = vst [vmem:[%s2501_s25 + $0x10] sm:$0xff] %v1438_v18  ;;  %v1884_v18 = vld [vmem:[%s2700_s0 + $0xd8] sm:$0xf0] }
  0xfb   : > { %v1079_v23 = vpop.f32.mrf.mxu2 }
  0xfc   : > { %v1168_v25 = vpop.f32.mrf.mxu3  ;;  %v904_v26 = vpop.f32.mrf.mxu0 }
  0xfd   : > { %v1169_v29 = vadd.f32 %v1168_v25, %v1079_v23  ;;  %v993_v30 = vpop.f32.mrf.mxu1  ;;  %v1887_v23 = vor.u32 %v2064_v17, %v1884_v18 }
  0xfe   : > { %v994_v32 = vadd.f32 %v993_v30, %v904_v26 }
  0xff   : > { %v1439_v31 = vpack.c.bf16 %v1169_v29, %v991_v28  ;;  %943 = vmatmul.bf16.gmra.mxu0 %v1859_v24 }
 0x100   : > { %1032 = vmatmul.bf16.gmra.mxu1 %v1863_v27  ;;  %1121 = vmatmul.bf16.gmra.mxu2 %v1859_v24 }
 0x101   : > { %1471 = vst [vmem:[%s2501_s25 + $0x18] sm:$0xff] %v1439_v31  ;;  %1210 = vmatmul.bf16.gmra.mxu3 %v1863_v27 }
 0x103   : > { %v1082_v33 = vpop.f32.mrf.mxu2 }
 0x104   : > { %v1171_v34 = vpop.f32.mrf.mxu3  ;;  %v906_v35 = vpop.f32.mrf.mxu0 }
 0x105   : > { %v1172_v36 = vadd.f32 %v1171_v34, %v1082_v33  ;;  %v995_v37 = vpop.f32.mrf.mxu1 }
 0x106   : > { %v996_v48 = vadd.f32 %v995_v37, %v906_v35  ;;  %v1890_v35 = vld [vmem:[%s2700_s0 + $0xe0] sm:$0xf]  ;;  %v2066_v37 = vld [vmem:[%s2700_s0 + $0xe4] sm:$0xf] }
 0x107   : > { %v1440_v38 = vpack.c.bf16 %v1172_v36, %v994_v32  ;;  %v2067_v36 = vld [vmem:[%s2700_s0 + $0xe4] sm:$0xf0] }
 0x108   : > { %v1891_v40 = vor.u32 %v2067_v36, %v1890_v35 }
 0x109   : > { %1472 = vst [vmem:[%s2501_s25 + $0x20] sm:$0xff] %v1440_v38  ;;  %v1892_v38 = vld [vmem:[%s2700_s0 + $0xe8] sm:$0xf0] }
 0x10b   : > { %v1084_v43 = vpop.f32.mrf.mxu2 }
 0x10c   : > { %v1173_v45 = vpop.f32.mrf.mxu3  ;;  %v909_v46 = vpop.f32.mrf.mxu0 }
 0x10d   : > { %v1174_v49 = vadd.f32 %v1173_v45, %v1084_v43  ;;  %v998_v50 = vpop.f32.mrf.mxu1  ;;  %v1895_v43 = vor.u32 %v2066_v37, %v1892_v38 }
 0x10e   : > { %v999_v52 = vadd.f32 %v998_v50, %v909_v46 }
 0x10f   : > { %v1441_v51 = vpack.c.bf16 %v1174_v49, %v996_v48  ;;  %948 = vmatmul.bf16.gmra.mxu0 %v1867_v44 }
 0x110   : > { %1037 = vmatmul.bf16.gmra.mxu1 %v1871_v47  ;;  %1126 = vmatmul.bf16.gmra.mxu2 %v1867_v44 }
 0x111   : > { %1473 = vst [vmem:[%s2501_s25 + $0x28] sm:$0xff] %v1441_v51  ;;  %1215 = vmatmul.bf16.gmra.mxu3 %v1871_v47 }
 0x113   : > { %v1087_v53 = vpop.f32.mrf.mxu2 }
 0x114   : > { %v1176_v54 = vpop.f32.mrf.mxu3  ;;  %v911_v55 = vpop.f32.mrf.mxu0 }
 0x115   : > { %v1177_v56 = vadd.f32 %v1176_v54, %v1087_v53  ;;  %v1000_v57 = vpop.f32.mrf.mxu1 }
 0x116   : > { %v1001_v4 = vadd.f32 %v1000_v57, %v911_v55  ;;  %v1898_v55 = vld [vmem:[%s2700_s0 + $0xf0] sm:$0xf]  ;;  %v2068_v57 = vld [vmem:[%s2700_s0 + $0xf4] sm:$0xf] }
 0x117   : > { %v1442_v58 = vpack.c.bf16 %v1177_v56, %v999_v52  ;;  %v2069_v56 = vld [vmem:[%s2700_s0 + $0xf4] sm:$0xf0] }
 0x118   : > { %v1899_v60 = vor.u32 %v2069_v56, %v1898_v55 }
 0x119   : > { %1474 = vst [vmem:[%s2501_s25 + $0x30] sm:$0xff] %v1442_v58  ;;  %v1900_v58 = vld [vmem:[%s2700_s0 + $0xf8] sm:$0xf0] }
 0x11b   : > { %v1089_v63 = vpop.f32.mrf.mxu2 }
 0x11c   : > { %v1178_v1 = vpop.f32.mrf.mxu3  ;;  %v914_v2 = vpop.f32.mrf.mxu0 }
 0x11d   : > { %v1179_v5 = vadd.f32 %v1178_v1, %v1089_v63  ;;  %v1003_v6 = vpop.f32.mrf.mxu1  ;;  %v1903_v63 = vor.u32 %v2068_v57, %v1900_v58 }
 0x11e   : > { %v1004_v8 = vadd.f32 %v1003_v6, %v914_v2 }
 0x11f   : > { %v1443_v7 = vpack.c.bf16 %v1179_v5, %v1001_v4  ;;  %953 = vmatmul.bf16.gmra.mxu0 %v1875_v0 }
 0x120   : > { %1042 = vmatmul.bf16.gmra.mxu1 %v1879_v3  ;;  %1131 = vmatmul.bf16.gmra.mxu2 %v1875_v0 }
 0x121   : > { %1475 = vst [vmem:[%s2501_s25 + $0x38] sm:$0xff] %v1443_v7  ;;  %1220 = vmatmul.bf16.gmra.mxu3 %v1879_v3 }
 0x123   : > { %v1092_v9 = vpop.f32.mrf.mxu2 }
 0x124   : > { %v1181_v10 = vpop.f32.mrf.mxu3  ;;  %v916_v11 = vpop.f32.mrf.mxu0 }
 0x125   : > { %v1182_v12 = vadd.f32 %v1181_v10, %v1092_v9  ;;  %v1005_v13 = vpop.f32.mrf.mxu1 }
 0x126   : > { %v1006_v24 = vadd.f32 %v1005_v13, %v916_v11 }
 0x127   : > { %v1444_v14 = vpack.c.bf16 %v1182_v12, %v1004_v8 }
 0x129   : > { %1476 = vst [vmem:[%s2501_s25 + $0x40] sm:$0xff] %v1444_v14 }
 0x12b   : > { %v1094_v19 = vpop.f32.mrf.mxu2 }
 0x12c   : > { %v1183_v21 = vpop.f32.mrf.mxu3  ;;  %v919_v22 = vpop.f32.mrf.mxu0 }
 0x12d   : > { %v1184_v25 = vadd.f32 %v1183_v21, %v1094_v19  ;;  %v1008_v26 = vpop.f32.mrf.mxu1 }
 0x12e   : > { %v1009_v28 = vadd.f32 %v1008_v26, %v919_v22 }
 0x12f   : > { %v1445_v27 = vpack.c.bf16 %v1184_v25, %v1006_v24  ;;  %958 = vmatmul.bf16.gmra.mxu0 %v1883_v20 }
 0x130   : > { %1047 = vmatmul.bf16.gmra.mxu1 %v1887_v23  ;;  %1136 = vmatmul.bf16.gmra.mxu2 %v1883_v20 }
 0x131   : > { %1477 = vst [vmem:[%s2501_s25 + $0x48] sm:$0xff] %v1445_v27  ;;  %1225 = vmatmul.bf16.gmra.mxu3 %v1887_v23 }
 0x133   : > { %v1097_v29 = vpop.f32.mrf.mxu2 }
 0x134   : > { %v1186_v30 = vpop.f32.mrf.mxu3  ;;  %v921_v31 = vpop.f32.mrf.mxu0 }
 0x135   : > { %v1187_v32 = vadd.f32 %v1186_v30, %v1097_v29  ;;  %v1010_v33 = vpop.f32.mrf.mxu1 }
 0x136   : > { %v1011_v44 = vadd.f32 %v1010_v33, %v921_v31 }
 0x137   : > { %v1446_v34 = vpack.c.bf16 %v1187_v32, %v1009_v28 }
 0x139   : > { %1478 = vst [vmem:[%s2501_s25 + $0x50] sm:$0xff] %v1446_v34 }
 0x13b   : > { %v1099_v39 = vpop.f32.mrf.mxu2 }
 0x13c   : > { %v1188_v41 = vpop.f32.mrf.mxu3  ;;  %v924_v42 = vpop.f32.mrf.mxu0 }
 0x13d   : > { %v1189_v45 = vadd.f32 %v1188_v41, %v1099_v39  ;;  %v1013_v46 = vpop.f32.mrf.mxu1 }
 0x13e   : > { %v1014_v48 = vadd.f32 %v1013_v46, %v924_v42 }
 0x13f   : > { %v1447_v47 = vpack.c.bf16 %v1189_v45, %v1011_v44  ;;  %963 = vmatmul.bf16.gmra.mxu0 %v1891_v40 }
 0x140   : > { %1052 = vmatmul.bf16.gmra.mxu1 %v1895_v43  ;;  %1141 = vmatmul.bf16.gmra.mxu2 %v1891_v40 }
 0x141   : > { %1479 = vst [vmem:[%s2501_s25 + $0x58] sm:$0xff] %v1447_v47  ;;  %1230 = vmatmul.bf16.gmra.mxu3 %v1895_v43 }
 0x143   : > { %v1102_v49 = vpop.f32.mrf.mxu2 }
 0x144   : > { %v1191_v50 = vpop.f32.mrf.mxu3  ;;  %v926_v51 = vpop.f32.mrf.mxu0 }
 0x145   : > { %v1192_v52 = vadd.f32 %v1191_v50, %v1102_v49  ;;  %v1015_v53 = vpop.f32.mrf.mxu1 }
 0x146   : > { %v1016_v0 = vadd.f32 %v1015_v53, %v926_v51 }
 0x147   : > { %v1448_v54 = vpack.c.bf16 %v1192_v52, %v1014_v48 }
 0x149   : > { %1480 = vst [vmem:[%s2501_s25 + $0x60] sm:$0xff] %v1448_v54 }
 0x14b   : > { %v1104_v59 = vpop.f32.mrf.mxu2 }
 0x14c   : > { %v1193_v61 = vpop.f32.mrf.mxu3  ;;  %v929_v62 = vpop.f32.mrf.mxu0 }
 0x14d   : > { %v1194_v1 = vadd.f32 %v1193_v61, %v1104_v59  ;;  %v1018_v2 = vpop.f32.mrf.mxu1 }
 0x14e   : > { %v1019_v4 = vadd.f32 %v1018_v2, %v929_v62 }
 0x14f   : > { %v1449_v3 = vpack.c.bf16 %v1194_v1, %v1016_v0  ;;  %968 = vmatmul.bf16.gmra.mxu0 %v1899_v60 }
 0x150   : > { %1057 = vmatmul.bf16.gmra.mxu1 %v1903_v63  ;;  %1146 = vmatmul.bf16.gmra.mxu2 %v1899_v60 }
 0x151   : > { %1481 = vst [vmem:[%s2501_s25 + $0x68] sm:$0xff] %v1449_v3  ;;  %1235 = vmatmul.bf16.gmra.mxu3 %v1903_v63 }
 0x153   : > { %v1107_v5 = vpop.f32.mrf.mxu2 }
 0x154   : > { %v1196_v6 = vpop.f32.mrf.mxu3  ;;  %v931_v7 = vpop.f32.mrf.mxu0 }
 0x155   : > { %v1197_v8 = vadd.f32 %v1196_v6, %v1107_v5  ;;  %v1020_v9 = vpop.f32.mrf.mxu1 }
 0x156   : > { %v1021_v14 = vadd.f32 %v1020_v9, %v931_v7 }
 0x157   : > { %v1450_v10 = vpack.c.bf16 %v1197_v8, %v1019_v4 }
 0x159   : > { %1482 = vst [vmem:[%s2501_s25 + $0x70] sm:$0xff] %v1450_v10 }
 0x15b   : > { %v1109_v11 = vpop.f32.mrf.mxu2 }
 0x15c   : > { %v1198_v12 = vpop.f32.mrf.mxu3  ;;  %v934_v13 = vpop.f32.mrf.mxu0 }
 0x15d   : > { %v1199_v15 = vadd.f32 %v1198_v12, %v1109_v11  ;;  %v1023_v16 = vpop.f32.mrf.mxu1 }
 0x15e   : > { %v1024_v18 = vadd.f32 %v1023_v16, %v934_v13 }
 0x15f   : > { %v1451_v17 = vpack.c.bf16 %v1199_v15, %v1021_v14 }
 0x161   : > { %1483 = vst [vmem:[%s2501_s25 + $0x78] sm:$0xff] %v1451_v17 }
 0x163   : > { %v1112_v19 = vpop.f32.mrf.mxu2 }
 0x164   : > { %v1201_v20 = vpop.f32.mrf.mxu3  ;;  %v936_v21 = vpop.f32.mrf.mxu0 }
 0x165   : > { %v1202_v22 = vadd.f32 %v1201_v20, %v1112_v19  ;;  %v1025_v23 = vpop.f32.mrf.mxu1 }
 0x166   : > { %v1026_v28 = vadd.f32 %v1025_v23, %v936_v21 }
 0x167   : > { %v1452_v24 = vpack.c.bf16 %v1202_v22, %v1024_v18 }
 0x169   : > { %1484 = vst [vmem:[%s2501_s25 + $0x80] sm:$0xff] %v1452_v24 }
 0x16b   : > { %v1114_v25 = vpop.f32.mrf.mxu2 }
 0x16c   : > { %v1203_v26 = vpop.f32.mrf.mxu3  ;;  %v939_v27 = vpop.f32.mrf.mxu0 }
 0x16d   : > { %v1204_v29 = vadd.f32 %v1203_v26, %v1114_v25  ;;  %v1028_v30 = vpop.f32.mrf.mxu1 }
 0x16e   : > { %v1029_v32 = vadd.f32 %v1028_v30, %v939_v27 }
 0x16f   : > { %v1453_v31 = vpack.c.bf16 %v1204_v29, %v1026_v28 }
 0x171   : > { %1485 = vst [vmem:[%s2501_s25 + $0x88] sm:$0xff] %v1453_v31 }
 0x173   : > { %v1117_v33 = vpop.f32.mrf.mxu2 }
 0x174   : > { %v1206_v34 = vpop.f32.mrf.mxu3  ;;  %v941_v35 = vpop.f32.mrf.mxu0 }
 0x175   : > { %v1207_v36 = vadd.f32 %v1206_v34, %v1117_v33  ;;  %v1030_v37 = vpop.f32.mrf.mxu1 }
 0x176   : > { %v1031_v42 = vadd.f32 %v1030_v37, %v941_v35 }
 0x177   : > { %v1454_v38 = vpack.c.bf16 %v1207_v36, %v1029_v32 }
 0x179   : > { %1486 = vst [vmem:[%s2501_s25 + $0x90] sm:$0xff] %v1454_v38 }
 0x17b   : > { %v1119_v39 = vpop.f32.mrf.mxu2 }
 0x17c   : > { %v1208_v40 = vpop.f32.mrf.mxu3  ;;  %v944_v41 = vpop.f32.mrf.mxu0 }
 0x17d   : > { %v1209_v43 = vadd.f32 %v1208_v40, %v1119_v39  ;;  %v1033_v44 = vpop.f32.mrf.mxu1 }
 0x17e   : > { %v1034_v46 = vadd.f32 %v1033_v44, %v944_v41 }
 0x17f   : > { %v1455_v45 = vpack.c.bf16 %v1209_v43, %v1031_v42 }
 0x181   : > { %1487 = vst [vmem:[%s2501_s25 + $0x98] sm:$0xff] %v1455_v45 }
 0x183   : > { %v1122_v47 = vpop.f32.mrf.mxu2 }
 0x184   : > { %v1211_v48 = vpop.f32.mrf.mxu3  ;;  %v946_v49 = vpop.f32.mrf.mxu0 }
 0x185   : > { %v1212_v50 = vadd.f32 %v1211_v48, %v1122_v47  ;;  %v1035_v51 = vpop.f32.mrf.mxu1 }
 0x186   : > { %v1036_v56 = vadd.f32 %v1035_v51, %v946_v49 }
 0x187   : > { %v1456_v52 = vpack.c.bf16 %v1212_v50, %v1034_v46 }
 0x189   : > { %1488 = vst [vmem:[%s2501_s25 + $0xa0] sm:$0xff] %v1456_v52 }
 0x18b   : > { %v1124_v53 = vpop.f32.mrf.mxu2 }
 0x18c   : > { %v1213_v54 = vpop.f32.mrf.mxu3  ;;  %v949_v55 = vpop.f32.mrf.mxu0 }
 0x18d   : > { %v1214_v57 = vadd.f32 %v1213_v54, %v1124_v53  ;;  %v1038_v58 = vpop.f32.mrf.mxu1 }
 0x18e   : > { %v1039_v60 = vadd.f32 %v1038_v58, %v949_v55 }
 0x18f   : > { %v1457_v59 = vpack.c.bf16 %v1214_v57, %v1036_v56 }
 0x191   : > { %1489 = vst [vmem:[%s2501_s25 + $0xa8] sm:$0xff] %v1457_v59 }
 0x193   : > { %v1127_v61 = vpop.f32.mrf.mxu2 }
 0x194   : > { %v1216_v62 = vpop.f32.mrf.mxu3  ;;  %v951_v63 = vpop.f32.mrf.mxu0 }
 0x195   : > { %v1217_v0 = vadd.f32 %v1216_v62, %v1127_v61  ;;  %v1040_v1 = vpop.f32.mrf.mxu1 }
 0x196   : > { %v1041_v6 = vadd.f32 %v1040_v1, %v951_v63  ;;  %v1605_v1 = vld [vmem:[%s2501_s25 + $0x8] sm:$0xff] (%p2233_p6) }
 0x197   : > { %v1458_v2 = vpack.c.bf16 %v1217_v0, %v1039_v60  ;;  %v1603_v0 = vld [vmem:[%s2501_s25] sm:$0xff] (%p2233_p6)  ;;  %1606 = vst [vmem:[%s2621_s20 + $0x18] sm:$0xff] (%p2233_p6), %v1605_v1 }
 0x198   : > { %1604 = vst [vmem:[%s2621_s20] sm:$0xff] (%p2233_p6), %v1603_v0 }
 0x199   : > { %1490 = vst [vmem:[%s2501_s25 + $0xb0] sm:$0xff] %v1458_v2  ;;  %v1607_v2 = vld [vmem:[%s2501_s25 + $0x10] sm:$0xff] (%p2233_p6) }
 0x19a   : > { %1608 = vst [vmem:[%s2621_s20 + $0x30] sm:$0xff] (%p2233_p6), %v1607_v2 }
 0x19b   : > { %v1129_v3 = vpop.f32.mrf.mxu2 }
 0x19c   : > { %v1218_v4 = vpop.f32.mrf.mxu3  ;;  %v954_v5 = vpop.f32.mrf.mxu0 }
 0x19d   : > { %v1219_v7 = vadd.f32 %v1218_v4, %v1129_v3  ;;  %v1043_v8 = vpop.f32.mrf.mxu1  ;;  %v1609_v3 = vld [vmem:[%s2501_s25 + $0x18] sm:$0xff] (%p2233_p6)  ;;  %v1611_v4 = vld [vmem:[%s2501_s25 + $0x20] sm:$0xff] (%p2233_p6) }
 0x19e   : > { %v1044_v10 = vadd.f32 %v1043_v8, %v954_v5  ;;  %v1613_v5 = vld [vmem:[%s2501_s25 + $0x28] sm:$0xff] (%p2233_p6)  ;;  %1610 = vst [vmem:[%s2621_s20 + $0x48] sm:$0xff] (%p2233_p6), %v1609_v3  ;;  %v1619_v8 = vld [vmem:[%s2501_s25 + $0x40] sm:$0xff] (%p2233_p6) }
 0x19f   : > { %v1459_v9 = vpack.c.bf16 %v1219_v7, %v1041_v6  ;;  %v1615_v6 = vld [vmem:[%s2501_s25 + $0x30] sm:$0xff] (%p2233_p6)  ;;  %1612 = vst [vmem:[%s2621_s20 + $0x60] sm:$0xff] (%p2233_p6), %v1611_v4  ;;  %v1617_v7 = vld [vmem:[%s2501_s25 + $0x38] sm:$0xff] (%p2233_p6) }
 0x1a0   : > { %1614 = vst [vmem:[%s2621_s20 + $0x78] sm:$0xff] (%p2233_p6), %v1613_v5 }
 0x1a1   : > { %1491 = vst [vmem:[%s2501_s25 + $0xb8] sm:$0xff] %v1459_v9  ;;  %v1621_v9 = vld [vmem:[%s2501_s25 + $0x48] sm:$0xff] (%p2233_p6) }
 0x1a2   : > { %1616 = vst [vmem:[%s2621_s20 + $0x90] sm:$0xff] (%p2233_p6), %v1615_v6 }
 0x1a3   : > { %v1132_v11 = vpop.f32.mrf.mxu2  ;;  %1618 = vst [vmem:[%s2621_s20 + $0xa8] sm:$0xff] (%p2233_p6), %v1617_v7 }
 0x1a4   : > { %v1221_v12 = vpop.f32.mrf.mxu3  ;;  %v956_v13 = vpop.f32.mrf.mxu0  ;;  %1620 = vst [vmem:[%s2621_s20 + $0xc0] sm:$0xff] (%p2233_p6), %v1619_v8 }
 0x1a5   : > { %v1222_v14 = vadd.f32 %v1221_v12, %v1132_v11  ;;  %v1045_v15 = vpop.f32.mrf.mxu1  ;;  %v1625_v11 = vld [vmem:[%s2501_s25 + $0x58] sm:$0xff] (%p2233_p6)  ;;  %1622 = vst [vmem:[%s2621_s20 + $0xd8] sm:$0xff] (%p2233_p6), %v1621_v9  ;;  %v1627_v12 = vld [vmem:[%s2501_s25 + $0x60] sm:$0xff] (%p2233_p6) }
 0x1a6   : > { %v1046_v20 = vadd.f32 %v1045_v15, %v956_v13  ;;  %v1629_v13 = vld [vmem:[%s2501_s25 + $0x68] sm:$0xff] (%p2233_p6)  ;;  %1626 = vst [vmem:[%s2621_s20 + $0x108] sm:$0xff] (%p2233_p6), %v1625_v11  ;;  %v1633_v15 = vld [vmem:[%s2501_s25 + $0x78] sm:$0xff] (%p2233_p6) }
 0x1a7   : > { %v1460_v16 = vpack.c.bf16 %v1222_v14, %v1044_v10  ;;  %v1623_v10 = vld [vmem:[%s2501_s25 + $0x50] sm:$0xff] (%p2233_p6)  ;;  %1628 = vst [vmem:[%s2621_s20 + $0x120] sm:$0xff] (%p2233_p6), %v1627_v12 }
 0x1a8   : > { %1624 = vst [vmem:[%s2621_s20 + $0xf0] sm:$0xff] (%p2233_p6), %v1623_v10  ;;  %v1631_v14 = vld [vmem:[%s2501_s25 + $0x70] sm:$0xff] (%p2233_p6) }
 0x1a9   : > { %1492 = vst [vmem:[%s2501_s25 + $0xc0] sm:$0xff] %v1460_v16  ;;  %v1635_v16 = vld [vmem:[%s2501_s25 + $0x80] sm:$0xff] (%p2233_p6) }
 0x1aa   : > { %1630 = vst [vmem:[%s2621_s20 + $0x138] sm:$0xff] (%p2233_p6), %v1629_v13 }
 0x1ab   : > { %v1134_v17 = vpop.f32.mrf.mxu2  ;;  %1632 = vst [vmem:[%s2621_s20 + $0x150] sm:$0xff] (%p2233_p6), %v1631_v14 }
 0x1ac   : > { %v1223_v18 = vpop.f32.mrf.mxu3  ;;  %v959_v19 = vpop.f32.mrf.mxu0  ;;  %1634 = vst [vmem:[%s2621_s20 + $0x168] sm:$0xff] (%p2233_p6), %v1633_v15 }
 0x1ad   : > { %v1224_v21 = vadd.f32 %v1223_v18, %v1134_v17  ;;  %v1048_v22 = vpop.f32.mrf.mxu1  ;;  %v1637_v17 = vld [vmem:[%s2501_s25 + $0x88] sm:$0xff] (%p2233_p6)  ;;  %v1639_v18 = vld [vmem:[%s2501_s25 + $0x90] sm:$0xff] (%p2233_p6)  ;;  %1636 = vst [vmem:[%s2621_s20 + $0x180] sm:$0xff] (%p2233_p6), %v1635_v16 }
 0x1ae   : > { %v1049_v24 = vadd.f32 %v1048_v22, %v959_v19  ;;  %v1641_v19 = vld [vmem:[%s2501_s25 + $0x98] sm:$0xff] (%p2233_p6)  ;;  %1638 = vst [vmem:[%s2621_s20 + $0x198] sm:$0xff] (%p2233_p6), %v1637_v17  ;;  %v1647_v22 = vld [vmem:[%s2501_s25 + $0xb0] sm:$0xff] (%p2233_p6) }
 0x1af   : > { %v1461_v23 = vpack.c.bf16 %v1224_v21, %v1046_v20  ;;  %v1643_v20 = vld [vmem:[%s2501_s25 + $0xa0] sm:$0xff] (%p2233_p6)  ;;  %1640 = vst [vmem:[%s2621_s20 + $0x1b0] sm:$0xff] (%p2233_p6), %v1639_v18  ;;  %v1645_v21 = vld [vmem:[%s2501_s25 + $0xa8] sm:$0xff] (%p2233_p6) }
 0x1b0   : > { %1642 = vst [vmem:[%s2621_s20 + $0x1c8] sm:$0xff] (%p2233_p6), %v1641_v19 }
 0x1b1   : > { %1493 = vst [vmem:[%s2501_s25 + $0xc8] sm:$0xff] %v1461_v23  ;;  %v1649_v23 = vld [vmem:[%s2501_s25 + $0xb8] sm:$0xff] (%p2233_p6) }
 0x1b2   : > { %1644 = vst [vmem:[%s2621_s20 + $0x1e0] sm:$0xff] (%p2233_p6), %v1643_v20 }
 0x1b3   : > { %v1137_v25 = vpop.f32.mrf.mxu2  ;;  %1646 = vst [vmem:[%s2621_s20 + $0x1f8] sm:$0xff] (%p2233_p6), %v1645_v21 }
 0x1b4   : > { %v1226_v26 = vpop.f32.mrf.mxu3  ;;  %v961_v27 = vpop.f32.mrf.mxu0  ;;  %1648 = vst [vmem:[%s2621_s20 + $0x210] sm:$0xff] (%p2233_p6), %v1647_v22 }
 0x1b5   : > { %v1227_v28 = vadd.f32 %v1226_v26, %v1137_v25  ;;  %v1050_v29 = vpop.f32.mrf.mxu1  ;;  %1650 = vst [vmem:[%s2621_s20 + $0x228] sm:$0xff] (%p2233_p6), %v1649_v23 }
 0x1b6   : > { %v1051_v34 = vadd.f32 %v1050_v29, %v961_v27 }
 0x1b7   : > { %v1462_v30 = vpack.c.bf16 %v1227_v28, %v1049_v24  ;;  %v1651_v24 = vld [vmem:[%s2501_s25 + $0xc0] sm:$0xff] (%p2233_p6) }
 0x1b8   : > { %v1653_v25 = vld [vmem:[%s2501_s25 + $0xc8] sm:$0xff] (%p2233_p6)  ;;  %1652 = vst [vmem:[%s2621_s20 + $0x240] sm:$0xff] (%p2233_p6), %v1651_v24 }
 0x1b9   : > { %1494 = vst [vmem:[%s2501_s25 + $0xd0] sm:$0xff] %v1462_v30 }
 0x1ba   : > { %1654 = vst [vmem:[%s2621_s20 + $0x258] sm:$0xff] (%p2233_p6), %v1653_v25 }
 0x1bb   : > { %v1139_v31 = vpop.f32.mrf.mxu2 }
 0x1bc   : > { %v1228_v32 = vpop.f32.mrf.mxu3  ;;  %v964_v33 = vpop.f32.mrf.mxu0 }
 0x1bd   : > { %v1229_v35 = vadd.f32 %v1228_v32, %v1139_v31  ;;  %v1053_v36 = vpop.f32.mrf.mxu1 }
 0x1be   : > { %v1054_v38 = vadd.f32 %v1053_v36, %v964_v33 }
 0x1bf   : > { %v1463_v37 = vpack.c.bf16 %v1229_v35, %v1051_v34 }
 0x1c0   : > { %v1655_v26 = vld [vmem:[%s2501_s25 + $0xd0] sm:$0xff] (%p2233_p6) }
 0x1c1   : > { %1495 = vst [vmem:[%s2501_s25 + $0xd8] sm:$0xff] %v1463_v37 }
 0x1c2   : > { %1656 = vst [vmem:[%s2621_s20 + $0x270] sm:$0xff] (%p2233_p6), %v1655_v26 }
 0x1c3   : > { %v1142_v39 = vpop.f32.mrf.mxu2 }
 0x1c4   : > { %v1231_v40 = vpop.f32.mrf.mxu3  ;;  %v966_v42 = vpop.f32.mrf.mxu0 }
 0x1c5   : > { %v1232_v41 = vadd.f32 %v1231_v40, %v1142_v39  ;;  %v1055_v43 = vpop.f32.mrf.mxu1 }
 0x1c6   : > { %v1056_v47 = vadd.f32 %v1055_v43, %v966_v42 }
 0x1c7   : > { %v1464_v44 = vpack.c.bf16 %v1232_v41, %v1054_v38 }
 0x1c8   : > { %v1657_v27 = vld [vmem:[%s2501_s25 + $0xd8] sm:$0xff] (%p2233_p6) }
 0x1c9   : > { %1496 = vst [vmem:[%s2501_s25 + $0xe0] sm:$0xff] %v1464_v44 }
 0x1ca   : > { %1658 = vst [vmem:[%s2621_s20 + $0x288] sm:$0xff] (%p2233_p6), %v1657_v27 }
 0x1cb   : > { %v1144_v45 = vpop.f32.mrf.mxu2 }
 0x1cc   : > { %v1233_v46 = vpop.f32.mrf.mxu3  ;;  %v969_v50 = vpop.f32.mrf.mxu0 }
 0x1cd   : > { %v1234_v48 = vadd.f32 %v1233_v46, %v1144_v45  ;;  %v1058_v51 = vpop.f32.mrf.mxu1 }
 0x1ce   : > { %v1059_v52 = vadd.f32 %v1058_v51, %v969_v50 }
 0x1cf   : > { %v1465_v49 = vpack.c.bf16 %v1234_v48, %v1056_v47 }
 0x1d0   : > { %v1659_v28 = vld [vmem:[%s2501_s25 + $0xe0] sm:$0xff] (%p2233_p6) }
 0x1d1   : > { %1497 = vst [vmem:[%s2501_s25 + $0xe8] sm:$0xff] %v1465_v49 }
 0x1d2   : > { %1660 = vst [vmem:[%s2621_s20 + $0x2a0] sm:$0xff] (%p2233_p6), %v1659_v28 }
 0x1d3   : > { %v1147_v53 = vpop.f32.mrf.mxu2 }
 0x1d4   : > { %v1236_v54 = vpop.f32.mrf.mxu3  ;;  %v971_v57 = vpop.f32.mrf.mxu0 }
 0x1d5   : > { %v1237_v55 = vadd.f32 %v1236_v54, %v1147_v53  ;;  %v1060_v58 = vpop.f32.mrf.mxu1 }
 0x1d6   : > { %v1061_v61 = vadd.f32 %v1060_v58, %v971_v57 }
 0x1d7   : > { %v1466_v56 = vpack.c.bf16 %v1237_v55, %v1059_v52 }
 0x1d8   : > { %v1661_v29 = vld [vmem:[%s2501_s25 + $0xe8] sm:$0xff] (%p2233_p6) }
 0x1d9   : > { %1498 = vst [vmem:[%s2501_s25 + $0xf0] sm:$0xff] %v1466_v56 }
 0x1da   : > { %1662 = vst [vmem:[%s2621_s20 + $0x2b8] sm:$0xff] (%p2233_p6), %v1661_v29 }
 0x1db   : > { %v1149_v59 = vpop.f32.mrf.mxu2 }
 0x1dc   : > { %v1238_v60 = vpop.f32.mrf.mxu3 }
 0x1dd   : > { %v1239_v62 = vadd.f32 %v1238_v60, %v1149_v59  ;;  %1506 = sbr.rel (!%p2233_p6) target bundleno = 490 (0x1ea), region = 78 }
 0x1df   : > { %v1467_v63 = vpack.c.bf16 %v1239_v62, %v1061_v61 }
 0x1e0   : > { %v1663_v30 = vld [vmem:[%s2501_s25 + $0xf0] sm:$0xff] (%p2233_p6) }
 0x1e1   : > { %1499 = vst [vmem:[%s2501_s25 + $0xf8] sm:$0xff] %v1467_v63 }
 0x1e2   : > { %1664 = vst [vmem:[%s2621_s20 + $0x2d0] sm:$0xff] %v1663_v30 }
 0x1e8   : > { %v1665_v31 = vld [vmem:[%s2501_s25 + $0xf8] sm:$0xff] }
 0x1e9   : > { %1666 = vst [vmem:[%s2621_s20 + $0x2e8] sm:$0xff] %v1665_v31 }
 0x1ea PF: > { %s12_s13 = sadd.s32 1, %s2181_s13   ;;  %s2704_s9 = smov %s2169_s10 }
 0x1eb   : > { %p9_p11 = scmp.ge.s32.totalorder %s12_s13, 5   ;;  %s2705_s10 = smov %s2238_s19 }
 0x1ec   : > { %s2706_s11 = smov %s2177_s12  ;;  %s2707_s12 = smov %s2709_s14 }
 0x1ed   :  { %11 = sbr.rel (!%p9_p11) target bundleno = 3 (0x3), region = 150 }

// kernel: rel_partial_learnable_mha_forward.5
= control target key start
LH: loop header
LB: loop body
LE: loop exit
PB: predicated region body
PF: predicated region fallthrough
CT: control target
= control target key end

     0   :  { %s1289_s1 = inlined_call_operand.vmem [shape: bf16[256,256], index: 1, kind: input, shape index: {}]   ;;  %s1290_s0 = inlined_call_operand.vmem [shape: bf16[128,256], index: 0, kind: input, shape index: {}]   ;;  %s1291_s2 = inlined_call_operand.vmem [shape: bf16[128,256], index: 2, kind: output, shape index: {}]  }
   0x1   :  { %v820_v0 = vld [vmem:[%s1289_s1 + $0x70] sm:$0xf]  ;;  %v921_v1 = vld [vmem:[%s1289_s1 + $0x74] sm:$0xf0]  ;;  %v920_v5 = vld [vmem:[%s1289_s1 + $0x74] sm:$0xf] }
   0x2   :  { %v884_v2 = vld [vmem:[%s1289_s1 + $0xf0] sm:$0xf]  ;;  %v821_v3 = vor.u32 %v921_v1, %v820_v0  ;;  %v937_v4 = vld [vmem:[%s1289_s1 + $0xf4] sm:$0xf0]  ;;  %v822_v6 = vld [vmem:[%s1289_s1 + $0x78] sm:$0xf0] }
   0x3   :  { %v885_v7 = vor.u32 %v937_v4, %v884_v2  ;;  %v825_v8 = vor.u32 %v920_v5, %v822_v6  ;;  %v936_v9 = vld [vmem:[%s1289_s1 + $0xf4] sm:$0xf]  ;;  %v886_v10 = vld [vmem:[%s1289_s1 + $0xf8] sm:$0xf0]  ;;  %v812_v11 = vld [vmem:[%s1289_s1 + $0x60] sm:$0xf] }
   0x4   :  { %367 = vmatpush.bf16.msra.mxu0 %v821_v3  ;;  %v889_v12 = vor.u32 %v936_v9, %v886_v10  ;;  %v919_v13 = vld [vmem:[%s1289_s1 + $0x64] sm:$0xf0]  ;;  %v876_v14 = vld [vmem:[%s1289_s1 + $0xe0] sm:$0xf]  ;;  %v918_v18 = vld [vmem:[%s1289_s1 + $0x64] sm:$0xf] }
   0x5   :  { %v935_v15 = vld [vmem:[%s1289_s1 + $0xe4] sm:$0xf0]  ;;  %416 = vmatpush.bf16.msra.mxu1 %v885_v7  ;;  %465 = vmatpush.bf16.msra.mxu2 %v825_v8  ;;  %v813_v16 = vor.u32 %v919_v13, %v812_v11  ;;  %v814_v19 = vld [vmem:[%s1289_s1 + $0x68] sm:$0xf0]  ;;  %v934_v20 = vld [vmem:[%s1289_s1 + $0xe4] sm:$0xf] }
   0x6   :  { %v877_v17 = vor.u32 %v935_v15, %v876_v14  ;;  %514 = vmatpush.bf16.msra.mxu3 %v889_v12  ;;  %v817_v21 = vor.u32 %v918_v18, %v814_v19  ;;  %v878_v22 = vld [vmem:[%s1289_s1 + $0xe8] sm:$0xf0]  ;;  %v804_v23 = vld [vmem:[%s1289_s1 + $0x50] sm:$0xf]  ;;  %v917_v24 = vld [vmem:[%s1289_s1 + $0x54] sm:$0xf0] }
   0x7   :  { %v881_v25 = vor.u32 %v934_v20, %v878_v22  ;;  %v868_v26 = vld [vmem:[%s1289_s1 + $0xd0] sm:$0xf]  ;;  %v933_v27 = vld [vmem:[%s1289_s1 + $0xd4] sm:$0xf0]  ;;  %v916_v28 = vld [vmem:[%s1289_s1 + $0x54] sm:$0xf]  ;;  %v805_v29 = vor.u32 %v917_v24, %v804_v23 }
   0x8   :  { %368 = vmatpush.bf16.msra.mxu0 %v813_v16  ;;  %v806_v30 = vld [vmem:[%s1289_s1 + $0x58] sm:$0xf0]  ;;  %v932_v31 = vld [vmem:[%s1289_s1 + $0xd4] sm:$0xf]  ;;  %v869_v33 = vor.u32 %v933_v27, %v868_v26  ;;  %v796_v35 = vld [vmem:[%s1289_s1 + $0x40] sm:$0xf] }
   0x9   :  { %v870_v32 = vld [vmem:[%s1289_s1 + $0xd8] sm:$0xf0]  ;;  %417 = vmatpush.bf16.msra.mxu1 %v877_v17  ;;  %466 = vmatpush.bf16.msra.mxu2 %v817_v21  ;;  %v809_v34 = vor.u32 %v916_v28, %v806_v30  ;;  %v915_v36 = vld [vmem:[%s1289_s1 + $0x44] sm:$0xf0]  ;;  %v860_v37 = vld [vmem:[%s1289_s1 + $0xc0] sm:$0xf] }
   0xa   :  { %515 = vmatpush.bf16.msra.mxu3 %v881_v25  ;;  %v873_v38 = vor.u32 %v932_v31, %v870_v32  ;;  %v931_v39 = vld [vmem:[%s1289_s1 + $0xc4] sm:$0xf0]  ;;  %v914_v40 = vld [vmem:[%s1289_s1 + $0x44] sm:$0xf]  ;;  %v798_v41 = vld [vmem:[%s1289_s1 + $0x48] sm:$0xf0]  ;;  %v797_v44 = vor.u32 %v915_v36, %v796_v35 }
   0xb   :  { %v930_v42 = vld [vmem:[%s1289_s1 + $0xc4] sm:$0xf]  ;;  %v862_v43 = vld [vmem:[%s1289_s1 + $0xc8] sm:$0xf0]  ;;  %v861_v45 = vor.u32 %v931_v39, %v860_v37  ;;  %v801_v46 = vor.u32 %v914_v40, %v798_v41  ;;  %v788_v47 = vld [vmem:[%s1289_s1 + $0x30] sm:$0xf] }
   0xc   :  { %369 = vmatpush.bf16.msra.mxu0 %v805_v29  ;;  %v913_v48 = vld [vmem:[%s1289_s1 + $0x34] sm:$0xf0]  ;;  %v852_v49 = vld [vmem:[%s1289_s1 + $0xb0] sm:$0xf]  ;;  %v865_v50 = vor.u32 %v930_v42, %v862_v43  ;;  %v912_v52 = vld [vmem:[%s1289_s1 + $0x34] sm:$0xf] }
   0xd   :  { %418 = vmatpush.bf16.msra.mxu1 %v869_v33  ;;  %467 = vmatpush.bf16.msra.mxu2 %v809_v34  ;;  %v929_v51 = vld [vmem:[%s1289_s1 + $0xb4] sm:$0xf0]  ;;  %v790_v53 = vld [vmem:[%s1289_s1 + $0x38] sm:$0xf0]  ;;  %v928_v54 = vld [vmem:[%s1289_s1 + $0xb4] sm:$0xf]  ;;  %v789_v56 = vor.u32 %v913_v48, %v788_v47 }
   0xe   :  { %516 = vmatpush.bf16.msra.mxu3 %v873_v38  ;;  %v854_v55 = vld [vmem:[%s1289_s1 + $0xb8] sm:$0xf0]  ;;  %v853_v57 = vor.u32 %v929_v51, %v852_v49  ;;  %v793_v58 = vor.u32 %v912_v52, %v790_v53  ;;  %v780_v59 = vld [vmem:[%s1289_s1 + $0x20] sm:$0xf]  ;;  %v911_v60 = vld [vmem:[%s1289_s1 + $0x24] sm:$0xf0] }
   0xf   :  { %v844_v61 = vld [vmem:[%s1289_s1 + $0xa0] sm:$0xf]  ;;  %v857_v62 = vor.u32 %v928_v54, %v854_v55  ;;  %v927_v63 = vld [vmem:[%s1289_s1 + $0xa4] sm:$0xf0]  ;;  %v910_v0 = vld [vmem:[%s1289_s1 + $0x24] sm:$0xf]  ;;  %v781_v4 = vor.u32 %v911_v60, %v780_v59 }
  0x10   :  { %370 = vmatpush.bf16.msra.mxu0 %v797_v44  ;;  %v782_v1 = vld [vmem:[%s1289_s1 + $0x28] sm:$0xf0]  ;;  %v926_v2 = vld [vmem:[%s1289_s1 + $0xa4] sm:$0xf]  ;;  %v845_v5 = vor.u32 %v927_v63, %v844_v61  ;;  %v772_v7 = vld [vmem:[%s1289_s1 + $0x10] sm:$0xf] }
  0x11   :  { %419 = vmatpush.bf16.msra.mxu1 %v861_v45  ;;  %468 = vmatpush.bf16.msra.mxu2 %v801_v46  ;;  %v846_v3 = vld [vmem:[%s1289_s1 + $0xa8] sm:$0xf0]  ;;  %v785_v6 = vor.u32 %v910_v0, %v782_v1  ;;  %v909_v8 = vld [vmem:[%s1289_s1 + $0x14] sm:$0xf0]  ;;  %v836_v9 = vld [vmem:[%s1289_s1 + $0x90] sm:$0xf] }
  0x12   :  { %517 = vmatpush.bf16.msra.mxu3 %v865_v50  ;;  %v849_v10 = vor.u32 %v926_v2, %v846_v3  ;;  %v925_v11 = vld [vmem:[%s1289_s1 + $0x94] sm:$0xf0]  ;;  %v908_v12 = vld [vmem:[%s1289_s1 + $0x14] sm:$0xf]  ;;  %v774_v13 = vld [vmem:[%s1289_s1 + $0x18] sm:$0xf0]  ;;  %v773_v16 = vor.u32 %v909_v8, %v772_v7 }
  0x13   :  { %v924_v14 = vld [vmem:[%s1289_s1 + $0x94] sm:$0xf]  ;;  %v838_v15 = vld [vmem:[%s1289_s1 + $0x98] sm:$0xf0]  ;;  %v837_v17 = vor.u32 %v925_v11, %v836_v9  ;;  %v777_v18 = vor.u32 %v908_v12, %v774_v13  ;;  %v764_v19 = vld [vmem:[%s1289_s1] sm:$0xf] }
  0x14   :  { %371 = vmatpush.bf16.msra.mxu0 %v789_v56  ;;  %v907_v20 = vld [vmem:[%s1289_s1 + $0x4] sm:$0xf0]  ;;  %v828_v21 = vld [vmem:[%s1289_s1 + $0x80] sm:$0xf]  ;;  %v841_v22 = vor.u32 %v924_v14, %v838_v15  ;;  %v906_v24 = vld [vmem:[%s1289_s1 + $0x4] sm:$0xf] }
  0x15   :  { %420 = vmatpush.bf16.msra.mxu1 %v853_v57  ;;  %469 = vmatpush.bf16.msra.mxu2 %v793_v58  ;;  %v923_v23 = vld [vmem:[%s1289_s1 + $0x84] sm:$0xf0]  ;;  %v766_v25 = vld [vmem:[%s1289_s1 + $0x8] sm:$0xf0]  ;;  %v922_v26 = vld [vmem:[%s1289_s1 + $0x84] sm:$0xf]  ;;  %v765_v28 = vor.u32 %v907_v20, %v764_v19 }
  0x16   :  { %518 = vmatpush.bf16.msra.mxu3 %v857_v62  ;;  %v830_v27 = vld [vmem:[%s1289_s1 + $0x88] sm:$0xf0]  ;;  %v700_v29 = vld [vmem:[%s1290_s0] sm:$0xf]  ;;  %v891_v30 = vld [vmem:[%s1290_s0 + $0x4] sm:$0xf0]  ;;  %v829_v31 = vor.u32 %v923_v23, %v828_v21  ;;  %v769_v32 = vor.u32 %v906_v24, %v766_v25 }
  0x17   :  { %v890_v33 = vld [vmem:[%s1290_s0 + $0x4] sm:$0xf]  ;;  %v702_v34 = vld [vmem:[%s1290_s0 + $0x8] sm:$0xf0]  ;;  %v833_v35 = vor.u32 %v922_v26, %v830_v27  ;;  %v701_v36 = vor.u32 %v891_v30, %v700_v29  ;;  %v708_v38 = vld [vmem:[%s1290_s0 + $0x10] sm:$0xf] }
  0x18   :  { %372 = vmatpush.bf16.msra.mxu0 %v781_v4  ;;  %v705_v37 = vor.u32 %v890_v33, %v702_v34  ;;  %v893_v39 = vld [vmem:[%s1290_s0 + $0x14] sm:$0xf0]  ;;  %v892_v40 = vld [vmem:[%s1290_s0 + $0x14] sm:$0xf]  ;;  %v710_v41 = vld [vmem:[%s1290_s0 + $0x18] sm:$0xf0] }
  0x19   :  { %421 = vmatpush.bf16.msra.mxu1 %v845_v5  ;;  %470 = vmatpush.bf16.msra.mxu2 %v785_v6  ;;  %v709_v42 = vor.u32 %v893_v39, %v708_v38  ;;  %v713_v43 = vor.u32 %v892_v40, %v710_v41  ;;  %v716_v44 = vld [vmem:[%s1290_s0 + $0x20] sm:$0xf]  ;;  %v895_v45 = vld [vmem:[%s1290_s0 + $0x24] sm:$0xf0]  ;;  %v894_v46 = vld [vmem:[%s1290_s0 + $0x24] sm:$0xf] }
  0x1a   :  { %519 = vmatpush.bf16.msra.mxu3 %v849_v10  ;;  %v718_v47 = vld [vmem:[%s1290_s0 + $0x28] sm:$0xf0]  ;;  %v717_v48 = vor.u32 %v895_v45, %v716_v44  ;;  %v724_v50 = vld [vmem:[%s1290_s0 + $0x30] sm:$0xf]  ;;  %v897_v51 = vld [vmem:[%s1290_s0 + $0x34] sm:$0xf0] }
  0x1b   :  { %v721_v49 = vor.u32 %v894_v46, %v718_v47  ;;  %v896_v52 = vld [vmem:[%s1290_s0 + $0x34] sm:$0xf]  ;;  %v726_v53 = vld [vmem:[%s1290_s0 + $0x38] sm:$0xf0]  ;;  %v725_v54 = vor.u32 %v897_v51, %v724_v50  ;;  %v732_v56 = vld [vmem:[%s1290_s0 + $0x40] sm:$0xf] }
  0x1c   :  { %373 = vmatpush.bf16.msra.mxu0 %v773_v16  ;;  %v729_v55 = vor.u32 %v896_v52, %v726_v53  ;;  %v899_v57 = vld [vmem:[%s1290_s0 + $0x44] sm:$0xf0]  ;;  %v898_v58 = vld [vmem:[%s1290_s0 + $0x44] sm:$0xf]  ;;  %v734_v59 = vld [vmem:[%s1290_s0 + $0x48] sm:$0xf0] }
  0x1d   :  { %422 = vmatpush.bf16.msra.mxu1 %v837_v17  ;;  %471 = vmatpush.bf16.msra.mxu2 %v777_v18  ;;  %v733_v60 = vor.u32 %v899_v57, %v732_v56  ;;  %v737_v61 = vor.u32 %v898_v58, %v734_v59  ;;  %v740_v62 = vld [vmem:[%s1290_s0 + $0x50] sm:$0xf]  ;;  %v901_v63 = vld [vmem:[%s1290_s0 + $0x54] sm:$0xf0]  ;;  %v900_v0 = vld [vmem:[%s1290_s0 + $0x54] sm:$0xf] }
  0x1e   :  { %520 = vmatpush.bf16.msra.mxu3 %v841_v22  ;;  %v742_v1 = vld [vmem:[%s1290_s0 + $0x58] sm:$0xf0]  ;;  %v741_v2 = vor.u32 %v901_v63, %v740_v62  ;;  %v748_v4 = vld [vmem:[%s1290_s0 + $0x60] sm:$0xf]  ;;  %v903_v5 = vld [vmem:[%s1290_s0 + $0x64] sm:$0xf0] }
  0x1f   :  { %v745_v3 = vor.u32 %v900_v0, %v742_v1  ;;  %v902_v6 = vld [vmem:[%s1290_s0 + $0x64] sm:$0xf]  ;;  %v750_v7 = vld [vmem:[%s1290_s0 + $0x68] sm:$0xf0]  ;;  %v749_v8 = vor.u32 %v903_v5, %v748_v4  ;;  %v756_v10 = vld [vmem:[%s1290_s0 + $0x70] sm:$0xf] }
  0x20   :  { %374 = vmatpush.bf16.msra.mxu0 %v765_v28  ;;  %v753_v9 = vor.u32 %v902_v6, %v750_v7  ;;  %v905_v11 = vld [vmem:[%s1290_s0 + $0x74] sm:$0xf0]  ;;  %v904_v12 = vld [vmem:[%s1290_s0 + $0x74] sm:$0xf]  ;;  %v758_v13 = vld [vmem:[%s1290_s0 + $0x78] sm:$0xf0] }
  0x21   :  { %423 = vmatpush.bf16.msra.mxu1 %v829_v31  ;;  %472 = vmatpush.bf16.msra.mxu2 %v769_v32  ;;  %v757_v14 = vor.u32 %v905_v11, %v756_v10  ;;  %v761_v15 = vor.u32 %v904_v12, %v758_v13 }
  0x22   :  { %521 = vmatpush.bf16.msra.mxu3 %v833_v35 }
  0x23   :  { %375 = vmatmul.bf16.vlgmr.msra.gmra.mxu0 %v701_v36 }
  0x24   :  { %424 = vmatmul.bf16.vlgmr.msra.gmra.mxu1 %v705_v37  ;;  %473 = vmatmul.bf16.vlgmr.msra.gmra.mxu2 %v701_v36 }
  0x25   :  { %522 = vmatmul.bf16.vlgmr.msra.gmra.mxu3 %v705_v37 }
  0x33   :  { %380 = vmatmul.bf16.gmra.mxu0 %v709_v42 }
  0x34   :  { %429 = vmatmul.bf16.gmra.mxu1 %v713_v43  ;;  %478 = vmatmul.bf16.gmra.mxu2 %v709_v42 }
  0x35   :  { %527 = vmatmul.bf16.gmra.mxu3 %v713_v43 }
  0x43   :  { %385 = vmatmul.bf16.gmra.mxu0 %v717_v48 }
  0x44   :  { %434 = vmatmul.bf16.gmra.mxu1 %v721_v49  ;;  %483 = vmatmul.bf16.gmra.mxu2 %v717_v48 }
  0x45   :  { %532 = vmatmul.bf16.gmra.mxu3 %v721_v49 }
  0x53   :  { %390 = vmatmul.bf16.gmra.mxu0 %v725_v54 }
  0x54   :  { %439 = vmatmul.bf16.gmra.mxu1 %v729_v55  ;;  %488 = vmatmul.bf16.gmra.mxu2 %v725_v54 }
  0x55   :  { %537 = vmatmul.bf16.gmra.mxu3 %v729_v55 }
  0x63   :  { %395 = vmatmul.bf16.gmra.mxu0 %v733_v60 }
  0x64   :  { %444 = vmatmul.bf16.gmra.mxu1 %v737_v61  ;;  %493 = vmatmul.bf16.gmra.mxu2 %v733_v60 }
  0x65   :  { %542 = vmatmul.bf16.gmra.mxu3 %v737_v61 }
  0x73   :  { %400 = vmatmul.bf16.gmra.mxu0 %v741_v2 }
  0x74   :  { %449 = vmatmul.bf16.gmra.mxu1 %v745_v3  ;;  %498 = vmatmul.bf16.gmra.mxu2 %v741_v2 }
  0x75   :  { %547 = vmatmul.bf16.gmra.mxu3 %v745_v3 }
  0x83   :  { %405 = vmatmul.bf16.gmra.mxu0 %v749_v8 }
  0x84   :  { %454 = vmatmul.bf16.gmra.mxu1 %v753_v9  ;;  %503 = vmatmul.bf16.gmra.mxu2 %v749_v8 }
  0x85   :  { %552 = vmatmul.bf16.gmra.mxu3 %v753_v9 }
  0x93   :  { %410 = vmatmul.bf16.gmra.mxu0 %v757_v14 }
  0x94   :  { %459 = vmatmul.bf16.gmra.mxu1 %v761_v15  ;;  %508 = vmatmul.bf16.gmra.mxu2 %v757_v14 }
  0x95   :  { %557 = vmatmul.bf16.gmra.mxu3 %v761_v15 }
  0xa0   :  { %v376_v16 = vpop.f32.mrf.mxu0 }
  0xa1   :  { %v425_v17 = vpop.f32.mrf.mxu1 }
  0xa2   :  { %v426_v18 = vadd.f32 %v425_v17, %v376_v16 }
  0xa7   :  { %v474_v19 = vpop.f32.mrf.mxu2 }
  0xa8   :  { %v523_v20 = vpop.f32.mrf.mxu3  ;;  %v378_v21 = vpop.f32.mrf.mxu0 }
  0xa9   :  { %v524_v22 = vadd.f32 %v523_v20, %v474_v19  ;;  %v427_v23 = vpop.f32.mrf.mxu1 }
  0xaa   :  { %v428_v28 = vadd.f32 %v427_v23, %v378_v21 }
  0xab   :  { %v662_v24 = vpack.c.bf16 %v524_v22, %v426_v18 }
  0xad   :  { %678 = vst [vmem:[%s1291_s2] sm:$0xff] %v662_v24 }
  0xaf   :  { %v476_v25 = vpop.f32.mrf.mxu2 }
  0xb0   :  { %v525_v26 = vpop.f32.mrf.mxu3  ;;  %v381_v27 = vpop.f32.mrf.mxu0 }
  0xb1   :  { %v526_v29 = vadd.f32 %v525_v26, %v476_v25  ;;  %v430_v30 = vpop.f32.mrf.mxu1 }
  0xb2   :  { %v431_v32 = vadd.f32 %v430_v30, %v381_v27 }
  0xb3   :  { %v663_v31 = vpack.c.bf16 %v526_v29, %v428_v28 }
  0xb5   :  { %679 = vst [vmem:[%s1291_s2 + $0x8] sm:$0xff] %v663_v31 }
  0xb7   :  { %v479_v33 = vpop.f32.mrf.mxu2 }
  0xb8   :  { %v528_v34 = vpop.f32.mrf.mxu3  ;;  %v383_v35 = vpop.f32.mrf.mxu0 }
  0xb9   :  { %v529_v36 = vadd.f32 %v528_v34, %v479_v33  ;;  %v432_v37 = vpop.f32.mrf.mxu1 }
  0xba   :  { %v433_v42 = vadd.f32 %v432_v37, %v383_v35 }
  0xbb   :  { %v664_v38 = vpack.c.bf16 %v529_v36, %v431_v32 }
  0xbd   :  { %680 = vst [vmem:[%s1291_s2 + $0x10] sm:$0xff] %v664_v38 }
  0xbf   :  { %v481_v39 = vpop.f32.mrf.mxu2 }
  0xc0   :  { %v530_v40 = vpop.f32.mrf.mxu3  ;;  %v386_v41 = vpop.f32.mrf.mxu0 }
  0xc1   :  { %v531_v43 = vadd.f32 %v530_v40, %v481_v39  ;;  %v435_v44 = vpop.f32.mrf.mxu1 }
  0xc2   :  { %v436_v46 = vadd.f32 %v435_v44, %v386_v41 }
  0xc3   :  { %v665_v45 = vpack.c.bf16 %v531_v43, %v433_v42 }
  0xc5   :  { %681 = vst [vmem:[%s1291_s2 + $0x18] sm:$0xff] %v665_v45 }
  0xc7   :  { %v484_v47 = vpop.f32.mrf.mxu2 }
  0xc8   :  { %v533_v48 = vpop.f32.mrf.mxu3  ;;  %v388_v49 = vpop.f32.mrf.mxu0 }
  0xc9   :  { %v534_v50 = vadd.f32 %v533_v48, %v484_v47  ;;  %v437_v51 = vpop.f32.mrf.mxu1 }
  0xca   :  { %v438_v56 = vadd.f32 %v437_v51, %v388_v49 }
  0xcb   :  { %v666_v52 = vpack.c.bf16 %v534_v50, %v436_v46 }
  0xcd   :  { %682 = vst [vmem:[%s1291_s2 + $0x20] sm:$0xff] %v666_v52 }
  0xcf   :  { %v486_v53 = vpop.f32.mrf.mxu2 }
  0xd0   :  { %v535_v54 = vpop.f32.mrf.mxu3  ;;  %v391_v55 = vpop.f32.mrf.mxu0 }
  0xd1   :  { %v536_v57 = vadd.f32 %v535_v54, %v486_v53  ;;  %v440_v58 = vpop.f32.mrf.mxu1 }
  0xd2   :  { %v441_v60 = vadd.f32 %v440_v58, %v391_v55 }
  0xd3   :  { %v667_v59 = vpack.c.bf16 %v536_v57, %v438_v56 }
  0xd5   :  { %683 = vst [vmem:[%s1291_s2 + $0x28] sm:$0xff] %v667_v59 }
  0xd7   :  { %v489_v61 = vpop.f32.mrf.mxu2 }
  0xd8   :  { %v538_v62 = vpop.f32.mrf.mxu3  ;;  %v393_v63 = vpop.f32.mrf.mxu0 }
  0xd9   :  { %v539_v0 = vadd.f32 %v538_v62, %v489_v61  ;;  %v442_v1 = vpop.f32.mrf.mxu1 }
  0xda   :  { %v443_v6 = vadd.f32 %v442_v1, %v393_v63 }
  0xdb   :  { %v668_v2 = vpack.c.bf16 %v539_v0, %v441_v60 }
  0xdd   :  { %684 = vst [vmem:[%s1291_s2 + $0x30] sm:$0xff] %v668_v2 }
  0xdf   :  { %v491_v3 = vpop.f32.mrf.mxu2 }
  0xe0   :  { %v540_v4 = vpop.f32.mrf.mxu3  ;;  %v396_v5 = vpop.f32.mrf.mxu0 }
  0xe1   :  { %v541_v7 = vadd.f32 %v540_v4, %v491_v3  ;;  %v445_v8 = vpop.f32.mrf.mxu1 }
  0xe2   :  { %v446_v10 = vadd.f32 %v445_v8, %v396_v5 }
  0xe3   :  { %v669_v9 = vpack.c.bf16 %v541_v7, %v443_v6 }
  0xe5   :  { %685 = vst [vmem:[%s1291_s2 + $0x38] sm:$0xff] %v669_v9 }
  0xe7   :  { %v494_v11 = vpop.f32.mrf.mxu2 }
  0xe8   :  { %v543_v12 = vpop.f32.mrf.mxu3  ;;  %v398_v13 = vpop.f32.mrf.mxu0 }
  0xe9   :  { %v544_v14 = vadd.f32 %v543_v12, %v494_v11  ;;  %v447_v15 = vpop.f32.mrf.mxu1 }
  0xea   :  { %v448_v20 = vadd.f32 %v447_v15, %v398_v13 }
  0xeb   :  { %v670_v16 = vpack.c.bf16 %v544_v14, %v446_v10 }
  0xed   :  { %686 = vst [vmem:[%s1291_s2 + $0x40] sm:$0xff] %v670_v16 }
  0xef   :  { %v496_v17 = vpop.f32.mrf.mxu2 }
  0xf0   :  { %v545_v18 = vpop.f32.mrf.mxu3  ;;  %v401_v19 = vpop.f32.mrf.mxu0 }
  0xf1   :  { %v546_v21 = vadd.f32 %v545_v18, %v496_v17  ;;  %v450_v22 = vpop.f32.mrf.mxu1 }
  0xf2   :  { %v451_v24 = vadd.f32 %v450_v22, %v401_v19 }
  0xf3   :  { %v671_v23 = vpack.c.bf16 %v546_v21, %v448_v20 }
  0xf5   :  { %687 = vst [vmem:[%s1291_s2 + $0x48] sm:$0xff] %v671_v23 }
  0xf7   :  { %v499_v25 = vpop.f32.mrf.mxu2 }
  0xf8   :  { %v548_v26 = vpop.f32.mrf.mxu3  ;;  %v403_v27 = vpop.f32.mrf.mxu0 }
  0xf9   :  { %v549_v28 = vadd.f32 %v548_v26, %v499_v25  ;;  %v452_v29 = vpop.f32.mrf.mxu1 }
  0xfa   :  { %v453_v34 = vadd.f32 %v452_v29, %v403_v27 }
  0xfb   :  { %v672_v30 = vpack.c.bf16 %v549_v28, %v451_v24 }
  0xfd   :  { %688 = vst [vmem:[%s1291_s2 + $0x50] sm:$0xff] %v672_v30 }
  0xff   :  { %v501_v31 = vpop.f32.mrf.mxu2 }
 0x100   :  { %v550_v32 = vpop.f32.mrf.mxu3  ;;  %v406_v33 = vpop.f32.mrf.mxu0 }
 0x101   :  { %v551_v35 = vadd.f32 %v550_v32, %v501_v31  ;;  %v455_v36 = vpop.f32.mrf.mxu1 }
 0x102   :  { %v456_v38 = vadd.f32 %v455_v36, %v406_v33 }
 0x103   :  { %v673_v37 = vpack.c.bf16 %v551_v35, %v453_v34 }
 0x105   :  { %689 = vst [vmem:[%s1291_s2 + $0x58] sm:$0xff] %v673_v37 }
 0x107   :  { %v504_v39 = vpop.f32.mrf.mxu2 }
 0x108   :  { %v553_v40 = vpop.f32.mrf.mxu3  ;;  %v408_v42 = vpop.f32.mrf.mxu0 }
 0x109   :  { %v554_v41 = vadd.f32 %v553_v40, %v504_v39  ;;  %v457_v43 = vpop.f32.mrf.mxu1 }
 0x10a   :  { %v458_v47 = vadd.f32 %v457_v43, %v408_v42 }
 0x10b   :  { %v674_v44 = vpack.c.bf16 %v554_v41, %v456_v38 }
 0x10d   :  { %690 = vst [vmem:[%s1291_s2 + $0x60] sm:$0xff] %v674_v44 }
 0x10f   :  { %v506_v45 = vpop.f32.mrf.mxu2 }
 0x110   :  { %v555_v46 = vpop.f32.mrf.mxu3  ;;  %v411_v50 = vpop.f32.mrf.mxu0 }
 0x111   :  { %v556_v48 = vadd.f32 %v555_v46, %v506_v45  ;;  %v460_v51 = vpop.f32.mrf.mxu1 }
 0x112   :  { %v461_v52 = vadd.f32 %v460_v51, %v411_v50 }
 0x113   :  { %v675_v49 = vpack.c.bf16 %v556_v48, %v458_v47 }
 0x115   :  { %691 = vst [vmem:[%s1291_s2 + $0x68] sm:$0xff] %v675_v49 }
 0x117   :  { %v509_v53 = vpop.f32.mrf.mxu2 }
 0x118   :  { %v558_v54 = vpop.f32.mrf.mxu3  ;;  %v413_v57 = vpop.f32.mrf.mxu0 }
 0x119   :  { %v559_v55 = vadd.f32 %v558_v54, %v509_v53  ;;  %v462_v58 = vpop.f32.mrf.mxu1 }
 0x11a   :  { %v463_v61 = vadd.f32 %v462_v58, %v413_v57 }
 0x11b   :  { %v676_v56 = vpack.c.bf16 %v559_v55, %v461_v52 }
 0x11d   :  { %692 = vst [vmem:[%s1291_s2 + $0x70] sm:$0xff] %v676_v56 }
 0x11f   :  { %v511_v59 = vpop.f32.mrf.mxu2 }
 0x120   :  { %v560_v60 = vpop.f32.mrf.mxu3 }
 0x121   :  { %v561_v62 = vadd.f32 %v560_v60, %v511_v59 }
 0x123   :  { %v677_v63 = vpack.c.bf16 %v561_v62, %v463_v61 }
 0x125   :  { %693 = vst [vmem:[%s1291_s2 + $0x78] sm:$0xff] %v677_v63 }

// kernel: rel_partial_learnable_mha_forward.7
= control target key start
LH: loop header
LB: loop body
LE: loop exit
PB: predicated region body
PF: predicated region fallthrough
CT: control target
= control target key end

     0   :  { %s3869_s1 = inlined_call_operand.vmem [shape: bf16[256,256], index: 1, kind: input, shape index: {}]   ;;  %s3870_s0 = inlined_call_operand.vmem [shape: bf16[256,256], index: 0, kind: input, shape index: {}]   ;;  %s3871_s2 = inlined_call_operand.vmem [shape: f32[256,256], index: 2, kind: input, shape index: {}]   ;;  %s3872_s3 = inlined_call_operand.vmem [shape: f32[1,256], index: 3, kind: input, shape index: {}]   ;;  %s3873_s4 = inlined_call_operand.vmem [shape: f32[1,256], index: 4, kind: input, shape index: {}]   ;;  %s3874_s5 = inlined_call_operand.vmem [shape: f32[256,256], index: 5, kind: output, shape index: {}]  }
   0x1   :  { %v2025_v0 = vld [vmem:[%s3869_s1 + $0x70] sm:$0xf]  ;;  %v2142_v1 = vld [vmem:[%s3869_s1 + $0x74] sm:$0xf0]  ;;  %v2141_v5 = vld [vmem:[%s3869_s1 + $0x74] sm:$0xf] }
   0x2   :  { %v2089_v2 = vld [vmem:[%s3869_s1 + $0xf0] sm:$0xf]  ;;  %v2026_v3 = vor.u32 %v2142_v1, %v2025_v0  ;;  %v2158_v4 = vld [vmem:[%s3869_s1 + $0xf4] sm:$0xf0]  ;;  %v2027_v6 = vld [vmem:[%s3869_s1 + $0x78] sm:$0xf0] }
   0x3   :  { %v2090_v7 = vor.u32 %v2158_v4, %v2089_v2  ;;  %v2030_v8 = vor.u32 %v2141_v5, %v2027_v6  ;;  %v2157_v9 = vld [vmem:[%s3869_s1 + $0xf4] sm:$0xf]  ;;  %v2091_v10 = vld [vmem:[%s3869_s1 + $0xf8] sm:$0xf0]  ;;  %v2017_v11 = vld [vmem:[%s3869_s1 + $0x60] sm:$0xf] }
   0x4   :  { %468 = vmatpush.bf16.msra.mxu0 %v2026_v3  ;;  %v2094_v12 = vor.u32 %v2157_v9, %v2091_v10  ;;  %v2140_v13 = vld [vmem:[%s3869_s1 + $0x64] sm:$0xf0]  ;;  %v2081_v14 = vld [vmem:[%s3869_s1 + $0xe0] sm:$0xf]  ;;  %v2139_v18 = vld [vmem:[%s3869_s1 + $0x64] sm:$0xf] }
   0x5   :  { %v2156_v15 = vld [vmem:[%s3869_s1 + $0xe4] sm:$0xf0]  ;;  %557 = vmatpush.bf16.msra.mxu1 %v2090_v7  ;;  %646 = vmatpush.bf16.msra.mxu2 %v2030_v8  ;;  %v2018_v16 = vor.u32 %v2140_v13, %v2017_v11  ;;  %v2019_v19 = vld [vmem:[%s3869_s1 + $0x68] sm:$0xf0]  ;;  %v2155_v20 = vld [vmem:[%s3869_s1 + $0xe4] sm:$0xf] }
   0x6   :  { %v2082_v17 = vor.u32 %v2156_v15, %v2081_v14  ;;  %735 = vmatpush.bf16.msra.mxu3 %v2094_v12  ;;  %v2022_v21 = vor.u32 %v2139_v18, %v2019_v19  ;;  %v2083_v22 = vld [vmem:[%s3869_s1 + $0xe8] sm:$0xf0]  ;;  %v2009_v23 = vld [vmem:[%s3869_s1 + $0x50] sm:$0xf]  ;;  %v2138_v24 = vld [vmem:[%s3869_s1 + $0x54] sm:$0xf0] }
   0x7   :  { %v2086_v25 = vor.u32 %v2155_v20, %v2083_v22  ;;  %v2073_v26 = vld [vmem:[%s3869_s1 + $0xd0] sm:$0xf]  ;;  %v2154_v27 = vld [vmem:[%s3869_s1 + $0xd4] sm:$0xf0]  ;;  %v2137_v28 = vld [vmem:[%s3869_s1 + $0x54] sm:$0xf]  ;;  %v2010_v29 = vor.u32 %v2138_v24, %v2009_v23 }
   0x8   :  { %469 = vmatpush.bf16.msra.mxu0 %v2018_v16  ;;  %v2011_v30 = vld [vmem:[%s3869_s1 + $0x58] sm:$0xf0]  ;;  %v2153_v31 = vld [vmem:[%s3869_s1 + $0xd4] sm:$0xf]  ;;  %v2074_v33 = vor.u32 %v2154_v27, %v2073_v26  ;;  %v2001_v35 = vld [vmem:[%s3869_s1 + $0x40] sm:$0xf] }
   0x9   :  { %v2075_v32 = vld [vmem:[%s3869_s1 + $0xd8] sm:$0xf0]  ;;  %558 = vmatpush.bf16.msra.mxu1 %v2082_v17  ;;  %647 = vmatpush.bf16.msra.mxu2 %v2022_v21  ;;  %v2014_v34 = vor.u32 %v2137_v28, %v2011_v30  ;;  %v2136_v36 = vld [vmem:[%s3869_s1 + $0x44] sm:$0xf0]  ;;  %v2065_v37 = vld [vmem:[%s3869_s1 + $0xc0] sm:$0xf] }
   0xa   :  { %736 = vmatpush.bf16.msra.mxu3 %v2086_v25  ;;  %v2078_v38 = vor.u32 %v2153_v31, %v2075_v32  ;;  %v2152_v39 = vld [vmem:[%s3869_s1 + $0xc4] sm:$0xf0]  ;;  %v2135_v40 = vld [vmem:[%s3869_s1 + $0x44] sm:$0xf]  ;;  %v2003_v41 = vld [vmem:[%s3869_s1 + $0x48] sm:$0xf0]  ;;  %v2002_v44 = vor.u32 %v2136_v36, %v2001_v35 }
   0xb   :  { %v2151_v42 = vld [vmem:[%s3869_s1 + $0xc4] sm:$0xf]  ;;  %v2067_v43 = vld [vmem:[%s3869_s1 + $0xc8] sm:$0xf0]  ;;  %v2066_v45 = vor.u32 %v2152_v39, %v2065_v37  ;;  %v2006_v46 = vor.u32 %v2135_v40, %v2003_v41  ;;  %v1993_v47 = vld [vmem:[%s3869_s1 + $0x30] sm:$0xf] }
   0xc   :  { %470 = vmatpush.bf16.msra.mxu0 %v2010_v29  ;;  %v2134_v48 = vld [vmem:[%s3869_s1 + $0x34] sm:$0xf0]  ;;  %v2057_v49 = vld [vmem:[%s3869_s1 + $0xb0] sm:$0xf]  ;;  %v2070_v50 = vor.u32 %v2151_v42, %v2067_v43  ;;  %v2133_v52 = vld [vmem:[%s3869_s1 + $0x34] sm:$0xf] }
   0xd   :  { %559 = vmatpush.bf16.msra.mxu1 %v2074_v33  ;;  %648 = vmatpush.bf16.msra.mxu2 %v2014_v34  ;;  %v2150_v51 = vld [vmem:[%s3869_s1 + $0xb4] sm:$0xf0]  ;;  %v1995_v53 = vld [vmem:[%s3869_s1 + $0x38] sm:$0xf0]  ;;  %v2149_v54 = vld [vmem:[%s3869_s1 + $0xb4] sm:$0xf]  ;;  %v1994_v56 = vor.u32 %v2134_v48, %v1993_v47 }
   0xe   :  { %737 = vmatpush.bf16.msra.mxu3 %v2078_v38  ;;  %v2059_v55 = vld [vmem:[%s3869_s1 + $0xb8] sm:$0xf0]  ;;  %v2058_v57 = vor.u32 %v2150_v51, %v2057_v49  ;;  %v1998_v58 = vor.u32 %v2133_v52, %v1995_v53  ;;  %v1985_v59 = vld [vmem:[%s3869_s1 + $0x20] sm:$0xf]  ;;  %v2132_v60 = vld [vmem:[%s3869_s1 + $0x24] sm:$0xf0] }
   0xf   :  { %v2049_v61 = vld [vmem:[%s3869_s1 + $0xa0] sm:$0xf]  ;;  %v2062_v62 = vor.u32 %v2149_v54, %v2059_v55  ;;  %v2148_v63 = vld [vmem:[%s3869_s1 + $0xa4] sm:$0xf0]  ;;  %v2131_v0 = vld [vmem:[%s3869_s1 + $0x24] sm:$0xf]  ;;  %v1986_v4 = vor.u32 %v2132_v60, %v1985_v59 }
  0x10   :  { %471 = vmatpush.bf16.msra.mxu0 %v2002_v44  ;;  %v1987_v1 = vld [vmem:[%s3869_s1 + $0x28] sm:$0xf0]  ;;  %v2147_v2 = vld [vmem:[%s3869_s1 + $0xa4] sm:$0xf]  ;;  %v2050_v5 = vor.u32 %v2148_v63, %v2049_v61  ;;  %v1977_v7 = vld [vmem:[%s3869_s1 + $0x10] sm:$0xf] }
  0x11   :  { %560 = vmatpush.bf16.msra.mxu1 %v2066_v45  ;;  %649 = vmatpush.bf16.msra.mxu2 %v2006_v46  ;;  %v2051_v3 = vld [vmem:[%s3869_s1 + $0xa8] sm:$0xf0]  ;;  %v1990_v6 = vor.u32 %v2131_v0, %v1987_v1  ;;  %v2130_v8 = vld [vmem:[%s3869_s1 + $0x14] sm:$0xf0]  ;;  %v2041_v9 = vld [vmem:[%s3869_s1 + $0x90] sm:$0xf] }
  0x12   :  { %738 = vmatpush.bf16.msra.mxu3 %v2070_v50  ;;  %v2054_v10 = vor.u32 %v2147_v2, %v2051_v3  ;;  %v2146_v11 = vld [vmem:[%s3869_s1 + $0x94] sm:$0xf0]  ;;  %v2129_v12 = vld [vmem:[%s3869_s1 + $0x14] sm:$0xf]  ;;  %v1979_v13 = vld [vmem:[%s3869_s1 + $0x18] sm:$0xf0]  ;;  %v1978_v16 = vor.u32 %v2130_v8, %v1977_v7 }
  0x13   :  { %v2145_v14 = vld [vmem:[%s3869_s1 + $0x94] sm:$0xf]  ;;  %v2043_v15 = vld [vmem:[%s3869_s1 + $0x98] sm:$0xf0]  ;;  %v2042_v17 = vor.u32 %v2146_v11, %v2041_v9  ;;  %v1982_v18 = vor.u32 %v2129_v12, %v1979_v13  ;;  %v1969_v19 = vld [vmem:[%s3869_s1] sm:$0xf] }
  0x14   :  { %472 = vmatpush.bf16.msra.mxu0 %v1994_v56  ;;  %v2128_v20 = vld [vmem:[%s3869_s1 + $0x4] sm:$0xf0]  ;;  %v2033_v21 = vld [vmem:[%s3869_s1 + $0x80] sm:$0xf]  ;;  %v2046_v22 = vor.u32 %v2145_v14, %v2043_v15  ;;  %v2127_v24 = vld [vmem:[%s3869_s1 + $0x4] sm:$0xf] }
  0x15   :  { %561 = vmatpush.bf16.msra.mxu1 %v2058_v57  ;;  %650 = vmatpush.bf16.msra.mxu2 %v1998_v58  ;;  %v2144_v23 = vld [vmem:[%s3869_s1 + $0x84] sm:$0xf0]  ;;  %v1971_v25 = vld [vmem:[%s3869_s1 + $0x8] sm:$0xf0]  ;;  %v2143_v26 = vld [vmem:[%s3869_s1 + $0x84] sm:$0xf]  ;;  %v1970_v28 = vor.u32 %v2128_v20, %v1969_v19 }
  0x16   :  { %739 = vmatpush.bf16.msra.mxu3 %v2062_v62  ;;  %v2035_v27 = vld [vmem:[%s3869_s1 + $0x88] sm:$0xf0]  ;;  %v1841_v29 = vld [vmem:[%s3870_s0] sm:$0xf]  ;;  %v2096_v30 = vld [vmem:[%s3870_s0 + $0x4] sm:$0xf0]  ;;  %v2034_v31 = vor.u32 %v2144_v23, %v2033_v21  ;;  %v1974_v32 = vor.u32 %v2127_v24, %v1971_v25 }
  0x17   :  { %v2095_v33 = vld [vmem:[%s3870_s0 + $0x4] sm:$0xf]  ;;  %v1843_v34 = vld [vmem:[%s3870_s0 + $0x8] sm:$0xf0]  ;;  %v2038_v35 = vor.u32 %v2143_v26, %v2035_v27  ;;  %v1842_v36 = vor.u32 %v2096_v30, %v1841_v29  ;;  %v1849_v38 = vld [vmem:[%s3870_s0 + $0x10] sm:$0xf] }
  0x18   :  { %473 = vmatpush.bf16.msra.mxu0 %v1986_v4  ;;  %v1846_v37 = vor.u32 %v2095_v33, %v1843_v34  ;;  %v2098_v39 = vld [vmem:[%s3870_s0 + $0x14] sm:$0xf0]  ;;  %v2097_v40 = vld [vmem:[%s3870_s0 + $0x14] sm:$0xf]  ;;  %v1851_v41 = vld [vmem:[%s3870_s0 + $0x18] sm:$0xf0] }
  0x19   :  { %562 = vmatpush.bf16.msra.mxu1 %v2050_v5  ;;  %651 = vmatpush.bf16.msra.mxu2 %v1990_v6  ;;  %v1850_v42 = vor.u32 %v2098_v39, %v1849_v38  ;;  %v1854_v43 = vor.u32 %v2097_v40, %v1851_v41  ;;  %v1857_v44 = vld [vmem:[%s3870_s0 + $0x20] sm:$0xf]  ;;  %v2100_v45 = vld [vmem:[%s3870_s0 + $0x24] sm:$0xf0]  ;;  %v2099_v46 = vld [vmem:[%s3870_s0 + $0x24] sm:$0xf] }
  0x1a   :  { %740 = vmatpush.bf16.msra.mxu3 %v2054_v10  ;;  %v1859_v47 = vld [vmem:[%s3870_s0 + $0x28] sm:$0xf0]  ;;  %v1858_v48 = vor.u32 %v2100_v45, %v1857_v44  ;;  %v1865_v50 = vld [vmem:[%s3870_s0 + $0x30] sm:$0xf]  ;;  %v2102_v51 = vld [vmem:[%s3870_s0 + $0x34] sm:$0xf0] }
  0x1b   :  { %v1862_v49 = vor.u32 %v2099_v46, %v1859_v47  ;;  %v2101_v52 = vld [vmem:[%s3870_s0 + $0x34] sm:$0xf]  ;;  %v1867_v53 = vld [vmem:[%s3870_s0 + $0x38] sm:$0xf0]  ;;  %v1866_v54 = vor.u32 %v2102_v51, %v1865_v50  ;;  %v1873_v56 = vld [vmem:[%s3870_s0 + $0x40] sm:$0xf] }
  0x1c   :  { %474 = vmatpush.bf16.msra.mxu0 %v1978_v16  ;;  %v1870_v55 = vor.u32 %v2101_v52, %v1867_v53  ;;  %v2104_v57 = vld [vmem:[%s3870_s0 + $0x44] sm:$0xf0]  ;;  %v2103_v58 = vld [vmem:[%s3870_s0 + $0x44] sm:$0xf]  ;;  %v1875_v59 = vld [vmem:[%s3870_s0 + $0x48] sm:$0xf0] }
  0x1d   :  { %563 = vmatpush.bf16.msra.mxu1 %v2042_v17  ;;  %652 = vmatpush.bf16.msra.mxu2 %v1982_v18  ;;  %v1874_v60 = vor.u32 %v2104_v57, %v1873_v56  ;;  %v1878_v61 = vor.u32 %v2103_v58, %v1875_v59  ;;  %v1881_v62 = vld [vmem:[%s3870_s0 + $0x50] sm:$0xf]  ;;  %v2106_v63 = vld [vmem:[%s3870_s0 + $0x54] sm:$0xf0]  ;;  %v2105_v0 = vld [vmem:[%s3870_s0 + $0x54] sm:$0xf] }
  0x1e   :  { %741 = vmatpush.bf16.msra.mxu3 %v2046_v22  ;;  %v1883_v1 = vld [vmem:[%s3870_s0 + $0x58] sm:$0xf0]  ;;  %v1882_v2 = vor.u32 %v2106_v63, %v1881_v62  ;;  %v1889_v4 = vld [vmem:[%s3870_s0 + $0x60] sm:$0xf]  ;;  %v2108_v5 = vld [vmem:[%s3870_s0 + $0x64] sm:$0xf0] }
  0x1f   :  { %v1886_v3 = vor.u32 %v2105_v0, %v1883_v1  ;;  %v2107_v6 = vld [vmem:[%s3870_s0 + $0x64] sm:$0xf]  ;;  %v1891_v7 = vld [vmem:[%s3870_s0 + $0x68] sm:$0xf0]  ;;  %v1890_v8 = vor.u32 %v2108_v5, %v1889_v4  ;;  %v1897_v10 = vld [vmem:[%s3870_s0 + $0x70] sm:$0xf] }
  0x20   :  { %475 = vmatpush.bf16.msra.mxu0 %v1970_v28  ;;  %v1894_v9 = vor.u32 %v2107_v6, %v1891_v7  ;;  %v2110_v11 = vld [vmem:[%s3870_s0 + $0x74] sm:$0xf0]  ;;  %v2109_v12 = vld [vmem:[%s3870_s0 + $0x74] sm:$0xf]  ;;  %v1899_v13 = vld [vmem:[%s3870_s0 + $0x78] sm:$0xf0] }
  0x21   :  { %564 = vmatpush.bf16.msra.mxu1 %v2034_v31  ;;  %653 = vmatpush.bf16.msra.mxu2 %v1974_v32  ;;  %v1898_v14 = vor.u32 %v2110_v11, %v1897_v10  ;;  %v1902_v15 = vor.u32 %v2109_v12, %v1899_v13  ;;  %v1905_v16 = vld [vmem:[%s3870_s0 + $0x80] sm:$0xf]  ;;  %v2112_v17 = vld [vmem:[%s3870_s0 + $0x84] sm:$0xf0]  ;;  %v2111_v18 = vld [vmem:[%s3870_s0 + $0x84] sm:$0xf] }
  0x22   :  { %742 = vmatpush.bf16.msra.mxu3 %v2038_v35  ;;  %v1907_v19 = vld [vmem:[%s3870_s0 + $0x88] sm:$0xf0]  ;;  %v1906_v20 = vor.u32 %v2112_v17, %v1905_v16  ;;  %v84_v23 = vld [vmem:[%s3871_s2] sm:$0xff]  ;;  %v86_v34 = vld [vmem:[%s3871_s2 + $0x10] sm:$0xff] }
  0x23   :  { %476 = vmatmul.bf16.vlgmr.msra.gmra.mxu0 %v1842_v36  ;;  %v1910_v22 = vor.u32 %v2111_v18, %v1907_v19  ;;  %v85_v26 = vld [vmem:[%s3871_s2 + $0x8] sm:$0xff]  ;;  %v87_v38 = vld [vmem:[%s3871_s2 + $0x18] sm:$0xff]  ;;  %v2113_v39 = vld [vmem:[%s3870_s0 + $0x94] sm:$0xf] }
  0x24   :  { %565 = vmatmul.bf16.vlgmr.msra.gmra.mxu1 %v1846_v37  ;;  %654 = vmatmul.bf16.vlgmr.msra.gmra.mxu2 %v1842_v36  ;;  %v1913_v36 = vld [vmem:[%s3870_s0 + $0x90] sm:$0xf]  ;;  %v1915_v40 = vld [vmem:[%s3870_s0 + $0x98] sm:$0xf0]  ;;  %v1921_v0 = vld [vmem:[%s3870_s0 + $0xa0] sm:$0xf] }
  0x25   :  { %743 = vmatmul.bf16.vlgmr.msra.gmra.mxu3 %v1846_v37  ;;  %v2114_v37 = vld [vmem:[%s3870_s0 + $0x94] sm:$0xf0]  ;;  %v1918_v47 = vor.u32 %v2113_v39, %v1915_v40  ;;  %v90_v62 = vld [vmem:[%s3871_s2 + $0x30] sm:$0xff]  ;;  %v2116_v1 = vld [vmem:[%s3870_s0 + $0xa4] sm:$0xf0] }
  0x26   :  { %v1923_v4 = vld [vmem:[%s3870_s0 + $0xa8] sm:$0xf0]  ;;  %v1922_v7 = vor.u32 %v2116_v1, %v1921_v0  ;;  %v92_v12 = vld [vmem:[%s3871_s2 + $0x40] sm:$0xff]  ;;  %v99_v0 = vld [vmem:[%s3871_s2 + $0x78] sm:$0xff] }
  0x27   :  { %v93_v18 = vld [vmem:[%s3871_s2 + $0x48] sm:$0xff]  ;;  %v2119_v1 = vld [vmem:[%s3870_s0 + $0xc4] sm:$0xf] }
  0x33   :  { %481 = vmatmul.bf16.gmra.mxu0 %v1850_v42 }
  0x34   :  { %570 = vmatmul.bf16.gmra.mxu1 %v1854_v43  ;;  %659 = vmatmul.bf16.gmra.mxu2 %v1850_v42 }
  0x35   :  { %748 = vmatmul.bf16.gmra.mxu3 %v1854_v43  ;;  %v1914_v43 = vor.u32 %v2114_v37, %v1913_v36 }
  0x43   :  { %486 = vmatmul.bf16.gmra.mxu0 %v1858_v48 }
  0x44   :  { %575 = vmatmul.bf16.gmra.mxu1 %v1862_v49  ;;  %664 = vmatmul.bf16.gmra.mxu2 %v1858_v48  ;;  %v88_v48 = vld [vmem:[%s3871_s2 + $0x20] sm:$0xff] }
  0x45   :  { %753 = vmatmul.bf16.gmra.mxu3 %v1862_v49 }
  0x53   :  { %491 = vmatmul.bf16.gmra.mxu0 %v1866_v54 }
  0x54   :  { %580 = vmatmul.bf16.gmra.mxu1 %v1870_v55  ;;  %669 = vmatmul.bf16.gmra.mxu2 %v1866_v54  ;;  %v89_v54 = vld [vmem:[%s3871_s2 + $0x28] sm:$0xff] }
  0x55   :  { %758 = vmatmul.bf16.gmra.mxu3 %v1870_v55 }
  0x63   :  { %496 = vmatmul.bf16.gmra.mxu0 %v1874_v60 }
  0x64   :  { %585 = vmatmul.bf16.gmra.mxu1 %v1878_v61  ;;  %674 = vmatmul.bf16.gmra.mxu2 %v1874_v60 }
  0x65   :  { %763 = vmatmul.bf16.gmra.mxu3 %v1878_v61 }
  0x73   :  { %501 = vmatmul.bf16.gmra.mxu0 %v1882_v2 }
  0x74   :  { %590 = vmatmul.bf16.gmra.mxu1 %v1886_v3  ;;  %679 = vmatmul.bf16.gmra.mxu2 %v1882_v2  ;;  %v91_v2 = vld [vmem:[%s3871_s2 + $0x38] sm:$0xff] }
  0x75   :  { %768 = vmatmul.bf16.gmra.mxu3 %v1886_v3  ;;  %v2115_v3 = vld [vmem:[%s3870_s0 + $0xa4] sm:$0xf] }
  0x76   :  { %v1926_v11 = vor.u32 %v2115_v3, %v1923_v4 }
  0x83   :  { %506 = vmatmul.bf16.gmra.mxu0 %v1890_v8 }
  0x84   :  { %595 = vmatmul.bf16.gmra.mxu1 %v1894_v9  ;;  %684 = vmatmul.bf16.gmra.mxu2 %v1890_v8 }
  0x85   :  { %773 = vmatmul.bf16.gmra.mxu3 %v1894_v9 }
  0x93   :  { %511 = vmatmul.bf16.gmra.mxu0 %v1898_v14 }
  0x94   :  { %600 = vmatmul.bf16.gmra.mxu1 %v1902_v15  ;;  %689 = vmatmul.bf16.gmra.mxu2 %v1898_v14 }
  0x95   :  { %778 = vmatmul.bf16.gmra.mxu3 %v1902_v15 }
  0xa0   :  { %v477_v21 = vpop.f32.mrf.mxu0 }
  0xa1   :  { %v566_v24 = vpop.f32.mrf.mxu1  ;;  %v478_v25 = vadd.f32 %v477_v21, %v84_v23 }
  0xa3   :  { %516 = vmatmul.bf16.gmra.mxu0 %v1906_v20  ;;  %v2563_v28 = vadd.f32 %v566_v24, %v478_v25 }
  0xa4   :  { %605 = vmatmul.bf16.gmra.mxu1 %v1910_v22  ;;  %694 = vmatmul.bf16.gmra.mxu2 %v1906_v20 }
  0xa5   :  { %783 = vmatmul.bf16.gmra.mxu3 %v1910_v22 }
  0xa7   :  { %v655_v27 = vpop.f32.mrf.mxu2 }
  0xa8   :  { %v656_v29 = vadd.f32 %v655_v27, %v85_v26  ;;  %v744_v30 = vpop.f32.mrf.mxu3  ;;  %v479_v31 = vpop.f32.mrf.mxu0  ;;  %v94_v26 = vld [vmem:[%s3871_s2 + $0x50] sm:$0xff] }
  0xa9   :  { %v568_v32 = vpop.f32.mrf.mxu1  ;;  %v480_v41 = vadd.f32 %v479_v31, %v86_v34  ;;  %v95_v31 = vld [vmem:[%s3871_s2 + $0x58] sm:$0xff] }
  0xaa   :  { %v2565_v33 = vadd.f32 %v744_v30, %v656_v29  ;;  %v1929_v29 = vld [vmem:[%s3870_s0 + $0xb0] sm:$0xf]  ;;  %v2118_v30 = vld [vmem:[%s3870_s0 + $0xb4] sm:$0xf0]  ;;  %v1931_v34 = vld [vmem:[%s3870_s0 + $0xb8] sm:$0xf0] }
  0xab   :  { %v2590_v50 = vadd.f32 %v568_v32, %v480_v41  ;;  %v2117_v32 = vld [vmem:[%s3870_s0 + $0xb4] sm:$0xf]  ;;  %v1930_v37 = vor.u32 %v2118_v30, %v1929_v29 }
  0xac   :  { %v824_v35 = vadd.f32 %v2565_v33, %v2563_v28  ;;  %v1934_v41 = vor.u32 %v2117_v32, %v1931_v34  ;;  %v102_v29 = vld [vmem:[%s3871_s2 + $0x90] sm:$0xff]  ;;  %v2122_v32 = vld [vmem:[%s3870_s0 + $0xd4] sm:$0xf0] }
  0xad   :  { %v103_v34 = vld [vmem:[%s3871_s2 + $0x98] sm:$0xff] }
  0xae   :  { %825 = vadd.xlane.f32.xlu0 %v824_v35 }
  0xaf   :  { %v657_v42 = vpop.f32.mrf.mxu2 }
  0xb0   :  { %v658_v44 = vadd.f32 %v657_v42, %v87_v38  ;;  %v746_v45 = vpop.f32.mrf.mxu3  ;;  %v482_v46 = vpop.f32.mrf.mxu0  ;;  %v96_v42 = vld [vmem:[%s3871_s2 + $0x60] sm:$0xff] }
  0xb1   :  { %v571_v49 = vpop.f32.mrf.mxu1  ;;  %v483_v52 = vadd.f32 %v482_v46, %v88_v48  ;;  %v97_v48 = vld [vmem:[%s3871_s2 + $0x68] sm:$0xff] }
  0xb2   :  { %v2592_v51 = vadd.f32 %v746_v45, %v658_v44 }
  0xb3   :  { %521 = vmatmul.bf16.gmra.mxu0 %v1914_v43  ;;  %v2599_v56 = vadd.f32 %v571_v49, %v483_v52 }
  0xb4   :  { %610 = vmatmul.bf16.gmra.mxu1 %v1918_v47  ;;  %699 = vmatmul.bf16.gmra.mxu2 %v1914_v43  ;;  %v827_v53 = vadd.f32 %v2592_v51, %v2590_v50 }
  0xb5   :  { %788 = vmatmul.bf16.gmra.mxu3 %v1918_v47 }
  0xb6   :  { %828 = vadd.xlane.f32.xlu0 %v827_v53 }
  0xb7   :  { %v660_v55 = vpop.f32.mrf.mxu2 }
  0xb8   :  { %v661_v57 = vadd.f32 %v660_v55, %v89_v54  ;;  %v749_v58 = vpop.f32.mrf.mxu3  ;;  %v484_v59 = vpop.f32.mrf.mxu0 }
  0xb9   :  { %v573_v60 = vpop.f32.mrf.mxu1  ;;  %v485_v5 = vadd.f32 %v484_v59, %v90_v62  ;;  %v98_v59 = vld [vmem:[%s3871_s2 + $0x70] sm:$0xff]  ;;  %v1937_v62 = vld [vmem:[%s3870_s0 + $0xc0] sm:$0xf] }
  0xba   :  { %v2601_v61 = vadd.f32 %v749_v58, %v661_v57 }
  0xbb   :  { %v2626_v14 = vadd.f32 %v573_v60, %v485_v5 }
  0xbc   :  { %v830_v63 = vadd.f32 %v2601_v61, %v2599_v56 }
  0xbe   :  { %831 = vadd.xlane.f32.xlu1 %v830_v63  ;;  %v2120_v63 = vld [vmem:[%s3870_s0 + $0xc4] sm:$0xf0] }
  0xbf   :  { %v662_v6 = vpop.f32.mrf.mxu2  ;;  %v1938_v5 = vor.u32 %v2120_v63, %v1937_v62 }
  0xc0   :  { %v663_v8 = vadd.f32 %v662_v6, %v91_v2  ;;  %v751_v9 = vpop.f32.mrf.mxu3  ;;  %v487_v10 = vpop.f32.mrf.mxu0  ;;  %v1939_v2 = vld [vmem:[%s3870_s0 + $0xc8] sm:$0xf0] }
  0xc1   :  { %v576_v13 = vpop.f32.mrf.mxu1  ;;  %v488_v16 = vadd.f32 %v487_v10, %v92_v12  ;;  %v100_v10 = vld [vmem:[%s3871_s2 + $0x80] sm:$0xff] }
  0xc2   :  { %v2628_v15 = vadd.f32 %v751_v9, %v663_v8  ;;  %v1942_v9 = vor.u32 %v2119_v1, %v1939_v2  ;;  %v106_v2 = vld [vmem:[%s3871_s2 + $0xb0] sm:$0xff] }
  0xc3   :  { %526 = vmatmul.bf16.gmra.mxu0 %v1922_v7  ;;  %v2635_v20 = vadd.f32 %v576_v13, %v488_v16 }
  0xc4   :  { %615 = vmatmul.bf16.gmra.mxu1 %v1926_v11  ;;  %704 = vmatmul.bf16.gmra.mxu2 %v1922_v7  ;;  %v833_v17 = vadd.f32 %v2628_v15, %v2626_v14 }
  0xc5   :  { %793 = vmatmul.bf16.gmra.mxu3 %v1926_v11 }
  0xc6   :  { %834 = vadd.xlane.f32.xlu1 %v833_v17 }
  0xc7   :  { %v665_v19 = vpop.f32.mrf.mxu2 }
  0xc8   :  { %v666_v21 = vadd.f32 %v665_v19, %v93_v18  ;;  %v754_v22 = vpop.f32.mrf.mxu3  ;;  %v489_v23 = vpop.f32.mrf.mxu0  ;;  %v101_v18 = vld [vmem:[%s3871_s2 + $0x88] sm:$0xff] }
  0xc9   :  { %v578_v24 = vpop.f32.mrf.mxu1  ;;  %v490_v35 = vadd.f32 %v489_v23, %v94_v26 }
  0xca   :  { %v2637_v25 = vadd.f32 %v754_v22, %v666_v21 }
  0xcb   :  { %v2662_v44 = vadd.f32 %v578_v24, %v490_v35  ;;  %v2121_v35 = vld [vmem:[%s3870_s0 + $0xd4] sm:$0xf] }
  0xcc   :  { %v836_v27 = vadd.f32 %v2637_v25, %v2635_v20 }
  0xce   :  { %837 = vadd.xlane.f32.xlu2 %v836_v27 }
  0xcf   :  { %v667_v36 = vpop.f32.mrf.mxu2 }
  0xd0   :  { %v668_v38 = vadd.f32 %v667_v36, %v95_v31  ;;  %v756_v39 = vpop.f32.mrf.mxu3  ;;  %v492_v40 = vpop.f32.mrf.mxu0  ;;  %v1945_v31 = vld [vmem:[%s3870_s0 + $0xd0] sm:$0xf]  ;;  %v1947_v36 = vld [vmem:[%s3870_s0 + $0xd8] sm:$0xf0] }
  0xd1   :  { %v581_v43 = vpop.f32.mrf.mxu1  ;;  %v493_v46 = vadd.f32 %v492_v40, %v96_v42 }
  0xd2   :  { %v2664_v45 = vadd.f32 %v756_v39, %v668_v38  ;;  %v1946_v39 = vor.u32 %v2122_v32, %v1945_v31  ;;  %v109_v31 = vld [vmem:[%s3871_s2 + $0xc8] sm:$0xff]  ;;  %v2226_v32 = vmov 256.0  }
  0xd3   :  { %531 = vmatmul.bf16.gmra.mxu0 %v1930_v37  ;;  %v2671_v52 = vadd.f32 %v581_v43, %v493_v46  ;;  %v1950_v43 = vor.u32 %v2121_v35, %v1947_v36  ;;  %v104_v46 = vld [vmem:[%s3871_s2 + $0xa0] sm:$0xff]  ;;  %2160 = vrcp.f32 %v2226_v32  ;;  %v114_v32 = vld [vmem:[%s3871_s2 + $0xf0] sm:$0xff] }
  0xd4   :  { %620 = vmatmul.bf16.gmra.mxu1 %v1934_v41  ;;  %709 = vmatmul.bf16.gmra.mxu2 %v1930_v37  ;;  %v839_v47 = vadd.f32 %v2664_v45, %v2662_v44 }
  0xd5   :  { %798 = vmatmul.bf16.gmra.mxu3 %v1934_v41 }
  0xd6   :  { %840 = vadd.xlane.f32.xlu2 %v839_v47 }
  0xd7   :  { %v670_v49 = vpop.f32.mrf.mxu2 }
  0xd8   :  { %v671_v53 = vadd.f32 %v670_v49, %v97_v48  ;;  %v759_v54 = vpop.f32.mrf.mxu3  ;;  %v494_v55 = vpop.f32.mrf.mxu0 }
  0xd9   :  { %v583_v57 = vpop.f32.mrf.mxu1  ;;  %v495_v3 = vadd.f32 %v494_v55, %v98_v59  ;;  %v105_v55 = vld [vmem:[%s3871_s2 + $0xa8] sm:$0xff] }
  0xda   :  { %v2673_v58 = vadd.f32 %v759_v54, %v671_v53 }
  0xdb   :  { %v2698_v12 = vadd.f32 %v583_v57, %v495_v3 }
  0xdc   :  { %v842_v60 = vadd.f32 %v2673_v58, %v2671_v52 }
  0xde   :  { %843 = vadd.xlane.f32.xlu0 %v842_v60 }
  0xdf   :  { %v672_v4 = vpop.f32.mrf.mxu2 }
  0xe0   :  { %v673_v6 = vadd.f32 %v672_v4, %v99_v0  ;;  %v761_v7 = vpop.f32.mrf.mxu3  ;;  %v497_v8 = vpop.f32.mrf.mxu0  ;;  %v1953_v4 = vld [vmem:[%s3870_s0 + $0xe0] sm:$0xf] }
  0xe1   :  { %v586_v11 = vpop.f32.mrf.mxu1  ;;  %v498_v16 = vadd.f32 %v497_v8, %v100_v10  ;;  %v1955_v8 = vld [vmem:[%s3870_s0 + $0xe8] sm:$0xf0] }
  0xe2   :  { %v2700_v13 = vadd.f32 %v761_v7, %v673_v6  ;;  %v107_v6 = vld [vmem:[%s3871_s2 + $0xb8] sm:$0xff]  ;;  %v2123_v7 = vld [vmem:[%s3870_s0 + $0xe4] sm:$0xf] }
  0xe3   :  { %536 = vmatmul.bf16.gmra.mxu0 %v1938_v5  ;;  %v2707_v21 = vadd.f32 %v586_v11, %v498_v16 }
  0xe4   :  { %625 = vmatmul.bf16.gmra.mxu1 %v1942_v9  ;;  %714 = vmatmul.bf16.gmra.mxu2 %v1938_v5  ;;  %v845_v17 = vadd.f32 %v2700_v13, %v2698_v12  ;;  %v2124_v5 = vld [vmem:[%s3870_s0 + $0xe4] sm:$0xf0] }
  0xe5   :  { %803 = vmatmul.bf16.gmra.mxu3 %v1942_v9  ;;  %v1954_v11 = vor.u32 %v2124_v5, %v1953_v4  ;;  %v112_v5 = vld [vmem:[%s3871_s2 + $0xe0] sm:$0xff] }
  0xe6   :  { %846 = vadd.xlane.f32.xlu1 %v845_v17 }
  0xe7   :  { %v675_v19 = vpop.f32.mrf.mxu2 }
  0xe8   :  { %v676_v22 = vadd.f32 %v675_v19, %v101_v18  ;;  %v764_v23 = vpop.f32.mrf.mxu3  ;;  %v499_v24 = vpop.f32.mrf.mxu0  ;;  %v1958_v19 = vor.u32 %v2123_v7, %v1955_v8 }
  0xe9   :  { %v588_v26 = vpop.f32.mrf.mxu1  ;;  %v500_v37 = vadd.f32 %v499_v24, %v102_v29 }
  0xea   :  { %v2709_v27 = vadd.f32 %v764_v23, %v676_v22  ;;  %v108_v22 = vld [vmem:[%s3871_s2 + $0xc0] sm:$0xff] }
  0xeb   :  { %v2734_v48 = vadd.f32 %v588_v26, %v500_v37 }
  0xec   :  { %v848_v30 = vadd.f32 %v2709_v27, %v2707_v21 }
  0xee   :  { %849 = vadd.xlane.f32.xlu2 %v848_v30 }
  0xef   :  { %v677_v38 = vpop.f32.mrf.mxu2 }
  0xf0   :  { %v678_v40 = vadd.f32 %v677_v38, %v103_v34  ;;  %v766_v41 = vpop.f32.mrf.mxu3  ;;  %v502_v42 = vpop.f32.mrf.mxu0 }
  0xf1   :  { %v591_v47 = vpop.f32.mrf.mxu1  ;;  %v503_v53 = vadd.f32 %v502_v42, %v104_v46  ;;  %v2161_v42 = vpop.eup %2160  ;;  %v1961_v46 = vld [vmem:[%s3870_s0 + $0xf0] sm:$0xf] }
  0xf2   :  { %v2736_v49 = vadd.f32 %v766_v41, %v678_v40  ;;  %v110_v41 = vld [vmem:[%s3871_s2 + $0xd0] sm:$0xff]  ;;  %vm925_vm0 = vweird.f32 %v2161_v42 }
  0xf3   :  { %541 = vmatmul.bf16.gmra.mxu0 %v1946_v39  ;;  %v2743_v59 = vadd.f32 %v591_v47, %v503_v53  ;;  %v2126_v47 = vld [vmem:[%s3870_s0 + $0xf4] sm:$0xf0] }
  0xf4   :  { %630 = vmatmul.bf16.gmra.mxu1 %v1950_v43  ;;  %719 = vmatmul.bf16.gmra.mxu2 %v1946_v39  ;;  %v851_v54 = vadd.f32 %v2736_v49, %v2734_v48  ;;  %v111_v53 = vld [vmem:[%s3871_s2 + $0xd8] sm:$0xff] }
  0xf5   :  { %808 = vmatmul.bf16.gmra.mxu3 %v1950_v43 }
  0xf6   :  { %852 = vadd.xlane.f32.xlu0 %v851_v54  ;;  %v2125_v54 = vld [vmem:[%s3870_s0 + $0xf4] sm:$0xf] }
  0xf7   :  { %v680_v57 = vpop.f32.mrf.mxu2 }
  0xf8   :  { %v681_v60 = vadd.f32 %v680_v57, %v105_v55  ;;  %v769_v62 = vpop.f32.mrf.mxu3  ;;  %v504_v63 = vpop.f32.mrf.mxu0  ;;  %v1963_v55 = vld [vmem:[%s3870_s0 + $0xf8] sm:$0xf0] }
  0xf9   :  { %v593_v0 = vpop.f32.mrf.mxu1  ;;  %v505_v9 = vadd.f32 %v504_v63, %v106_v2  ;;  %v921_v63 = vmul.f32 256.0, %v2161_v42  ;;  %v1966_v4 = vor.u32 %v2125_v54, %v1963_v55 }
  0xfa   :  { %v2745_v1 = vadd.f32 %v769_v62, %v681_v60  ;;  %v1962_v62 = vor.u32 %v2126_v47, %v1961_v46 }
  0xfb   :  { %v2770_v24 = vadd.f32 %v593_v0, %v505_v9  ;;  %v922_v9 = vsub.f32 1.0, %v921_v63 }
  0xfc   :  { %v854_v3 = vadd.f32 %v2745_v1, %v2743_v59 }
  0xfe   :  { %855 = vadd.xlane.f32.xlu1 %v854_v3 }
  0xff   :  { %v682_v10 = vpop.f32.mrf.mxu2 }
 0x100   :  { %v683_v16 = vadd.f32 %v682_v10, %v107_v6  ;;  %v771_v17 = vpop.f32.mrf.mxu3  ;;  %v507_v18 = vpop.f32.mrf.mxu0 }
 0x101   :  { %v596_v23 = vpop.f32.mrf.mxu1  ;;  %v508_v29 = vadd.f32 %v507_v18, %v108_v22  ;;  %v923_v18 = vmul.f32 %v2161_v42, %v922_v9 }
 0x102   :  { %v2772_v26 = vadd.f32 %v771_v17, %v683_v16  ;;  %v113_v16 = vld [vmem:[%s3871_s2 + $0xe8] sm:$0xff] }
 0x103   :  { %546 = vmatmul.bf16.gmra.mxu0 %v1954_v11  ;;  %v2779_v35 = vadd.f32 %v596_v23, %v508_v29 }
 0x104   :  { %635 = vmatmul.bf16.gmra.mxu1 %v1958_v19  ;;  %724 = vmatmul.bf16.gmra.mxu2 %v1954_v11  ;;  %v857_v30 = vadd.f32 %v2772_v26, %v2770_v24 }
 0x105   :  { %813 = vmatmul.bf16.gmra.mxu3 %v1958_v19 }
 0x106   :  { %858 = vadd.xlane.f32.xlu2 %v857_v30 }
 0x107   :  { %v685_v34 = vpop.f32.mrf.mxu2 }
 0x108   :  { %v686_v36 = vadd.f32 %v685_v34, %v109_v31  ;;  %v774_v37 = vpop.f32.mrf.mxu3  ;;  %v509_v38 = vpop.f32.mrf.mxu0  ;;  %v924_v34 = vadd.f32 %v2161_v42, %v923_v18 }
 0x109   :  { %v598_v39 = vpop.f32.mrf.mxu1  ;;  %v510_v57 = vadd.f32 %v509_v38, %v110_v41 }
 0x10a   :  { %v2781_v40 = vadd.f32 %v774_v37, %v686_v36  ;;  %v115_v37 = vld [vmem:[%s3871_s2 + $0xf8] sm:$0xff]  ;;  %v2827_v41 = vsel %vm925_vm0, %v2161_v42, %v924_v34 }
 0x10b   :  { %v2806_v7 = vadd.f32 %v598_v39, %v510_v57  ;;  %v119_v34 = vld [vmem:[%s3871_s2 + $0x118] sm:$0xff] }
 0x10c   :  { %v860_v43 = vadd.f32 %v2781_v40, %v2779_v35 }
 0x10e   :  { %861 = vadd.xlane.f32.xlu0 %v860_v43 }
 0x10f   :  { %v687_v60 = vpop.f32.mrf.mxu2 }
 0x110   :  { %v688_v0 = vadd.f32 %v687_v60, %v111_v53  ;;  %v776_v2 = vpop.f32.mrf.mxu3  ;;  %v512_v3 = vpop.f32.mrf.mxu0  ;;  %v116_v53 = vld [vmem:[%s3871_s2 + $0x100] sm:$0xff] }
 0x111   :  { %v601_v6 = vpop.f32.mrf.mxu1  ;;  %v513_v10 = vadd.f32 %v512_v3, %v112_v5  ;;  %v117_v3 = vld [vmem:[%s3871_s2 + $0x108] sm:$0xff] }
 0x112   :  { %v2808_v8 = vadd.f32 %v776_v2, %v688_v0 }
 0x113   :  { %551 = vmatmul.bf16.gmra.mxu0 %v1962_v62  ;;  %v2815_v19 = vadd.f32 %v601_v6, %v513_v10 }
 0x114   :  { %640 = vmatmul.bf16.gmra.mxu1 %v1966_v4  ;;  %729 = vmatmul.bf16.gmra.mxu2 %v1962_v62  ;;  %v863_v11 = vadd.f32 %v2808_v8, %v2806_v7 }
 0x115   :  { %818 = vmatmul.bf16.gmra.mxu3 %v1966_v4 }
 0x116   :  { %864 = vadd.xlane.f32.xlu1 %v863_v11 }
 0x117   :  { %v690_v17 = vpop.f32.mrf.mxu2 }
 0x118   :  { %v691_v22 = vadd.f32 %v690_v17, %v113_v16  ;;  %v779_v23 = vpop.f32.mrf.mxu3  ;;  %v514_v29 = vpop.f32.mrf.mxu0 }
 0x119   :  { %v603_v30 = vpop.f32.mrf.mxu1  ;;  %v515_v38 = vadd.f32 %v514_v29, %v114_v32 }
 0x11a   :  { %v2817_v31 = vadd.f32 %v779_v23, %v691_v22  ;;  %v118_v23 = vld [vmem:[%s3871_s2 + $0x110] sm:$0xff] }
 0x11b   :  { %v2832_v57 = vadd.f32 %v603_v30, %v515_v38 }
 0x11c   :  { %v866_v36 = vadd.f32 %v2817_v31, %v2815_v19 }
 0x11e   :  { %867 = vadd.xlane.f32.xlu2 %v866_v36 }
 0x11f   :  { %v692_v39 = vpop.f32.mrf.mxu2 }
 0x120   :  { %v693_v43 = vadd.f32 %v692_v39, %v115_v37  ;;  %v781_v46 = vpop.f32.mrf.mxu3  ;;  %v517_v47 = vpop.f32.mrf.mxu0 }
 0x121   :  { %v606_v54 = vpop.f32.mrf.mxu1  ;;  %v826_v55 = vpop.xlane.xlu0 %825  ;;  %v518_v63 = vadd.f32 %v517_v47, %v116_v53  ;;  %v120_v47 = vld [vmem:[%s3871_s2 + $0x120] sm:$0xff] }
 0x122   :  { %v2834_v60 = vadd.f32 %v781_v46, %v693_v43  ;;  %v927_v62 = vmul.f32 %v2827_v41, %v826_v55 }
 0x124   :  { %v2838_v0 = vsub.f32 %v2563_v28, %v927_v62  ;;  %v2841_v42 = vsub.f32 %v2565_v33, %v927_v62  ;;  %v869_v2 = vadd.f32 %v2834_v60, %v2832_v57  ;;  %v2852_v28 = vadd.f32 %v606_v54, %v518_v63 }
 0x126   :  { %870 = vadd.xlane.f32.xlu0 %v869_v2  ;;  %v1023_v4 = vmul.f32 %v2838_v0, %v2838_v0  ;;  %v1024_v5 = vmul.f32 %v2841_v42, %v2841_v42 }
 0x127   :  { %v695_v6 = vpop.f32.mrf.mxu2 }
 0x128   :  { %v696_v9 = vadd.f32 %v695_v6, %v117_v3  ;;  %v784_v33 = vpop.f32.mrf.mxu3  ;;  %v519_v10 = vpop.f32.mrf.mxu0  ;;  %v1087_v11 = vadd.f32 %v1024_v5, %v1023_v4  ;;  %v121_v6 = vld [vmem:[%s3871_s2 + $0x128] sm:$0xff] }
 0x129   :  { %v608_v16 = vpop.f32.mrf.mxu1  ;;  %v829_v17 = vpop.xlane.xlu0 %828  ;;  %v520_v36 = vadd.f32 %v519_v10, %v118_v23 }
 0x12a   :  { %v2854_v18 = vadd.f32 %v784_v33, %v696_v9  ;;  %v928_v22 = vmul.f32 %v2827_v41, %v829_v17  ;;  %1088 = vadd.xlane.f32.xlu2 %v1087_v11 }
 0x12b   :  { %v2878_v55 = vadd.f32 %v608_v16, %v520_v36  ;;  %v122_v36 = vld [vmem:[%s3871_s2 + $0x130] sm:$0xff] }
 0x12c   :  { %v2861_v29 = vsub.f32 %v2590_v50, %v928_v22  ;;  %v2864_v30 = vsub.f32 %v2592_v51, %v928_v22  ;;  %v872_v32 = vadd.f32 %v2854_v18, %v2852_v28 }
 0x12e   :  { %873 = vadd.xlane.f32.xlu1 %v872_v32  ;;  %v1025_v37 = vmul.f32 %v2861_v29, %v2861_v29  ;;  %v1026_v38 = vmul.f32 %v2864_v30, %v2864_v30 }
 0x12f   :  { %v697_v50 = vpop.f32.mrf.mxu2 }
 0x130   :  { %v698_v39 = vadd.f32 %v697_v50, %v119_v34  ;;  %v786_v43 = vpop.f32.mrf.mxu3  ;;  %v522_v51 = vpop.f32.mrf.mxu0  ;;  %v1090_v46 = vadd.f32 %v1026_v38, %v1025_v37 }
 0x131   :  { %v611_v53 = vpop.f32.mrf.mxu1  ;;  %v832_v54 = vpop.xlane.xlu1 %831  ;;  %v523_v2 = vadd.f32 %v522_v51, %v120_v47 }
 0x132   :  { %v2880_v62 = vadd.f32 %v786_v43, %v698_v39  ;;  %v929_v63 = vmul.f32 %v2827_v41, %v832_v54  ;;  %1091 = vadd.xlane.f32.xlu0 %v1090_v46  ;;  %v123_v39 = vld [vmem:[%s3871_s2 + $0x138] sm:$0xff] }
 0x134   :  { %v2884_v3 = vsub.f32 %v2599_v56, %v929_v63  ;;  %v2887_v4 = vsub.f32 %v2601_v61, %v929_v63  ;;  %v875_v5 = vadd.f32 %v2880_v62, %v2878_v55  ;;  %v2898_v56 = vadd.f32 %v611_v53, %v523_v2  ;;  %v124_v63 = vld [vmem:[%s3871_s2 + $0x140] sm:$0xff] }
 0x136   :  { %876 = vadd.xlane.f32.xlu2 %v875_v5  ;;  %v1027_v9 = vmul.f32 %v2884_v3, %v2884_v3  ;;  %v1028_v33 = vmul.f32 %v2887_v4, %v2887_v4 }
 0x137   :  { %v700_v10 = vpop.f32.mrf.mxu2 }
 0x138   :  { %v701_v11 = vadd.f32 %v700_v10, %v121_v6  ;;  %v789_v61 = vpop.f32.mrf.mxu3  ;;  %v524_v16 = vpop.f32.mrf.mxu0  ;;  %v1093_v17 = vadd.f32 %v1028_v33, %v1027_v9 }
 0x139   :  { %v613_v22 = vpop.f32.mrf.mxu1  ;;  %v835_v23 = vpop.xlane.xlu1 %834  ;;  %v525_v43 = vadd.f32 %v524_v16, %v122_v36 }
 0x13a   :  { %v2900_v32 = vadd.f32 %v789_v61, %v701_v11  ;;  %v930_v34 = vmul.f32 %v2827_v41, %v835_v23  ;;  %1094 = vadd.xlane.f32.xlu1 %v1093_v17  ;;  %v125_v17 = vld [vmem:[%s3871_s2 + $0x148] sm:$0xff] }
 0x13b   :  { %v2924_v6 = vadd.f32 %v613_v22, %v525_v43 }
 0x13c   :  { %v2907_v37 = vsub.f32 %v2626_v14, %v930_v34  ;;  %v2910_v38 = vsub.f32 %v2628_v15, %v930_v34  ;;  %v878_v50 = vadd.f32 %v2900_v32, %v2898_v56 }
 0x13e   :  { %879 = vadd.xlane.f32.xlu0 %v878_v50  ;;  %v1029_v51 = vmul.f32 %v2907_v37, %v2907_v37  ;;  %v1030_v46 = vmul.f32 %v2910_v38, %v2910_v38 }
 0x13f   :  { %v702_v14 = vpop.f32.mrf.mxu2 }
 0x140   :  { %v703_v47 = vadd.f32 %v702_v14, %v123_v39  ;;  %v791_v53 = vpop.f32.mrf.mxu3  ;;  %v527_v15 = vpop.f32.mrf.mxu0  ;;  %v1096_v54 = vadd.f32 %v1030_v46, %v1029_v51 }
 0x141   :  { %v616_v2 = vpop.f32.mrf.mxu1  ;;  %v838_v5 = vpop.xlane.xlu2 %837  ;;  %v528_v10 = vadd.f32 %v527_v15, %v124_v63  ;;  %v127_v63 = vld [vmem:[%s3871_s2 + $0x158] sm:$0xff] }
 0x142   :  { %v2926_v9 = vadd.f32 %v791_v53, %v703_v47  ;;  %v931_v33 = vmul.f32 %v2827_v41, %v838_v5  ;;  %1097 = vadd.xlane.f32.xlu2 %v1096_v54  ;;  %v126_v47 = vld [vmem:[%s3871_s2 + $0x150] sm:$0xff] }
 0x144   :  { %v2930_v11 = vsub.f32 %v2635_v20, %v931_v33  ;;  %v2933_v61 = vsub.f32 %v2637_v25, %v931_v33  ;;  %v881_v16 = vadd.f32 %v2926_v9, %v2924_v6  ;;  %v2944_v20 = vadd.f32 %v616_v2, %v528_v10 }
 0x146   :  { %882 = vadd.xlane.f32.xlu1 %v881_v16  ;;  %v1031_v22 = vmul.f32 %v2930_v11, %v2930_v11  ;;  %v1032_v23 = vmul.f32 %v2933_v61, %v2933_v61 }
 0x147   :  { %v705_v34 = vpop.f32.mrf.mxu2 }
 0x148   :  { %v706_v36 = vadd.f32 %v705_v34, %v125_v17  ;;  %v794_v25 = vpop.f32.mrf.mxu3  ;;  %v529_v50 = vpop.f32.mrf.mxu0  ;;  %v1099_v39 = vadd.f32 %v1032_v23, %v1031_v22  ;;  %v128_v22 = vld [vmem:[%s3871_s2 + $0x160] sm:$0xff] }
 0x149   :  { %v618_v43 = vpop.f32.mrf.mxu1  ;;  %v841_v51 = vpop.xlane.xlu2 %840  ;;  %v530_v2 = vadd.f32 %v529_v50, %v126_v47 }
 0x14a   :  { %v2946_v46 = vadd.f32 %v794_v25, %v706_v36  ;;  %v932_v14 = vmul.f32 %v2827_v41, %v841_v51  ;;  %1100 = vadd.xlane.f32.xlu0 %v1099_v39 }
 0x14b   :  { %v2970_v36 = vadd.f32 %v618_v43, %v530_v2  ;;  %v129_v43 = vld [vmem:[%s3871_s2 + $0x168] sm:$0xff] }
 0x14c   :  { %v2953_v53 = vsub.f32 %v2662_v44, %v932_v14  ;;  %v2956_v15 = vsub.f32 %v2664_v45, %v932_v14  ;;  %v884_v54 = vadd.f32 %v2946_v46, %v2944_v20 }
 0x14e   :  { %885 = vadd.xlane.f32.xlu2 %v884_v54  ;;  %v1033_v5 = vmul.f32 %v2953_v53, %v2953_v53  ;;  %v1034_v33 = vmul.f32 %v2956_v15, %v2956_v15 }
 0x14f   :  { %v707_v44 = vpop.f32.mrf.mxu2 }
 0x150   :  { %v708_v10 = vadd.f32 %v707_v44, %v127_v63  ;;  %v796_v16 = vpop.f32.mrf.mxu3  ;;  %v532_v45 = vpop.f32.mrf.mxu0  ;;  %v1102_v17 = vadd.f32 %v1034_v33, %v1033_v5 }
 0x151   :  { %v621_v23 = vpop.f32.mrf.mxu1  ;;  %v844_v34 = vpop.xlane.xlu0 %843  ;;  %v533_v39 = vadd.f32 %v532_v45, %v128_v22  ;;  %v130_v22 = vld [vmem:[%s3871_s2 + $0x170] sm:$0xff] }
 0x152   :  { %v2972_v25 = vadd.f32 %v796_v16, %v708_v10  ;;  %v933_v50 = vmul.f32 %v2827_v41, %v844_v34  ;;  %1103 = vadd.xlane.f32.xlu1 %v1102_v17 }
 0x154   :  { %v2976_v51 = vsub.f32 %v2671_v52, %v933_v50  ;;  %v2979_v14 = vsub.f32 %v2673_v58, %v933_v50  ;;  %v887_v47 = vadd.f32 %v2972_v25, %v2970_v36  ;;  %v2990_v52 = vadd.f32 %v621_v23, %v533_v39  ;;  %v131_v39 = vld [vmem:[%s3871_s2 + $0x178] sm:$0xff] }
 0x156   :  { %888 = vadd.xlane.f32.xlu0 %v887_v47  ;;  %v1035_v54 = vmul.f32 %v2976_v51, %v2976_v51  ;;  %v1036_v63 = vmul.f32 %v2979_v14, %v2979_v14 }
 0x157   :  { %v710_v2 = vpop.f32.mrf.mxu2 }
 0x158   :  { %v711_v5 = vadd.f32 %v710_v2, %v129_v43  ;;  %v799_v58 = vpop.f32.mrf.mxu3  ;;  %v534_v33 = vpop.f32.mrf.mxu0  ;;  %v1105_v44 = vadd.f32 %v1036_v63, %v1035_v54 }
 0x159   :  { %v623_v10 = vpop.f32.mrf.mxu1  ;;  %v847_v16 = vpop.xlane.xlu1 %846  ;;  %v535_v47 = vadd.f32 %v534_v33, %v130_v22 }
 0x15a   :  { %v2992_v45 = vadd.f32 %v799_v58, %v711_v5  ;;  %v934_v17 = vmul.f32 %v2827_v41, %v847_v16  ;;  %1106 = vadd.xlane.f32.xlu2 %v1105_v44  ;;  %v132_v58 = vld [vmem:[%s3871_s2 + $0x180] sm:$0xff] }
 0x15c   :  { %v2999_v34 = vsub.f32 %v2698_v12, %v934_v17  ;;  %v3002_v23 = vsub.f32 %v2700_v13, %v934_v17  ;;  %v890_v50 = vadd.f32 %v2992_v45, %v2990_v52  ;;  %v3016_v17 = vadd.f32 %v623_v10, %v535_v47  ;;  %v133_v10 = vld [vmem:[%s3871_s2 + $0x188] sm:$0xff] }
 0x15e   :  { %3901 = vst [vmem:[#allocation2_spill] sm:$0xff] %v2999_v34  ;;  %891 = vadd.xlane.f32.xlu1 %v890_v50  ;;  %v1037_v43 = vmul.f32 %v2999_v34, %v2999_v34  ;;  %v1038_v54 = vmul.f32 %v3002_v23, %v3002_v23 }
 0x15f   :  { %3902 = vst [vmem:[#allocation3_spill] sm:$0xff] %v3002_v23  ;;  %v712_v12 = vpop.f32.mrf.mxu2 }
 0x160   :  { %v713_v63 = vadd.f32 %v712_v12, %v131_v39  ;;  %v801_v2 = vpop.f32.mrf.mxu3  ;;  %v537_v13 = vpop.f32.mrf.mxu0  ;;  %v1108_v5 = vadd.f32 %v1038_v54, %v1037_v43 }
 0x161   :  { %v626_v44 = vpop.f32.mrf.mxu1  ;;  %v850_v16 = vpop.xlane.xlu2 %849  ;;  %v538_v50 = vadd.f32 %v537_v13, %v132_v58 }
 0x162   :  { %v3018_v33 = vadd.f32 %v801_v2, %v713_v63  ;;  %v935_v22 = vmul.f32 %v2827_v41, %v850_v16  ;;  %1109 = vadd.xlane.f32.xlu0 %v1108_v5 }
 0x164   :  { %v3022_v23 = vsub.f32 %v2707_v21, %v935_v22  ;;  %v3025_v39 = vsub.f32 %v2709_v27, %v935_v22  ;;  %v893_v43 = vadd.f32 %v3018_v33, %v3016_v17  ;;  %v3036_v21 = vadd.f32 %v626_v44, %v538_v50 }
 0x166   :  { %3903 = vst [vmem:[#allocation4_spill] sm:$0xff] %v3022_v23  ;;  %894 = vadd.xlane.f32.xlu2 %v893_v43  ;;  %v1039_v47 = vmul.f32 %v3022_v23, %v3022_v23  ;;  %v1040_v54 = vmul.f32 %v3025_v39, %v3025_v39  ;;  %v134_v43 = vld [vmem:[%s3871_s2 + $0x190] sm:$0xff] }
 0x167   :  { %3904 = vst [vmem:[#allocation5_spill] sm:$0xff] %v3025_v39  ;;  %v715_v12 = vpop.f32.mrf.mxu2 }
 0x168   :  { %v716_v63 = vadd.f32 %v715_v12, %v133_v10  ;;  %v804_v27 = vpop.f32.mrf.mxu3  ;;  %v539_v2 = vpop.f32.mrf.mxu0  ;;  %v1111_v13 = vadd.f32 %v1040_v54, %v1039_v47  ;;  %v135_v10 = vld [vmem:[%s3871_s2 + $0x198] sm:$0xff] }
 0x169   :  { %v628_v5 = vpop.f32.mrf.mxu1  ;;  %v853_v58 = vpop.xlane.xlu0 %852  ;;  %v540_v47 = vadd.f32 %v539_v2, %v134_v43 }
 0x16a   :  { %v3038_v16 = vadd.f32 %v804_v27, %v716_v63  ;;  %v936_v22 = vmul.f32 %v2827_v41, %v853_v58  ;;  %1112 = vadd.xlane.f32.xlu1 %v1111_v13  ;;  %v136_v58 = vld [vmem:[%s3871_s2 + $0x1a0] sm:$0xff] }
 0x16b   :  { %v3062_v34 = vadd.f32 %v628_v5, %v540_v47  ;;  %v137_v5 = vld [vmem:[%s3871_s2 + $0x1a8] sm:$0xff] }
 0x16c   :  { %v3045_v39 = vsub.f32 %v2734_v48, %v936_v22  ;;  %v3048_v44 = vsub.f32 %v2736_v49, %v936_v22  ;;  %v896_v50 = vadd.f32 %v3038_v16, %v3036_v21 }
 0x16e   :  { %3905 = vst [vmem:[#allocation6_spill] sm:$0xff] %v3048_v44  ;;  %897 = vadd.xlane.f32.xlu0 %v896_v50  ;;  %v1041_v54 = vmul.f32 %v3045_v39, %v3045_v39  ;;  %v1042_v12 = vmul.f32 %v3048_v44, %v3048_v44 }
 0x16f   :  { %v717_v48 = vpop.f32.mrf.mxu2 }
 0x170   :  { %v718_v63 = vadd.f32 %v717_v48, %v135_v10  ;;  %v806_v27 = vpop.f32.mrf.mxu3  ;;  %v542_v49 = vpop.f32.mrf.mxu0  ;;  %v1114_v13 = vadd.f32 %v1042_v12, %v1041_v54 }
 0x171   :  { %v631_v22 = vpop.f32.mrf.mxu1  ;;  %v856_v23 = vpop.xlane.xlu1 %855  ;;  %v543_v50 = vadd.f32 %v542_v49, %v136_v58 }
 0x172   :  { %v3064_v2 = vadd.f32 %v806_v27, %v718_v63  ;;  %v937_v43 = vmul.f32 %v2827_v41, %v856_v23  ;;  %1115 = vadd.xlane.f32.xlu2 %v1114_v13 }
 0x174   :  { %v3068_v44 = vsub.f32 %v2743_v59, %v937_v43  ;;  %v3071_v10 = vsub.f32 %v2745_v1, %v937_v43  ;;  %v899_v54 = vadd.f32 %v3064_v2, %v3062_v34  ;;  %v3082_v59 = vadd.f32 %v631_v22, %v543_v50 }
 0x176   :  { %3906 = vst [vmem:[#allocation7_spill] sm:$0xff] %v3068_v44  ;;  %900 = vadd.xlane.f32.xlu1 %v899_v54  ;;  %v1043_v47 = vmul.f32 %v3068_v44, %v3068_v44  ;;  %v1044_v23 = vmul.f32 %v3071_v10, %v3071_v10  ;;  %v138_v54 = vld [vmem:[%s3871_s2 + $0x1b0] sm:$0xff] }
 0x177   :  { %3907 = vst [vmem:[#allocation8_spill] sm:$0xff] %v3071_v10  ;;  %v720_v12 = vpop.f32.mrf.mxu2 }
 0x178   :  { %v721_v48 = vadd.f32 %v720_v12, %v137_v5  ;;  %v809_v1 = vpop.f32.mrf.mxu3  ;;  %v544_v63 = vpop.f32.mrf.mxu0  ;;  %v1117_v27 = vadd.f32 %v1044_v23, %v1043_v47  ;;  %v139_v5 = vld [vmem:[%s3871_s2 + $0x1b8] sm:$0xff] }
 0x179   :  { %v633_v49 = vpop.f32.mrf.mxu1  ;;  %v859_v13 = vpop.xlane.xlu2 %858  ;;  %v545_v47 = vadd.f32 %v544_v63, %v138_v54 }
 0x17a   :  { %v3084_v58 = vadd.f32 %v809_v1, %v721_v48  ;;  %v938_v43 = vmul.f32 %v2827_v41, %v859_v13  ;;  %1118 = vadd.xlane.f32.xlu0 %v1117_v27  ;;  %v140_v13 = vld [vmem:[%s3871_s2 + $0x1c0] sm:$0xff] }
 0x17b   :  { %v3108_v44 = vadd.f32 %v633_v49, %v545_v47  ;;  %v141_v49 = vld [vmem:[%s3871_s2 + $0x1c8] sm:$0xff] }
 0x17c   :  { %v3091_v10 = vsub.f32 %v2770_v24, %v938_v43  ;;  %v3094_v22 = vsub.f32 %v2772_v26, %v938_v43  ;;  %v902_v50 = vadd.f32 %v3084_v58, %v3082_v59 }
 0x17e   :  { %3908 = vst [vmem:[#allocation9_spill] sm:$0xff] %v3091_v10  ;;  %903 = vadd.xlane.f32.xlu2 %v902_v50  ;;  %v1045_v23 = vmul.f32 %v3091_v10, %v3091_v10  ;;  %v1046_v12 = vmul.f32 %v3094_v22, %v3094_v22 }
 0x17f   :  { %3909 = vst [vmem:[#allocation10_spill] sm:$0xff] %v3094_v22  ;;  %v722_v24 = vpop.f32.mrf.mxu2 }
 0x180   :  { %v723_v48 = vadd.f32 %v722_v24, %v139_v5  ;;  %v811_v1 = vpop.f32.mrf.mxu3  ;;  %v547_v26 = vpop.f32.mrf.mxu0  ;;  %v1120_v27 = vadd.f32 %v1046_v12, %v1045_v23 }
 0x181   :  { %v862_v43 = vpop.xlane.xlu0 %861  ;;  %v636_v54 = vpop.f32.mrf.mxu1  ;;  %v548_v10 = vadd.f32 %v547_v26, %v140_v13 }
 0x182   :  { %v3110_v63 = vadd.f32 %v811_v1, %v723_v48  ;;  %v939_v50 = vmul.f32 %v2827_v41, %v862_v43  ;;  %1121 = vadd.xlane.f32.xlu1 %v1120_v27 }
 0x184   :  { %v3114_v22 = vsub.f32 %v2779_v35, %v939_v50  ;;  %v3117_v5 = vsub.f32 %v2781_v40, %v939_v50  ;;  %v905_v23 = vadd.f32 %v3110_v63, %v3108_v44  ;;  %v3128_v35 = vadd.f32 %v636_v54, %v548_v10  ;;  %v142_v50 = vld [vmem:[%s3871_s2 + $0x1d0] sm:$0xff] }
 0x186   :  { %3910 = vst [vmem:[#allocation11_spill] sm:$0xff] %v3114_v22  ;;  %906 = vadd.xlane.f32.xlu0 %v905_v23  ;;  %v1047_v47 = vmul.f32 %v3114_v22, %v3114_v22  ;;  %v1048_v12 = vmul.f32 %v3117_v5, %v3117_v5 }
 0x187   :  { %3911 = vst [vmem:[#allocation12_spill] sm:$0xff] %v3117_v5  ;;  %v725_v24 = vpop.f32.mrf.mxu2 }
 0x188   :  { %v726_v48 = vadd.f32 %v725_v24, %v141_v49  ;;  %v814_v40 = vpop.f32.mrf.mxu3  ;;  %v549_v1 = vpop.f32.mrf.mxu0  ;;  %v1123_v26 = vadd.f32 %v1048_v12, %v1047_v47  ;;  %v143_v49 = vld [vmem:[%s3871_s2 + $0x1d8] sm:$0xff] }
 0x189   :  { %v865_v27 = vpop.xlane.xlu1 %864  ;;  %v638_v23 = vpop.f32.mrf.mxu1  ;;  %v550_v47 = vadd.f32 %v549_v1, %v142_v50 }
 0x18a   :  { %v3130_v13 = vadd.f32 %v814_v40, %v726_v48  ;;  %v940_v43 = vmul.f32 %v2827_v41, %v865_v27  ;;  %1124 = vadd.xlane.f32.xlu2 %v1123_v26  ;;  %v144_v26 = vld [vmem:[%s3871_s2 + $0x1e0] sm:$0xff] }
 0x18c   :  { %3912 = vst [vmem:[#allocation13_spill] sm:$0xff] %v3130_v13  ;;  %v3137_v5 = vsub.f32 %v2806_v7, %v940_v43  ;;  %v3140_v10 = vsub.f32 %v2808_v8, %v940_v43  ;;  %v908_v54 = vadd.f32 %v3130_v13, %v3128_v35  ;;  %v3154_v43 = vadd.f32 %v638_v23, %v550_v47 }
 0x18e   :  { %3913 = vst [vmem:[#allocation14_spill] sm:$0xff] %v3137_v5  ;;  %909 = vadd.xlane.f32.xlu1 %v908_v54  ;;  %v1049_v12 = vmul.f32 %v3137_v5, %v3137_v5  ;;  %v1050_v24 = vmul.f32 %v3140_v10, %v3140_v10 }
 0x18f   :  { %3914 = vst [vmem:[#allocation15_spill] sm:$0xff] %v3140_v10  ;;  %v727_v7 = vpop.f32.mrf.mxu2 }
 0x190   :  { %v728_v48 = vadd.f32 %v727_v7, %v143_v49  ;;  %v816_v40 = vpop.f32.mrf.mxu3  ;;  %v1126_v8 = vadd.f32 %v1050_v24, %v1049_v12  ;;  %v552_v27 = vpop.f32.mrf.mxu0  ;;  %3915 = vst [vmem:[#allocation16_spill] sm:$0xff] %v3154_v43  ;;  %v145_v49 = vld [vmem:[%s3871_s2 + $0x1e8] sm:$0xff] }
 0x191   :  { %v553_v1 = vadd.f32 %v552_v27, %v144_v26  ;;  %v868_v54 = vpop.xlane.xlu2 %867  ;;  %v641_v12 = vpop.f32.mrf.mxu1 }
 0x192   :  { %v3156_v22 = vadd.f32 %v816_v40, %v728_v48  ;;  %1127 = vadd.xlane.f32.xlu0 %v1126_v8  ;;  %v146_v8 = vld [vmem:[%s3871_s2 + $0x1f0] sm:$0xff] }
 0x193   :  { %v3163_v7 = vadd.f32 %v641_v12, %v553_v1 }
 0x194   :  { %3916 = vst [vmem:[#allocation17_spill] sm:$0xff] %v3156_v22  ;;  %v911_v50 = vadd.f32 %v3156_v22, %v3154_v43 }
 0x195   :  { %3917 = vst [vmem:[#allocation18_spill] sm:$0xff] %v3163_v7 }
 0x196   :  { %912 = vadd.xlane.f32.xlu2 %v911_v50 }
 0x197   :  { %v730_v24 = vpop.f32.mrf.mxu2 }
 0x198   :  { %v731_v10 = vadd.f32 %v730_v24, %v145_v49  ;;  %v819_v23 = vpop.f32.mrf.mxu3  ;;  %v554_v26 = vpop.f32.mrf.mxu0 }
 0x199   :  { %v871_v47 = vpop.xlane.xlu0 %870  ;;  %v555_v12 = vadd.f32 %v554_v26, %v146_v8 }
 0x19a   :  { %v3165_v48 = vadd.f32 %v819_v23, %v731_v10  ;;  %v942_v40 = vmul.f32 %v2827_v41, %v871_v47  ;;  %v147_v10 = vld [vmem:[%s3871_s2 + $0x1f8] sm:$0xff] }
 0x19c   :  { %3918 = vst [vmem:[#allocation19_spill] sm:$0xff] %v3165_v48  ;;  %v3172_v27 = vsub.f32 %v2832_v57, %v942_v40  ;;  %v3175_v50 = vsub.f32 %v2834_v60, %v942_v40  ;;  %v914_v1 = vadd.f32 %v3165_v48, %v3163_v7  ;;  %v941_v60 = vmul.f32 %v2827_v41, %v868_v54  ;;  %v643_v40 = vpop.f32.mrf.mxu1 }
 0x19d   :  { %v1089_v49 = vpop.xlane.xlu2 %1088  ;;  %v3188_v13 = vadd.f32 %v643_v40, %v555_v12 }
 0x19e   :  { %3919 = vst [vmem:[#allocation20_spill] sm:$0xff] %v3172_v27  ;;  %v1183_v24 = vmul.f32 %v1089_v49, %v2827_v41  ;;  %915 = vadd.xlane.f32.xlu0 %v914_v1  ;;  %v1053_v23 = vmul.f32 %v3172_v27, %v3172_v27  ;;  %v1054_v57 = vmul.f32 %v3175_v50, %v3175_v50 }
 0x19f   :  { %3920 = vst [vmem:[#allocation21_spill] sm:$0xff] %v3175_v50  ;;  %v732_v47 = vpop.f32.mrf.mxu2  ;;  %v3194_v1 = vsub.f32 %v2815_v19, %v941_v60  ;;  %v3197_v54 = vsub.f32 %v2817_v31, %v941_v60 }
 0x1a0   :  { %v1215_v5 = vadd.f32 1e-05, %v1183_v24  ;;  %v733_v48 = vadd.f32 %v732_v47, %v147_v10  ;;  %v1132_v7 = vadd.f32 %v1054_v57, %v1053_v23  ;;  %v821_v22 = vpop.f32.mrf.mxu3 }
 0x1a1   :  { %v874_v43 = vpop.xlane.xlu1 %873  ;;  %3921 = vst [vmem:[#allocation22_spill] sm:$0xff] %v3194_v1  ;;  %v1052_v24 = vmul.f32 %v3197_v54, %v3197_v54 }
 0x1a2   :  { %2162 = vrsqrt.f32 %v1215_v5  ;;  %v3190_v8 = vadd.f32 %v821_v22, %v733_v48  ;;  %v943_v26 = vmul.f32 %v2827_v41, %v874_v43  ;;  %1133 = vadd.xlane.f32.xlu2 %v1132_v7  ;;  %3922 = vst [vmem:[#allocation23_spill] sm:$0xff] %v3197_v54  ;;  %vm1253_vm2 = vweird.f32 %v1215_v5 }
 0x1a4   :  { %v3200_v49 = vsub.f32 %v2852_v28, %v943_v26  ;;  %v3203_v10 = vsub.f32 %v2854_v18, %v943_v26  ;;  %v917_v12 = vadd.f32 %v3190_v8, %v3188_v13  ;;  %v1051_v18 = vmul.f32 %v3194_v1, %v3194_v1 }
 0x1a5   :  { %v1092_v22 = vpop.xlane.xlu0 %1091 }
 0x1a6   :  { %3923 = vst [vmem:[#allocation24_spill] sm:$0xff] %v3200_v49  ;;  %v1184_v48 = vmul.f32 %v1092_v22, %v2827_v41  ;;  %918 = vadd.xlane.f32.xlu1 %v917_v12  ;;  %v1055_v19 = vmul.f32 %v3200_v49, %v3200_v49  ;;  %v1056_v31 = vmul.f32 %v3203_v10, %v3203_v10 }
 0x1a7   :  { %3924 = vst [vmem:[#allocation25_spill] sm:$0xff] %v3203_v10  ;;  %v1129_v12 = vadd.f32 %v1052_v24, %v1051_v18 }
 0x1a8   :  { %v2163_v43 = vpop.eup %2162  ;;  %v3212_v7 = vadd.f32 1e-05, %v1184_v48  ;;  %v1135_v28 = vadd.f32 %v1056_v31, %v1055_v19  ;;  %v1631_v19 = vld [vmem:[%s3872_s3] sm:$0x3] }
 0x1a9   :  { %v1248_v23 = vmul.f32 %v2163_v43, %v1215_v5  ;;  %v877_v57 = vpop.xlane.xlu2 %876  ;;  %vm1254_vm1 = vweird.f32 %v2163_v43 }
 0x1aa   :  { %2164 = vrsqrt.f32 %v3212_v7  ;;  %v944_v60 = vmul.f32 %v2827_v41, %v877_v57  ;;  %1136 = vadd.xlane.f32.xlu0 %v1135_v28  ;;  %v1701_v28 = vld [vmem:[%s3873_s4] sm:$0x3]  ;;  %v3239_v57 = vperm.slane %v1631_v19, 0  ;;  %vm1255_vm3 = vmor %vm1253_vm2, %vm1254_vm1  ;;  %vm1263_vm5 = vweird.f32 %v3212_v7 }
 0x1ab   :  { %v1249_v47 = vmul.f32 %v2163_v43, %v1248_v23 }
 0x1ac   :  { %v3221_v40 = vsub.f32 %v2878_v55, %v944_v60  ;;  %v3224_v26 = vsub.f32 %v2880_v62, %v944_v60 }
 0x1ad   :  { %v1250_v22 = vmul.f32 0.5, %v1249_v47  ;;  %v1095_v48 = vpop.xlane.xlu1 %1094 }
 0x1ae   :  { %3925 = vst [vmem:[#allocation26_spill] sm:$0xff] %v3221_v40  ;;  %v1185_v31 = vmul.f32 %v1095_v48, %v2827_v41  ;;  %1130 = vadd.xlane.f32.xlu1 %v1129_v12  ;;  %v1057_v55 = vmul.f32 %v3221_v40, %v3221_v40  ;;  %v1058_v62 = vmul.f32 %v3224_v26, %v3224_v26  ;;  %v3242_v48 = vperm.slane %v1631_v19, 1 }
 0x1af   :  { %3926 = vst [vmem:[#allocation27_spill] sm:$0xff] %v3224_v26  ;;  %v1251_v23 = vsub.f32 1.5, %v1250_v22  ;;  %v3244_v22 = vperm.slane %v1701_v28, 0  ;;  %v3248_v26 = vperm.slane %v1701_v28, 1 }
 0x1b0   :  { %v2165_v18 = vpop.eup %2164  ;;  %v3237_v24 = vadd.f32 1e-05, %v1185_v31  ;;  %v1138_v1 = vadd.f32 %v1058_v62, %v1057_v55 }
 0x1b1   :  { %v1252_v60 = vmul.f32 %v2163_v43, %v1251_v23  ;;  %v1258_v47 = vmul.f32 %v2165_v18, %v3212_v7  ;;  %v880_v12 = vpop.xlane.xlu0 %879  ;;  %vm1264_vm4 = vweird.f32 %v2165_v18 }
 0x1b2   :  { %2166 = vrsqrt.f32 %v3237_v24  ;;  %v945_v40 = vmul.f32 %v2827_v41, %v880_v12  ;;  %vm1265_vm6 = vmor %vm1263_vm5, %vm1264_vm4  ;;  %vm1273_vm8 = vweird.f32 %v3237_v24 }
 0x1b3   :  { %v1256_v31 = vsel %vm1255_vm3, %v2163_v43, %v1252_v60  ;;  %v1259_v54 = vmul.f32 %v2165_v18, %v1258_v47 }
 0x1b4   :  { %v1567_v23 = vmul.f32 %v1256_v31, %v2838_v0  ;;  %v1568_v5 = vmul.f32 %v1256_v31, %v2841_v42  ;;  %v3253_v10 = vsub.f32 %v2898_v56, %v945_v40  ;;  %v3256_v19 = vsub.f32 %v2900_v32, %v945_v40 }
 0x1b5   :  { %v1260_v49 = vmul.f32 0.5, %v1259_v54  ;;  %v1098_v50 = vpop.xlane.xlu2 %1097 }
 0x1b6   :  { %v1637_v27 = vmul.f32 %v3239_v57, %v1567_v23  ;;  %v1638_v28 = vmul.f32 %v3242_v48, %v1568_v5  ;;  %v1186_v43 = vmul.f32 %v1098_v50, %v2827_v41  ;;  %1139 = vadd.xlane.f32.xlu1 %v1138_v1  ;;  %v1059_v0 = vmul.f32 %v3253_v10, %v3253_v10 }
 0x1b7   :  { %v1261_v55 = vsub.f32 1.5, %v1260_v49  ;;  %v1060_v42 = vmul.f32 %v3256_v19, %v3256_v19 }
 0x1b8   :  { %v2167_v56 = vpop.eup %2166  ;;  %v1707_v32 = vadd.f32 %v3244_v22, %v1637_v27  ;;  %v1708_v54 = vadd.f32 %v3248_v26, %v1638_v28  ;;  %v3267_v40 = vadd.f32 1e-05, %v1186_v43 }
 0x1b9   :  { %v1262_v62 = vmul.f32 %v2165_v18, %v1261_v55  ;;  %v1268_v50 = vmul.f32 %v2167_v56, %v3237_v24  ;;  %v883_v1 = vpop.xlane.xlu1 %882  ;;  %v1141_v60 = vadd.f32 %v1060_v42, %v1059_v0  ;;  %vm1274_vm7 = vweird.f32 %v2167_v56 }
 0x1ba   :  { %1771 = vst [vmem:[%s3874_s5] sm:$0xff] %v1707_v32  ;;  %2168 = vrsqrt.f32 %v3267_v40  ;;  %v946_v27 = vmul.f32 %v2827_v41, %v883_v1  ;;  %vm1275_vm9 = vmor %vm1273_vm8, %vm1274_vm7  ;;  %vm1283_vm11 = vweird.f32 %v3267_v40 }
 0x1bb   :  { %1772 = vst [vmem:[%s3874_s5 + $0x8] sm:$0xff] %v1708_v54  ;;  %v1266_v49 = vsel %vm1265_vm6, %v2165_v18, %v1262_v62  ;;  %v1269_v47 = vmul.f32 %v2167_v56, %v1268_v50  ;;  %1142 = vadd.xlane.f32.xlu2 %v1141_v60 }
 0x1bc   :  { %v1569_v7 = vmul.f32 %v1266_v49, %v2861_v29  ;;  %v1570_v12 = vmul.f32 %v1266_v49, %v2864_v30  ;;  %v3282_v31 = vsub.f32 %v2924_v6, %v946_v27  ;;  %v3285_v23 = vsub.f32 %v2926_v9, %v946_v27 }
 0x1bd   :  { %v1270_v5 = vmul.f32 0.5, %v1269_v47  ;;  %v1101_v28 = vpop.xlane.xlu0 %1100 }
 0x1be   :  { %v1639_v43 = vmul.f32 %v3239_v57, %v1569_v7  ;;  %v1640_v0 = vmul.f32 %v3242_v48, %v1570_v12  ;;  %v1187_v18 = vmul.f32 %v1101_v28, %v2827_v41  ;;  %v1061_v55 = vmul.f32 %v3282_v31, %v3282_v31 }
 0x1bf   :  { %v1271_v29 = vsub.f32 1.5, %v1270_v5  ;;  %v1062_v30 = vmul.f32 %v3285_v23, %v3285_v23 }
 0x1c0   :  { %v2169_v6 = vpop.eup %2168  ;;  %v1709_v9 = vadd.f32 %v3244_v22, %v1639_v43  ;;  %v1710_v42 = vadd.f32 %v3248_v26, %v1640_v0  ;;  %v3296_v32 = vadd.f32 1e-05, %v1187_v18 }
 0x1c1   :  { %v1272_v54 = vmul.f32 %v2167_v56, %v1271_v29  ;;  %v1278_v62 = vmul.f32 %v2169_v6, %v3267_v40  ;;  %v886_v50 = vpop.xlane.xlu2 %885  ;;  %v1144_v1 = vadd.f32 %v1062_v30, %v1061_v55  ;;  %vm1284_vm10 = vweird.f32 %v2169_v6 }
 0x1c2   :  { %1773 = vst [vmem:[%s3874_s5 + $0x10] sm:$0xff] %v1709_v9  ;;  %2170 = vrsqrt.f32 %v3296_v32  ;;  %v947_v60 = vmul.f32 %v2827_v41, %v886_v50  ;;  %vm1285_vm12 = vmor %vm1283_vm11, %vm1284_vm10  ;;  %vm1293_vm14 = vweird.f32 %v3296_v32 }
 0x1c3   :  { %1774 = vst [vmem:[%s3874_s5 + $0x18] sm:$0xff] %v1710_v42  ;;  %v1276_v27 = vsel %vm1275_vm9, %v2167_v56, %v1272_v54  ;;  %v1279_v49 = vmul.f32 %v2169_v6, %v1278_v62  ;;  %1145 = vadd.xlane.f32.xlu0 %v1144_v1 }
 0x1c4   :  { %v1571_v24 = vmul.f32 %v1276_v27, %v2884_v3  ;;  %v1572_v47 = vmul.f32 %v1276_v27, %v2887_v4  ;;  %v3311_v7 = vsub.f32 %v2944_v20, %v947_v60  ;;  %v3314_v12 = vsub.f32 %v2946_v46, %v947_v60 }
 0x1c5   :  { %v1280_v5 = vmul.f32 0.5, %v1279_v49  ;;  %v1104_v28 = vpop.xlane.xlu1 %1103 }
 0x1c6   :  { %v1641_v43 = vmul.f32 %v3239_v57, %v1571_v24  ;;  %v1642_v0 = vmul.f32 %v3242_v48, %v1572_v47  ;;  %v1188_v56 = vmul.f32 %v1104_v28, %v2827_v41  ;;  %v1063_v18 = vmul.f32 %v3311_v7, %v3311_v7 }
 0x1c7   :  { %v1281_v3 = vsub.f32 1.5, %v1280_v5  ;;  %v1064_v4 = vmul.f32 %v3314_v12, %v3314_v12 }
 0x1c8   :  { %v2171_v20 = vpop.eup %2170  ;;  %v1711_v46 = vadd.f32 %v3244_v22, %v1641_v43  ;;  %v1712_v55 = vadd.f32 %v3248_v26, %v1642_v0  ;;  %v3325_v29 = vadd.f32 1e-05, %v1188_v56 }
 0x1c9   :  { %v1282_v30 = vmul.f32 %v2169_v6, %v1281_v3  ;;  %v1288_v9 = vmul.f32 %v2171_v20, %v3296_v32  ;;  %v889_v42 = vpop.xlane.xlu0 %888  ;;  %v1147_v54 = vadd.f32 %v1064_v4, %v1063_v18  ;;  %vm1294_vm13 = vweird.f32 %v2171_v20 }
 0x1ca   :  { %1775 = vst [vmem:[%s3874_s5 + $0x20] sm:$0xff] %v1711_v46  ;;  %2172 = vrsqrt.f32 %v3325_v29  ;;  %v948_v62 = vmul.f32 %v2827_v41, %v889_v42  ;;  %vm1295_vm15 = vmor %vm1293_vm14, %vm1294_vm13  ;;  %vm1303_vm1 = vweird.f32 %v3325_v29 }
 0x1cb   :  { %1776 = vst [vmem:[%s3874_s5 + $0x28] sm:$0xff] %v1712_v55  ;;  %v1286_v50 = vsel %vm1285_vm12, %v2169_v6, %v1282_v30  ;;  %v1289_v1 = vmul.f32 %v2171_v20, %v1288_v9  ;;  %1148 = vadd.xlane.f32.xlu1 %v1147_v54 }
 0x1cc   :  { %v1573_v40 = vmul.f32 %v1286_v50, %v2907_v37  ;;  %v1574_v60 = vmul.f32 %v1286_v50, %v2910_v38  ;;  %v3340_v27 = vsub.f32 %v2970_v36, %v948_v62  ;;  %v3343_v49 = vsub.f32 %v2972_v25, %v948_v62 }
 0x1cd   :  { %v1290_v24 = vmul.f32 0.5, %v1289_v1  ;;  %v1107_v47 = vpop.xlane.xlu2 %1106 }
 0x1ce   :  { %v1643_v5 = vmul.f32 %v3239_v57, %v1573_v40  ;;  %v1644_v28 = vmul.f32 %v3242_v48, %v1574_v60  ;;  %v1189_v6 = vmul.f32 %v1107_v47, %v2827_v41  ;;  %v1065_v43 = vmul.f32 %v3340_v27, %v3340_v27 }
 0x1cf   :  { %v1291_v37 = vsub.f32 1.5, %v1290_v24  ;;  %v1066_v38 = vmul.f32 %v3343_v49, %v3343_v49 }
 0x1d0   :  { %v2173_v36 = vpop.eup %2172  ;;  %v1713_v25 = vadd.f32 %v3244_v22, %v1643_v5  ;;  %v1714_v0 = vadd.f32 %v3248_v26, %v1644_v28  ;;  %v3354_v56 = vadd.f32 1e-05, %v1189_v6 }
 0x1d1   :  { %v1292_v18 = vmul.f32 %v2171_v20, %v1291_v37  ;;  %v1298_v3 = vmul.f32 %v2173_v36, %v3325_v29  ;;  %v892_v4 = vpop.xlane.xlu1 %891  ;;  %v1150_v46 = vadd.f32 %v1066_v38, %v1065_v43  ;;  %vm1304_vm0 = vweird.f32 %v2173_v36 }
 0x1d2   :  { %1777 = vst [vmem:[%s3874_s5 + $0x30] sm:$0xff] %v1713_v25  ;;  %2174 = vrsqrt.f32 %v3354_v56  ;;  %v949_v55 = vmul.f32 %v2827_v41, %v892_v4  ;;  %vm1305_vm2 = vmor %vm1303_vm1, %vm1304_vm0  ;;  %vm1313_vm4 = vweird.f32 %v3354_v56 }
 0x1d3   :  { %1778 = vst [vmem:[%s3874_s5 + $0x38] sm:$0xff] %v1714_v0  ;;  %v1296_v30 = vsel %vm1295_vm15, %v2171_v20, %v1292_v18  ;;  %v1299_v9 = vmul.f32 %v2173_v36, %v1298_v3  ;;  %1151 = vadd.xlane.f32.xlu2 %v1150_v46 }
 0x1d4   :  { %v1575_v32 = vmul.f32 %v1296_v30, %v2930_v11  ;;  %v1576_v42 = vmul.f32 %v1296_v30, %v2933_v61  ;;  %v3369_v54 = vsub.f32 %v2990_v52, %v949_v55  ;;  %v3372_v62 = vsub.f32 %v2992_v45, %v949_v55 }
 0x1d5   :  { %v1300_v50 = vmul.f32 0.5, %v1299_v9  ;;  %v1110_v1 = vpop.xlane.xlu0 %1109 }
 0x1d6   :  { %v1645_v40 = vmul.f32 %v3239_v57, %v1575_v32  ;;  %v1646_v60 = vmul.f32 %v3242_v48, %v1576_v42  ;;  %v1190_v20 = vmul.f32 %v1110_v1, %v2827_v41  ;;  %v1067_v24 = vmul.f32 %v3369_v54, %v3369_v54 }
 0x1d7   :  { %v1301_v11 = vsub.f32 1.5, %v1300_v50  ;;  %v1068_v61 = vmul.f32 %v3372_v62, %v3372_v62 }
 0x1d8   :  { %v2175_v52 = vpop.eup %2174  ;;  %v1715_v45 = vadd.f32 %v3244_v22, %v1645_v40  ;;  %v1716_v47 = vadd.f32 %v3248_v26, %v1646_v60  ;;  %v3383_v5 = vadd.f32 1e-05, %v1190_v20 }
 0x1d9   :  { %v1302_v28 = vmul.f32 %v2173_v36, %v1301_v11  ;;  %v1308_v6 = vmul.f32 %v2175_v52, %v3354_v56  ;;  %v895_v43 = vpop.xlane.xlu2 %894  ;;  %v1153_v37 = vadd.f32 %v1068_v61, %v1067_v24  ;;  %vm1314_vm3 = vweird.f32 %v2175_v52 }
 0x1da   :  { %1779 = vst [vmem:[%s3874_s5 + $0x40] sm:$0xff] %v1715_v45  ;;  %2176 = vrsqrt.f32 %v3383_v5  ;;  %v950_v38 = vmul.f32 %v2827_v41, %v895_v43  ;;  %vm1315_vm5 = vmor %vm1313_vm4, %vm1314_vm3  ;;  %vm1323_vm7 = vweird.f32 %v3383_v5 }
 0x1db   :  { %1780 = vst [vmem:[%s3874_s5 + $0x48] sm:$0xff] %v1716_v47  ;;  %v1306_v25 = vsel %vm1305_vm2, %v2173_v36, %v1302_v28  ;;  %v1309_v0 = vmul.f32 %v2175_v52, %v1308_v6  ;;  %1154 = vadd.xlane.f32.xlu0 %v1153_v37 }
 0x1dc   :  { %v1577_v29 = vmul.f32 %v1306_v25, %v2953_v53  ;;  %v1578_v18 = vmul.f32 %v1306_v25, %v2956_v15  ;;  %v3398_v3 = vsub.f32 %v3016_v17, %v950_v38  ;;  %v3401_v4 = vsub.f32 %v3018_v33, %v950_v38 }
 0x1dd   :  { %v1310_v46 = vmul.f32 0.5, %v1309_v0  ;;  %v1113_v55 = vpop.xlane.xlu1 %1112 }
 0x1de   :  { %v1647_v30 = vmul.f32 %v3239_v57, %v1577_v29  ;;  %v1648_v9 = vmul.f32 %v3242_v48, %v1578_v18  ;;  %v1191_v36 = vmul.f32 %v1113_v55, %v2827_v41  ;;  %v1069_v32 = vmul.f32 %v3398_v3, %v3398_v3 }
 0x1df   :  { %v1311_v53 = vsub.f32 1.5, %v1310_v46  ;;  %v1070_v15 = vmul.f32 %v3401_v4, %v3401_v4 }
 0x1e0   :  { %v2177_v17 = vpop.eup %2176  ;;  %v1717_v33 = vadd.f32 %v3244_v22, %v1647_v30  ;;  %v1718_v42 = vadd.f32 %v3248_v26, %v1648_v9  ;;  %v3412_v50 = vadd.f32 1e-05, %v1191_v36 }
 0x1e1   :  { %v1312_v1 = vmul.f32 %v2175_v52, %v1311_v53  ;;  %v1318_v40 = vmul.f32 %v2177_v17, %v3383_v5  ;;  %v898_v60 = vpop.xlane.xlu0 %897  ;;  %v1156_v20 = vadd.f32 %v1070_v15, %v1069_v32  ;;  %vm1324_vm6 = vweird.f32 %v2177_v17  ;;  %v3927_v5 = vld [vmem:[#allocation2_spill] sm:$0xff]  ;;  %v3928_v15 = vld [vmem:[#allocation3_spill] sm:$0xff] }
 0x1e2   :  { %1781 = vst [vmem:[%s3874_s5 + $0x50] sm:$0xff] %v1717_v33  ;;  %2178 = vrsqrt.f32 %v3412_v50  ;;  %v951_v24 = vmul.f32 %v2827_v41, %v898_v60  ;;  %vm1325_vm8 = vmor %vm1323_vm7, %vm1324_vm6  ;;  %vm1333_vm10 = vweird.f32 %v3412_v50 }
 0x1e3   :  { %1782 = vst [vmem:[%s3874_s5 + $0x58] sm:$0xff] %v1718_v42  ;;  %v1316_v11 = vsel %vm1315_vm5, %v2175_v52, %v1312_v1  ;;  %v1319_v61 = vmul.f32 %v2177_v17, %v1318_v40  ;;  %1157 = vadd.xlane.f32.xlu1 %v1156_v20 }
 0x1e4   :  { %v1579_v56 = vmul.f32 %v1316_v11, %v2976_v51  ;;  %v1580_v45 = vmul.f32 %v1316_v11, %v2979_v14  ;;  %v3427_v47 = vsub.f32 %v3036_v21, %v951_v24  ;;  %v3430_v28 = vsub.f32 %v3038_v16, %v951_v24 }
 0x1e5   :  { %v1320_v6 = vmul.f32 0.5, %v1319_v61  ;;  %v1116_v43 = vpop.xlane.xlu2 %1115 }
 0x1e6   :  { %v1649_v37 = vmul.f32 %v3239_v57, %v1579_v56  ;;  %v1650_v38 = vmul.f32 %v3242_v48, %v1580_v45  ;;  %v1192_v52 = vmul.f32 %v1116_v43, %v2827_v41  ;;  %v1071_v25 = vmul.f32 %v3427_v47, %v3427_v47 }
 0x1e7   :  { %v1321_v51 = vsub.f32 1.5, %v1320_v6  ;;  %v1072_v14 = vmul.f32 %v3430_v28, %v3430_v28 }
 0x1e8   :  { %v2179_v21 = vpop.eup %2178  ;;  %v1719_v16 = vadd.f32 %v3244_v22, %v1649_v37  ;;  %v1720_v0 = vadd.f32 %v3248_v26, %v1650_v38  ;;  %v3441_v29 = vadd.f32 1e-05, %v1192_v52 }
 0x1e9   :  { %v1322_v18 = vmul.f32 %v2177_v17, %v1321_v51  ;;  %v1328_v46 = vmul.f32 %v2179_v21, %v3412_v50  ;;  %v901_v55 = vpop.xlane.xlu1 %900  ;;  %v1159_v30 = vadd.f32 %v1072_v14, %v1071_v25  ;;  %vm1334_vm9 = vweird.f32 %v2179_v21  ;;  %v3929_v50 = vld [vmem:[#allocation4_spill] sm:$0xff] }
 0x1ea   :  { %1783 = vst [vmem:[%s3874_s5 + $0x60] sm:$0xff] %v1719_v16  ;;  %2180 = vrsqrt.f32 %v3441_v29  ;;  %v952_v9 = vmul.f32 %v2827_v41, %v901_v55  ;;  %vm1335_vm11 = vmor %vm1333_vm10, %vm1334_vm9  ;;  %vm1343_vm13 = vweird.f32 %v3441_v29 }
 0x1eb   :  { %1784 = vst [vmem:[%s3874_s5 + $0x68] sm:$0xff] %v1720_v0  ;;  %v1326_v36 = vsel %vm1325_vm8, %v2177_v17, %v1322_v18  ;;  %v1329_v32 = vmul.f32 %v2179_v21, %v1328_v46  ;;  %1160 = vadd.xlane.f32.xlu2 %v1159_v30  ;;  %v3930_v0 = vld [vmem:[#allocation5_spill] sm:$0xff] }
 0x1ec   :  { %v1581_v53 = vmul.f32 %v1326_v36, %v3927_v5  ;;  %v1582_v33 = vmul.f32 %v1326_v36, %v3928_v15  ;;  %v3456_v42 = vsub.f32 %v3062_v34, %v952_v9  ;;  %v3459_v1 = vsub.f32 %v3064_v2, %v952_v9 }
 0x1ed   :  { %v1330_v40 = vmul.f32 0.5, %v1329_v32  ;;  %v1119_v60 = vpop.xlane.xlu0 %1118 }
 0x1ee   :  { %v1651_v20 = vmul.f32 %v3239_v57, %v1581_v53  ;;  %v1652_v24 = vmul.f32 %v3242_v48, %v1582_v33  ;;  %v1193_v17 = vmul.f32 %v1119_v60, %v2827_v41  ;;  %v1073_v11 = vmul.f32 %v3456_v42, %v3456_v42 }
 0x1ef   :  { %v1331_v61 = vsub.f32 1.5, %v1330_v40  ;;  %v1074_v34 = vmul.f32 %v3459_v1, %v3459_v1 }
 0x1f0   :  { %v2181_v56 = vpop.eup %2180  ;;  %v1721_v2 = vadd.f32 %v3244_v22, %v1651_v20  ;;  %v1722_v45 = vadd.f32 %v3248_v26, %v1652_v24  ;;  %v3470_v6 = vadd.f32 1e-05, %v1193_v17 }
 0x1f1   :  { %v1332_v43 = vmul.f32 %v2179_v21, %v1331_v61  ;;  %v1338_v37 = vmul.f32 %v2181_v56, %v3441_v29  ;;  %v904_v38 = vpop.xlane.xlu2 %903  ;;  %v1162_v52 = vadd.f32 %v1074_v34, %v1073_v11  ;;  %vm1344_vm12 = vweird.f32 %v2181_v56 }
 0x1f2   :  { %1785 = vst [vmem:[%s3874_s5 + $0x70] sm:$0xff] %v1721_v2  ;;  %2182 = vrsqrt.f32 %v3470_v6  ;;  %v953_v25 = vmul.f32 %v2827_v41, %v904_v38  ;;  %vm1345_vm14 = vmor %vm1343_vm13, %vm1344_vm12  ;;  %v3931_v2 = vld [vmem:[#allocation6_spill] sm:$0xff]  ;;  %vm1353_vm0 = vweird.f32 %v3470_v6 }
 0x1f3   :  { %1786 = vst [vmem:[%s3874_s5 + $0x78] sm:$0xff] %v1722_v45  ;;  %v1336_v51 = vsel %vm1335_vm11, %v2179_v21, %v1332_v43  ;;  %v1339_v14 = vmul.f32 %v2181_v56, %v1338_v37  ;;  %1163 = vadd.xlane.f32.xlu0 %v1162_v52 }
 0x1f4   :  { %v1583_v16 = vmul.f32 %v1336_v51, %v3929_v50  ;;  %v1584_v18 = vmul.f32 %v1336_v51, %v3930_v0  ;;  %v3485_v46 = vsub.f32 %v3082_v59, %v953_v25  ;;  %v3488_v55 = vsub.f32 %v3084_v58, %v953_v25 }
 0x1f5   :  { %v1340_v30 = vmul.f32 0.5, %v1339_v14  ;;  %v1122_v9 = vpop.xlane.xlu1 %1121 }
 0x1f6   :  { %v1653_v36 = vmul.f32 %v3239_v57, %v1583_v16  ;;  %v1654_v32 = vmul.f32 %v3242_v48, %v1584_v18  ;;  %v1194_v21 = vmul.f32 %v1122_v9, %v2827_v41  ;;  %v1075_v5 = vmul.f32 %v3485_v46, %v3485_v46 }
 0x1f7   :  { %v1341_v53 = vsub.f32 1.5, %v1340_v30  ;;  %v1076_v59 = vmul.f32 %v3488_v55, %v3488_v55 }
 0x1f8   :  { %v2183_v15 = vpop.eup %2182  ;;  %v1723_v58 = vadd.f32 %v3244_v22, %v1653_v36  ;;  %v1724_v33 = vadd.f32 %v3248_v26, %v1654_v32  ;;  %v3499_v40 = vadd.f32 1e-05, %v1194_v21 }
 0x1f9   :  { %v1342_v60 = vmul.f32 %v2181_v56, %v1341_v53  ;;  %v1348_v20 = vmul.f32 %v2183_v15, %v3470_v6  ;;  %v907_v24 = vpop.xlane.xlu0 %906  ;;  %v1165_v17 = vadd.f32 %v1076_v59, %v1075_v5  ;;  %vm1354_vm15 = vweird.f32 %v2183_v15  ;;  %v3932_v6 = vld [vmem:[#allocation7_spill] sm:$0xff]  ;;  %v3933_v59 = vld [vmem:[#allocation8_spill] sm:$0xff] }
 0x1fa   :  { %1787 = vst [vmem:[%s3874_s5 + $0x80] sm:$0xff] %v1723_v58  ;;  %2184 = vrsqrt.f32 %v3499_v40  ;;  %v954_v11 = vmul.f32 %v2827_v41, %v907_v24  ;;  %vm1355_vm1 = vmor %vm1353_vm0, %vm1354_vm15  ;;  %vm1363_vm3 = vweird.f32 %v3499_v40 }
 0x1fb   :  { %1788 = vst [vmem:[%s3874_s5 + $0x88] sm:$0xff] %v1724_v33  ;;  %v1346_v61 = vsel %vm1345_vm14, %v2181_v56, %v1342_v60  ;;  %v1349_v34 = vmul.f32 %v2183_v15, %v1348_v20  ;;  %1166 = vadd.xlane.f32.xlu1 %v1165_v17  ;;  %v3934_v60 = vld [vmem:[#allocation13_spill] sm:$0xff] }
 0x1fc   :  { %v1585_v29 = vmul.f32 %v1346_v61, %v3045_v39  ;;  %v1586_v45 = vmul.f32 %v1346_v61, %v3931_v2  ;;  %v3514_v43 = vsub.f32 %v3108_v44, %v954_v11  ;;  %v3517_v37 = vsub.f32 %v3110_v63, %v954_v11 }
 0x1fd   :  { %v1350_v38 = vmul.f32 0.5, %v1349_v34  ;;  %v1125_v52 = vpop.xlane.xlu2 %1124 }
 0x1fe   :  { %v1655_v25 = vmul.f32 %v3239_v57, %v1585_v29  ;;  %v1656_v51 = vmul.f32 %v3242_v48, %v1586_v45  ;;  %v1195_v56 = vmul.f32 %v1125_v52, %v2827_v41  ;;  %v1077_v14 = vmul.f32 %v3514_v43, %v3514_v43 }
 0x1ff   :  { %v1351_v39 = vsub.f32 1.5, %v1350_v38  ;;  %v1078_v44 = vmul.f32 %v3517_v37, %v3517_v37 }
 0x200   :  { %v2185_v50 = vpop.eup %2184  ;;  %v1725_v63 = vadd.f32 %v3244_v22, %v1655_v25  ;;  %v1726_v16 = vadd.f32 %v3248_v26, %v1656_v51  ;;  %v3528_v0 = vadd.f32 1e-05, %v1195_v56 }
 0x201   :  { %v1352_v18 = vmul.f32 %v2183_v15, %v1351_v39  ;;  %v1358_v30 = vmul.f32 %v2185_v50, %v3499_v40  ;;  %v910_v9 = vpop.xlane.xlu1 %909  ;;  %v1168_v36 = vadd.f32 %v1078_v44, %v1077_v14  ;;  %vm1364_vm2 = vweird.f32 %v2185_v50  ;;  %v3935_v40 = vld [vmem:[#allocation9_spill] sm:$0xff] }
 0x202   :  { %1789 = vst [vmem:[%s3874_s5 + $0x90] sm:$0xff] %v1725_v63  ;;  %2186 = vrsqrt.f32 %v3528_v0  ;;  %v955_v32 = vmul.f32 %v2827_v41, %v910_v9  ;;  %vm1365_vm4 = vmor %vm1363_vm3, %vm1364_vm2  ;;  %v3937_v9 = vld [vmem:[#allocation16_spill] sm:$0xff]  ;;  %vm1373_vm6 = vweird.f32 %v3528_v0 }
 0x203   :  { %1790 = vst [vmem:[%s3874_s5 + $0x98] sm:$0xff] %v1726_v16  ;;  %v1356_v21 = vsel %vm1355_vm1, %v2183_v15, %v1352_v18  ;;  %v1359_v5 = vmul.f32 %v2185_v50, %v1358_v30  ;;  %1169 = vadd.xlane.f32.xlu2 %v1168_v36  ;;  %v3936_v18 = vld [vmem:[#allocation10_spill] sm:$0xff] }
 0x204   :  { %v1587_v53 = vmul.f32 %v1356_v21, %v3932_v6  ;;  %v1588_v58 = vmul.f32 %v1356_v21, %v3933_v59  ;;  %v3543_v33 = vsub.f32 %v3128_v35, %v955_v32  ;;  %v3546_v20 = vsub.f32 %v3934_v60, %v955_v32  ;;  %v3938_v32 = vld [vmem:[#allocation17_spill] sm:$0xff] }
 0x205   :  { %v1360_v24 = vmul.f32 0.5, %v1359_v5  ;;  %v1128_v17 = vpop.xlane.xlu0 %1127 }
 0x206   :  { %v1657_v11 = vmul.f32 %v3239_v57, %v1587_v53  ;;  %v1658_v61 = vmul.f32 %v3242_v48, %v1588_v58  ;;  %v1196_v15 = vmul.f32 %v1128_v17, %v2827_v41  ;;  %v1079_v34 = vmul.f32 %v3543_v33, %v3543_v33 }
 0x207   :  { %v1361_v29 = vsub.f32 1.5, %v1360_v24  ;;  %v1080_v35 = vmul.f32 %v3546_v20, %v3546_v20 }
 0x208   :  { %v2187_v2 = vpop.eup %2186  ;;  %v1727_v45 = vadd.f32 %v3244_v22, %v1657_v11  ;;  %v1728_v38 = vadd.f32 %v3248_v26, %v1658_v61  ;;  %v1228_v52 = vadd.f32 1e-05, %v1196_v15 }
 0x209   :  { %v1362_v25 = vmul.f32 %v2185_v50, %v1361_v29  ;;  %v1368_v51 = vmul.f32 %v2187_v2, %v3528_v0  ;;  %v913_v56 = vpop.xlane.xlu2 %912  ;;  %v1171_v14 = vadd.f32 %v1080_v35, %v1079_v34  ;;  %vm1374_vm5 = vweird.f32 %v2187_v2 }
 0x20a   :  { %1791 = vst [vmem:[%s3874_s5 + $0xa0] sm:$0xff] %v1727_v45  ;;  %2188 = vrsqrt.f32 %v1228_v52  ;;  %v956_v39 = vmul.f32 %v2827_v41, %v913_v56  ;;  %vm1375_vm7 = vmor %vm1373_vm6, %vm1374_vm5  ;;  %v3941_v56 = vld [vmem:[#allocation18_spill] sm:$0xff]  ;;  %vm1383_vm9 = vweird.f32 %v1228_v52 }
 0x20b   :  { %1792 = vst [vmem:[%s3874_s5 + $0xa8] sm:$0xff] %v1728_v38  ;;  %v1366_v44 = vsel %vm1365_vm4, %v2185_v50, %v1362_v25  ;;  %v1369_v63 = vmul.f32 %v2187_v2, %v1368_v51  ;;  %1172 = vadd.xlane.f32.xlu0 %v1171_v14  ;;  %v3939_v38 = vld [vmem:[#allocation11_spill] sm:$0xff]  ;;  %v3940_v51 = vld [vmem:[#allocation12_spill] sm:$0xff] }
 0x20c   :  { %v1589_v16 = vmul.f32 %v1366_v44, %v3935_v40  ;;  %v1590_v30 = vmul.f32 %v1366_v44, %v3936_v18  ;;  %v3569_v36 = vsub.f32 %v3937_v9, %v956_v39  ;;  %v3572_v21 = vsub.f32 %v3938_v32, %v956_v39  ;;  %v3942_v39 = vld [vmem:[#allocation19_spill] sm:$0xff] }
 0x20d   :  { %v1370_v5 = vmul.f32 0.5, %v1369_v63 }
 0x20e   :  { %v1659_v6 = vmul.f32 %v3239_v57, %v1589_v16  ;;  %v1660_v53 = vmul.f32 %v3242_v48, %v1590_v30  ;;  %v1081_v50 = vmul.f32 %v3569_v36, %v3569_v36  ;;  %v1082_v59 = vmul.f32 %v3572_v21, %v3572_v21 }
 0x20f   :  { %v1371_v58 = vsub.f32 1.5, %v1370_v5 }
 0x210   :  { %v2189_v60 = vpop.eup %2188  ;;  %v1729_v24 = vadd.f32 %v3244_v22, %v1659_v6  ;;  %v1730_v17 = vadd.f32 %v3248_v26, %v1660_v53  ;;  %v1174_v11 = vadd.f32 %v1082_v59, %v1081_v50 }
 0x211   :  { %v1372_v61 = vmul.f32 %v2187_v2, %v1371_v58  ;;  %v1378_v15 = vmul.f32 %v2189_v60, %v1228_v52  ;;  %v916_v34 = vpop.xlane.xlu0 %915  ;;  %vm1384_vm8 = vweird.f32 %v2189_v60 }
 0x212   :  { %1793 = vst [vmem:[%s3874_s5 + $0xb0] sm:$0xff] %v1729_v24  ;;  %v957_v29 = vmul.f32 %v2827_v41, %v916_v34  ;;  %1175 = vadd.xlane.f32.xlu1 %v1174_v11  ;;  %vm1385_vm10 = vmor %vm1383_vm9, %vm1384_vm8  ;;  %v3943_v11 = vld [vmem:[#allocation14_spill] sm:$0xff] }
 0x213   :  { %1794 = vst [vmem:[%s3874_s5 + $0xb8] sm:$0xff] %v1730_v17  ;;  %v1376_v35 = vsel %vm1375_vm7, %v2187_v2, %v1372_v61  ;;  %v1379_v45 = vmul.f32 %v2189_v60, %v1378_v15  ;;  %v3944_v15 = vld [vmem:[#allocation15_spill] sm:$0xff] }
 0x214   :  { %v1591_v25 = vmul.f32 %v1376_v35, %v3939_v38  ;;  %v1592_v0 = vmul.f32 %v1376_v35, %v3940_v51  ;;  %v3593_v14 = vsub.f32 %v3941_v56, %v957_v29  ;;  %v3596_v44 = vsub.f32 %v3942_v39, %v957_v29 }
 0x215   :  { %v1380_v63 = vmul.f32 0.5, %v1379_v45  ;;  %v1134_v40 = vpop.xlane.xlu2 %1133 }
 0x216   :  { %v1661_v16 = vmul.f32 %v3239_v57, %v1591_v25  ;;  %v1662_v18 = vmul.f32 %v3242_v48, %v1592_v0  ;;  %v1198_v30 = vmul.f32 %v1134_v40, %v2827_v41  ;;  %v1083_v2 = vmul.f32 %v3593_v14, %v3593_v14 }
 0x217   :  { %v1381_v9 = vsub.f32 1.5, %v1380_v63  ;;  %v1084_v32 = vmul.f32 %v3596_v44, %v3596_v44 }
 0x218   :  { %v1731_v5 = vadd.f32 %v3244_v22, %v1661_v16  ;;  %v1732_v6 = vadd.f32 %v3248_v26, %v1662_v18  ;;  %v1230_v53 = vadd.f32 1e-05, %v1198_v30 }
 0x219   :  { %v1382_v50 = vmul.f32 %v2189_v60, %v1381_v9  ;;  %v919_v59 = vpop.xlane.xlu1 %918  ;;  %v1177_v58 = vadd.f32 %v1084_v32, %v1083_v2 }
 0x21a   :  { %1795 = vst [vmem:[%s3874_s5 + $0xc0] sm:$0xff] %v1731_v5  ;;  %2190 = vrsqrt.f32 %v1230_v53  ;;  %v958_v24 = vmul.f32 %v2827_v41, %v919_v59  ;;  %vm1403_vm12 = vweird.f32 %v1230_v53 }
 0x21b   :  { %1796 = vst [vmem:[%s3874_s5 + $0xc8] sm:$0xff] %v1732_v6  ;;  %v1386_v17 = vsel %vm1385_vm10, %v2189_v60, %v1382_v50  ;;  %1178 = vadd.xlane.f32.xlu2 %v1177_v58 }
 0x21c   :  { %v1593_v61 = vmul.f32 %v1386_v17, %v3943_v11  ;;  %v1594_v52 = vmul.f32 %v1386_v17, %v3944_v15  ;;  %v3617_v34 = vsub.f32 %v3188_v13, %v958_v24  ;;  %v3620_v29 = vsub.f32 %v3190_v8, %v958_v24  ;;  %v3945_v11 = vld [vmem:[#allocation20_spill] sm:$0xff]  ;;  %v3946_v15 = vld [vmem:[#allocation21_spill] sm:$0xff] }
 0x21d   :  { %v1137_v35 = vpop.xlane.xlu0 %1136 }
 0x21e   :  { %v1663_v45 = vmul.f32 %v3239_v57, %v1593_v61  ;;  %v1664_v38 = vmul.f32 %v3242_v48, %v1594_v52  ;;  %v1199_v25 = vmul.f32 %v1137_v35, %v2827_v41  ;;  %v1085_v60 = vmul.f32 %v3617_v34, %v3617_v34 }
 0x21f   :  { %v1086_v51 = vmul.f32 %v3620_v29, %v3620_v29 }
 0x220   :  { %v2191_v0 = vpop.eup %2190  ;;  %v1733_v13 = vadd.f32 %v3244_v22, %v1663_v45  ;;  %v1734_v56 = vadd.f32 %v3248_v26, %v1664_v38  ;;  %v1231_v8 = vadd.f32 1e-05, %v1199_v25 }
 0x221   :  { %v1398_v39 = vmul.f32 %v2191_v0, %v1230_v53  ;;  %v1131_v63 = vpop.xlane.xlu1 %1130  ;;  %v1180_v40 = vadd.f32 %v1086_v51, %v1085_v60  ;;  %vm1404_vm11 = vweird.f32 %v2191_v0 }
 0x222   :  { %1797 = vst [vmem:[%s3874_s5 + $0xd0] sm:$0xff] %v1733_v13  ;;  %2192 = vrsqrt.f32 %v1231_v8  ;;  %v1197_v16 = vmul.f32 %v1131_v63, %v2827_v41  ;;  %vm1405_vm13 = vmor %vm1403_vm12, %vm1404_vm11  ;;  %vm1413_vm15 = vweird.f32 %v1231_v8 }
 0x223   :  { %1798 = vst [vmem:[%s3874_s5 + $0xd8] sm:$0xff] %v1734_v56  ;;  %v1399_v18 = vmul.f32 %v2191_v0, %v1398_v39  ;;  %1181 = vadd.xlane.f32.xlu0 %v1180_v40 }
 0x224   :  { %v1229_v30 = vadd.f32 1e-05, %v1197_v16 }
 0x225   :  { %v1400_v2 = vmul.f32 0.5, %v1399_v18 }
 0x226   :  { %2194 = vrsqrt.f32 %v1229_v30  ;;  %vm1393_vm2 = vweird.f32 %v1229_v30 }
 0x227   :  { %v1401_v9 = vsub.f32 1.5, %v1400_v2 }
 0x228   :  { %v2193_v32 = vpop.eup %2192 }
 0x229   :  { %v1402_v5 = vmul.f32 %v2191_v0, %v1401_v9  ;;  %v1408_v6 = vmul.f32 %v2193_v32, %v1231_v8  ;;  %v1140_v50 = vpop.xlane.xlu1 %1139  ;;  %vm1414_vm14 = vweird.f32 %v2193_v32 }
 0x22a   :  { %v1200_v59 = vmul.f32 %v1140_v50, %v2827_v41  ;;  %vm1415_vm0 = vmor %vm1413_vm15, %vm1414_vm14  ;;  %v3948_v50 = vld [vmem:[#allocation25_spill] sm:$0xff] }
 0x22b   :  { %v1406_v58 = vsel %vm1405_vm13, %v2191_v0, %v1402_v5  ;;  %v1409_v24 = vmul.f32 %v2193_v32, %v1408_v6  ;;  %v3947_v5 = vld [vmem:[#allocation24_spill] sm:$0xff] }
 0x22c   :  { %v2195_v17 = vpop.eup %2194  ;;  %v1597_v61 = vmul.f32 %v1406_v58, %v3945_v11  ;;  %v1598_v52 = vmul.f32 %v1406_v58, %v3946_v15  ;;  %v1232_v35 = vadd.f32 1e-05, %v1200_v59 }
 0x22d   :  { %v1410_v45 = vmul.f32 0.5, %v1409_v24  ;;  %v1388_v38 = vmul.f32 %v2195_v17, %v1229_v30  ;;  %vm1394_vm1 = vweird.f32 %v2195_v17 }
 0x22e   :  { %v1667_v25 = vmul.f32 %v3239_v57, %v1597_v61  ;;  %v1668_v60 = vmul.f32 %v3242_v48, %v1598_v52  ;;  %2196 = vrsqrt.f32 %v1232_v35  ;;  %v1143_v53 = vpop.xlane.xlu2 %1142  ;;  %vm1395_vm3 = vmor %vm1393_vm2, %vm1394_vm1  ;;  %vm1423_vm5 = vweird.f32 %v1232_v35 }
 0x22f   :  { %v1411_v51 = vsub.f32 1.5, %v1410_v45  ;;  %v1389_v13 = vmul.f32 %v2195_v17, %v1388_v38  ;;  %v1201_v0 = vmul.f32 %v1143_v53, %v2827_v41  ;;  %v3950_v53 = vld [vmem:[#allocation23_spill] sm:$0xff] }
 0x230   :  { %v1737_v56 = vadd.f32 %v3244_v22, %v1667_v25  ;;  %v1738_v39 = vadd.f32 %v3248_v26, %v1668_v60  ;;  %v3949_v25 = vld [vmem:[#allocation22_spill] sm:$0xff] }
 0x231   :  { %v1412_v63 = vmul.f32 %v2193_v32, %v1411_v51  ;;  %v1390_v40 = vmul.f32 0.5, %v1389_v13  ;;  %v1233_v16 = vadd.f32 1e-05, %v1201_v0 }
 0x232   :  { %1801 = vst [vmem:[%s3874_s5 + $0xf0] sm:$0xff] %v1737_v56 }
 0x233   :  { %1802 = vst [vmem:[%s3874_s5 + $0xf8] sm:$0xff] %v1738_v39  ;;  %v1416_v18 = vsel %vm1415_vm0, %v2193_v32, %v1412_v63  ;;  %v1391_v2 = vsub.f32 1.5, %v1390_v40  ;;  %2198 = vrsqrt.f32 %v1233_v16  ;;  %vm1433_vm8 = vweird.f32 %v1233_v16 }
 0x234   :  { %v2197_v9 = vpop.eup %2196  ;;  %v1599_v6 = vmul.f32 %v1416_v18, %v3947_v5  ;;  %v1600_v8 = vmul.f32 %v1416_v18, %v3948_v50 }
 0x235   :  { %v1392_v59 = vmul.f32 %v2195_v17, %v1391_v2  ;;  %v1418_v58 = vmul.f32 %v2197_v9, %v1232_v35  ;;  %vm1424_vm4 = vweird.f32 %v2197_v9 }
 0x236   :  { %v1669_v24 = vmul.f32 %v3239_v57, %v1599_v6  ;;  %v1670_v11 = vmul.f32 %v3242_v48, %v1600_v8  ;;  %v1146_v61 = vpop.xlane.xlu0 %1145  ;;  %vm1425_vm6 = vmor %vm1423_vm5, %vm1424_vm4 }
 0x237   :  { %v1396_v15 = vsel %vm1395_vm3, %v2195_v17, %v1392_v59  ;;  %v1419_v52 = vmul.f32 %v2197_v9, %v1418_v58  ;;  %v1202_v32 = vmul.f32 %v1146_v61, %v2827_v41  ;;  %v3951_v58 = vld [vmem:[#allocation26_spill] sm:$0xff] }
 0x238   :  { %v1739_v45 = vadd.f32 %v3244_v22, %v1669_v24  ;;  %v1740_v38 = vadd.f32 %v3248_v26, %v1670_v11  ;;  %v1595_v60 = vmul.f32 %v1396_v15, %v3949_v25  ;;  %v1596_v51 = vmul.f32 %v1396_v15, %v3950_v53  ;;  %v3952_v11 = vld [vmem:[#allocation27_spill] sm:$0xff] }
 0x239   :  { %v2199_v30 = vpop.eup %2198  ;;  %v1420_v13 = vmul.f32 0.5, %v1419_v52  ;;  %v1234_v0 = vadd.f32 1e-05, %v1202_v32 }
 0x23a   :  { %1803 = vst [vmem:[%s3874_s5 + $0x100] sm:$0xff] %v1739_v45  ;;  %v1665_v17 = vmul.f32 %v3239_v57, %v1595_v60  ;;  %v1666_v56 = vmul.f32 %v3242_v48, %v1596_v51  ;;  %v1428_v39 = vmul.f32 %v2199_v30, %v1233_v16  ;;  %vm1434_vm7 = vweird.f32 %v2199_v30 }
 0x23b   :  { %1804 = vst [vmem:[%s3874_s5 + $0x108] sm:$0xff] %v1740_v38  ;;  %v1421_v63 = vsub.f32 1.5, %v1420_v13  ;;  %2200 = vrsqrt.f32 %v1234_v0  ;;  %vm1435_vm9 = vmor %vm1433_vm8, %vm1434_vm7  ;;  %vm1443_vm11 = vweird.f32 %v1234_v0 }
 0x23c   :  { %v1735_v40 = vadd.f32 %v3244_v22, %v1665_v17  ;;  %v1736_v18 = vadd.f32 %v3248_v26, %v1666_v56  ;;  %v1429_v2 = vmul.f32 %v2199_v30, %v1428_v39 }
 0x23d   :  { %v1422_v5 = vmul.f32 %v2197_v9, %v1421_v63 }
 0x23e   :  { %1799 = vst [vmem:[%s3874_s5 + $0xe0] sm:$0xff] %v1735_v40  ;;  %v1430_v6 = vmul.f32 0.5, %v1429_v2  ;;  %v1149_v50 = vpop.xlane.xlu1 %1148 }
 0x23f   :  { %1800 = vst [vmem:[%s3874_s5 + $0xe8] sm:$0xff] %v1736_v18  ;;  %v1426_v8 = vsel %vm1425_vm6, %v2197_v9, %v1422_v5  ;;  %v1203_v59 = vmul.f32 %v1149_v50, %v2827_v41 }
 0x240   :  { %v1601_v24 = vmul.f32 %v1426_v8, %v3951_v58  ;;  %v1602_v61 = vmul.f32 %v1426_v8, %v3952_v11  ;;  %v1431_v15 = vsub.f32 1.5, %v1430_v6 }
 0x241   :  { %v2201_v35 = vpop.eup %2200  ;;  %v1235_v52 = vadd.f32 1e-05, %v1203_v59 }
 0x242   :  { %v1671_v32 = vmul.f32 %v3239_v57, %v1601_v24  ;;  %v1672_v45 = vmul.f32 %v3242_v48, %v1602_v61  ;;  %v1432_v38 = vmul.f32 %v2199_v30, %v1431_v15  ;;  %v1438_v25 = vmul.f32 %v2201_v35, %v1234_v0 }
 0x243   :  { %2202 = vrsqrt.f32 %v1235_v52  ;;  %vm1444_vm10 = vweird.f32 %v2201_v35  ;;  %vm1453_vm14 = vweird.f32 %v1235_v52 }
 0x244   :  { %v1741_v9 = vadd.f32 %v3244_v22, %v1671_v32  ;;  %v1742_v60 = vadd.f32 %v3248_v26, %v1672_v45  ;;  %v1436_v53 = vsel %vm1435_vm9, %v2199_v30, %v1432_v38  ;;  %v1439_v51 = vmul.f32 %v2201_v35, %v1438_v25  ;;  %vm1445_vm12 = vmor %vm1443_vm11, %vm1444_vm10 }
 0x245   :  { %v1603_v13 = vmul.f32 %v1436_v53, %v3253_v10  ;;  %v1604_v17 = vmul.f32 %v1436_v53, %v3256_v19 }
 0x246   :  { %1805 = vst [vmem:[%s3874_s5 + $0x110] sm:$0xff] %v1741_v9  ;;  %v1440_v16 = vmul.f32 0.5, %v1439_v51  ;;  %v1152_v56 = vpop.xlane.xlu2 %1151 }
 0x247   :  { %1806 = vst [vmem:[%s3874_s5 + $0x118] sm:$0xff] %v1742_v60  ;;  %v1673_v39 = vmul.f32 %v3239_v57, %v1603_v13  ;;  %v1674_v63 = vmul.f32 %v3242_v48, %v1604_v17  ;;  %v1204_v30 = vmul.f32 %v1152_v56, %v2827_v41 }
 0x248   :  { %v1441_v40 = vsub.f32 1.5, %v1440_v16 }
 0x249   :  { %v2203_v10 = vpop.eup %2202  ;;  %v1743_v19 = vadd.f32 %v3244_v22, %v1673_v39  ;;  %v1744_v18 = vadd.f32 %v3248_v26, %v1674_v63  ;;  %v1236_v2 = vadd.f32 1e-05, %v1204_v30 }
 0x24a   :  { %v1442_v5 = vmul.f32 %v2201_v35, %v1441_v40  ;;  %v1448_v6 = vmul.f32 %v2203_v10, %v1235_v52  ;;  %vm1454_vm13 = vweird.f32 %v2203_v10 }
 0x24b   :  { %1807 = vst [vmem:[%s3874_s5 + $0x120] sm:$0xff] %v1743_v19  ;;  %2204 = vrsqrt.f32 %v1236_v2  ;;  %vm1455_vm15 = vmor %vm1453_vm14, %vm1454_vm13  ;;  %vm1463_vm1 = vweird.f32 %v1236_v2 }
 0x24c   :  { %1808 = vst [vmem:[%s3874_s5 + $0x128] sm:$0xff] %v1744_v18  ;;  %v1446_v50 = vsel %vm1445_vm12, %v2201_v35, %v1442_v5  ;;  %v1449_v8 = vmul.f32 %v2203_v10, %v1448_v6 }
 0x24d   :  { %v1605_v59 = vmul.f32 %v1446_v50, %v3282_v31  ;;  %v1606_v58 = vmul.f32 %v1446_v50, %v3285_v23 }
 0x24e   :  { %v1450_v24 = vmul.f32 0.5, %v1449_v8  ;;  %v1155_v11 = vpop.xlane.xlu0 %1154 }
 0x24f   :  { %v1675_v0 = vmul.f32 %v3239_v57, %v1605_v59  ;;  %v1676_v61 = vmul.f32 %v3242_v48, %v1606_v58  ;;  %v1205_v15 = vmul.f32 %v1155_v11, %v2827_v41 }
 0x250   :  { %v1451_v32 = vsub.f32 1.5, %v1450_v24 }
 0x251   :  { %v2205_v45 = vpop.eup %2204  ;;  %v1745_v38 = vadd.f32 %v3244_v22, %v1675_v0  ;;  %v1746_v35 = vadd.f32 %v3248_v26, %v1676_v61  ;;  %v1237_v25 = vadd.f32 1e-05, %v1205_v15 }
 0x252   :  { %v1452_v9 = vmul.f32 %v2203_v10, %v1451_v32  ;;  %v1458_v31 = vmul.f32 %v2205_v45, %v1236_v2  ;;  %vm1464_vm0 = vweird.f32 %v2205_v45 }
 0x253   :  { %1809 = vst [vmem:[%s3874_s5 + $0x130] sm:$0xff] %v1745_v38  ;;  %2206 = vrsqrt.f32 %v1237_v25  ;;  %vm1465_vm2 = vmor %vm1463_vm1, %vm1464_vm0  ;;  %vm1473_vm4 = vweird.f32 %v1237_v25 }
 0x254   :  { %1810 = vst [vmem:[%s3874_s5 + $0x138] sm:$0xff] %v1746_v35  ;;  %v1456_v23 = vsel %vm1455_vm15, %v2203_v10, %v1452_v9  ;;  %v1459_v60 = vmul.f32 %v2205_v45, %v1458_v31 }
 0x255   :  { %v1607_v53 = vmul.f32 %v1456_v23, %v3311_v7  ;;  %v1608_v51 = vmul.f32 %v1456_v23, %v3314_v12 }
 0x256   :  { %v1460_v13 = vmul.f32 0.5, %v1459_v60  ;;  %v1158_v17 = vpop.xlane.xlu1 %1157 }
 0x257   :  { %v1677_v52 = vmul.f32 %v3239_v57, %v1607_v53  ;;  %v1678_v16 = vmul.f32 %v3242_v48, %v1608_v51  ;;  %v1206_v56 = vmul.f32 %v1158_v17, %v2827_v41 }
 0x258   :  { %v1461_v39 = vsub.f32 1.5, %v1460_v13 }
 0x259   :  { %v2207_v63 = vpop.eup %2206  ;;  %v1747_v30 = vadd.f32 %v3244_v22, %v1677_v52  ;;  %v1748_v40 = vadd.f32 %v3248_v26, %v1678_v16  ;;  %v1238_v10 = vadd.f32 1e-05, %v1206_v56 }
 0x25a   :  { %v1462_v19 = vmul.f32 %v2205_v45, %v1461_v39  ;;  %v1468_v7 = vmul.f32 %v2207_v63, %v1237_v25  ;;  %vm1474_vm3 = vweird.f32 %v2207_v63 }
 0x25b   :  { %1811 = vst [vmem:[%s3874_s5 + $0x140] sm:$0xff] %v1747_v30  ;;  %2208 = vrsqrt.f32 %v1238_v10  ;;  %vm1475_vm5 = vmor %vm1473_vm4, %vm1474_vm3  ;;  %vm1483_vm7 = vweird.f32 %v1238_v10 }
 0x25c   :  { %1812 = vst [vmem:[%s3874_s5 + $0x148] sm:$0xff] %v1748_v40  ;;  %v1466_v12 = vsel %vm1465_vm2, %v2205_v45, %v1462_v19  ;;  %v1469_v18 = vmul.f32 %v2207_v63, %v1468_v7 }
 0x25d   :  { %v1609_v5 = vmul.f32 %v1466_v12, %v3340_v27  ;;  %v1610_v6 = vmul.f32 %v1466_v12, %v3343_v49 }
 0x25e   :  { %v1470_v50 = vmul.f32 0.5, %v1469_v18  ;;  %v1161_v8 = vpop.xlane.xlu2 %1160 }
 0x25f   :  { %v1679_v2 = vmul.f32 %v3239_v57, %v1609_v5  ;;  %v1680_v59 = vmul.f32 %v3242_v48, %v1610_v6  ;;  %v1207_v58 = vmul.f32 %v1161_v8, %v2827_v41 }
 0x260   :  { %v1471_v24 = vsub.f32 1.5, %v1470_v50 }
 0x261   :  { %v2209_v11 = vpop.eup %2208  ;;  %v1749_v0 = vadd.f32 %v3244_v22, %v1679_v2  ;;  %v1750_v61 = vadd.f32 %v3248_v26, %v1680_v59  ;;  %v1239_v15 = vadd.f32 1e-05, %v1207_v58 }
 0x262   :  { %v1472_v32 = vmul.f32 %v2207_v63, %v1471_v24  ;;  %v1478_v27 = vmul.f32 %v2209_v11, %v1238_v10  ;;  %vm1484_vm6 = vweird.f32 %v2209_v11 }
 0x263   :  { %1813 = vst [vmem:[%s3874_s5 + $0x150] sm:$0xff] %v1749_v0  ;;  %2210 = vrsqrt.f32 %v1239_v15  ;;  %vm1485_vm8 = vmor %vm1483_vm7, %vm1484_vm6  ;;  %vm1493_vm10 = vweird.f32 %v1239_v15 }
 0x264   :  { %1814 = vst [vmem:[%s3874_s5 + $0x158] sm:$0xff] %v1750_v61  ;;  %v1476_v49 = vsel %vm1475_vm5, %v2207_v63, %v1472_v32  ;;  %v1479_v45 = vmul.f32 %v2209_v11, %v1478_v27 }
 0x265   :  { %v1611_v38 = vmul.f32 %v1476_v49, %v3369_v54  ;;  %v1612_v35 = vmul.f32 %v1476_v49, %v3372_v62 }
 0x266   :  { %v1480_v9 = vmul.f32 0.5, %v1479_v45  ;;  %v1164_v31 = vpop.xlane.xlu0 %1163 }
 0x267   :  { %v1681_v25 = vmul.f32 %v3239_v57, %v1611_v38  ;;  %v1682_v23 = vmul.f32 %v3242_v48, %v1612_v35  ;;  %v1208_v60 = vmul.f32 %v1164_v31, %v2827_v41 }
 0x268   :  { %v1481_v53 = vsub.f32 1.5, %v1480_v9 }
 0x269   :  { %v2211_v51 = vpop.eup %2210  ;;  %v1751_v13 = vadd.f32 %v3244_v22, %v1681_v25  ;;  %v1752_v17 = vadd.f32 %v3248_v26, %v1682_v23  ;;  %v1240_v52 = vadd.f32 1e-05, %v1208_v60 }
 0x26a   :  { %v1482_v16 = vmul.f32 %v2209_v11, %v1481_v53  ;;  %v1488_v54 = vmul.f32 %v2211_v51, %v1239_v15  ;;  %vm1494_vm9 = vweird.f32 %v2211_v51 }
 0x26b   :  { %1815 = vst [vmem:[%s3874_s5 + $0x160] sm:$0xff] %v1751_v13  ;;  %2212 = vrsqrt.f32 %v1240_v52  ;;  %vm1495_vm11 = vmor %vm1493_vm10, %vm1494_vm9  ;;  %vm1503_vm13 = vweird.f32 %v1240_v52 }
 0x26c   :  { %1816 = vst [vmem:[%s3874_s5 + $0x168] sm:$0xff] %v1752_v17  ;;  %v1486_v62 = vsel %vm1485_vm8, %v2209_v11, %v1482_v16  ;;  %v1489_v56 = vmul.f32 %v2211_v51, %v1488_v54 }
 0x26d   :  { %v1613_v39 = vmul.f32 %v1486_v62, %v3398_v3  ;;  %v1614_v63 = vmul.f32 %v1486_v62, %v3401_v4 }
 0x26e   :  { %v1490_v30 = vmul.f32 0.5, %v1489_v56  ;;  %v1167_v40 = vpop.xlane.xlu1 %1166 }
 0x26f   :  { %v1683_v10 = vmul.f32 %v3239_v57, %v1613_v39  ;;  %v1684_v19 = vmul.f32 %v3242_v48, %v1614_v63  ;;  %v1209_v7 = vmul.f32 %v1167_v40, %v2827_v41 }
 0x270   :  { %v1491_v12 = vsub.f32 1.5, %v1490_v30 }
 0x271   :  { %v2213_v18 = vpop.eup %2212  ;;  %v1753_v5 = vadd.f32 %v3244_v22, %v1683_v10  ;;  %v1754_v6 = vadd.f32 %v3248_v26, %v1684_v19  ;;  %v1241_v50 = vadd.f32 1e-05, %v1209_v7 }
 0x272   :  { %v1492_v8 = vmul.f32 %v2211_v51, %v1491_v12  ;;  %v1498_v3 = vmul.f32 %v2213_v18, %v1240_v52  ;;  %vm1504_vm12 = vweird.f32 %v2213_v18 }
 0x273   :  { %1817 = vst [vmem:[%s3874_s5 + $0x170] sm:$0xff] %v1753_v5  ;;  %2214 = vrsqrt.f32 %v1241_v50  ;;  %vm1505_vm14 = vmor %vm1503_vm13, %vm1504_vm12  ;;  %vm1513_vm0 = vweird.f32 %v1241_v50 }
 0x274   :  { %1818 = vst [vmem:[%s3874_s5 + $0x178] sm:$0xff] %v1754_v6  ;;  %v1496_v4 = vsel %vm1495_vm11, %v2211_v51, %v1492_v8  ;;  %v1499_v2 = vmul.f32 %v2213_v18, %v1498_v3 }
 0x275   :  { %v1615_v59 = vmul.f32 %v1496_v4, %v3427_v47  ;;  %v1616_v58 = vmul.f32 %v1496_v4, %v3430_v28 }
 0x276   :  { %v1500_v24 = vmul.f32 0.5, %v1499_v2  ;;  %v1170_v11 = vpop.xlane.xlu2 %1169 }
 0x277   :  { %v1685_v0 = vmul.f32 %v3239_v57, %v1615_v59  ;;  %v1686_v61 = vmul.f32 %v3242_v48, %v1616_v58  ;;  %v1210_v15 = vmul.f32 %v1170_v11, %v2827_v41 }
 0x278   :  { %v1501_v32 = vsub.f32 1.5, %v1500_v24 }
 0x279   :  { %v2215_v27 = vpop.eup %2214  ;;  %v1755_v49 = vadd.f32 %v3244_v22, %v1685_v0  ;;  %v1756_v45 = vadd.f32 %v3248_v26, %v1686_v61  ;;  %v1242_v38 = vadd.f32 1e-05, %v1210_v15 }
 0x27a   :  { %v1502_v35 = vmul.f32 %v2213_v18, %v1501_v32  ;;  %v1508_v47 = vmul.f32 %v2215_v27, %v1241_v50  ;;  %vm1514_vm15 = vweird.f32 %v2215_v27 }
 0x27b   :  { %1819 = vst [vmem:[%s3874_s5 + $0x180] sm:$0xff] %v1755_v49  ;;  %2216 = vrsqrt.f32 %v1242_v38  ;;  %vm1515_vm1 = vmor %vm1513_vm0, %vm1514_vm15  ;;  %vm1523_vm3 = vweird.f32 %v1242_v38 }
 0x27c   :  { %1820 = vst [vmem:[%s3874_s5 + $0x188] sm:$0xff] %v1756_v45  ;;  %v1506_v28 = vsel %vm1505_vm14, %v2213_v18, %v1502_v35  ;;  %v1509_v9 = vmul.f32 %v2215_v27, %v1508_v47 }
 0x27d   :  { %v1617_v31 = vmul.f32 %v1506_v28, %v3456_v42  ;;  %v1618_v25 = vmul.f32 %v1506_v28, %v3459_v1 }
 0x27e   :  { %v1510_v23 = vmul.f32 0.5, %v1509_v9  ;;  %v1173_v60 = vpop.xlane.xlu0 %1172 }
 0x27f   :  { %v1687_v53 = vmul.f32 %v3239_v57, %v1617_v31  ;;  %v1688_v51 = vmul.f32 %v3242_v48, %v1618_v25  ;;  %v1211_v13 = vmul.f32 %v1173_v60, %v2827_v41 }
 0x280   :  { %v1511_v17 = vsub.f32 1.5, %v1510_v23 }
 0x281   :  { %v2217_v52 = vpop.eup %2216  ;;  %v1757_v16 = vadd.f32 %v3244_v22, %v1687_v53  ;;  %v1758_v54 = vadd.f32 %v3248_v26, %v1688_v51  ;;  %v1243_v62 = vadd.f32 1e-05, %v1211_v13 }
 0x282   :  { %v1512_v56 = vmul.f32 %v2215_v27, %v1511_v17  ;;  %v1518_v42 = vmul.f32 %v2217_v52, %v1242_v38  ;;  %vm1524_vm2 = vweird.f32 %v2217_v52 }
 0x283   :  { %1821 = vst [vmem:[%s3874_s5 + $0x190] sm:$0xff] %v1757_v16  ;;  %2218 = vrsqrt.f32 %v1243_v62  ;;  %vm1525_vm4 = vmor %vm1523_vm3, %vm1524_vm2  ;;  %vm1533_vm6 = vweird.f32 %v1243_v62 }
 0x284   :  { %1822 = vst [vmem:[%s3874_s5 + $0x198] sm:$0xff] %v1758_v54  ;;  %v1516_v1 = vsel %vm1515_vm1, %v2215_v27, %v1512_v56  ;;  %v1519_v39 = vmul.f32 %v2217_v52, %v1518_v42 }
 0x285   :  { %v1619_v63 = vmul.f32 %v1516_v1, %v3485_v46  ;;  %v1620_v30 = vmul.f32 %v1516_v1, %v3488_v55  ;;  %v1176_v40 = vpop.xlane.xlu1 %1175 }
 0x286   :  { %v1520_v10 = vmul.f32 0.5, %v1519_v39  ;;  %v1212_v19 = vmul.f32 %v1176_v40, %v2827_v41 }
 0x287   :  { %v1689_v7 = vmul.f32 %v3239_v57, %v1619_v63  ;;  %v1690_v12 = vmul.f32 %v3242_v48, %v1620_v30 }
 0x288   :  { %v1521_v18 = vsub.f32 1.5, %v1520_v10  ;;  %v1244_v5 = vadd.f32 1e-05, %v1212_v19 }
 0x289   :  { %v2219_v6 = vpop.eup %2218  ;;  %v1759_v50 = vadd.f32 %v3244_v22, %v1689_v7  ;;  %v1760_v8 = vadd.f32 %v3248_v26, %v1690_v12 }
 0x28a   :  { %v1522_v3 = vmul.f32 %v2217_v52, %v1521_v18  ;;  %v1528_v46 = vmul.f32 %v2219_v6, %v1243_v62  ;;  %2220 = vrsqrt.f32 %v1244_v5  ;;  %vm1534_vm5 = vweird.f32 %v2219_v6 }
 0x28b   :  { %1823 = vst [vmem:[%s3874_s5 + $0x1a0] sm:$0xff] %v1759_v50  ;;  %vm1535_vm7 = vmor %vm1533_vm6, %vm1534_vm5  ;;  %vm1543_vm9 = vweird.f32 %v1244_v5 }
 0x28c   :  { %1824 = vst [vmem:[%s3874_s5 + $0x1a8] sm:$0xff] %v1760_v8  ;;  %v1526_v55 = vsel %vm1525_vm4, %v2217_v52, %v1522_v3  ;;  %v1529_v4 = vmul.f32 %v2219_v6, %v1528_v46 }
 0x28d   :  { %v1621_v2 = vmul.f32 %v1526_v55, %v3514_v43  ;;  %v1622_v59 = vmul.f32 %v1526_v55, %v3517_v37 }
 0x28e   :  { %v1530_v58 = vmul.f32 0.5, %v1529_v4  ;;  %v1179_v24 = vpop.xlane.xlu2 %1178 }
 0x28f   :  { %v1691_v11 = vmul.f32 %v3239_v57, %v1621_v2  ;;  %v1692_v0 = vmul.f32 %v3242_v48, %v1622_v59  ;;  %v1213_v61 = vmul.f32 %v1179_v24, %v2827_v41 }
 0x290   :  { %v2221_v15 = vpop.eup %2220  ;;  %v1531_v32 = vsub.f32 1.5, %v1530_v58 }
 0x291   :  { %v1761_v27 = vadd.f32 %v3244_v22, %v1691_v11  ;;  %v1762_v49 = vadd.f32 %v3248_v26, %v1692_v0  ;;  %v1538_v45 = vmul.f32 %v2221_v15, %v1244_v5  ;;  %v1245_v43 = vadd.f32 1e-05, %v1213_v61 }
 0x292   :  { %v1532_v38 = vmul.f32 %v2219_v6, %v1531_v32  ;;  %vm1544_vm8 = vweird.f32 %v2221_v15 }
 0x293   :  { %1825 = vst [vmem:[%s3874_s5 + $0x1b0] sm:$0xff] %v1761_v27  ;;  %v1539_v37 = vmul.f32 %v2221_v15, %v1538_v45  ;;  %2222 = vrsqrt.f32 %v1245_v43  ;;  %vm1545_vm10 = vmor %vm1543_vm9, %vm1544_vm8  ;;  %vm1553_vm12 = vweird.f32 %v1245_v43 }
 0x294   :  { %1826 = vst [vmem:[%s3874_s5 + $0x1b8] sm:$0xff] %v1762_v49  ;;  %v1536_v35 = vsel %vm1535_vm7, %v2219_v6, %v1532_v38 }
 0x295   :  { %v1623_v47 = vmul.f32 %v1536_v35, %v3543_v33  ;;  %v1624_v28 = vmul.f32 %v1536_v35, %v3546_v20  ;;  %v1540_v9 = vmul.f32 0.5, %v1539_v37 }
 0x296   :  { %v1182_v31 = vpop.xlane.xlu0 %1181 }
 0x297   :  { %v1693_v25 = vmul.f32 %v3239_v57, %v1623_v47  ;;  %v1694_v23 = vmul.f32 %v3242_v48, %v1624_v28  ;;  %v1541_v60 = vsub.f32 1.5, %v1540_v9  ;;  %v1214_v53 = vmul.f32 %v1182_v31, %v2827_v41 }
 0x299   :  { %v1763_v51 = vadd.f32 %v3244_v22, %v1693_v25  ;;  %v1764_v13 = vadd.f32 %v3248_v26, %v1694_v23  ;;  %v1542_v17 = vmul.f32 %v2221_v15, %v1541_v60  ;;  %v1246_v52 = vadd.f32 1e-05, %v1214_v53  ;;  %v2223_v33 = vpop.eup %2222 }
 0x29a   :  { %v1548_v16 = vmul.f32 %v2223_v33, %v1245_v43  ;;  %vm1554_vm11 = vweird.f32 %v2223_v33 }
 0x29b   :  { %1827 = vst [vmem:[%s3874_s5 + $0x1c0] sm:$0xff] %v1763_v51  ;;  %v1546_v20 = vsel %vm1545_vm10, %v2221_v15, %v1542_v17  ;;  %2224 = vrsqrt.f32 %v1246_v52  ;;  %vm1555_vm13 = vmor %vm1553_vm12, %vm1554_vm11  ;;  %vm1563_vm15 = vweird.f32 %v1246_v52 }
 0x29c   :  { %1828 = vst [vmem:[%s3874_s5 + $0x1c8] sm:$0xff] %v1764_v13  ;;  %v1625_v41 = vmul.f32 %v1546_v20, %v3569_v36  ;;  %v1626_v54 = vmul.f32 %v1546_v20, %v3572_v21  ;;  %v1549_v62 = vmul.f32 %v2223_v33, %v1548_v16 }
 0x29e   :  { %v1695_v56 = vmul.f32 %v3239_v57, %v1625_v41  ;;  %v1696_v42 = vmul.f32 %v3242_v48, %v1626_v54  ;;  %v1550_v1 = vmul.f32 0.5, %v1549_v62 }
 0x2a0   :  { %v1765_v39 = vadd.f32 %v3244_v22, %v1695_v56  ;;  %v1766_v63 = vadd.f32 %v3248_v26, %v1696_v42  ;;  %v1551_v40 = vsub.f32 1.5, %v1550_v1 }
 0x2a1   :  { %v2225_v30 = vpop.eup %2224 }
 0x2a2   :  { %1829 = vst [vmem:[%s3874_s5 + $0x1d0] sm:$0xff] %v1765_v39  ;;  %v1558_v36 = vmul.f32 %v2225_v30, %v1246_v52  ;;  %v1552_v21 = vmul.f32 %v2223_v33, %v1551_v40  ;;  %vm1564_vm14 = vweird.f32 %v2225_v30 }
 0x2a3   :  { %1830 = vst [vmem:[%s3874_s5 + $0x1d8] sm:$0xff] %v1766_v63  ;;  %vm1565_vm0 = vmor %vm1563_vm15, %vm1564_vm14 }
 0x2a4   :  { %v1559_v10 = vmul.f32 %v2225_v30, %v1558_v36  ;;  %v1556_v19 = vsel %vm1555_vm13, %v2223_v33, %v1552_v21 }
 0x2a5   :  { %v1627_v7 = vmul.f32 %v1556_v19, %v3593_v14  ;;  %v1628_v12 = vmul.f32 %v1556_v19, %v3596_v44 }
 0x2a6   :  { %v1560_v18 = vmul.f32 0.5, %v1559_v10 }
 0x2a7   :  { %v1697_v5 = vmul.f32 %v3239_v57, %v1627_v7  ;;  %v1698_v6 = vmul.f32 %v3242_v48, %v1628_v12 }
 0x2a8   :  { %v1561_v50 = vsub.f32 1.5, %v1560_v18 }
 0x2a9   :  { %v1767_v8 = vadd.f32 %v3244_v22, %v1697_v5  ;;  %v1768_v3 = vadd.f32 %v3248_v26, %v1698_v6 }
 0x2aa   :  { %v1562_v46 = vmul.f32 %v2225_v30, %v1561_v50 }
 0x2ab   :  { %1831 = vst [vmem:[%s3874_s5 + $0x1e0] sm:$0xff] %v1767_v8 }
 0x2ac   :  { %v1566_v14 = vsel %vm1565_vm0, %v2225_v30, %v1562_v46  ;;  %1832 = vst [vmem:[%s3874_s5 + $0x1e8] sm:$0xff] %v1768_v3 }
 0x2ad   :  { %v1629_v44 = vmul.f32 %v1566_v14, %v3617_v34  ;;  %v1630_v55 = vmul.f32 %v1566_v14, %v3620_v29 }
 0x2af   :  { %v1699_v4 = vmul.f32 %v3239_v57, %v1629_v44  ;;  %v1700_v2 = vmul.f32 %v3242_v48, %v1630_v55 }
 0x2b1   :  { %v1769_v59 = vadd.f32 %v3244_v22, %v1699_v4  ;;  %v1770_v58 = vadd.f32 %v3248_v26, %v1700_v2 }
 0x2b3   :  { %1833 = vst [vmem:[%s3874_s5 + $0x1f0] sm:$0xff] %v1769_v59 }
 0x2b4   :  { %1834 = vst [vmem:[%s3874_s5 + $0x1f8] sm:$0xff] %v1770_v58 }

// kernel: rel_partial_learnable_mha_forward.6
= control target key start
LH: loop header
LB: loop body
LE: loop exit
PB: predicated region body
PF: predicated region fallthrough
CT: control target
= control target key end

     0   :  { %s6062_s21 = smov 0   ;;  %s6064_s22 = smov 0   ;;  %s8392_s0 = inlined_call_operand.vmem [shape: bf16[2,4,128,64], index: 0, kind: input, shape index: {}]   ;;  %s8393_s1 = inlined_call_operand.vmem [shape: bf16[2,4,128,64], index: 1, kind: input, shape index: {}]   ;;  %s8394_s2 = inlined_call_operand.vmem [shape: bf16[2,4,128,64], index: 2, kind: input, shape index: {}]   ;;  %s8395_s3 = inlined_call_operand.vmem [shape: bf16[4,128,64], index: 3, kind: input, shape index: {}]   ;;  %s8396_s4 = inlined_call_operand.vmem [shape: f32[4,1,64], index: 4, kind: input, shape index: {}]   ;;  %s8397_s5 = inlined_call_operand.vmem [shape: f32[4,1,64], index: 5, kind: input, shape index: {}]   ;;  %s8398_s6 = inlined_call_operand.vmem [shape: bf16[2,128,256], index: 6, kind: output, shape index: {}]  }
   0x1   :  { %s6066_s23 = smov 0  }
   0x2 LB: > { %s28_s24 = sadd.s32 1, %s6004_s22  ;;  %p4683_p0 = scmp.ge.s32.totalorder %s6008_s23, 1  ;;  %s6008_s23 = sphi %s6066_s23, %s16_s23   ;;  %s6004_s22 = sphi %s6064_s22, %s8614_s22   ;;  %s6000_s21 = sphi %s6062_s21, %s8613_s21  }
   0x3   : > { %p30_p1 = scmp.ge.s32.totalorder %s28_s24, 2  ;;  %p253_p2 = scmp.lt.s32.totalorder %s6008_s23, 3 }
   0x5   : > { %s8616_s24 = smov (%p30_p1, %s28_s24), 0  ;;  %p254_p3 = pnand %p4683_p0, %p253_p2 }
   0x7   : > { %257 = sbr.rel (%p254_p3) target bundleno = 2590 (0xa1e), region = 44 }
   0xc   : > { %v5359_v0 = vld [vmem:[%s8395_s3 + $0x38] sm:$0xff]  ;;  %vm546_vm0 = vcmask 523264   ;;  %v5358_v2 = vld [vmem:[%s8395_s3 + $0x30] sm:$0xff]  ;;  %v5357_v4 = vld [vmem:[%s8395_s3 + $0x28] sm:$0xff]  ;;  %p303_p4 = scmp.lt.s32.totalorder %s6000_s21, 1  ;;  %s6010_s8 = smov 257  }
   0xd   : > { %v593_v1 = vsel %vm546_vm0, %v5359_v0, 0  ;;  %v590_v3 = vsel %vm546_vm0, %v5358_v2, 0  ;;  %v587_v5 = vsel %vm546_vm0, %v5357_v4, 0  ;;  %v5356_v6 = vld [vmem:[%s8395_s3 + $0x20] sm:$0xff]  ;;  %v5355_v8 = vld [vmem:[%s8395_s3 + $0x18] sm:$0xff]  ;;  %v5354_v10 = vld [vmem:[%s8395_s3 + $0x10] sm:$0xff] }
   0xe   : > { %595 = vmatpush.bf16.xpose.msra.mxu0 %v593_v1  ;;  %v584_v7 = vsel %vm546_vm0, %v5356_v6, 0  ;;  %v581_v9 = vsel %vm546_vm0, %v5355_v8, 0  ;;  %v578_v11 = vsel %vm546_vm0, %v5354_v10, 0  ;;  %s8618_s21 = smov (!%p303_p4, %s6000_s21), 1  ;;  %v5353_v12 = vld [vmem:[%s8395_s3 + $0x8] sm:$0xff]  ;;  %v5352_v16 = vld [vmem:[%s8395_s3] sm:$0xff] }
   0xf   : > { %s6110_s15 = sshll.u32 %s8618_s21, 8  ;;  %v575_v13 = vsel %vm546_vm0, %v5353_v12, 0  ;;  %v6134_v20 = vld [vmem:[%s8397_s5] ss:$0 sm:$0xff]  ;;  %v572_v21 = vsel %vm546_vm0, %v5352_v16, 0  ;;  %s6011_s9 = smov 265  }
  0x10   : > { %s6116_s18 = scalar_lea.vmem %s8393_s1, %s6110_s15  ;;  %s6123_s25 = scalar_lea.vmem %s8392_s0, %s6110_s15  ;;  %v6168_v56 = vld [vmem:[%s8396_s4] ss:$0 sm:$0xff] }
  0x11   : > { %v5351_v14 = vld [vmem:[%s6116_s18 + $0x38] sm:$0xff]  ;;  %v5441_v15 = vld [vmem:[%s6123_s25] sm:$0xff]   ;;  %v5350_v25 = vld [vmem:[%s6116_s18 + $0x30] sm:$0xff]  ;;  %s6012_s10 = smov 273   ;;  %s6013_s11 = smov 281  }
  0x12   : > { %v859_v17 = vsel %vm546_vm0, %v5351_v14, 0  ;;  %v5442_v18 = vunpack.c.l.bf16 %v5441_v15  ;;  %v5443_v19 = vunpack.c.h.bf16 %v5441_v15  ;;  %v5568_v26 = vld [vmem:[%s6123_s25 + $0x8] sm:$0xff]   ;;  %v856_v27 = vsel %vm546_vm0, %v5350_v25, 0  ;;  %v5348_v35 = vld [vmem:[%s6116_s18 + $0x20] sm:$0xff]  ;;  %v5569_v36 = vld [vmem:[%s6123_s25 + $0x10] sm:$0xff]   ;;  %s6014_s12 = smov 289  }
  0x13   : > { %861 = vmatpush.bf16.xpose.msra.mxu1 %v859_v17  ;;  %v5446_v28 = vunpack.c.l.bf16 %v5568_v26  ;;  %v5447_v29 = vunpack.c.h.bf16 %v5568_v26  ;;  %v5349_v30 = vld [vmem:[%s6116_s18 + $0x28] sm:$0xff]  ;;  %v850_v37 = vsel %vm546_vm0, %v5348_v35, 0  ;;  %v5450_v38 = vunpack.c.l.bf16 %v5569_v36  ;;  %v5347_v40 = vld [vmem:[%s6116_s18 + $0x18] sm:$0xff]  ;;  %v5346_v45 = vld [vmem:[%s6116_s18 + $0x10] sm:$0xff]  ;;  %s8440_s13 = smov 297   ;;  %s8439_s14 = smov 305  }
  0x14   : > { %v450_v22 = vadd.f32 %v6134_v20, %v5442_v18  ;;  %v451_v23 = vadd.f32 %v6134_v20, %v5443_v19  ;;  %v853_v33 = vsel %vm546_vm0, %v5349_v30, 0  ;;  %v5451_v39 = vunpack.c.h.bf16 %v5569_v36  ;;  %v5570_v46 = vld [vmem:[%s6123_s25 + $0x18] sm:$0xff]   ;;  %v5345_v50 = vld [vmem:[%s6116_s18 + $0x8] sm:$0xff]  ;;  %v5344_v55 = vld [vmem:[%s6116_s18] sm:$0xff]  ;;  %s8441_s16 = smov 313   ;;  %s8421_s17 = smov 321  }
  0x15   : > { %v452_v31 = vadd.f32 %v6134_v20, %v5446_v28  ;;  %v453_v32 = vadd.f32 %v6134_v20, %v5447_v29  ;;  %v454_v41 = vadd.f32 %v6134_v20, %v5450_v38  ;;  %v847_v43 = vsel %vm546_vm0, %v5347_v40, 0  ;;  %v5571_v57 = vld [vmem:[%s6123_s25 + $0x20] sm:$0xff]   ;;  %v6186_v12 = vld [vmem:[%s6123_s25 + $0x30] sm:$0xff]   ;;  %s8423_s19 = smov 329   ;;  %s8419_s20 = smov 337  }
  0x16   : > { %596 = vmatpush.bf16.xpose.msra.mxu0 %v590_v3  ;;  %v466_v24 = vpack.c.bf16 %v451_v23, %v450_v22  ;;  %v455_v42 = vadd.f32 %v6134_v20, %v5451_v39  ;;  %v844_v47 = vsel %vm546_vm0, %v5346_v45, 0  ;;  %v5454_v48 = vunpack.c.l.bf16 %v5570_v46  ;;  %v5572_v3 = vld [vmem:[%s6123_s25 + $0x28] sm:$0xff]   ;;  %s8416_s26 = smov 345   ;;  %s8414_s27 = smov 353  }
  0x17   : > { %v467_v34 = vpack.c.bf16 %v453_v32, %v452_v31  ;;  %v5455_v49 = vunpack.c.h.bf16 %v5570_v46  ;;  %v841_v53 = vsel %vm546_vm0, %v5345_v50, 0  ;;  %v838_v58 = vsel %vm546_vm0, %v5344_v55, 0  ;;  %s8401_s28 = smov 361   ;;  %s8399_s29 = smov 369  }
  0x18   : > { %v468_v44 = vpack.c.bf16 %v455_v42, %v454_v41  ;;  %v456_v51 = vadd.f32 %v6134_v20, %v5454_v48  ;;  %v422_v59 = vadd.f32 %v6168_v56, %v5442_v18  ;;  %v423_v60 = vadd.f32 %v6168_v56, %v5443_v19  ;;  %s8411_s30 = smov 377   ;;  %s8508_s7 = smov 321  }
  0x19   : > { %v457_v52 = vadd.f32 %v6134_v20, %v5455_v49  ;;  %v5458_v61 = vunpack.c.l.bf16 %v5571_v57  ;;  %v5459_v62 = vunpack.c.h.bf16 %v5571_v57  ;;  %v424_v4 = vadd.f32 %v6168_v56, %v5446_v28 }
  0x1a   : > { %v438_v63 = vpack.c.bf16 %v423_v60, %v422_v59  ;;  %v5462_v6 = vunpack.c.l.bf16 %v5572_v3  ;;  %v427_v14 = vadd.f32 %v6168_v56, %v5451_v39  ;;  %v5466_v15 = vunpack.c.l.bf16 %v6186_v12 }
  0x1b   : > { %862 = vmatpush.bf16.xpose.msra.mxu1 %v856_v27  ;;  %v469_v54 = vpack.c.bf16 %v457_v52, %v456_v51  ;;  %v458_v0 = vadd.f32 %v6134_v20, %v5458_v61  ;;  %v459_v1 = vadd.f32 %v6134_v20, %v5459_v62  ;;  %v5467_v16 = vunpack.c.h.bf16 %v6186_v12  ;;  %v6222_v51 = vld [vmem:[%s6123_s25 + $0x38] sm:$0xff]  }
  0x1c   : > { %v462_v18 = vadd.f32 %v6134_v20, %v5466_v15  ;;  %v428_v22 = vadd.f32 %v6168_v56, %v5454_v48  ;;  %v429_v23 = vadd.f32 %v6168_v56, %v5455_v49  ;;  %v430_v28 = vadd.f32 %v6168_v56, %v5458_v61 }
  0x1d   : > { %v470_v2 = vpack.c.bf16 %v459_v1, %v458_v0  ;;  %v463_v19 = vadd.f32 %v6134_v20, %v5467_v16  ;;  %v434_v45 = vadd.f32 %v6168_v56, %v5466_v15  ;;  %v435_v46 = vadd.f32 %v6168_v56, %v5467_v16 }
  0x1e   : > { %597 = vmatpush.bf16.xpose.msra.mxu0 %v587_v5  ;;  %v425_v5 = vadd.f32 %v6168_v56, %v5447_v29  ;;  %v431_v29 = vadd.f32 %v6168_v56, %v5459_v62  ;;  %v5470_v52 = vunpack.c.l.bf16 %v6222_v51  ;;  %v334_v57 = vlaneseq }
  0x20   : > { %v439_v8 = vpack.c.bf16 %v425_v5, %v424_v4  ;;  %v442_v30 = vpack.c.bf16 %v431_v29, %v430_v28  ;;  %v6232_v61 = vshrl.u32 %v334_v57, 7 }
  0x22   : > { %v6236_v62 = vadd.s32 8, %v6232_v61  ;;  %v6267_v16 = vadd.s32 24, %v6232_v61  ;;  %v6289_v28 = vadd.s32 56, %v6232_v61  ;;  %v6293_v29 = vadd.s32 40, %v6232_v61 }
  0x23   : > { %863 = vmatpush.bf16.xpose.msra.mxu1 %v853_v33  ;;  %v432_v33 = vadd.f32 %v6168_v56, %v5462_v6 }
  0x26   : > { %598 = vmatpush.bf16.xpose.msra.mxu0 %v584_v7  ;;  %v5463_v7 = vunpack.c.h.bf16 %v5572_v3 }
  0x28   : > { %v461_v10 = vadd.f32 %v6134_v20, %v5463_v7 }
  0x2b   : > { %864 = vmatpush.bf16.xpose.msra.mxu1 %v850_v37 }
  0x2e   : > { %599 = vmatpush.bf16.xpose.msra.mxu0 %v581_v9  ;;  %v460_v9 = vadd.f32 %v6134_v20, %v5462_v6 }
  0x33   : > { %865 = vmatpush.bf16.xpose.msra.mxu1 %v847_v43 }
  0x36   : > { %600 = vmatpush.bf16.xpose.msra.mxu0 %v578_v11  ;;  %v471_v11 = vpack.c.bf16 %v461_v10, %v460_v9 }
  0x3b   : > { %866 = vmatpush.bf16.xpose.msra.mxu1 %v844_v47  ;;  %v444_v47 = vpack.c.bf16 %v435_v46, %v434_v45 }
  0x3e   : > { %601 = vmatpush.bf16.xpose.msra.mxu0 %v575_v13  ;;  %v426_v13 = vadd.f32 %v6168_v56, %v5450_v38 }
  0x40   : > { %v440_v17 = vpack.c.bf16 %v427_v14, %v426_v13 }
  0x43   : > { %867 = vmatpush.bf16.xpose.msra.mxu1 %v841_v53  ;;  %v5471_v53 = vunpack.c.h.bf16 %v6222_v51 }
  0x45   : > { %v465_v59 = vadd.f32 %v6134_v20, %v5471_v53 }
  0x46   : > { %602 = vmatpush.bf16.xpose.msra.mxu0 %v572_v21  ;;  %v472_v21 = vpack.c.bf16 %v463_v19, %v462_v18 }
  0x4b   : > { %868 = vmatpush.bf16.xpose.msra.mxu1 %v838_v58  ;;  %v464_v58 = vadd.f32 %v6134_v20, %v5470_v52 }
  0x4d   : > { %4724 = vmatmul.msk.bf16.vlgmr.msra.gmra.mxu0 %vm546_vm0, %v466_v24  ;;  %v441_v24 = vpack.c.bf16 %v429_v23, %v428_v22  ;;  %v473_v60 = vpack.c.bf16 %v465_v59, %v464_v58  ;;  %v437_v58 = vadd.f32 %v6168_v56, %v5471_v53 }
  0x52   : > { %4764 = vmatmul.msk.bf16.vlgmr.msra.gmra.mxu1 %vm546_vm0, %v438_v63 }
  0x5d   : > { %4725 = vmatmul.msk.bf16.gmra.mxu0 %vm546_vm0, %v467_v34  ;;  %v433_v34 = vadd.f32 %v6168_v56, %v5463_v7  ;;  %v6251_v7 = vadd.s32 16, %v6232_v61 }
  0x5f   : > { %v443_v35 = vpack.c.bf16 %v433_v34, %v432_v33 }
  0x62   : > { %4765 = vmatmul.msk.bf16.gmra.mxu1 %vm546_vm0, %v439_v8 }
  0x6d   : > { %4726 = vmatmul.msk.bf16.gmra.mxu0 %vm546_vm0, %v468_v44 }
  0x72   : > { %4766 = vmatmul.msk.bf16.gmra.mxu1 %vm546_vm0, %v440_v17  ;;  %v6271_v17 = vadd.s32 32, %v6232_v61 }
  0x7d   : > { %4727 = vmatmul.msk.bf16.gmra.mxu0 %vm546_vm0, %v469_v54 }
  0x82   : > { %4767 = vmatmul.msk.bf16.gmra.mxu1 %vm546_vm0, %v441_v24 }
  0x8d   : > { %4728 = vmatmul.msk.bf16.gmra.mxu0 %vm546_vm0, %v470_v2  ;;  %v6238_v2 = vand.u32 127, %v334_v57  ;;  %v436_v57 = vadd.f32 %v6168_v56, %v5470_v52 }
  0x8f   : > { %vm371_vm1 = vcmp.ge.s32.totalorder %v6236_v62, %v6238_v2  ;;  %vm370_vm2 = vcmp.ge.s32.totalorder %v6232_v61, %v6238_v2  ;;  %vm372_vm3 = vcmp.ge.s32.totalorder %v6251_v7, %v6238_v2  ;;  %vm373_vm4 = vcmp.ge.s32.totalorder %v6267_v16, %v6238_v2 }
  0x90   : > { %vm374_vm5 = vcmp.ge.s32.totalorder %v6271_v17, %v6238_v2  ;;  %vm377_vm6 = vcmp.ge.s32.totalorder %v6289_v28, %v6238_v2  ;;  %vm375_vm7 = vcmp.ge.s32.totalorder %v6293_v29, %v6238_v2  ;;  %v445_v59 = vpack.c.bf16 %v437_v58, %v436_v57 }
  0x92   : > { %4768 = vmatmul.msk.bf16.gmra.mxu1 %vm546_vm0, %v442_v30 }
  0x9d   : > { %4729 = vmatmul.msk.bf16.gmra.mxu0 %vm546_vm0, %v471_v11 }
  0xa2   : > { %4769 = vmatmul.msk.bf16.gmra.mxu1 %vm546_vm0, %v443_v35 }
  0xad   : > { %4730 = vmatmul.msk.bf16.gmra.mxu0 %vm546_vm0, %v472_v21 }
  0xb2   : > { %4770 = vmatmul.msk.bf16.gmra.mxu1 %vm546_vm0, %v444_v47 }
  0xbd   : > { %4731 = vmatmul.msk.bf16.gmra.mxu0 %vm546_vm0, %v473_v60 }
  0xc2   : > { %4771 = vmatmul.msk.bf16.gmra.mxu1 %vm546_vm0, %v445_v59 }
  0xca   : > { %v604_v25 = vpop.f32.mrf.mxu0 }
  0xcb   : > { %651 = vrot.lane.b32.xlu0 %v604_v25, %s6010_s8 }
  0xcf   : > { %v870_v41 = vpop.f32.mrf.mxu1 }
  0xd2   : > { %v606_v26 = vpop.f32.mrf.mxu0 }
  0xd3   : > { %659 = vrot.lane.b32.xlu0 %v606_v26, %s6011_s9 }
  0xd7   : > { %v872_v43 = vpop.f32.mrf.mxu1 }
  0xda   : > { %v609_v27 = vpop.f32.mrf.mxu0 }
  0xdb   : > { %667 = vrot.lane.b32.xlu1 %v609_v27, %s6012_s10 }
  0xdf   : > { %v875_v48 = vpop.f32.mrf.mxu1 }
  0xe2   : > { %v611_v31 = vpop.f32.mrf.mxu0 }
  0xe3   : > { %675 = vrot.lane.b32.xlu1 %v611_v31, %s6013_s11 }
  0xe7   : > { %v877_v50 = vpop.f32.mrf.mxu1 }
  0xea   : > { %v614_v32 = vpop.f32.mrf.mxu0 }
  0xeb   : > { %683 = vrot.lane.b32.xlu2 %v614_v32, %s6014_s12 }
  0xef   : > { %v880_v55 = vpop.f32.mrf.mxu1 }
  0xf2   : > { %v616_v36 = vpop.f32.mrf.mxu0 }
  0xf3   : > { %691 = vrot.lane.b32.xlu2 %v616_v36, %s8440_s13 }
  0xf7   : > { %v882_v4 = vpop.f32.mrf.mxu1 }
  0xfa   : > { %v619_v37 = vpop.f32.mrf.mxu0 }
  0xfb   : > { %699 = vrot.lane.b32.xlu2 %v619_v37, %s8439_s14 }
  0xff   : > { %v885_v13 = vpop.f32.mrf.mxu1 }
 0x102   : > { %v621_v38 = vpop.f32.mrf.mxu0 }
 0x103   : > { %707 = vrot.lane.b32.xlu2 %v621_v38, %s8441_s16  ;;  %v6312_v38 = vadd.s32 64, %v6232_v61 }
 0x105   : > { %vm8407_vm8 = vcmp.ge.s32.totalorder %v6312_v38, %v6238_v2 }
 0x107   : > { %v887_v27 = vpop.f32.mrf.mxu1 }
 0x10a   : > { %v624_v39 = vpop.f32.mrf.mxu0 }
 0x10b   : > { %715 = vrot.lane.b32.xlu1 %v624_v39, %s8421_s17 }
 0x10f   : > { %v890_v36 = vpop.f32.mrf.mxu1 }
 0x112   : > { %v626_v40 = vpop.f32.mrf.mxu0 }
 0x113   : > { %723 = vrot.lane.b32.xlu0 %v626_v40, %s8423_s19 }
 0x11a   : > { %v629_v42 = vpop.f32.mrf.mxu0 }
 0x11b   : > { %731 = vrot.lane.b32.xlu1 %v629_v42, %s8419_s20 }
 0x122   : > { %v631_v44 = vpop.f32.mrf.mxu0 }
 0x123   : > { %739 = vrot.lane.b32.xlu0 %v631_v44, %s8416_s26  ;;  %v6324_v44 = vadd.s32 72, %v6232_v61  ;;  %s8478_s26 = smov 361  }
 0x125   : > { %vm8405_vm9 = vcmp.ge.s32.totalorder %v6324_v44, %v6238_v2 }
 0x12a   : > { %v634_v49 = vpop.f32.mrf.mxu0 }
 0x12b   : > { %747 = vrot.lane.b32.xlu2 %v634_v49, %s8414_s27 }
 0x132   : > { %v636_v37 = vpop.f32.mrf.mxu0 }
 0x13d   : > { %v652_v54 = vpop.permute.xlu0 %651 }
 0x13e   : > { %v871_v63 = vadd.f32 %v870_v41, %v652_v54 }
 0x140   : > { %v910_v5 = vmul.f32 0.125, %v871_v63 }
 0x142   : > { %v6256_v8 = vsel %vm370_vm2, %v910_v5, -1e+30 }
 0x145   : > { %v660_v0 = vpop.permute.xlu0 %659  ;;  %v684_v1 = vpop.permute.xlu2 %683 }
 0x146   : > { %v873_v3 = vadd.f32 %v872_v43, %v660_v0  ;;  %v881_v15 = vadd.f32 %v880_v55, %v684_v1  ;;  %v892_v43 = vpop.f32.mrf.mxu1 }
 0x148   : > { %v911_v20 = vmul.f32 0.125, %v873_v3  ;;  %v914_v22 = vmul.f32 0.125, %v881_v15 }
 0x14a   : > { %v6247_v6 = vsel %vm371_vm1, %v911_v20, -1e+30  ;;  %v6286_v26 = vsel %vm374_vm5, %v914_v22, -1e+30 }
 0x14b   : > { %944 = vmax.xlane.f32.xlu1 %v6247_v6 }
 0x14d   : > { %v668_v9 = vpop.permute.xlu1 %667  ;;  %v692_v10 = vpop.permute.xlu2 %691  ;;  %942 = vmax.xlane.f32.xlu0 %v6256_v8 }
 0x14e   : > { %v876_v11 = vadd.f32 %v875_v48, %v668_v9  ;;  %v883_v25 = vadd.f32 %v882_v4, %v692_v10  ;;  %v6356_v0 = vpop.f32.mrf.mxu1 }
 0x150   : > { %v912_v12 = vmul.f32 0.125, %v876_v11  ;;  %v915_v32 = vmul.f32 0.125, %v883_v25 }
 0x152   : > { %v6264_v14 = vsel %vm372_vm3, %v912_v12, -1e+30  ;;  %v6308_v35 = vsel %vm375_vm7, %v915_v32, -1e+30 }
 0x154   : > { %946 = vmax.xlane.f32.xlu2 %v6264_v14 }
 0x155   : > { %v676_v18 = vpop.permute.xlu1 %675  ;;  %v700_v19 = vpop.permute.xlu2 %699 }
 0x156   : > { %v878_v21 = vadd.f32 %v877_v50, %v676_v18  ;;  %v886_v49 = vadd.f32 %v885_v13, %v700_v19  ;;  %v6335_v50 = vadd.s32 48, %v6232_v61  ;;  %v6360_v56 = vpop.f32.mrf.mxu1 }
 0x158   : > { %v913_v23 = vmul.f32 0.125, %v878_v21  ;;  %v916_v54 = vmul.f32 0.125, %v886_v49  ;;  %vm8409_vm10 = vcmp.ge.s32.totalorder %v6335_v50, %v6238_v2 }
 0x15a   : > { %v6280_v24 = vsel %vm373_vm4, %v913_v23, -1e+30  ;;  %v6342_v55 = vsel %vm8409_vm10, %v916_v54, -1e+30 }
 0x15b   : > { %948 = vmax.xlane.f32.xlu0 %v6280_v24 }
 0x15c   : > { %950 = vmax.xlane.f32.xlu2 %v6286_v26 }
 0x15d   : > { %v708_v30 = vpop.permute.xlu2 %707 }
 0x15e   : > { %v888_v31 = vadd.f32 %v887_v27, %v708_v30 }
 0x160   : > { %v917_v33 = vmul.f32 0.125, %v888_v31  ;;  %v639_v31 = vpop.f32.mrf.mxu0 }
 0x162   : > { %v6302_v34 = vsel %vm377_vm6, %v917_v33, -1e+30 }
 0x163   : > { %956 = vmax.xlane.f32.xlu1 %v6302_v34 }
 0x164   : > { %952 = vmax.xlane.f32.xlu2 %v6308_v35 }
 0x17c   : > { %755 = vrot.lane.b32.xlu2 %v636_v37, %s8401_s28  ;;  %s6419_s28 = scalar_lea.vmem %s8394_s2, %s6110_s15  ;;  %s8473_s15 = smov 345  }
 0x17d   : > { %v716_v39 = vpop.permute.xlu1 %715 }
 0x17e   : > { %v891_v40 = vadd.f32 %v890_v36, %v716_v39 }
 0x180   : > { %v918_v41 = vmul.f32 0.125, %v891_v40 }
 0x182   : > { %v6320_v42 = vsel %vm8407_vm8, %v918_v41, -1e+30 }
 0x183   : > { %958 = vmax.xlane.f32.xlu1 %v6320_v42 }
 0x185   : > { %v724_v45 = vpop.permute.xlu0 %723  ;;  %v748_v1 = vpop.permute.xlu2 %747 }
 0x186   : > { %v893_v46 = vadd.f32 %v892_v43, %v724_v45 }
 0x188   : > { %v919_v47 = vmul.f32 0.125, %v893_v46 }
 0x18a   : > { %v6331_v48 = vsel %vm8405_vm9, %v919_v47, -1e+30  ;;  %v641_v47 = vpop.f32.mrf.mxu0 }
 0x18b   : > { %960 = vmax.xlane.f32.xlu0 %v6331_v48 }
 0x18d   : > { %v6352_v60 = vpop.permute.xlu1 %731 }
 0x195   : > { %v6354_v63 = vpop.permute.xlu0 %739 }
 0x1a5   : > { %954 = vmax.xlane.f32.xlu2 %v6342_v55 }
 0x1be   : > { %v945_v3 = vpop.xlane.xlu1 %944 }
 0x1bf   : > { %v975_v4 = vsub.f32 %v6247_v6, %v945_v3  ;;  %v5367_v3 = vld [vmem:[%s6419_s28 + $0x38] sm:$0xff] }
 0x1c0   : > { %v943_v5 = vpop.xlane.xlu0 %942  ;;  %1366 = vmatpush.bf16.msra.mxu2 %v5367_v3 }
 0x1c1   : > { %v992_v20 = vmul.f32 1.442695, %v975_v4  ;;  %v974_v52 = vsub.f32 %v6256_v8, %v943_v5  ;;  %v900_v8 = vpop.f32.mrf.mxu1  ;;  %v5366_v5 = vld [vmem:[%s6419_s28 + $0x30] sm:$0xff] }
 0x1c2   : > { %v901_v21 = vadd.f32 %v900_v8, %v748_v1  ;;  %v896_v1 = vadd.f32 %v6356_v0, %v6352_v60  ;;  %v898_v60 = vadd.f32 %v6360_v56, %v6354_v63  ;;  %v6440_v0 = vadd.s32 88, %v6232_v61  ;;  %v5365_v63 = vld [vmem:[%s6419_s28 + $0x28] sm:$0xff]  ;;  %v5364_v56 = vld [vmem:[%s6419_s28 + $0x20] sm:$0xff]  ;;  %v5362_v8 = vld [vmem:[%s6419_s28 + $0x10] sm:$0xff] }
 0x1c3   : > { %5728 = vpow2.f32 %v992_v20  ;;  %v990_v51 = vmul.f32 1.442695, %v974_v52 }
 0x1c4   : > { %v922_v23 = vmul.f32 0.125, %v901_v21  ;;  %v920_v4 = vmul.f32 0.125, %v896_v1  ;;  %1367 = vmatpush.bf16.msra.mxu2 %v5366_v5  ;;  %v921_v52 = vmul.f32 0.125, %v898_v60  ;;  %vm8403_vm14 = vcmp.ge.s32.totalorder %v6440_v0, %v6238_v2 }
 0x1c5   : > { %5730 = vpow2.f32 %v990_v51 }
 0x1c7   : > { %v947_v53 = vpop.xlane.xlu2 %946 }
 0x1c8   : > { %v976_v9 = vsub.f32 %v6264_v14, %v947_v53  ;;  %v6374_v14 = vadd.s32 96, %v6232_v61  ;;  %1368 = vmatpush.bf16.msra.mxu2 %v5365_v63 }
 0x1c9   : > { %v6363_v10 = vpop.eup %5728  ;;  %v902_v36 = vpop.f32.mrf.mxu1 }
 0x1ca   : > { %v994_v11 = vmul.f32 1.442695, %v976_v9  ;;  %1024 = vadd.xlane.f32.xlu2 %v6363_v10  ;;  %vm8408_vm11 = vcmp.ge.s32.totalorder %v6374_v14, %v6238_v2 }
 0x1cb   : > { %v6366_v12 = vpop.eup %5730  ;;  %v6385_v30 = vsel %vm8408_vm11, %v922_v23, -1e+30 }
 0x1cc   : > { %5732 = vpow2.f32 %v994_v11  ;;  %1022 = vadd.xlane.f32.xlu0 %v6366_v12  ;;  %v6448_v11 = vsel %vm8403_vm14, %v921_v52, -1e+30  ;;  %1369 = vmatpush.bf16.msra.mxu2 %v5364_v56  ;;  %v6470_v56 = vadd.s32 112, %v6232_v61 }
 0x1ce   : > { %v949_v6 = vpop.xlane.xlu0 %948 }
 0x1cf   : > { %v977_v13 = vsub.f32 %v6280_v24, %v949_v6  ;;  %v951_v15 = vpop.xlane.xlu2 %950 }
 0x1d0   : > { %v978_v22 = vsub.f32 %v6286_v26, %v951_v15  ;;  %v5360_v15 = vld [vmem:[%s6419_s28] sm:$0xff] }
 0x1d1   : > { %v996_v18 = vmul.f32 1.442695, %v977_v13  ;;  %v5361_v13 = vld [vmem:[%s6419_s28 + $0x8] sm:$0xff] }
 0x1d2   : > { %v6370_v19 = vpop.eup %5732  ;;  %v998_v25 = vmul.f32 1.442695, %v978_v22 }
 0x1d3   : > { %5734 = vpow2.f32 %v996_v18  ;;  %1026 = vadd.xlane.f32.xlu2 %v6370_v19 }
 0x1d4   : > { %5736 = vpow2.f32 %v998_v25 }
 0x1d6   : > { %v957_v39 = vpop.xlane.xlu1 %956 }
 0x1d7   : > { %v953_v24 = vpop.xlane.xlu2 %952  ;;  %v981_v43 = vsub.f32 %v6302_v34, %v957_v39 }
 0x1d8   : > { %v979_v26 = vsub.f32 %v6308_v35, %v953_v24  ;;  %v6397_v35 = vadd.s32 104, %v6232_v61 }
 0x1d9   : > { %v6379_v27 = vpop.eup %5734  ;;  %v1004_v46 = vmul.f32 1.442695, %v981_v43 }
 0x1da   : > { %1028 = vadd.xlane.f32.xlu1 %v6379_v27  ;;  %v1000_v32 = vmul.f32 1.442695, %v979_v26  ;;  %v6390_v33 = vpop.eup %5736  ;;  %vm8404_vm12 = vcmp.ge.s32.totalorder %v6397_v35, %v6238_v2 }
 0x1db   : > { %966 = vmax.xlane.f32.xlu2 %v6385_v30 }
 0x1dc   : > { %5738 = vpow2.f32 %v1000_v32 }
 0x1dd   : > { %5740 = vpow2.f32 %v1004_v46 }
 0x1df   : > { %v756_v37 = vpop.permute.xlu2 %755 }
 0x1e0   : > { %763 = vrot.lane.b32.xlu0 %v639_v31, %s8399_s29  ;;  %v903_v41 = vadd.f32 %v902_v36, %v756_v37  ;;  %s8476_s29 = smov 353  }
 0x1e2   : > { %v6393_v40 = vpop.eup %5738  ;;  %v923_v45 = vmul.f32 0.125, %v903_v41 }
 0x1e3   : > { %1030 = vadd.xlane.f32.xlu2 %v6390_v33  ;;  %v6410_v58 = vpop.eup %5740 }
 0x1e4   : > { %v6405_v49 = vsel %vm8404_vm12, %v923_v45, -1e+30 }
 0x1eb   : > { %1032 = vadd.xlane.f32.xlu2 %v6393_v40 }
 0x1f3   : > { %968 = vmax.xlane.f32.xlu2 %v6405_v49  ;;  %771 = vrot.lane.b32.xlu1 %v641_v47, %s8411_s30  ;;  %s8487_s30 = smov 369  }
 0x1f6   : > { %v959_v54 = vpop.xlane.xlu1 %958 }
 0x1f7   : > { %v982_v34 = vsub.f32 %v6320_v42, %v959_v54  ;;  %v6424_v42 = vadd.s32 80, %v6232_v61 }
 0x1f9   : > { %v1006_v57 = vmul.f32 1.442695, %v982_v34  ;;  %vm8406_vm13 = vcmp.ge.s32.totalorder %v6424_v42, %v6238_v2 }
 0x1fa   : > { %v6434_v20 = vsel %vm8406_vm13, %v920_v4, -1e+30 }
 0x1fb   : > { %5742 = vpow2.f32 %v1006_v57  ;;  %1036 = vadd.xlane.f32.xlu2 %v6410_v58 }
 0x1fe   : > { %v961_v18 = vpop.xlane.xlu0 %960 }
 0x1ff   : > { %v983_v54 = vsub.f32 %v6331_v48, %v961_v18 }
 0x201   : > { %v6413_v59 = vpop.eup %5742 }
 0x203   : > { %1038 = vadd.xlane.f32.xlu2 %v6413_v59 }
 0x20a   : > { %962 = vmax.xlane.f32.xlu0 %v6434_v20 }
 0x218   : > { %v955_v51 = vpop.xlane.xlu2 %954 }
 0x219   : > { %v980_v53 = vsub.f32 %v6342_v55, %v955_v51  ;;  %v5363_v55 = vld [vmem:[%s6419_s28 + $0x18] sm:$0xff] }
 0x21a   : > { %1370 = vmatpush.bf16.msra.mxu2 %v5363_v55 }
 0x21b   : > { %v1002_v9 = vmul.f32 1.442695, %v980_v53 }
 0x21d   : > { %5744 = vpow2.f32 %v1002_v9  ;;  %964 = vmax.xlane.f32.xlu1 %v6448_v11  ;;  %v905_v9 = vpop.f32.mrf.mxu1 }
 0x21e   : > { %1371 = vmatpush.bf16.msra.mxu2 %v5362_v8 }
 0x222   : > { %1372 = vmatpush.bf16.msra.mxu2 %v5361_v13  ;;  %v1008_v13 = vmul.f32 1.442695, %v983_v54 }
 0x223   : > { %v6453_v6 = vpop.eup %5744 }
 0x224   : > { %1034 = vadd.xlane.f32.xlu0 %v6453_v6 }
 0x226   : > { %1373 = vmatpush.bf16.msra.mxu2 %v5360_v15 }
 0x23d   : > { %v1025_v21 = vpop.xlane.xlu2 %1024 }
 0x23e   : > { %5746 = vrcp.f32 %v1025_v21  ;;  %v1080_v36 = vand.u32 2147483648, %v1025_v21  ;;  %v1078_v41 = vand.u32 2147483647, %v1025_v21  ;;  %vm1074_vm14 = vweird.f32 %v1025_v21 }
 0x23f   : > { %v1023_v22 = vpop.xlane.xlu0 %1022 }
 0x240   : > { %5748 = vrcp.f32 %v1023_v22  ;;  %v1065_v43 = vand.u32 2147483648, %v1023_v22  ;;  %v1063_v46 = vand.u32 2147483647, %v1023_v22  ;;  %v1081_v34 = vor.u32 1.1754944e-38, %v1080_v36 }
 0x241   : > { %vm1059_vm13 = vweird.f32 %v1023_v22  ;;  %vm1079_vm8 = vcmp.eq.f32.partialorder %v1078_v41, 8.507059e+37 }
 0x242   : > { %v1066_v52 = vor.u32 1.1754944e-38, %v1065_v43  ;;  %vm1064_vm10 = vcmp.eq.f32.partialorder %v1063_v46, 8.507059e+37 }
 0x244   : > { %v5747_v23 = vpop.eup %5746 }
 0x245   : > { %v1070_v25 = vmul.f32 %v5747_v23, %v1025_v21  ;;  %vm1075_vm15 = vweird.f32 %v5747_v23 }
 0x246   : > { %v5749_v24 = vpop.eup %5748  ;;  %v6460_v26 = vpop.xlane.xlu2 %1026  ;;  %vm1076_vm9 = vmor %vm1074_vm14, %vm1075_vm15 }
 0x247   : > { %v1071_v31 = vsub.f32 1.0, %v1070_v25  ;;  %v1055_v32 = vmul.f32 %v5749_v24, %v1023_v22  ;;  %5750 = vrcp.f32 %v6460_v26  ;;  %vm1060_vm12 = vweird.f32 %v5749_v24 }
 0x248   : > { %vm1061_vm11 = vmor %vm1059_vm13, %vm1060_vm12  ;;  %v1093_v36 = vand.u32 2147483647, %v6460_v26 }
 0x249   : > { %v1056_v37 = vsub.f32 1.0, %v1055_v32  ;;  %v1072_v39 = vmul.f32 %v5747_v23, %v1071_v31 }
 0x24a   : > { %vm1094_vm15 = vcmp.eq.f32.partialorder %v1093_v36, 8.507059e+37 }
 0x24b   : > { %v1057_v45 = vmul.f32 %v5749_v24, %v1056_v37  ;;  %v1073_v47 = vadd.f32 %v5747_v23, %v1072_v39  ;;  %v1095_v37 = vand.u32 2147483648, %v6460_v26 }
 0x24d   : > { %v6464_v57 = vpop.eup %5750  ;;  %v1029_v1 = vpop.xlane.xlu1 %1028  ;;  %v1058_v3 = vadd.f32 %v5749_v24, %v1057_v45  ;;  %v1077_v4 = vsel %vm1076_vm9, %v5747_v23, %v1073_v47 }
 0x24e   : > { %v1085_v5 = vmul.f32 %v6464_v57, %v6460_v26  ;;  %5752 = vrcp.f32 %v1029_v1  ;;  %v967_v60 = vpop.xlane.xlu2 %966  ;;  %v1082_v51 = vsel %vm1079_vm8, %v1081_v34, %v1077_v4  ;;  %vm8410_vm8 = vcmp.ge.s32.totalorder %v6470_v56, %v6238_v2 }
 0x24f   : > { %v1062_v53 = vsel %vm1061_vm11, %v5749_v24, %v1058_v3  ;;  %v1083_v8 = vmul.f32 %v6363_v10, %v1082_v51  ;;  %5754 = vpow2.f32 %v1008_v13  ;;  %vm1090_vm9 = vweird.f32 %v6464_v57  ;;  %v907_v13 = vpop.f32.mrf.mxu1 }
 0x250   : > { %v1086_v48 = vsub.f32 1.0, %v1085_v5  ;;  %v1067_v63 = vsel %vm1064_vm10, %v1066_v52, %v1062_v53  ;;  %vm1089_vm10 = vweird.f32 %v6460_v26  ;;  %v1110_v39 = vand.u32 2147483648, %v1029_v1 }
 0x251   : > { %v1068_v55 = vmul.f32 %v6366_v12, %v1067_v63  ;;  %v986_v41 = vsub.f32 %v6385_v30, %v967_v60  ;;  %v1108_v45 = vand.u32 2147483647, %v1029_v1  ;;  %vm6492_vm12 = vmor %vm1089_vm10, %vm1090_vm9  ;;  %vm1104_vm13 = vweird.f32 %v1029_v1 }
 0x252   : > { %v764_v15 = vpop.permute.xlu0 %763  ;;  %v1087_v22 = vmul.f32 %v6464_v57, %v1086_v48  ;;  %v1096_v3 = vor.u32 1.1754944e-38, %v1095_v37  ;;  %v1111_v26 = vor.u32 1.1754944e-38, %v1110_v39 }
 0x253   : > { %v906_v18 = vadd.f32 %v905_v9, %v764_v15  ;;  %v1294_v21 = vpack.c.bf16 %v1083_v8, %v1068_v55  ;;  %v1014_v30 = vmul.f32 1.442695, %v986_v41  ;;  %v6506_v55 = vadd.s32 120, %v6232_v61 }
 0x254   : > { %v5753_v23 = vpop.eup %5752  ;;  %v1088_v32 = vadd.f32 %v6464_v57, %v1087_v22 }
 0x255   : > { %v1100_v25 = vmul.f32 %v5753_v23, %v1029_v1  ;;  %v924_v24 = vmul.f32 0.125, %v906_v18  ;;  %1374 = vmatmul.bf16.vlgmr.msra.gmra.mxu2 %v1294_v21  ;;  %vm1105_vm11 = vweird.f32 %v5753_v23  ;;  %v6499_v34 = vpop.eup %5754  ;;  %8461 = vst [vmem:[#allocation2_spill] sm:$0xff] %v6506_v55  ;;  %vm8413_vm9 = vcmp.ge.s32.totalorder %v6506_v55, %v6238_v2 }
 0x256   : > { %v6477_v31 = vpop.xlane.xlu2 %1030  ;;  %v1092_v47 = vsel %vm6492_vm12, %v6464_v57, %v1088_v32  ;;  %vm1106_vm14 = vmor %vm1104_vm13, %vm1105_vm11 }
 0x257   : > { %v1101_v12 = vsub.f32 1.0, %v1100_v25  ;;  %5756 = vrcp.f32 %v6477_v31  ;;  %v6484_v10 = vsel %vm8410_vm8, %v924_v24, -1e+30  ;;  %vm1109_vm8 = vcmp.eq.f32.partialorder %v1108_v45, 8.507059e+37 }
 0x258   : > { %970 = vmax.xlane.f32.xlu0 %v6484_v10  ;;  %v1097_v51 = vsel %vm1094_vm15, %v1096_v3, %v1092_v47  ;;  %vm1119_vm10 = vweird.f32 %v6477_v31  ;;  %v1123_v24 = vand.u32 2147483647, %v6477_v31 }
 0x259   : > { %v1102_v43 = vmul.f32 %v5753_v23, %v1101_v12  ;;  %v1098_v1 = vmul.f32 %v6370_v19, %v1097_v51  ;;  %v1125_v19 = vand.u32 2147483648, %v6477_v31 }
 0x25a   : > { %vm1124_vm13 = vcmp.eq.f32.partialorder %v1123_v24, 8.507059e+37 }
 0x25b   : > { %v1103_v54 = vadd.f32 %v5753_v23, %v1102_v43  ;;  %v1126_v41 = vor.u32 1.1754944e-38, %v1125_v19 }
 0x25d   : > { %v5757_v4 = vpop.eup %5756  ;;  %v1107_v5 = vsel %vm1106_vm14, %v5753_v23, %v1103_v54 }
 0x25e   : > { %v1115_v60 = vmul.f32 %v5757_v4, %v6477_v31  ;;  %v1033_v52 = vpop.xlane.xlu2 %1032  ;;  %v1112_v53 = vsel %vm1109_vm8, %v1111_v26, %v1107_v5  ;;  %vm1120_vm8 = vweird.f32 %v5757_v4 }
 0x25f   : > { %5758 = vrcp.f32 %v1033_v52  ;;  %v1113_v57 = vmul.f32 %v6379_v27, %v1112_v53  ;;  %vm1121_vm11 = vmor %vm1119_vm10, %vm1120_vm8  ;;  %v1138_v12 = vand.u32 2147483647, %v1033_v52  ;;  %v1140_v32 = vand.u32 2147483648, %v1033_v52 }
 0x260   : > { %v1116_v48 = vsub.f32 1.0, %v1115_v60  ;;  %1040 = vadd.xlane.f32.xlu0 %v6499_v34  ;;  %5760 = vpow2.f32 %v1014_v30  ;;  %vm1134_vm14 = vweird.f32 %v1033_v52 }
 0x261   : > { %v1295_v63 = vpack.c.bf16 %v1113_v57, %v1098_v1  ;;  %v1141_v31 = vor.u32 1.1754944e-38, %v1140_v32  ;;  %vm1139_vm8 = vcmp.eq.f32.partialorder %v1138_v12, 8.507059e+37 }
 0x262   : > { %v1117_v9 = vmul.f32 %v5757_v4, %v1116_v48 }
 0x264   : > { %v1118_v22 = vadd.f32 %v5757_v4, %v1117_v9  ;;  %v5382_v9 = vld [vmem:[%s8395_s3 + $0x70] sm:$0xff] }
 0x265   : > { %v5759_v8 = vpop.eup %5758  ;;  %v772_v15 = vpop.permute.xlu1 %771  ;;  %1379 = vmatmul.bf16.gmra.mxu2 %v1295_v63 }
 0x266   : > { %v1130_v18 = vmul.f32 %v5759_v8, %v1033_v52  ;;  %v908_v21 = vadd.f32 %v907_v13, %v772_v15  ;;  %v6508_v27 = vpop.eup %5760  ;;  %v1122_v37 = vsel %vm1121_vm11, %v5757_v4, %v1118_v22  ;;  %vm1135_vm12 = vweird.f32 %v5759_v8  ;;  %v969_v4 = vpop.xlane.xlu2 %968 }
 0x267   : > { %v1127_v45 = vsel %vm1124_vm13, %v1126_v41, %v1122_v37  ;;  %vm1136_vm15 = vmor %vm1134_vm14, %vm1135_vm12  ;;  %v987_v51 = vsub.f32 %v6405_v49, %v969_v4  ;;  %v1623_v13 = vsel %vm546_vm0, %v5382_v9, 0 }
 0x268   : > { %v1131_v23 = vsub.f32 1.0, %v1130_v18  ;;  %v925_v25 = vmul.f32 0.125, %v908_v21  ;;  %1046 = vadd.xlane.f32.xlu0 %v6508_v27  ;;  %v1128_v54 = vmul.f32 %v6390_v33, %v1127_v45  ;;  %v5383_v33 = vld [vmem:[%s8395_s3 + $0x78] sm:$0xff]  ;;  %v5381_v21 = vld [vmem:[%s8395_s3 + $0x68] sm:$0xff] }
 0x269   : > { %v1016_v52 = vmul.f32 1.442695, %v987_v51  ;;  %v1620_v19 = vsel %vm546_vm0, %v5381_v21, 0  ;;  %v6577_v21 = vld [vmem:[%s8397_s5 + $0x1] ss:$0 sm:$0xff] }
 0x26a   : > { %v6519_v36 = vsel %vm8413_vm9, %v925_v25, -1e+30  ;;  %v1132_v39 = vmul.f32 %v5759_v8, %v1131_v23 }
 0x26b   : > { %972 = vmax.xlane.f32.xlu1 %v6519_v36 }
 0x26c   : > { %v1133_v43 = vadd.f32 %v5759_v8, %v1132_v39 }
 0x26e   : > { %v1137_v46 = vsel %vm1136_vm15, %v5759_v8, %v1133_v43  ;;  %v1037_v53 = vpop.xlane.xlu2 %1036 }
 0x26f   : > { %v1142_v47 = vsel %vm1139_vm8, %v1141_v31, %v1137_v46  ;;  %v1170_v12 = vand.u32 2147483648, %v1037_v53  ;;  %vm1164_vm11 = vweird.f32 %v1037_v53  ;;  %v1168_v37 = vand.u32 2147483647, %v1037_v53 }
 0x270   : > { %v1143_v3 = vmul.f32 %v6393_v40, %v1142_v47 }
 0x271   : > { %v1171_v31 = vor.u32 1.1754944e-38, %v1170_v12  ;;  %vm1169_vm15 = vcmp.eq.f32.partialorder %v1168_v37, 8.507059e+37 }
 0x272   : > { %v1296_v26 = vpack.c.bf16 %v1143_v3, %v1128_v54 }
 0x275   : > { %1384 = vmatmul.bf16.gmra.mxu2 %v1296_v26 }
 0x27d   : > { %v963_v30 = vpop.xlane.xlu0 %962 }
 0x27e   : > { %v984_v5 = vsub.f32 %v6434_v20, %v963_v30  ;;  %v1626_v20 = vsel %vm546_vm0, %v5383_v33, 0  ;;  %v1039_v33 = vpop.xlane.xlu2 %1038 }
 0x27f   : > { %1628 = vmatpush.bf16.xpose.msra.mxu3 %v1626_v20  ;;  %v5377_v20 = vld [vmem:[%s8395_s3 + $0x48] sm:$0xff] }
 0x280   : > { %v1010_v60 = vmul.f32 1.442695, %v984_v5 }
 0x282   : > { %5762 = vpow2.f32 %v1010_v60  ;;  %v5380_v60 = vld [vmem:[%s8395_s3 + $0x60] sm:$0xff] }
 0x283   : > { %5764 = vpow2.f32 %v1016_v52  ;;  %v1617_v51 = vsel %vm546_vm0, %v5380_v60, 0  ;;  %v5379_v52 = vld [vmem:[%s8395_s3 + $0x58] sm:$0xff] }
 0x284   : > { %5766 = vrcp.f32 %v1037_v53 }
 0x287   : > { %1629 = vmatpush.bf16.xpose.msra.mxu3 %v1623_v13 }
 0x288   : > { %v6526_v57 = vpop.eup %5762 }
 0x289   : > { %1042 = vadd.xlane.f32.xlu1 %v6526_v57  ;;  %v6532_v40 = vpop.eup %5764 }
 0x28a   : > { %v5767_v48 = vpop.eup %5766 }
 0x28b   : > { %v1160_v63 = vmul.f32 %v5767_v48, %v1037_v53  ;;  %vm1165_vm10 = vweird.f32 %v5767_v48  ;;  %v1614_v53 = vsel %vm546_vm0, %v5379_v52, 0 }
 0x28c   : > { %vm1166_vm12 = vmor %vm1164_vm11, %vm1165_vm10  ;;  %vm1179_vm10 = vweird.f32 %v1039_v33 }
 0x28d   : > { %v1161_v15 = vsub.f32 1.0, %v1160_v63 }
 0x28f   : > { %v1162_v22 = vmul.f32 %v5767_v48, %v1161_v15  ;;  %1630 = vmatpush.bf16.xpose.msra.mxu3 %v1620_v19 }
 0x290   : > { %v965_v1 = vpop.xlane.xlu1 %964 }
 0x291   : > { %v985_v49 = vsub.f32 %v6448_v11, %v965_v1  ;;  %1048 = vadd.xlane.f32.xlu1 %v6532_v40  ;;  %v1163_v24 = vadd.f32 %v5767_v48, %v1162_v22  ;;  %v5376_v1 = vld [vmem:[%s8395_s3 + $0x40] sm:$0xff] }
 0x292   : > { %v1605_v15 = vsel %vm546_vm0, %v5376_v1, 0 }
 0x293   : > { %v1012_v8 = vmul.f32 1.442695, %v985_v49  ;;  %v1167_v45 = vsel %vm1166_vm12, %v5767_v48, %v1163_v24  ;;  %v1608_v48 = vsel %vm546_vm0, %v5377_v20, 0 }
 0x294   : > { %v1172_v54 = vsel %vm1169_vm15, %v1171_v31, %v1167_v45  ;;  %v1185_v45 = vand.u32 2147483648, %v1039_v33 }
 0x295   : > { %5768 = vpow2.f32 %v1012_v8  ;;  %v1173_v30 = vmul.f32 %v6410_v58, %v1172_v54  ;;  %v5378_v58 = vld [vmem:[%s8395_s3 + $0x50] sm:$0xff] }
 0x296   : > { %v1186_v60 = vor.u32 1.1754944e-38, %v1185_v45  ;;  %v5373_v45 = vld [vmem:[%s6116_s18 + $0x68] sm:$0xff] }
 0x297   : > { %v1035_v18 = vpop.xlane.xlu0 %1034  ;;  %1631 = vmatpush.bf16.xpose.msra.mxu3 %v1617_v51 }
 0x298   : > { %5770 = vrcp.f32 %v1035_v18  ;;  %v1155_v39 = vand.u32 2147483648, %v1035_v18  ;;  %v1153_v43 = vand.u32 2147483647, %v1035_v18  ;;  %vm1149_vm14 = vweird.f32 %v1035_v18 }
 0x299   : > { %5772 = vrcp.f32 %v1039_v33 }
 0x29a   : > { %v1156_v47 = vor.u32 1.1754944e-38, %v1155_v39  ;;  %vm1154_vm9 = vcmp.eq.f32.partialorder %v1153_v43, 8.507059e+37 }
 0x29b   : > { %v6544_v11 = vpop.eup %5768 }
 0x29c   : > { %1044 = vadd.xlane.f32.xlu2 %v6544_v11 }
 0x29e   : > { %v5771_v23 = vpop.eup %5770 }
 0x29f   : > { %v1145_v25 = vmul.f32 %v5771_v23, %v1035_v18  ;;  %vm1150_vm13 = vweird.f32 %v5771_v23  ;;  %1632 = vmatpush.bf16.xpose.msra.mxu3 %v1614_v53  ;;  %v5773_v49 = vpop.eup %5772  ;;  %v6572_v18 = vld [vmem:[%s6123_s25 + $0x40] sm:$0xff]   ;;  %v6599_v53 = vld [vmem:[%s6123_s25 + $0x48] sm:$0xff]  }
 0x2a0   : > { %vm1151_vm8 = vmor %vm1149_vm14, %vm1150_vm13  ;;  %v1175_v8 = vmul.f32 %v5773_v49, %v1039_v33  ;;  %v5474_v22 = vunpack.c.l.bf16 %v6572_v18  ;;  %v5475_v19 = vunpack.c.h.bf16 %v6572_v18  ;;  %v5479_v20 = vunpack.c.h.bf16 %v6599_v53 }
 0x2a1   : > { %v1146_v32 = vsub.f32 1.0, %v1145_v25 }
 0x2a2   : > { %v1483_v24 = vadd.f32 %v6577_v21, %v5475_v19 }
 0x2a3   : > { %v1147_v41 = vmul.f32 %v5771_v23, %v1146_v32 }
 0x2a5   : > { %v1148_v46 = vadd.f32 %v5771_v23, %v1147_v41 }
 0x2a7   : > { %v1152_v3 = vsel %vm1151_vm8, %v5771_v23, %v1148_v46  ;;  %v1176_v23 = vsub.f32 1.0, %v1175_v8  ;;  %v5375_v8 = vld [vmem:[%s6116_s18 + $0x78] sm:$0xff] }
 0x2a8   : > { %v1157_v26 = vsel %vm1154_vm9, %v1156_v47, %v1152_v3  ;;  %vm1180_vm9 = vweird.f32 %v5773_v49  ;;  %v1183_v47 = vand.u32 2147483647, %v1039_v33  ;;  %v5478_v33 = vunpack.c.l.bf16 %v6599_v53 }
 0x2a9   : > { %v1158_v4 = vmul.f32 %v6453_v6, %v1157_v26  ;;  %v1611_v6 = vsel %vm546_vm0, %v5378_v58, 0  ;;  %v1177_v37 = vmul.f32 %v5773_v49, %v1176_v23  ;;  %vm6591_vm11 = vmor %vm1179_vm10, %vm1180_vm9  ;;  %v1843_v23 = vsel %vm546_vm0, %v5375_v8, 0 }
 0x2aa   : > { %1633 = vmatpush.bf16.xpose.msra.mxu3 %v1611_v6  ;;  %vm1184_vm13 = vcmp.eq.f32.partialorder %v1183_v47, 8.507059e+37  ;;  %v1484_v1 = vadd.f32 %v6577_v21, %v5478_v33  ;;  %1845 = vmatpush.bf16.xpose.msrb.mxu2 %v1843_v23 }
 0x2ab   : > { %v1297_v5 = vpack.c.bf16 %v1173_v30, %v1158_v4  ;;  %v1178_v41 = vadd.f32 %v5773_v49, %v1177_v37 }
 0x2ad   : > { %1389 = vmatmul.bf16.gmra.mxu2 %v1297_v5  ;;  %v1182_v3 = vsel %vm6591_vm11, %v5773_v49, %v1178_v41  ;;  %v1485_v49 = vadd.f32 %v6577_v21, %v5479_v20 }
 0x2ae   : > { %v1187_v58 = vsel %vm1184_vm13, %v1186_v60, %v1182_v3 }
 0x2b2   : > { %1634 = vmatpush.bf16.xpose.msra.mxu3 %v1608_v48 }
 0x2ba   : > { %1635 = vmatpush.bf16.xpose.msra.mxu3 %v1605_v15 }
 0x2cb   : > { %v971_v9 = vpop.xlane.xlu0 %970 }
 0x2cc   : > { %v988_v63 = vsub.f32 %v6484_v10, %v971_v9  ;;  %v1482_v10 = vadd.f32 %v6577_v21, %v5474_v22  ;;  %v1188_v9 = vmul.f32 %v6413_v59, %v1187_v58 }
 0x2ce   : > { %v1018_v13 = vmul.f32 1.442695, %v988_v63  ;;  %v1498_v12 = vpack.c.bf16 %v1483_v24, %v1482_v10  ;;  %v6618_v10 = vld [vmem:[%s6123_s25 + $0x50] sm:$0xff]  }
 0x2cf   : > { %v5482_v59 = vunpack.c.l.bf16 %v6618_v10 }
 0x2d0   : > { %5774 = vpow2.f32 %v1018_v13  ;;  %4886 = vmatmul.msk.bf16.vlgmr.msra.gmra.mxu3 %vm546_vm0, %v1498_v12  ;;  %v1499_v13 = vpack.c.bf16 %v1485_v49, %v1484_v1 }
 0x2d1   : > { %v1486_v24 = vadd.f32 %v6577_v21, %v5482_v59 }
 0x2d3   : > { %v1041_v25 = vpop.xlane.xlu0 %1040 }
 0x2d4   : > { %5776 = vrcp.f32 %v1041_v25  ;;  %v1200_v26 = vand.u32 2147483648, %v1041_v25  ;;  %v1198_v5 = vand.u32 2147483647, %v1041_v25  ;;  %vm1194_vm14 = vweird.f32 %v1041_v25 }
 0x2d6   : > { %v6587_v32 = vpop.eup %5774  ;;  %v1201_v6 = vor.u32 1.1754944e-38, %v1200_v26  ;;  %vm1199_vm8 = vcmp.eq.f32.partialorder %v1198_v5, 8.507059e+37 }
 0x2d7   : > { %1050 = vadd.xlane.f32.xlu2 %v6587_v32 }
 0x2da   : > { %v5777_v39 = vpop.eup %5776 }
 0x2db   : > { %v1190_v43 = vmul.f32 %v5777_v39, %v1041_v25  ;;  %vm1195_vm12 = vweird.f32 %v5777_v39 }
 0x2dc   : > { %vm1196_vm15 = vmor %vm1194_vm14, %vm1195_vm12 }
 0x2dd   : > { %v1191_v31 = vsub.f32 1.0, %v1190_v43 }
 0x2de   : > { %v973_v54 = vpop.xlane.xlu1 %972 }
 0x2df   : > { %v989_v4 = vsub.f32 %v6519_v36, %v973_v54  ;;  %v1192_v30 = vmul.f32 %v5777_v39, %v1191_v31  ;;  %v6633_v31 = vld [vmem:[%s6123_s25 + $0x58] sm:$0xff]   ;;  %v1837_v54 = vsel %vm546_vm0, %v5373_v45, 0 }
 0x2e0   : > { %4887 = vmatmul.msk.bf16.gmra.mxu3 %vm546_vm0, %v1499_v13  ;;  %v5486_v46 = vunpack.c.l.bf16 %v6633_v31  ;;  %v5487_v47 = vunpack.c.h.bf16 %v6633_v31 }
 0x2e1   : > { %v1020_v51 = vmul.f32 1.442695, %v989_v4  ;;  %v1193_v52 = vadd.f32 %v5777_v39, %v1192_v30 }
 0x2e2   : > { %v1488_v3 = vadd.f32 %v6577_v21, %v5486_v46  ;;  %v1489_v26 = vadd.f32 %v6577_v21, %v5487_v47 }
 0x2e3   : > { %5778 = vpow2.f32 %v1020_v51  ;;  %v1197_v36 = vsel %vm1196_vm15, %v5777_v39, %v1193_v52  ;;  %v5374_v39 = vld [vmem:[%s6116_s18 + $0x70] sm:$0xff]  ;;  %v6647_v52 = vpop.xlane.xlu0 %1046 }
 0x2e4   : > { %v1202_v48 = vsel %vm1199_vm8, %v1201_v6, %v1197_v36  ;;  %v1840_v43 = vsel %vm546_vm0, %v5374_v39, 0  ;;  %v1501_v30 = vpack.c.bf16 %v1489_v26, %v1488_v3  ;;  %v5372_v6 = vld [vmem:[%s6116_s18 + $0x60] sm:$0xff]  ;;  %v5371_v3 = vld [vmem:[%s6116_s18 + $0x58] sm:$0xff] }
 0x2e5   : > { %v1203_v63 = vmul.f32 %v6499_v34, %v1202_v48  ;;  %v5483_v34 = vunpack.c.h.bf16 %v6618_v10  ;;  %1846 = vmatpush.bf16.xpose.msrb.mxu2 %v1840_v43  ;;  %v6653_v48 = vld [vmem:[%s6123_s25 + $0x60] sm:$0xff]   ;;  %v1834_v1 = vsel %vm546_vm0, %v5372_v6, 0  ;;  %v1831_v6 = vsel %vm546_vm0, %v5371_v3, 0 }
 0x2e6   : > { %v5490_v49 = vunpack.c.l.bf16 %v6653_v48  ;;  %v8475_v31 = vunpack.c.h.bf16 %v6653_v48 }
 0x2e7   : > { %v1298_v15 = vpack.c.bf16 %v1203_v63, %v1188_v9  ;;  %v1487_v12 = vadd.f32 %v6577_v21, %v5483_v34  ;;  %v8418_v9 = vunpack.c.h.bf16 %v6653_v48 }
 0x2e8   : > { %v1490_v63 = vadd.f32 %v6577_v21, %v5490_v49 }
 0x2e9   : > { %v6614_v25 = vpop.eup %5778  ;;  %1394 = vmatmul.bf16.gmra.mxu2 %v1298_v15  ;;  %v1500_v37 = vpack.c.bf16 %v1487_v12, %v1486_v24  ;;  %v1491_v15 = vadd.f32 %v6577_v21, %v8418_v9 }
 0x2ea   : > { %1052 = vadd.xlane.f32.xlu0 %v6614_v25 }
 0x2eb   : > { %v1502_v43 = vpack.c.bf16 %v1491_v15, %v1490_v63 }
 0x2ed   : > { %1847 = vmatpush.bf16.xpose.msrb.mxu2 %v1837_v54 }
 0x2f0   : > { %4888 = vmatmul.msk.bf16.gmra.mxu3 %vm546_vm0, %v1500_v37 }
 0x2f5   : > { %1848 = vmatpush.bf16.xpose.msrb.mxu2 %v1834_v1 }
 0x2fc   : > { %v1043_v41 = vpop.xlane.xlu1 %1042 }
 0x2fd   : > { %5780 = vrcp.f32 %v1043_v41  ;;  %v1215_v24 = vand.u32 2147483648, %v1043_v41  ;;  %vm1209_vm10 = vweird.f32 %v1043_v41  ;;  %v1213_v39 = vand.u32 2147483647, %v1043_v41  ;;  %1849 = vmatpush.bf16.xpose.msrb.mxu2 %v1831_v6 }
 0x2ff   : > { %vm1214_vm12 = vcmp.eq.f32.partialorder %v1213_v39, 8.507059e+37 }
 0x300   : > { %4889 = vmatmul.msk.bf16.gmra.mxu3 %vm546_vm0, %v1501_v30 }
 0x303   : > { %v5781_v4 = vpop.eup %5780 }
 0x304   : > { %v1205_v5 = vmul.f32 %v5781_v4, %v1043_v41  ;;  %v6645_v60 = vpop.xlane.xlu1 %1048  ;;  %vm1210_vm9 = vweird.f32 %v5781_v4  ;;  %v1216_v41 = vor.u32 1.1754944e-38, %v1215_v24 }
 0x305   : > { %5782 = vrcp.f32 %v6645_v60  ;;  %vm6670_vm11 = vmor %vm1209_vm10, %vm1210_vm9 }
 0x306   : > { %v1206_v51 = vsub.f32 1.0, %v1205_v5 }
 0x308   : > { %v1207_v36 = vmul.f32 %v5781_v4, %v1206_v51 }
 0x30a   : > { %v1208_v13 = vadd.f32 %v5781_v4, %v1207_v36  ;;  %v6682_v36 = vld [vmem:[%s6123_s25 + $0x68] sm:$0xff]  }
 0x30b   : > { %v6661_v8 = vpop.eup %5782 }
 0x30c   : > { %v1250_v45 = vmul.f32 %v6661_v8, %v6645_v60  ;;  %v1212_v30 = vsel %vm6670_vm11, %v5781_v4, %v1208_v13  ;;  %v5494_v13 = vunpack.c.l.bf16 %v6682_v36  ;;  %vm1255_vm9 = vweird.f32 %v6661_v8 }
 0x30d   : > { %vm1254_vm11 = vweird.f32 %v6645_v60 }
 0x30e   : > { %v1251_v15 = vsub.f32 1.0, %v1250_v45 }
 0x30f   : > { %v1045_v58 = vpop.xlane.xlu2 %1044 }
 0x310   : > { %5784 = vrcp.f32 %v1045_v58  ;;  %4890 = vmatmul.msk.bf16.gmra.mxu3 %vm546_vm0, %v1502_v43  ;;  %v1230_v51 = vand.u32 2147483648, %v1045_v58  ;;  %v1228_v63 = vand.u32 2147483647, %v1045_v58  ;;  %vm1224_vm14 = vweird.f32 %v1045_v58 }
 0x311   : > { %5786 = vrcp.f32 %v6647_v52  ;;  %v5495_v43 = vunpack.c.h.bf16 %v6682_v36  ;;  %v1252_v6 = vmul.f32 %v6661_v8, %v1251_v15 }
 0x312   : > { %v1231_v54 = vor.u32 1.1754944e-38, %v1230_v51  ;;  %vm1229_vm8 = vcmp.eq.f32.partialorder %v1228_v63, 8.507059e+37  ;;  %v1258_v51 = vand.u32 2147483647, %v6645_v60 }
 0x313   : > { %v1493_v45 = vadd.f32 %v6577_v21, %v5495_v43 }
 0x316   : > { %v5785_v23 = vpop.eup %5784 }
 0x317   : > { %v6666_v12 = vpop.eup %5786  ;;  %v1220_v37 = vmul.f32 %v5785_v23, %v1045_v58  ;;  %vm1225_vm13 = vweird.f32 %v5785_v23  ;;  %v1492_v58 = vadd.f32 %v6577_v21, %v5494_v13 }
 0x318   : > { %v1235_v5 = vmul.f32 %v6666_v12, %v6647_v52  ;;  %vm1226_vm15 = vmor %vm1224_vm14, %vm1225_vm13  ;;  %vm1240_vm10 = vweird.f32 %v6666_v12  ;;  %vm1239_vm13 = vweird.f32 %v6647_v52 }
 0x319   : > { %v1221_v26 = vsub.f32 1.0, %v1220_v37  ;;  %v1217_v37 = vsel %vm1214_vm12, %v1216_v41, %v1212_v30  ;;  %v1245_v41 = vand.u32 2147483648, %v6647_v52  ;;  %vm1256_vm12 = vmor %vm1254_vm11, %vm1255_vm9 }
 0x31a   : > { %v1236_v24 = vsub.f32 1.0, %v1235_v5  ;;  %v1218_v3 = vmul.f32 %v6526_v57, %v1217_v37  ;;  %v1503_v57 = vpack.c.bf16 %v1493_v45, %v1492_v58  ;;  %vm1241_vm14 = vmor %vm1239_vm13, %vm1240_vm10  ;;  %v5369_v45 = vld [vmem:[%s6116_s18 + $0x48] sm:$0xff] }
 0x31b   : > { %v1222_v1 = vmul.f32 %v5785_v23, %v1221_v26 }
 0x31c   : > { %v1237_v5 = vmul.f32 %v6666_v12, %v1236_v24 }
 0x31d   : > { %v1223_v4 = vadd.f32 %v5785_v23, %v1222_v1  ;;  %v1243_v1 = vand.u32 2147483647, %v6647_v52  ;;  %v6712_v52 = vld [vmem:[%s6123_s25 + $0x70] sm:$0xff]  }
 0x31f   : > { %v1227_v9 = vsel %vm1226_vm15, %v5785_v23, %v1223_v4  ;;  %v1253_v23 = vadd.f32 %v6661_v8, %v1252_v6  ;;  %vm1259_vm15 = vcmp.eq.f32.partialorder %v1258_v51, 8.507059e+37  ;;  %v1246_v4 = vor.u32 1.1754944e-38, %v1245_v41 }
 0x320   : > { %v1232_v26 = vsel %vm1229_vm8, %v1231_v54, %v1227_v9  ;;  %v1238_v9 = vadd.f32 %v6666_v12, %v1237_v5  ;;  %4891 = vmatmul.msk.bf16.gmra.mxu3 %vm546_vm0, %v1503_v57  ;;  %vm1244_vm8 = vcmp.eq.f32.partialorder %v1243_v1, 8.507059e+37 }
 0x321   : > { %v1233_v39 = vmul.f32 %v6544_v11, %v1232_v26  ;;  %v1260_v11 = vand.u32 2147483648, %v6645_v60  ;;  %v1257_v63 = vsel %vm1256_vm12, %v6661_v8, %v1253_v23  ;;  %v5498_v8 = vunpack.c.l.bf16 %v6712_v52  ;;  %v5368_v23 = vld [vmem:[%s6116_s18 + $0x40] sm:$0xff] }
 0x322   : > { %v1242_v37 = vsel %vm1241_vm14, %v6666_v12, %v1238_v9  ;;  %v5499_v26 = vunpack.c.h.bf16 %v6712_v52  ;;  %v1822_v57 = vsel %vm546_vm0, %v5368_v23, 0 }
 0x323   : > { %v1299_v30 = vpack.c.bf16 %v1233_v39, %v1218_v3  ;;  %v1261_v15 = vor.u32 1.1754944e-38, %v1260_v11  ;;  %v1247_v54 = vsel %vm1244_vm8, %v1246_v4, %v1242_v37  ;;  %v1494_v12 = vadd.f32 %v6577_v21, %v5498_v8 }
 0x324   : > { %v1248_v3 = vmul.f32 %v6508_v27, %v1247_v54  ;;  %v1495_v6 = vadd.f32 %v6577_v21, %v5499_v26 }
 0x325   : > { %1399 = vmatmul.bf16.gmra.mxu2 %v1299_v30  ;;  %v1262_v60 = vsel %vm1259_vm15, %v1261_v15, %v1257_v63  ;;  %v1825_v30 = vsel %vm546_vm0, %v5369_v45, 0 }
 0x326   : > { %v1263_v24 = vmul.f32 %v6532_v40, %v1262_v60  ;;  %v5370_v40 = vld [vmem:[%s6116_s18 + $0x50] sm:$0xff]  ;;  %v1504_v58 = vpack.c.bf16 %v1495_v6, %v1494_v12 }
 0x327   : > { %v1828_v27 = vsel %vm546_vm0, %v5370_v40, 0 }
 0x328   : > { %v1300_v39 = vpack.c.bf16 %v1263_v24, %v1248_v3  ;;  %1850 = vmatpush.bf16.xpose.msrb.mxu2 %v1828_v27 }
 0x330   : > { %4892 = vmatmul.msk.bf16.gmra.mxu3 %vm546_vm0, %v1504_v58  ;;  %1851 = vmatpush.bf16.xpose.msrb.mxu2 %v1825_v30 }
 0x335   : > { %1404 = vmatmul.bf16.gmra.mxu2 %v1300_v39 }
 0x338   : > { %1852 = vmatpush.bf16.xpose.msrb.mxu2 %v1822_v57 }
 0x34a   : > { %v1051_v5 = vpop.xlane.xlu2 %1050 }
 0x34b   : > { %5788 = vrcp.f32 %v1051_v5  ;;  %v1275_v54 = vand.u32 2147483648, %v1051_v5  ;;  %vm1269_vm10 = vweird.f32 %v1051_v5  ;;  %v1273_v3 = vand.u32 2147483647, %v1051_v5 }
 0x34d   : > { %v1276_v58 = vor.u32 1.1754944e-38, %v1275_v54  ;;  %vm1274_vm13 = vcmp.eq.f32.partialorder %v1273_v3, 8.507059e+37 }
 0x351   : > { %v5789_v11 = vpop.eup %5788 }
 0x352   : > { %v1265_v9 = vmul.f32 %v5789_v11, %v1051_v5  ;;  %vm1270_vm9 = vweird.f32 %v5789_v11 }
 0x353   : > { %v1637_v51 = vpop.f32.mrf.mxu3  ;;  %vm1271_vm11 = vmor %vm1269_vm10, %vm1270_vm9  ;;  %vm8488_vm9 = vcmp.ge.s32.totalorder %v6335_v50, %v6238_v2  ;;  %vm8489_vm10 = vcmp.ge.s32.totalorder %v6374_v14, %v6238_v2 }
 0x354   : > { %1680 = vrot.lane.b32.xlu1 %v1637_v51, %s6010_s8  ;;  %v1266_v41 = vsub.f32 1.0, %v1265_v9 }
 0x356   : > { %v1267_v63 = vmul.f32 %v5789_v11, %v1266_v41  ;;  %v6734_v41 = vpop.f32.mrf.mxu2 }
 0x357   : > { %8466 = vst [vmem:[#allocation3_spill] sm:$0xff] %v6734_v41 }
 0x358   : > { %v1268_v60 = vadd.f32 %v5789_v11, %v1267_v63 }
 0x35a   : > { %v1272_v12 = vsel %vm1271_vm11, %v5789_v11, %v1268_v60  ;;  %vm8490_vm11 = vcmp.ge.s32.totalorder %v6312_v38, %v6238_v2 }
 0x35b   : > { %v1639_v15 = vpop.f32.mrf.mxu3  ;;  %v1277_v30 = vsel %vm1274_vm13, %v1276_v58, %v1272_v12  ;;  %vm8492_vm13 = vcmp.ge.s32.totalorder %v6324_v44, %v6238_v2 }
 0x35c   : > { %1685 = vrot.lane.b32.xlu2 %v1639_v15, %s6011_s9  ;;  %v1278_v9 = vmul.f32 %v6587_v32, %v1277_v30  ;;  %v6737_v15 = vld [vmem:[%s6123_s25 + $0x78] sm:$0xff]  }
 0x35d   : > { %v1053_v1 = vpop.xlane.xlu0 %1052 }
 0x35e   : > { %5790 = vrcp.f32 %v1053_v1  ;;  %v1290_v39 = vand.u32 2147483648, %v1053_v1  ;;  %v1288_v40 = vand.u32 2147483647, %v1053_v1  ;;  %vm1284_vm14 = vweird.f32 %v1053_v1 }
 0x360   : > { %v1291_v23 = vor.u32 1.1754944e-38, %v1290_v39  ;;  %vm1289_vm8 = vcmp.eq.f32.partialorder %v1288_v40, 8.507059e+37  ;;  %v6760_v39 = vpop.f32.mrf.mxu2 }
 0x361   : > { %8467 = vst [vmem:[#allocation4_spill] sm:$0xff] %v6760_v39 }
 0x363   : > { %v1642_v45 = vpop.f32.mrf.mxu3 }
 0x364   : > { %v5791_v37 = vpop.eup %5790  ;;  %1690 = vrot.lane.b32.xlu0 %v1642_v45, %s6012_s10 }
 0x365   : > { %v1280_v4 = vmul.f32 %v5791_v37, %v1053_v1  ;;  %vm1285_vm12 = vweird.f32 %v5791_v37  ;;  %v5502_v1 = vunpack.c.l.bf16 %v6737_v15 }
 0x366   : > { %vm1286_vm15 = vmor %vm1284_vm14, %vm1285_vm12  ;;  %vm8491_vm12 = vcmp.ge.s32.totalorder %v6424_v42, %v6238_v2  ;;  %vm8493_vm14 = vcmp.ge.s32.totalorder %v6397_v35, %v6238_v2 }
 0x367   : > { %v1281_v24 = vsub.f32 1.0, %v1280_v4  ;;  %v5503_v4 = vunpack.c.h.bf16 %v6737_v15 }
 0x369   : > { %v1282_v6 = vmul.f32 %v5791_v37, %v1281_v24  ;;  %v1497_v32 = vadd.f32 %v6577_v21, %v5503_v4 }
 0x36b   : > { %v1283_v27 = vadd.f32 %v5791_v37, %v1282_v6  ;;  %v1644_v63 = vpop.f32.mrf.mxu3  ;;  %v6765_v6 = vpop.f32.mrf.mxu2 }
 0x36c   : > { %1695 = vrot.lane.b32.xlu1 %v1644_v63, %s6013_s11  ;;  %8468 = vst [vmem:[#allocation5_spill] sm:$0xff] %v6765_v6 }
 0x36d   : > { %v1287_v57 = vsel %vm1286_vm15, %v5791_v37, %v1283_v27  ;;  %v1496_v37 = vadd.f32 %v6577_v21, %v5502_v1  ;;  %vm8494_vm15 = vcmp.ge.s32.totalorder %v6440_v0, %v6238_v2 }
 0x36e   : > { %v1292_v5 = vsel %vm1289_vm8, %v1291_v23, %v1287_v57  ;;  %vm8495_vm8 = vcmp.ge.s32.totalorder %v6506_v55, %v6238_v2 }
 0x36f   : > { %v1293_v11 = vmul.f32 %v6614_v25, %v1292_v5  ;;  %v6751_v25 = vld [vmem:[%s8396_s4 + $0x1] ss:$0 sm:$0xff]  ;;  %v1505_v60 = vpack.c.bf16 %v1497_v32, %v1496_v37 }
 0x370   : > { %v1453_v54 = vadd.f32 %v6751_v25, %v5474_v22  ;;  %v1454_v24 = vadd.f32 %v6751_v25, %v5475_v19  ;;  %v1455_v22 = vadd.f32 %v6751_v25, %v5478_v33  ;;  %v1456_v18 = vadd.f32 %v6751_v25, %v5479_v20 }
 0x371   : > { %v1301_v51 = vpack.c.bf16 %v1293_v11, %v1278_v9  ;;  %4893 = vmatmul.msk.bf16.gmra.mxu3 %vm546_vm0, %v1505_v60  ;;  %v1457_v33 = vadd.f32 %v6751_v25, %v5482_v59  ;;  %v1458_v53 = vadd.f32 %v6751_v25, %v5483_v34  ;;  %v1459_v5 = vadd.f32 %v6751_v25, %v5486_v46 }
 0x372   : > { %v1469_v21 = vpack.c.bf16 %v1454_v24, %v1453_v54  ;;  %v1470_v40 = vpack.c.bf16 %v1456_v18, %v1455_v22  ;;  %v1460_v10 = vadd.f32 %v6751_v25, %v5487_v47  ;;  %v1461_v46 = vadd.f32 %v6751_v25, %v5490_v49 }
 0x373   : > { %1409 = vmatmul.bf16.gmra.mxu2 %v1301_v51  ;;  %v1647_v3 = vpop.f32.mrf.mxu3  ;;  %v6774_v58 = vpop.f32.mrf.mxu2  ;;  %v1471_v30 = vpack.c.bf16 %v1458_v53, %v1457_v33  ;;  %v1462_v47 = vadd.f32 %v6751_v25, %v8475_v31  ;;  %v1463_v49 = vadd.f32 %v6751_v25, %v5494_v13  ;;  %v1464_v48 = vadd.f32 %v6751_v25, %v5495_v43  ;;  %v5407_v43 = vld [vmem:[%s8395_s3 + $0xb8] sm:$0xff] }
 0x374   : > { %1700 = vrot.lane.b32.xlu0 %v1647_v3, %s6014_s12  ;;  %8469 = vst [vmem:[#allocation6_spill] sm:$0xff] %v6774_v58  ;;  %v1472_v9 = vpack.c.bf16 %v1460_v10, %v1459_v5  ;;  %v1466_v22 = vadd.f32 %v6751_v25, %v5499_v26  ;;  %v2611_v18 = vsel %vm546_vm0, %v5407_v43, 0  ;;  %v1468_v52 = vadd.f32 %v6751_v25, %v5503_v4 }
 0x375   : > { %v1473_v32 = vpack.c.bf16 %v1462_v47, %v1461_v46  ;;  %v1474_v24 = vpack.c.bf16 %v1464_v48, %v1463_v49  ;;  %2613 = vmatpush.bf16.xpose.msrb.mxu1 %v2611_v18 }
 0x37b   : > { %v1649_v12 = vpop.f32.mrf.mxu3  ;;  %v6778_v45 = vpop.f32.mrf.mxu2 }
 0x37c   : > { %1705 = vrot.lane.b32.xlu2 %v1649_v12, %s8440_s13  ;;  %8470 = vst [vmem:[#allocation7_spill] sm:$0xff] %v6778_v45  ;;  %v1465_v12 = vadd.f32 %v6751_v25, %v5498_v8 }
 0x37e   : > { %v1475_v13 = vpack.c.bf16 %v1466_v22, %v1465_v12 }
 0x383   : > { %4926 = vmatmul.msk.bf16.vlgmr.msrb.gmra.mxu2 %vm546_vm0, %v1469_v21  ;;  %v1652_v19 = vpop.f32.mrf.mxu3  ;;  %v6788_v23 = vpop.f32.mrf.mxu2 }
 0x384   : > { %1710 = vrot.lane.b32.xlu2 %v1652_v19, %s8439_s14  ;;  %8471 = vst [vmem:[#allocation8_spill] sm:$0xff] %v6788_v23  ;;  %v1467_v19 = vadd.f32 %v6751_v25, %v5502_v1 }
 0x386   : > { %v1476_v26 = vpack.c.bf16 %v1468_v52, %v1467_v19  ;;  %v5403_v19 = vld [vmem:[%s8395_s3 + $0x98] sm:$0xff] }
 0x387   : > { %v2599_v52 = vsel %vm546_vm0, %v5403_v19, 0 }
 0x38b   : > { %v1654_v27 = vpop.f32.mrf.mxu3  ;;  %v6797_v59 = vpop.f32.mrf.mxu2 }
 0x38c   : > { %1715 = vrot.lane.b32.xlu2 %v1654_v27, %s8441_s16  ;;  %8472 = vst [vmem:[#allocation9_spill] sm:$0xff] %v6797_v59  ;;  %v5406_v27 = vld [vmem:[%s8395_s3 + $0xb0] sm:$0xff] }
 0x38d   : > { %v2608_v33 = vsel %vm546_vm0, %v5406_v27, 0 }
 0x38e   : > { %2614 = vmatpush.bf16.xpose.msrb.mxu1 %v2608_v33 }
 0x393   : > { %4927 = vmatmul.msk.bf16.gmra.mxu2 %vm546_vm0, %v1470_v40  ;;  %v1657_v20 = vpop.f32.mrf.mxu3  ;;  %v6802_v51 = vpop.f32.mrf.mxu2 }
 0x394   : > { %1720 = vrot.lane.b32.xlu0 %v1657_v20, %s8421_s17  ;;  %8474 = vst [vmem:[#allocation10_spill] sm:$0xff] %v6802_v51  ;;  %v5405_v20 = vld [vmem:[%s8395_s3 + $0xa8] sm:$0xff] }
 0x39b   : > { %v1659_v57 = vpop.f32.mrf.mxu3  ;;  %v6811_v37 = vpop.f32.mrf.mxu2 }
 0x39c   : > { %1725 = vrot.lane.b32.xlu1 %v1659_v57, %s8423_s19  ;;  %8477 = vst [vmem:[#allocation11_spill] sm:$0xff] %v6811_v37  ;;  %v2605_v57 = vsel %vm546_vm0, %v5405_v20, 0  ;;  %v5402_v20 = vld [vmem:[%s8395_s3 + $0x90] sm:$0xff] }
 0x39d   : > { %2615 = vmatpush.bf16.xpose.msrb.mxu1 %v2605_v57  ;;  %v2596_v57 = vsel %vm546_vm0, %v5402_v20, 0 }
 0x3a3   : > { %4928 = vmatmul.msk.bf16.gmra.mxu2 %vm546_vm0, %v1471_v30  ;;  %v1662_v34 = vpop.f32.mrf.mxu3  ;;  %v6815_v54 = vpop.f32.mrf.mxu2 }
 0x3a4   : > { %1730 = vrot.lane.b32.xlu2 %v1662_v34, %s8419_s20  ;;  %8479 = vst [vmem:[#allocation12_spill] sm:$0xff] %v6815_v54  ;;  %s8486_s20 = smov 377  }
 0x3ab   : > { %v1664_v11 = vpop.f32.mrf.mxu3  ;;  %v6823_v3 = vpop.f32.mrf.mxu2 }
 0x3ac   : > { %1735 = vrot.lane.b32.xlu1 %v1664_v11, %s8473_s15  ;;  %8480 = vst [vmem:[#allocation13_spill] sm:$0xff] %v6823_v3 }
 0x3b3   : > { %4929 = vmatmul.msk.bf16.gmra.mxu2 %vm546_vm0, %v1472_v9  ;;  %v1667_v63 = vpop.f32.mrf.mxu3  ;;  %v6826_v21 = vpop.f32.mrf.mxu2 }
 0x3b4   : > { %1740 = vrot.lane.b32.xlu0 %v1667_v63, %s8476_s29  ;;  %8481 = vst [vmem:[#allocation14_spill] sm:$0xff] %v6826_v21 }
 0x3b6   : > { %v1686_v5 = vpop.permute.xlu2 %1685 }
 0x3bb   : > { %v1669_v60 = vpop.f32.mrf.mxu3  ;;  %v6835_v36 = vpop.f32.mrf.mxu2 }
 0x3bc   : > { %1745 = vrot.lane.b32.xlu1 %v1669_v60, %s8478_s26  ;;  %8482 = vst [vmem:[#allocation15_spill] sm:$0xff] %v6835_v36 }
 0x3c3   : > { %4930 = vmatmul.msk.bf16.gmra.mxu2 %vm546_vm0, %v1473_v32  ;;  %v6847_v8 = vpop.f32.mrf.mxu2  ;;  %v5404_v32 = vld [vmem:[%s8395_s3 + $0xa0] sm:$0xff] }
 0x3c4   : > { %8483 = vst [vmem:[#allocation16_spill] sm:$0xff] %v6847_v8  ;;  %v2602_v49 = vsel %vm546_vm0, %v5404_v32, 0  ;;  %v5399_v32 = vld [vmem:[%s6116_s18 + $0xb8] sm:$0xff] }
 0x3c5   : > { %2616 = vmatpush.bf16.xpose.msrb.mxu1 %v2602_v49 }
 0x3c6   : > { %v1681_v15 = vpop.permute.xlu1 %1680 }
 0x3cd   : > { %2617 = vmatpush.bf16.xpose.msrb.mxu1 %v2599_v52 }
 0x3d3   : > { %4931 = vmatmul.msk.bf16.gmra.mxu2 %vm546_vm0, %v1474_v24 }
 0x3d5   : > { %2618 = vmatpush.bf16.xpose.msrb.mxu1 %v2596_v57 }
 0x3d6   : > { %v1691_v46 = vpop.permute.xlu0 %1690 }
 0x3de   : > { %v1696_v48 = vpop.permute.xlu1 %1695 }
 0x3e3   : > { %4932 = vmatmul.msk.bf16.gmra.mxu2 %vm546_vm0, %v1475_v13 }
 0x3f3   : > { %4933 = vmatmul.msk.bf16.gmra.mxu2 %vm546_vm0, %v1476_v26  ;;  %v1706_v26 = vpop.permute.xlu2 %1705 }
 0x3f4   : > { %v1672_v18 = vpop.f32.mrf.mxu3 }
 0x3f6   : > { %v6850_v40 = vpop.f32.mrf.mxu2 }
 0x3f7   : > { %8484 = vst [vmem:[#allocation17_spill] sm:$0xff] %v6850_v40 }
 0x3fe   : > { %v6856_v1 = vpop.f32.mrf.mxu2 }
 0x3ff   : > { %8485 = vst [vmem:[#allocation18_spill] sm:$0xff] %v6856_v1  ;;  %v7018_v1 = vld [vmem:[%s6123_s25 + $0x90] sm:$0xff]  }
 0x406   : > { %v1854_v53 = vpop.f32.mrf.mxu2 }
 0x407   : > { %v1855_v4 = vadd.f32 %v1854_v53, %v1681_v15  ;;  %v1674_v53 = vpop.f32.mrf.mxu3 }
 0x409   : > { %v1894_v25 = vmul.f32 0.125, %v1855_v4 }
 0x40b   : > { %v6864_v30 = vsel %vm370_vm2, %v1894_v25, -1e+30 }
 0x40c   : > { %1926 = vmax.xlane.f32.xlu1 %v6864_v30 }
 0x40e   : > { %v1856_v10 = vpop.f32.mrf.mxu2 }
 0x40f   : > { %v1857_v34 = vadd.f32 %v1856_v10, %v1686_v5 }
 0x411   : > { %v1895_v9 = vmul.f32 0.125, %v1857_v34  ;;  %v5401_v34 = vld [vmem:[%s8395_s3 + $0x88] sm:$0xff] }
 0x413   : > { %v6871_v11 = vsel %vm371_vm1, %v1895_v9, -1e+30  ;;  %v2593_v9 = vsel %vm546_vm0, %v5401_v34, 0 }
 0x414   : > { %1928 = vmax.xlane.f32.xlu0 %v6871_v11  ;;  %2619 = vmatpush.bf16.xpose.msrb.mxu1 %v2593_v9 }
 0x416   : > { %v1859_v31 = vpop.f32.mrf.mxu2 }
 0x417   : > { %v1860_v47 = vadd.f32 %v1859_v31, %v1691_v46  ;;  %v1711_v31 = vpop.permute.xlu2 %1710 }
 0x419   : > { %v1896_v63 = vmul.f32 0.125, %v1860_v47  ;;  %v1701_v47 = vpop.permute.xlu0 %1700 }
 0x41b   : > { %v6880_v60 = vsel %vm372_vm3, %v1896_v63, -1e+30 }
 0x41c   : > { %1930 = vmax.xlane.f32.xlu2 %v6880_v60 }
 0x41e   : > { %v1861_v24 = vpop.f32.mrf.mxu2 }
 0x41f   : > { %v1862_v12 = vadd.f32 %v1861_v24, %v1696_v48  ;;  %v2828_v48 = vsel %vm546_vm0, %v5399_v32, 0  ;;  %v5400_v24 = vld [vmem:[%s8395_s3 + $0x80] sm:$0xff] }
 0x420   : > { %2830 = vmatpush.bf16.xpose.msrb.mxu3 %v2828_v48 }
 0x421   : > { %v1897_v22 = vmul.f32 0.125, %v1862_v12  ;;  %v1721_v20 = vpop.permute.xlu0 %1720 }
 0x423   : > { %v6887_v13 = vsel %vm373_vm4, %v1897_v22, -1e+30  ;;  %v2590_v22 = vsel %vm546_vm0, %v5400_v24, 0 }
 0x424   : > { %1932 = vmax.xlane.f32.xlu1 %v6887_v13  ;;  %2620 = vmatpush.bf16.xpose.msrb.mxu1 %v2590_v22 }
 0x426   : > { %v1864_v43 = vpop.f32.mrf.mxu2 }
 0x427   : > { %v1865_v63 = vadd.f32 %v1864_v43, %v1701_v47  ;;  %v6922_v43 = vld [vmem:[%s6123_s25 + $0x80] sm:$0xff]  }
 0x429   : > { %v1898_v12 = vmul.f32 0.125, %v1865_v63  ;;  %v1741_v22 = vpop.permute.xlu0 %1740 }
 0x42b   : > { %v6919_v52 = vsel %vm374_vm5, %v1898_v12, -1e+30 }
 0x42e   : > { %v1866_v27 = vpop.f32.mrf.mxu2 }
 0x42f   : > { %v1867_v33 = vadd.f32 %v1866_v27, %v1706_v26  ;;  %v1726_v26 = vpop.permute.xlu1 %1725  ;;  %v8428_v27 = vunpack.c.l.bf16 %v6922_v43 }
 0x431   : > { %v1899_v15 = vmul.f32 0.125, %v1867_v33  ;;  %v8427_v33 = vunpack.c.h.bf16 %v6922_v43 }
 0x433   : > { %v6897_v4 = vsel %vm375_vm7, %v1899_v15, -1e+30  ;;  %v6930_v15 = vld [vmem:[%s8397_s5 + $0x2] ss:$0 sm:$0xff] }
 0x434   : > { %1936 = vmax.xlane.f32.xlu0 %v6897_v4  ;;  %1755 = vrot.lane.b32.xlu2 %v1674_v53, %s8486_s20  ;;  %v2468_v34 = vadd.f32 %v6930_v15, %v8427_v33 }
 0x436   : > { %v1869_v25 = vpop.f32.mrf.mxu2 }
 0x437   : > { %v1870_v53 = vadd.f32 %v1869_v25, %v1711_v31  ;;  %v5398_v31 = vld [vmem:[%s6116_s18 + $0xb0] sm:$0xff]  ;;  %v1736_v24 = vpop.permute.xlu1 %1735 }
 0x439   : > { %v1900_v63 = vmul.f32 0.125, %v1870_v53 }
 0x43d   : > { %1750 = vrot.lane.b32.xlu1 %v1672_v18, %s8487_s30  ;;  %v1716_v18 = vpop.permute.xlu2 %1715 }
 0x43e   : > { %v1871_v5 = vpop.f32.mrf.mxu2 }
 0x43f   : > { %v1872_v19 = vadd.f32 %v1871_v5, %v1716_v18  ;;  %v2467_v5 = vadd.f32 %v6930_v15, %v8428_v27 }
 0x441   : > { %v1901_v9 = vmul.f32 0.125, %v1872_v19  ;;  %v2483_v47 = vpack.c.bf16 %v2468_v34, %v2467_v5  ;;  %v6949_v19 = vsel %vm8488_vm9, %v1900_v63, -1e+30  ;;  %v6966_v63 = vld [vmem:[%s6123_s25 + $0x88] sm:$0xff]   ;;  %vm8496_vm9 = vcmp.ge.s32.totalorder %v6470_v56, %v6238_v2 }
 0x443   : > { %5064 = vmatmul.msk.bf16.vlgmr.msrb.gmra.mxu1 %vm546_vm0, %v2483_v47  ;;  %v6942_v25 = vsel %vm377_vm6, %v1901_v9, -1e+30 }
 0x445   : > { %v1731_v48 = vpop.permute.xlu2 %1730 }
 0x446   : > { %v1874_v10 = vpop.f32.mrf.mxu2 }
 0x447   : > { %v1875_v32 = vadd.f32 %v1874_v10, %v1721_v20  ;;  %v2825_v10 = vsel %vm546_vm0, %v5398_v31, 0 }
 0x448   : > { %2831 = vmatpush.bf16.xpose.msrb.mxu3 %v2825_v10 }
 0x449   : > { %v1902_v20 = vmul.f32 0.125, %v1875_v32  ;;  %v1746_v32 = vpop.permute.xlu1 %1745 }
 0x44b   : > { %v6962_v47 = vsel %vm8490_vm11, %v1902_v20, -1e+30 }
 0x44e   : > { %v1876_v46 = vpop.f32.mrf.mxu2 }
 0x44f   : > { %v1877_v9 = vadd.f32 %v1876_v46, %v1726_v26  ;;  %v8426_v46 = vunpack.c.l.bf16 %v6966_v63  ;;  %v8425_v26 = vunpack.c.h.bf16 %v6966_v63 }
 0x451   : > { %v2470_v10 = vadd.f32 %v6930_v15, %v8425_v26 }
 0x456   : > { %v1879_v49 = vpop.f32.mrf.mxu2 }
 0x457   : > { %v1880_v12 = vadd.f32 %v1879_v49, %v1731_v48 }
 0x459   : > { %v1904_v34 = vmul.f32 0.125, %v1880_v12 }
 0x45b   : > { %v6971_v48 = vsel %vm8491_vm12, %v1904_v34, -1e+30 }
 0x45d   : > { %1934 = vmax.xlane.f32.xlu2 %v6919_v52 }
 0x45e   : > { %v1881_v57 = vpop.f32.mrf.mxu2 }
 0x465   : > { %1940 = vmax.xlane.f32.xlu2 %v6942_v25 }
 0x466   : > { %v1884_v18 = vpop.f32.mrf.mxu2 }
 0x467   : > { %v1885_v53 = vadd.f32 %v1884_v18, %v1741_v22  ;;  %1938 = vmax.xlane.f32.xlu1 %v6949_v19  ;;  %v1903_v22 = vmul.f32 0.125, %v1877_v9  ;;  %v2469_v18 = vadd.f32 %v6930_v15, %v8426_v46  ;;  %v5397_v9 = vld [vmem:[%s6116_s18 + $0xa8] sm:$0xff] }
 0x469   : > { %v1906_v5 = vmul.f32 0.125, %v1885_v53  ;;  %v2484_v20 = vpack.c.bf16 %v2470_v10, %v2469_v18  ;;  %v6985_v34 = vsel %vm8492_vm13, %v1903_v22, -1e+30 }
 0x46b   : > { %v6956_v49 = vsel %vm8489_vm10, %v1906_v5, -1e+30  ;;  %v1882_v5 = vadd.f32 %v1881_v57, %v1736_v24  ;;  %5065 = vmatmul.msk.bf16.gmra.mxu1 %vm546_vm0, %v2484_v20 }
 0x46c   : > { %1950 = vmax.xlane.f32.xlu0 %v6956_v49 }
 0x46d   : > { %1942 = vmax.xlane.f32.xlu2 %v6962_v47  ;;  %v1905_v57 = vmul.f32 0.125, %v1882_v5 }
 0x46e   : > { %v1886_v31 = vpop.f32.mrf.mxu2 }
 0x46f   : > { %v1887_v12 = vadd.f32 %v1886_v31, %v1746_v32  ;;  %1946 = vmax.xlane.f32.xlu1 %v6971_v48  ;;  %v2822_v31 = vsel %vm546_vm0, %v5397_v9, 0  ;;  %v7000_v24 = vsel %vm8494_vm15, %v1905_v57, -1e+30  ;;  %v5395_v9 = vld [vmem:[%s6116_s18 + $0x98] sm:$0xff] }
 0x470   : > { %2832 = vmatpush.bf16.xpose.msrb.mxu3 %v2822_v31  ;;  %v2816_v31 = vsel %vm546_vm0, %v5395_v9, 0 }
 0x471   : > { %v1907_v53 = vmul.f32 0.125, %v1887_v12  ;;  %v5396_v12 = vld [vmem:[%s6116_s18 + $0xa0] sm:$0xff] }
 0x472   : > { %v2819_v22 = vsel %vm546_vm0, %v5396_v12, 0 }
 0x473   : > { %v6993_v32 = vsel %vm8493_vm14, %v1907_v53, -1e+30 }
 0x475   : > { %1944 = vmax.xlane.f32.xlu2 %v6985_v34 }
 0x476   : > { %v1889_v18 = vpop.f32.mrf.mxu2 }
 0x477   : > { %1952 = vmax.xlane.f32.xlu1 %v6993_v32 }
 0x478   : > { %2833 = vmatpush.bf16.xpose.msrb.mxu3 %v2819_v22 }
 0x47d   : > { %1948 = vmax.xlane.f32.xlu2 %v7000_v24 }
 0x47e   : > { %v1891_v20 = vpop.f32.mrf.mxu2 }
 0x47f   : > { %v1927_v10 = vpop.xlane.xlu1 %1926 }
 0x480   : > { %2834 = vmatpush.bf16.xpose.msrb.mxu3 %v2816_v31 }
 0x487   : > { %v1929_v36 = vpop.xlane.xlu0 %1928 }
 0x48f   : > { %v1931_v53 = vpop.xlane.xlu2 %1930 }
 0x497   : > { %v1933_v26 = vpop.xlane.xlu1 %1932  ;;  %v1756_v5 = vpop.permute.xlu2 %1755 }
 0x498   : > { %v1961_v57 = vsub.f32 %v6887_v13, %v1933_v26  ;;  %v1892_v46 = vadd.f32 %v1891_v20, %v1756_v5  ;;  %v8429_v13 = vunpack.c.l.bf16 %v7018_v1  ;;  %v8432_v26 = vunpack.c.h.bf16 %v7018_v1 }
 0x499   : > { %v1958_v5 = vsub.f32 %v6864_v30, %v1927_v10 }
 0x49a   : > { %v1980_v33 = vmul.f32 1.442695, %v1961_v57  ;;  %v1909_v27 = vmul.f32 0.125, %v1892_v46  ;;  %v5394_v46 = vld [vmem:[%s6116_s18 + $0x90] sm:$0xff] }
 0x49b   : > { %v2813_v20 = vsel %vm546_vm0, %v5394_v46, 0  ;;  %v1974_v40 = vmul.f32 1.442695, %v1958_v5  ;;  %v5393_v46 = vld [vmem:[%s6116_s18 + $0x88] sm:$0xff] }
 0x49c   : > { %5792 = vpow2.f32 %v1980_v33  ;;  %v7011_v12 = vsel %vm8495_vm8, %v1909_v27, -1e+30  ;;  %v2471_v33 = vadd.f32 %v6930_v15, %v8429_v13  ;;  %v2472_v27 = vadd.f32 %v6930_v15, %v8432_v26  ;;  %2835 = vmatpush.bf16.xpose.msrb.mxu3 %v2813_v20 }
 0x49d   : > { %1956 = vmax.xlane.f32.xlu1 %v7011_v12  ;;  %5794 = vpow2.f32 %v1974_v40  ;;  %v1960_v40 = vsub.f32 %v6880_v60, %v1931_v53  ;;  %v7065_v53 = vld [vmem:[%s8396_s4 + $0x2] ss:$0 sm:$0xff] }
 0x49e   : > { %v2485_v9 = vpack.c.bf16 %v2472_v27, %v2471_v33  ;;  %v1959_v33 = vsub.f32 %v6871_v11, %v1929_v36  ;;  %v2810_v27 = vsel %vm546_vm0, %v5393_v46, 0 }
 0x49f   : > { %v1978_v5 = vmul.f32 1.442695, %v1960_v40 }
 0x4a0   : > { %5066 = vmatmul.msk.bf16.gmra.mxu1 %vm546_vm0, %v2485_v9  ;;  %v1976_v30 = vmul.f32 1.442695, %v1959_v33  ;;  %v8497_v33 = vunpack.c.l.bf16 %v6922_v43 }
 0x4a2   : > { %v7014_v22 = vpop.eup %5792  ;;  %5796 = vpow2.f32 %v1976_v30  ;;  %v8498_v30 = vunpack.c.h.bf16 %v6922_v43 }
 0x4a3   : > { %2012 = vadd.xlane.f32.xlu2 %v7014_v22  ;;  %v7044_v10 = vpop.eup %5794  ;;  %5798 = vpow2.f32 %v1978_v5 }
 0x4a4   : > { %2836 = vmatpush.bf16.xpose.msrb.mxu3 %v2810_v27  ;;  %v2438_v27 = vadd.f32 %v7065_v53, %v8497_v33  ;;  %v2439_v40 = vadd.f32 %v7065_v53, %v8498_v30 }
 0x4af   : > { %v1751_v31 = vpop.permute.xlu1 %1750 }
 0x4b0   : > { %v1890_v57 = vadd.f32 %v1889_v18, %v1751_v31  ;;  %v7042_v18 = vld [vmem:[%s6123_s25 + $0x98] sm:$0xff]   ;;  %v7057_v31 = vpop.eup %5796 }
 0x4b1   : > { %v8431_v20 = vunpack.c.l.bf16 %v7042_v18  ;;  %v7067_v46 = vpop.eup %5798 }
 0x4b2   : > { %v1908_v8 = vmul.f32 0.125, %v1890_v57  ;;  %v5392_v57 = vld [vmem:[%s6116_s18 + $0x80] sm:$0xff] }
 0x4b3   : > { %v2473_v36 = vadd.f32 %v6930_v15, %v8431_v20  ;;  %v2807_v60 = vsel %vm546_vm0, %v5392_v57, 0 }
 0x4b4   : > { %v7035_v13 = vsel %vm8496_vm9, %v1908_v8, -1e+30  ;;  %v8430_v8 = vunpack.c.h.bf16 %v7042_v18  ;;  %2837 = vmatpush.bf16.xpose.msrb.mxu3 %v2807_v60 }
 0x4b5   : > { %1954 = vmax.xlane.f32.xlu0 %v7035_v13 }
 0x4b6   : > { %v2474_v11 = vadd.f32 %v6930_v15, %v8430_v8 }
 0x4b8   : > { %v2486_v9 = vpack.c.bf16 %v2474_v11, %v2473_v36  ;;  %v2454_v36 = vpack.c.bf16 %v2439_v40, %v2438_v27  ;;  %v8499_v40 = vunpack.c.l.bf16 %v6966_v63 }
 0x4ba   : > { %5067 = vmatmul.msk.bf16.gmra.mxu1 %vm546_vm0, %v2486_v9  ;;  %v1937_v9 = vpop.xlane.xlu0 %1936 }
 0x4bb   : > { %5104 = vmatmul.msk.bf16.vlgmr.msrb.gmra.mxu3 %vm546_vm0, %v2454_v36  ;;  %v1963_v60 = vsub.f32 %v6897_v4, %v1937_v9  ;;  %v8500_v4 = vunpack.c.h.bf16 %v6966_v63 }
 0x4bd   : > { %2006 = vadd.xlane.f32.xlu0 %v7044_v10  ;;  %v1984_v8 = vmul.f32 1.442695, %v1963_v60  ;;  %v2441_v36 = vadd.f32 %v7065_v53, %v8500_v4 }
 0x4c5   : > { %2008 = vadd.xlane.f32.xlu0 %v7057_v31 }
 0x4cd   : > { %2010 = vadd.xlane.f32.xlu0 %v7067_v46 }
 0x4d0   : > { %v1935_v11 = vpop.xlane.xlu2 %1934 }
 0x4d1   : > { %v1962_v5 = vsub.f32 %v6919_v52, %v1935_v11  ;;  %v2440_v52 = vadd.f32 %v7065_v53, %v8499_v40 }
 0x4d3   : > { %v1982_v57 = vmul.f32 1.442695, %v1962_v5  ;;  %v2455_v11 = vpack.c.bf16 %v2441_v36, %v2440_v52  ;;  %v7114_v36 = vld [vmem:[%s6123_s25 + $0xa0] sm:$0xff]  }
 0x4d5   : > { %5800 = vpow2.f32 %v1982_v57  ;;  %5105 = vmatmul.msk.bf16.gmra.mxu3 %vm546_vm0, %v2455_v11  ;;  %v8434_v11 = vunpack.c.l.bf16 %v7114_v36 }
 0x4d6   : > { %5802 = vpow2.f32 %v1984_v8 }
 0x4d8   : > { %v1941_v20 = vpop.xlane.xlu2 %1940 }
 0x4d9   : > { %v1965_v33 = vsub.f32 %v6942_v25, %v1941_v20 }
 0x4da   : > { %v1939_v43 = vpop.xlane.xlu1 %1938 }
 0x4db   : > { %v7080_v26 = vpop.eup %5800  ;;  %v1988_v30 = vmul.f32 1.442695, %v1965_v33  ;;  %v1964_v27 = vsub.f32 %v6949_v19, %v1939_v43 }
 0x4dc   : > { %2014 = vadd.xlane.f32.xlu0 %v7080_v26  ;;  %v7092_v9 = vpop.eup %5802 }
 0x4dd   : > { %5804 = vpow2.f32 %v1988_v30  ;;  %v1986_v25 = vmul.f32 1.442695, %v1964_v27 }
 0x4df   : > { %5806 = vpow2.f32 %v1986_v25  ;;  %v8433_v25 = vunpack.c.h.bf16 %v7114_v36 }
 0x4e0   : > { %v1943_v20 = vpop.xlane.xlu2 %1942 }
 0x4e1   : > { %v1966_v8 = vsub.f32 %v6962_v47, %v1943_v20  ;;  %v2622_v20 = vpop.f32.mrf.mxu1 }
 0x4e2   : > { %v1947_v19 = vpop.xlane.xlu1 %1946 }
 0x4e3   : > { %v7094_v5 = vpop.eup %5804  ;;  %v1990_v57 = vmul.f32 1.442695, %v1966_v8  ;;  %v1968_v60 = vsub.f32 %v6971_v48, %v1947_v19  ;;  %v2475_v8 = vadd.f32 %v6930_v15, %v8434_v11 }
 0x4e4   : > { %2020 = vadd.xlane.f32.xlu1 %v7094_v5  ;;  %2016 = vadd.xlane.f32.xlu0 %v7092_v9 }
 0x4e5   : > { %5808 = vpow2.f32 %v1990_v57  ;;  %v1994_v63 = vmul.f32 1.442695, %v1968_v60  ;;  %v7100_v43 = vpop.eup %5806  ;;  %v8501_v60 = vunpack.c.l.bf16 %v7018_v1 }
 0x4e7   : > { %5810 = vpow2.f32 %v1994_v63  ;;  %v2442_v63 = vadd.f32 %v7065_v53, %v8501_v60 }
 0x4e8   : > { %v1945_v33 = vpop.xlane.xlu2 %1944 }
 0x4e9   : > { %v1967_v47 = vsub.f32 %v6985_v34, %v1945_v33  ;;  %v8502_v33 = vunpack.c.h.bf16 %v7018_v1 }
 0x4eb   : > { %v7102_v30 = vpop.eup %5808  ;;  %v1992_v27 = vmul.f32 1.442695, %v1967_v47  ;;  %v2443_v47 = vadd.f32 %v7065_v53, %v8502_v33  ;;  %v1951_v33 = vpop.xlane.xlu0 %1950 }
 0x4ec   : > { %2022 = vadd.xlane.f32.xlu2 %v7102_v30  ;;  %2018 = vadd.xlane.f32.xlu0 %v7100_v43 }
 0x4ed   : > { %v7106_v48 = vpop.eup %5810  ;;  %5812 = vpow2.f32 %v1992_v27  ;;  %v2456_v27 = vpack.c.bf16 %v2443_v47, %v2442_v63  ;;  %v5387_v63 = vld [vmem:[%s6419_s28 + $0x58] sm:$0xff]  ;;  %v5386_v47 = vld [vmem:[%s6419_s28 + $0x50] sm:$0xff] }
 0x4ee   : > { %2026 = vadd.xlane.f32.xlu1 %v7106_v48 }
 0x4ef   : > { %5106 = vmatmul.msk.bf16.gmra.mxu3 %vm546_vm0, %v2456_v27 }
 0x4f0   : > { %v1949_v40 = vpop.xlane.xlu2 %1948 }
 0x4f1   : > { %v1969_v52 = vsub.f32 %v7000_v24, %v1949_v40  ;;  %v2476_v24 = vadd.f32 %v6930_v15, %v8433_v25  ;;  %v5391_v40 = vld [vmem:[%s6419_s28 + $0x78] sm:$0xff] }
 0x4f2   : > { %2351 = vmatpush.bf16.msrb.mxu0 %v5391_v40 }
 0x4f3   : > { %v7110_v4 = vpop.eup %5812  ;;  %v1996_v34 = vmul.f32 1.442695, %v1969_v52  ;;  %v2487_v57 = vpack.c.bf16 %v2476_v24, %v2475_v8  ;;  %v2624_v52 = vpop.f32.mrf.mxu1  ;;  %v5389_v8 = vld [vmem:[%s6419_s28 + $0x68] sm:$0xff]  ;;  %v5388_v24 = vld [vmem:[%s6419_s28 + $0x60] sm:$0xff] }
 0x4f4   : > { %2024 = vadd.xlane.f32.xlu0 %v7110_v4 }
 0x4f5   : > { %5814 = vpow2.f32 %v1996_v34  ;;  %5068 = vmatmul.msk.bf16.gmra.mxu1 %vm546_vm0, %v2487_v57  ;;  %v5390_v34 = vld [vmem:[%s6419_s28 + $0x70] sm:$0xff]  ;;  %v1953_v57 = vpop.xlane.xlu1 %1952 }
 0x4f6   : > { %2352 = vmatpush.bf16.msrb.mxu0 %v5390_v34  ;;  %v5384_v34 = vld [vmem:[%s6419_s28 + $0x40] sm:$0xff] }
 0x4fa   : > { %2353 = vmatpush.bf16.msrb.mxu0 %v5389_v8  ;;  %v1970_v8 = vsub.f32 %v6956_v49, %v1951_v33  ;;  %v7165_v33 = vld [vmem:[%s6123_s25 + $0xa8] sm:$0xff]  }
 0x4fb   : > { %v7124_v19 = vpop.eup %5814  ;;  %v2627_v1 = vpop.f32.mrf.mxu1 }
 0x4fc   : > { %2028 = vadd.xlane.f32.xlu2 %v7124_v19 }
 0x4fe   : > { %2354 = vmatpush.bf16.msrb.mxu0 %v5388_v24  ;;  %v1998_v24 = vmul.f32 1.442695, %v1970_v8  ;;  %v8436_v8 = vunpack.c.h.bf16 %v7165_v33 }
 0x500   : > { %v2478_v11 = vadd.f32 %v6930_v15, %v8436_v8 }
 0x502   : > { %2355 = vmatpush.bf16.msrb.mxu0 %v5387_v63 }
 0x503   : > { %v7142_v60 = vpop.f32.mrf.mxu1 }
 0x506   : > { %2356 = vmatpush.bf16.msrb.mxu0 %v5386_v47 }
 0x507   : > { %2665 = vrot.lane.b32.xlu1 %v2622_v20, %s6010_s8  ;;  %v1971_v20 = vsub.f32 %v6993_v32, %v1953_v57 }
 0x508   : > { %2670 = vrot.lane.b32.xlu0 %v2624_v52, %s6011_s9  ;;  %v5385_v52 = vld [vmem:[%s6419_s28 + $0x48] sm:$0xff] }
 0x509   : > { %v2000_v27 = vmul.f32 1.442695, %v1971_v20 }
 0x50a   : > { %2357 = vmatpush.bf16.msrb.mxu0 %v5385_v52 }
 0x50b   : > { %5816 = vpow2.f32 %v2000_v27 }
 0x50e   : > { %2358 = vmatpush.bf16.msrb.mxu0 %v5384_v34  ;;  %v8435_v34 = vunpack.c.l.bf16 %v7165_v33 }
 0x510   : > { %2675 = vrot.lane.b32.xlu0 %v2627_v1, %s6012_s10 }
 0x511   : > { %v7154_v63 = vpop.eup %5816 }
 0x516   : > { %v7158_v20 = vpop.xlane.xlu2 %2012 }
 0x51d   : > { %v7147_v40 = vpop.f32.mrf.mxu1 }
 0x525   : > { %v2634_v25 = vpop.f32.mrf.mxu1 }
 0x526   : > { %2690 = vrot.lane.b32.xlu2 %v2634_v25, %s8440_s13  ;;  %s8509_s13 = smov 337  }
 0x528   : > { %v7150_v1 = vpop.xlane.xlu0 %1954 }
 0x530   : > { %v2007_v32 = vpop.xlane.xlu0 %2006 }
 0x531   : > { %5818 = vrcp.f32 %v2007_v32  ;;  %2032 = vadd.xlane.f32.xlu1 %v7154_v63  ;;  %v2049_v59 = vand.u32 2147483648, %v2007_v32  ;;  %vm2043_vm11 = vweird.f32 %v2007_v32  ;;  %v2047_v6 = vand.u32 2147483647, %v2007_v32 }
 0x532   : > { %5820 = vpow2.f32 %v1998_v24  ;;  %v2477_v24 = vadd.f32 %v6930_v15, %v8435_v34 }
 0x533   : > { %v2050_v23 = vor.u32 1.1754944e-38, %v2049_v59  ;;  %vm2048_vm15 = vcmp.eq.f32.partialorder %v2047_v6, 8.507059e+37  ;;  %v8503_v6 = vunpack.c.l.bf16 %v7042_v18 }
 0x537   : > { %v5819_v57 = vpop.eup %5818 }
 0x538   : > { %v2039_v47 = vmul.f32 %v5819_v57, %v2007_v32  ;;  %v2009_v27 = vpop.xlane.xlu0 %2008  ;;  %v7160_v52 = vpop.eup %5820  ;;  %vm2044_vm10 = vweird.f32 %v5819_v57 }
 0x539   : > { %5822 = vrcp.f32 %v2009_v27  ;;  %v2064_v58 = vand.u32 2147483648, %v2009_v27  ;;  %vm2045_vm12 = vmor %vm2043_vm11, %vm2044_vm10  ;;  %v2062_v45 = vand.u32 2147483647, %v2009_v27  ;;  %vm2058_vm14 = vweird.f32 %v2009_v27 }
 0x53a   : > { %5824 = vrcp.f32 %v7158_v20  ;;  %v2040_v49 = vsub.f32 1.0, %v2039_v47  ;;  %2030 = vadd.xlane.f32.xlu0 %v7160_v52 }
 0x53b   : > { %vm2063_vm9 = vcmp.eq.f32.partialorder %v2062_v45, 8.507059e+37 }
 0x53c   : > { %v2041_v25 = vmul.f32 %v5819_v57, %v2040_v49  ;;  %v2488_v49 = vpack.c.bf16 %v2478_v11, %v2477_v24 }
 0x53e   : > { %v2042_v54 = vadd.f32 %v5819_v57, %v2041_v25  ;;  %5069 = vmatmul.msk.bf16.gmra.mxu1 %vm546_vm0, %v2488_v49 }
 0x53f   : > { %v5823_v21 = vpop.eup %5822 }
 0x540   : > { %v7175_v3 = vpop.eup %5824  ;;  %v2054_v47 = vmul.f32 %v5823_v21, %v2009_v27  ;;  %v2011_v37 = vpop.xlane.xlu0 %2010  ;;  %v2046_v8 = vsel %vm2045_vm12, %v5819_v57, %v2042_v54  ;;  %vm2059_vm13 = vweird.f32 %v5823_v21  ;;  %v2444_v54 = vadd.f32 %v7065_v53, %v8503_v6 }
 0x541   : > { %5826 = vrcp.f32 %v2011_v37  ;;  %v2084_v34 = vmul.f32 %v7175_v3, %v7158_v20  ;;  %v2051_v24 = vsel %vm2048_vm15, %v2050_v23, %v2046_v8  ;;  %vm2060_vm8 = vmor %vm2058_vm14, %vm2059_vm13  ;;  %v8504_v23 = vunpack.c.h.bf16 %v7042_v18  ;;  %v7197_v27 = vpop.xlane.xlu1 %1956 }
 0x542   : > { %v2055_v51 = vsub.f32 1.0, %v2054_v47  ;;  %v2065_v47 = vor.u32 1.1754944e-38, %v2064_v58  ;;  %vm2089_vm11 = vweird.f32 %v7175_v3  ;;  %vm2073_vm12 = vweird.f32 %v2011_v37 }
 0x543   : > { %v2085_v32 = vsub.f32 1.0, %v2084_v34  ;;  %v2445_v58 = vadd.f32 %v7065_v53, %v8504_v23  ;;  %v2077_v18 = vand.u32 2147483647, %v2011_v37  ;;  %vm2088_vm14 = vweird.f32 %v7158_v20 }
 0x544   : > { %v2056_v15 = vmul.f32 %v5823_v21, %v2055_v51  ;;  %v2052_v51 = vmul.f32 %v7044_v10, %v2051_v24  ;;  %v2092_v34 = vand.u32 2147483647, %v7158_v20  ;;  %vm2090_vm15 = vmor %vm2088_vm14, %vm2089_vm11 }
 0x546   : > { %v2057_v11 = vadd.f32 %v5823_v21, %v2056_v15 }
 0x547   : > { %v5827_v25 = vpop.eup %5826 }
 0x548   : > { %v2069_v41 = vmul.f32 %v5827_v25, %v2011_v37  ;;  %v2061_v49 = vsel %vm2060_vm8, %v5823_v21, %v2057_v11  ;;  %v2086_v21 = vmul.f32 %v7175_v3, %v2085_v32  ;;  %vm2074_vm10 = vweird.f32 %v5827_v25 }
 0x549   : > { %v2066_v39 = vsel %vm2063_vm9, %v2065_v47, %v2061_v49  ;;  %vm2075_vm13 = vmor %vm2073_vm12, %vm2074_vm10  ;;  %vm2078_vm8 = vcmp.eq.f32.partialorder %v2077_v18, 8.507059e+37  ;;  %vm2093_vm9 = vcmp.eq.f32.partialorder %v2092_v34, 8.507059e+37 }
 0x54a   : > { %v2070_v55 = vsub.f32 1.0, %v2069_v41  ;;  %2685 = vrot.lane.b32.xlu1 %v7147_v40, %s6014_s12  ;;  %v2067_v59 = vmul.f32 %v7057_v31, %v2066_v39  ;;  %v2457_v41 = vpack.c.bf16 %v2445_v58, %v2444_v54  ;;  %v2637_v31 = vpop.f32.mrf.mxu1  ;;  %v2079_v40 = vand.u32 2147483648, %v2011_v37 }
 0x54b   : > { %v2087_v53 = vadd.f32 %v7175_v3, %v2086_v21 }
 0x54c   : > { %v2278_v45 = vpack.c.bf16 %v2067_v59, %v2052_v51  ;;  %v2071_v57 = vmul.f32 %v5827_v25, %v2070_v55  ;;  %5107 = vmatmul.msk.bf16.gmra.mxu3 %vm546_vm0, %v2457_v41  ;;  %v2094_v55 = vand.u32 2147483648, %v7158_v20  ;;  %v2080_v8 = vor.u32 1.1754944e-38, %v2079_v40 }
 0x54d   : > { %v2091_v15 = vsel %vm2090_vm15, %v7175_v3, %v2087_v53 }
 0x54e   : > { %2680 = vrot.lane.b32.xlu0 %v7142_v60, %s6013_s11  ;;  %2359 = vmatmul.bf16.vlgmr.msrb.gmra.mxu0 %v2278_v45  ;;  %v2072_v10 = vadd.f32 %v5827_v25, %v2071_v57  ;;  %v2095_v11 = vor.u32 1.1754944e-38, %v2094_v55 }
 0x54f   : > { %v2015_v39 = vpop.xlane.xlu0 %2014 }
 0x550   : > { %5828 = vrcp.f32 %v2015_v39  ;;  %v2076_v60 = vsel %vm2075_vm13, %v5827_v25, %v2072_v10  ;;  %v2096_v49 = vsel %vm2093_vm9, %v2095_v11, %v2091_v15  ;;  %v2109_v57 = vand.u32 2147483648, %v2015_v39 }
 0x551   : > { %v2081_v37 = vsel %vm2078_vm8, %v2080_v8, %v2076_v60  ;;  %v2097_v20 = vmul.f32 %v7014_v22, %v2096_v49  ;;  %vm2103_vm11 = vweird.f32 %v2015_v39  ;;  %v2107_v41 = vand.u32 2147483647, %v2015_v39 }
 0x552   : > { %2695 = vrot.lane.b32.xlu1 %v2637_v31, %s8439_s14  ;;  %v2082_v51 = vmul.f32 %v7067_v46, %v2081_v37  ;;  %v2110_v60 = vor.u32 1.1754944e-38, %v2109_v57  ;;  %s8507_s14 = smov 329  }
 0x553   : > { %vm2108_vm14 = vcmp.eq.f32.partialorder %v2107_v41, 8.507059e+37 }
 0x554   : > { %v2279_v25 = vpack.c.bf16 %v2097_v20, %v2082_v51 }
 0x556   : > { %v5829_v24 = vpop.eup %5828 }
 0x557   : > { %v2099_v47 = vmul.f32 %v5829_v24, %v2015_v39  ;;  %v2017_v32 = vpop.xlane.xlu0 %2016  ;;  %v7204_v6 = vpop.xlane.xlu1 %2020  ;;  %vm2104_vm10 = vweird.f32 %v5829_v24  ;;  %v1973_v39 = vsub.f32 %v7011_v12, %v7197_v27 }
 0x558   : > { %5830 = vrcp.f32 %v2017_v32  ;;  %vm2105_vm12 = vmor %vm2103_vm11, %vm2104_vm10  ;;  %v2122_v10 = vand.u32 2147483647, %v2017_v32  ;;  %v2124_v31 = vand.u32 2147483648, %v2017_v32  ;;  %vm2118_vm15 = vweird.f32 %v2017_v32 }
 0x559   : > { %v2100_v59 = vsub.f32 1.0, %v2099_v47  ;;  %5832 = vrcp.f32 %v7204_v6  ;;  %v2154_v41 = vand.u32 2147483648, %v7204_v6 }
 0x55a   : > { %v2125_v37 = vor.u32 1.1754944e-38, %v2124_v31  ;;  %vm2123_vm9 = vcmp.eq.f32.partialorder %v2122_v10, 8.507059e+37  ;;  %v2152_v31 = vand.u32 2147483647, %v7204_v6 }
 0x55b   : > { %v2101_v3 = vmul.f32 %v5829_v24, %v2100_v59 }
 0x55d   : > { %v2102_v45 = vadd.f32 %v5829_v24, %v2101_v3  ;;  %v2004_v3 = vmul.f32 1.442695, %v1973_v39  ;;  %v2155_v39 = vor.u32 1.1754944e-38, %v2154_v41 }
 0x55e   : > { %2364 = vmatmul.bf16.gmra.mxu0 %v2279_v25  ;;  %v5831_v54 = vpop.eup %5830  ;;  %v2839_v25 = vpop.f32.mrf.mxu3 }
 0x55f   : > { %v7208_v23 = vpop.xlane.xlu0 %2018  ;;  %v2114_v58 = vmul.f32 %v5831_v54, %v2017_v32  ;;  %v7211_v46 = vpop.eup %5832  ;;  %v2106_v18 = vsel %vm2105_vm12, %v5829_v24, %v2102_v45  ;;  %vm2119_vm13 = vweird.f32 %v5831_v54 }
 0x560   : > { %5834 = vrcp.f32 %v7208_v23  ;;  %v2144_v40 = vmul.f32 %v7211_v46, %v7204_v6  ;;  %v2111_v15 = vsel %vm2108_vm14, %v2110_v60, %v2106_v18  ;;  %vm2120_vm8 = vmor %vm2118_vm15, %vm2119_vm13  ;;  %v7220_v47 = vpop.xlane.xlu2 %2022  ;;  %vm2133_vm11 = vweird.f32 %v7208_v23 }
 0x561   : > { %v2115_v21 = vsub.f32 1.0, %v2114_v58  ;;  %v2112_v20 = vmul.f32 %v7080_v26, %v2111_v15  ;;  %v7230_v45 = vpop.xlane.xlu1 %2026  ;;  %v2137_v26 = vand.u32 2147483647, %v7208_v23  ;;  %vm2149_vm12 = vweird.f32 %v7211_v46 }
 0x562   : > { %v2145_v11 = vsub.f32 1.0, %v2144_v40  ;;  %vm2148_vm14 = vweird.f32 %v7204_v6  ;;  %v1972_v15 = vsub.f32 %v7035_v13, %v7150_v1 }
 0x563   : > { %v2116_v22 = vmul.f32 %v5831_v54, %v2115_v21  ;;  %v2139_v21 = vand.u32 2147483648, %v7208_v23  ;;  %vm2150_vm15 = vmor %vm2148_vm14, %vm2149_vm12  ;;  %vm2163_vm14 = vweird.f32 %v7220_v47 }
 0x564   : > { %v2146_v12 = vmul.f32 %v7211_v46, %v2145_v11 }
 0x565   : > { %v2117_v53 = vadd.f32 %v5831_v54, %v2116_v22  ;;  %v2140_v40 = vor.u32 1.1754944e-38, %v2139_v21  ;;  %v5431_v21 = vld [vmem:[%s8395_s3 + $0xf8] sm:$0xff] }
 0x566   : > { %v5835_v55 = vpop.eup %5834  ;;  %v2841_v18 = vpop.f32.mrf.mxu3 }
 0x567   : > { %v2129_v34 = vmul.f32 %v5835_v55, %v7208_v23  ;;  %v7216_v8 = vpop.xlane.xlu0 %2024  ;;  %v2121_v49 = vsel %vm2120_vm8, %v5831_v54, %v2117_v53  ;;  %vm2134_vm10 = vweird.f32 %v5835_v55  ;;  %vm2138_vm8 = vcmp.eq.f32.partialorder %v2137_v26, 8.507059e+37 }
 0x568   : > { %5836 = vrcp.f32 %v7216_v8  ;;  %v2126_v51 = vsel %vm2123_vm9, %v2125_v37, %v2121_v49  ;;  %vm2135_vm13 = vmor %vm2133_vm11, %vm2134_vm10  ;;  %vm2153_vm9 = vcmp.eq.f32.partialorder %v2152_v31, 8.507059e+37  ;;  %vm2178_vm12 = vweird.f32 %v7216_v8 }
 0x569   : > { %v2130_v24 = vsub.f32 1.0, %v2129_v34  ;;  %v2127_v32 = vmul.f32 %v7092_v9, %v2126_v51  ;;  %5838 = vrcp.f32 %v7220_v47  ;;  %v2147_v9 = vadd.f32 %v7211_v46, %v2146_v12 }
 0x56a   : > { %5840 = vpow2.f32 %v2004_v3  ;;  %v3596_v31 = vsel %vm546_vm0, %v5431_v21, 0  ;;  %v2199_v21 = vand.u32 2147483648, %v7230_v45 }
 0x56b   : > { %v2131_v59 = vmul.f32 %v5835_v55, %v2130_v24  ;;  %v2280_v27 = vpack.c.bf16 %v2127_v32, %v2112_v20  ;;  %v2151_v53 = vsel %vm2150_vm15, %v7211_v46, %v2147_v9  ;;  %v2002_v20 = vmul.f32 1.442695, %v1972_v15  ;;  %3598 = vmatpush.bf16.xpose.msra.mxu0 %v3596_v31 }
 0x56c   : > { %v2156_v11 = vsel %vm2153_vm9, %v2155_v39, %v2151_v53  ;;  %v2184_v9 = vand.u32 2147483648, %v7216_v8 }
 0x56d   : > { %v2132_v58 = vadd.f32 %v5835_v55, %v2131_v59  ;;  %v2157_v1 = vmul.f32 %v7094_v5, %v2156_v11 }
 0x56e   : > { %2369 = vmatmul.bf16.gmra.mxu0 %v2280_v27  ;;  %v7227_v54 = vpop.eup %5836  ;;  %v2185_v15 = vor.u32 1.1754944e-38, %v2184_v9 }
 0x56f   : > { %v7236_v57 = vpop.eup %5838  ;;  %v2174_v22 = vmul.f32 %v7227_v54, %v7216_v8  ;;  %v2136_v10 = vsel %vm2135_vm13, %v5835_v55, %v2132_v58  ;;  %v7250_v55 = vpop.xlane.xlu2 %2028  ;;  %vm2179_vm10 = vweird.f32 %v7227_v54 }
 0x570   : > { %v2159_v23 = vmul.f32 %v7236_v57, %v7220_v47  ;;  %v7246_v60 = vpop.eup %5840  ;;  %v2141_v34 = vsel %vm2138_vm8, %v2140_v40, %v2136_v10  ;;  %5842 = vrcp.f32 %v7250_v55  ;;  %v2844_v58 = vpop.f32.mrf.mxu3  ;;  %vm2164_vm11 = vweird.f32 %v7236_v57  ;;  %vm7285_vm13 = vmor %vm2178_vm12, %vm2179_vm10 }
 0x571   : > { %v2175_v37 = vsub.f32 1.0, %v2174_v22  ;;  %v2142_v46 = vmul.f32 %v7100_v43, %v2141_v34  ;;  %5844 = vrcp.f32 %v7230_v45  ;;  %v2182_v22 = vand.u32 2147483647, %v7216_v8  ;;  %vm2165_vm15 = vmor %vm2163_vm14, %vm2164_vm11 }
 0x572   : > { %v2160_v24 = vsub.f32 1.0, %v2159_v23  ;;  %5846 = vpow2.f32 %v2002_v20  ;;  %v2169_v23 = vand.u32 2147483648, %v7220_v47  ;;  %v2167_v34 = vand.u32 2147483647, %v7220_v47 }
 0x573   : > { %v2176_v32 = vmul.f32 %v7227_v54, %v2175_v37  ;;  %v2281_v27 = vpack.c.bf16 %v2157_v1, %v2142_v46  ;;  %vm2183_vm8 = vcmp.eq.f32.partialorder %v2182_v22, 8.507059e+37  ;;  %vm2208_vm12 = vweird.f32 %v7250_v55 }
 0x574   : > { %v2161_v12 = vmul.f32 %v7236_v57, %v2160_v24  ;;  %vm2168_vm9 = vcmp.eq.f32.partialorder %v2167_v34, 8.507059e+37  ;;  %vm2193_vm14 = vweird.f32 %v7230_v45 }
 0x575   : > { %v2177_v5 = vadd.f32 %v7227_v54, %v2176_v32  ;;  %v2639_v32 = vpop.f32.mrf.mxu1 }
 0x576   : > { %v5843_v26 = vpop.eup %5842  ;;  %v2162_v41 = vadd.f32 %v7236_v57, %v2161_v12 }
 0x577   : > { %v5845_v40 = vpop.eup %5844  ;;  %v2204_v8 = vmul.f32 %v5843_v26, %v7250_v55  ;;  %v2181_v39 = vsel %vm7285_vm13, %v7227_v54, %v2177_v5  ;;  %vm2209_vm10 = vweird.f32 %v5843_v26 }
 0x578   : > { %2036 = vadd.xlane.f32.xlu0 %v7246_v60  ;;  %v2189_v11 = vmul.f32 %v5845_v40, %v7230_v45  ;;  %v2166_v24 = vsel %vm2165_vm15, %v7236_v57, %v2162_v41  ;;  %v2186_v54 = vsel %vm2183_vm8, %v2185_v15, %v2181_v39  ;;  %vm2194_vm11 = vweird.f32 %v5845_v40  ;;  %vm2210_vm13 = vmor %vm2208_vm12, %vm2209_vm10  ;;  %v5428_v39 = vld [vmem:[%s8395_s3 + $0xe0] sm:$0xff] }
 0x579   : > { %v2666_v6 = vpop.permute.xlu1 %2665  ;;  %v2187_v20 = vmul.f32 %v7110_v4, %v2186_v54  ;;  %vm2195_vm15 = vmor %vm2193_vm14, %vm2194_vm11  ;;  %v2846_v54 = vpop.f32.mrf.mxu3 }
 0x57a   : > { %v2840_v49 = vadd.f32 %v2839_v25, %v2666_v6  ;;  %v2671_v51 = vpop.permute.xlu0 %2670  ;;  %v7297_v6 = vpop.eup %5846 }
 0x57b   : > { %v2842_v59 = vadd.f32 %v2841_v18, %v2671_v51  ;;  %v2205_v51 = vsub.f32 1.0, %v2204_v8 }
 0x57c   : > { %v2879_v13 = vmul.f32 0.125, %v2840_v49  ;;  %v2170_v49 = vor.u32 1.1754944e-38, %v2169_v23 }
 0x57d   : > { %v2880_v3 = vmul.f32 0.125, %v2842_v59  ;;  %v2190_v59 = vsub.f32 1.0, %v2189_v11  ;;  %v2642_v4 = vpop.f32.mrf.mxu1  ;;  %v3587_v11 = vsel %vm546_vm0, %v5428_v39, 0 }
 0x57e   : > { %v7262_v25 = vsel %vm370_vm2, %v2879_v13, -1e+30  ;;  %2374 = vmatmul.bf16.gmra.mxu0 %v2281_v27  ;;  %v2171_v46 = vsel %vm2168_vm9, %v2170_v49, %v2166_v24  ;;  %v2206_v13 = vmul.f32 %v5843_v26, %v2205_v51  ;;  %v2214_v27 = vand.u32 2147483648, %v7250_v55 }
 0x57f   : > { %2911 = vmax.xlane.f32.xlu2 %v7262_v25  ;;  %v7268_v43 = vsel %vm371_vm1, %v2880_v3, -1e+30  ;;  %v2172_v57 = vmul.f32 %v7102_v30, %v2171_v46  ;;  %v2191_v1 = vmul.f32 %v5845_v40, %v2190_v59  ;;  %v2197_v30 = vand.u32 2147483647, %v7230_v45 }
 0x580   : > { %2913 = vmax.xlane.f32.xlu0 %v7268_v43  ;;  %v2207_v12 = vadd.f32 %v5843_v26, %v2206_v13  ;;  %v2215_v41 = vor.u32 1.1754944e-38, %v2214_v27 }
 0x581   : > { %v2282_v3 = vpack.c.bf16 %v2187_v20, %v2172_v57  ;;  %v2192_v5 = vadd.f32 %v5845_v40, %v2191_v1  ;;  %vm2198_vm9 = vcmp.eq.f32.partialorder %v2197_v30, 8.507059e+37 }
 0x582   : > { %v2676_v10 = vpop.permute.xlu0 %2675  ;;  %v2211_v9 = vsel %vm2210_vm13, %v5843_v26, %v2207_v12 }
 0x583   : > { %v2845_v53 = vadd.f32 %v2844_v58, %v2676_v10  ;;  %v2212_v58 = vand.u32 2147483647, %v7250_v55  ;;  %v2196_v22 = vsel %vm2195_vm15, %v5845_v40, %v2192_v5  ;;  %v2200_v10 = vor.u32 1.1754944e-38, %v2199_v21  ;;  %v5430_v55 = vld [vmem:[%s8395_s3 + $0xf0] sm:$0xff]  ;;  %v5429_v40 = vld [vmem:[%s8395_s3 + $0xe8] sm:$0xff] }
 0x584   : > { %v3593_v45 = vsel %vm546_vm0, %v5430_v55, 0 }
 0x585   : > { %v2881_v37 = vmul.f32 0.125, %v2845_v53  ;;  %vm2213_vm8 = vcmp.eq.f32.partialorder %v2212_v58, 8.507059e+37  ;;  %v2201_v23 = vsel %vm2198_vm9, %v2200_v10, %v2196_v22  ;;  %v2644_v26 = vpop.f32.mrf.mxu1  ;;  %3599 = vmatpush.bf16.xpose.msra.mxu0 %v3593_v45  ;;  %v5427_v58 = vld [vmem:[%s8395_s3 + $0xd8] sm:$0xff] }
 0x586   : > { %v2216_v31 = vsel %vm2213_vm8, %v2215_v41, %v2211_v9  ;;  %v2202_v53 = vmul.f32 %v7106_v48, %v2201_v23  ;;  %v3584_v41 = vsel %vm546_vm0, %v5427_v58, 0 }
 0x587   : > { %2034 = vadd.xlane.f32.xlu2 %v7297_v6  ;;  %v7305_v47 = vsel %vm372_vm3, %v2881_v37, -1e+30  ;;  %v2217_v18 = vmul.f32 %v7124_v19, %v2216_v31  ;;  %v3590_v19 = vsel %vm546_vm0, %v5429_v40, 0 }
 0x588   : > { %2915 = vmax.xlane.f32.xlu1 %v7305_v47 }
 0x589   : > { %v2283_v34 = vpack.c.bf16 %v2217_v18, %v2202_v53 }
 0x58d   : > { %3600 = vmatpush.bf16.xpose.msra.mxu0 %v3590_v19 }
 0x58e   : > { %2379 = vmatmul.bf16.gmra.mxu0 %v2282_v3 }
 0x595   : > { %3601 = vmatpush.bf16.xpose.msra.mxu0 %v3587_v11 }
 0x59d   : > { %3602 = vmatpush.bf16.xpose.msra.mxu0 %v3584_v41 }
 0x59e   : > { %2384 = vmatmul.bf16.gmra.mxu0 %v2283_v34 }
 0x59f   : > { %2700 = vrot.lane.b32.xlu2 %v2639_v32, %s8441_s16 }
 0x5a1   : > { %2710 = vrot.lane.b32.xlu1 %v2644_v26, %s8507_s14 }
 0x5a4   : > { %v2033_v8 = vpop.xlane.xlu1 %2032 }
 0x5a5   : > { %5848 = vrcp.f32 %v2033_v8  ;;  %v2244_v20 = vand.u32 2147483648, %v2033_v8  ;;  %vm2238_vm11 = vweird.f32 %v2033_v8  ;;  %v2242_v32 = vand.u32 2147483647, %v2033_v8 }
 0x5a7   : > { %2705 = vrot.lane.b32.xlu2 %v2642_v4, %s8508_s7  ;;  %v2245_v27 = vor.u32 1.1754944e-38, %v2244_v20  ;;  %vm2243_vm14 = vcmp.eq.f32.partialorder %v2242_v32, 8.507059e+37  ;;  %v2849_v4 = vpop.f32.mrf.mxu3 }
 0x5ab   : > { %v5849_v48 = vpop.eup %5848 }
 0x5ac   : > { %v2234_v15 = vmul.f32 %v5849_v48, %v2033_v8  ;;  %vm2239_vm10 = vweird.f32 %v5849_v48  ;;  %v2691_v8 = vpop.permute.xlu2 %2690 }
 0x5ad   : > { %v2031_v37 = vpop.xlane.xlu0 %2030  ;;  %vm2240_vm12 = vmor %vm2238_vm11, %vm2239_vm10  ;;  %vm8510_vm10 = vcmp.ge.s32.totalorder %v6335_v50, %v6238_v2 }
 0x5ae   : > { %v2235_v24 = vsub.f32 1.0, %v2234_v15  ;;  %5850 = vrcp.f32 %v2031_v37  ;;  %v2229_v57 = vand.u32 2147483648, %v2031_v37  ;;  %v2227_v3 = vand.u32 2147483647, %v2031_v37 }
 0x5af   : > { %vm2223_vm15 = vweird.f32 %v2031_v37  ;;  %v2851_v19 = vpop.f32.mrf.mxu3 }
 0x5b0   : > { %v2236_v49 = vmul.f32 %v5849_v48, %v2235_v24  ;;  %v2230_v21 = vor.u32 1.1754944e-38, %v2229_v57  ;;  %vm2228_vm9 = vcmp.eq.f32.partialorder %v2227_v3, 8.507059e+37  ;;  %v5425_v57 = vld [vmem:[%s8395_s3 + $0xc8] sm:$0xff] }
 0x5b2   : > { %v2237_v46 = vadd.f32 %v5849_v48, %v2236_v49 }
 0x5b4   : > { %v5851_v51 = vpop.eup %5850  ;;  %v2241_v12 = vsel %vm2240_vm12, %v5849_v48, %v2237_v46  ;;  %v2852_v48 = vadd.f32 %v2851_v19, %v2691_v8  ;;  %v5426_v46 = vld [vmem:[%s8395_s3 + $0xd0] sm:$0xff] }
 0x5b5   : > { %v2219_v59 = vmul.f32 %v5851_v51, %v2031_v37  ;;  %vm2224_vm13 = vweird.f32 %v5851_v51  ;;  %v2246_v30 = vsel %vm2243_vm14, %v2245_v27, %v2241_v12  ;;  %v3581_v32 = vsel %vm546_vm0, %v5426_v46, 0  ;;  %v5424_v27 = vld [vmem:[%s8395_s3 + $0xc0] sm:$0xff] }
 0x5b6   : > { %vm2225_vm8 = vmor %vm2223_vm15, %vm2224_vm13  ;;  %v2247_v23 = vmul.f32 %v7154_v63, %v2246_v30  ;;  %v2884_v39 = vmul.f32 0.125, %v2852_v48  ;;  %3603 = vmatpush.bf16.xpose.msra.mxu0 %v3581_v32  ;;  %v3575_v58 = vsel %vm546_vm0, %v5424_v27, 0 }
 0x5b7   : > { %v2220_v13 = vsub.f32 1.0, %v2219_v59 }
 0x5b8   : > { %v7356_v15 = vsel %vm375_vm7, %v2884_v39, -1e+30 }
 0x5b9   : > { %v2221_v1 = vmul.f32 %v5851_v51, %v2220_v13 }
 0x5bb   : > { %v2222_v5 = vadd.f32 %v5851_v51, %v2221_v1  ;;  %v3578_v1 = vsel %vm546_vm0, %v5425_v57, 0 }
 0x5bc   : > { %v2686_v10 = vpop.permute.xlu1 %2685 }
 0x5bd   : > { %v2226_v9 = vsel %vm2225_vm8, %v5851_v51, %v2222_v5  ;;  %v2850_v45 = vadd.f32 %v2849_v4, %v2686_v10 }
 0x5be   : > { %v2231_v22 = vsel %vm2228_vm9, %v2230_v21, %v2226_v9  ;;  %3604 = vmatpush.bf16.xpose.msra.mxu0 %v3578_v1  ;;  %v5423_v1 = vld [vmem:[%s6116_s18 + $0xf8] sm:$0xff] }
 0x5bf   : > { %v2232_v31 = vmul.f32 %v7160_v52, %v2231_v22  ;;  %v2883_v40 = vmul.f32 0.125, %v2850_v45 }
 0x5c0   : > { %v2681_v18 = vpop.permute.xlu0 %2680 }
 0x5c1   : > { %v2847_v55 = vadd.f32 %v2846_v54, %v2681_v18  ;;  %v2284_v53 = vpack.c.bf16 %v2247_v23, %v2232_v31  ;;  %v7348_v63 = vsel %vm374_vm5, %v2883_v40, -1e+30  ;;  %v2647_v54 = vpop.f32.mrf.mxu1 }
 0x5c3   : > { %v2882_v34 = vmul.f32 0.125, %v2847_v55  ;;  %2389 = vmatmul.bf16.gmra.mxu0 %v2284_v53 }
 0x5c4   : > { %v2696_v24 = vpop.permute.xlu1 %2695 }
 0x5c5   : > { %v7342_v26 = vsel %vm373_vm4, %v2882_v34, -1e+30 }
 0x5c6   : > { %2917 = vmax.xlane.f32.xlu0 %v7342_v26  ;;  %3605 = vmatpush.bf16.xpose.msra.mxu0 %v3575_v58  ;;  %v3813_v58 = vsel %vm546_vm0, %v5423_v1, 0  ;;  %v5421_v1 = vld [vmem:[%s6116_s18 + $0xe8] sm:$0xff] }
 0x5c7   : > { %3815 = vmatpush.bf16.xpose.msra.mxu1 %v3813_v58 }
 0x5cb   : > { %v7350_v52 = vpop.f32.mrf.mxu0  ;;  %2919 = vmax.xlane.f32.xlu1 %v7348_v63 }
 0x5cf   : > { %v2854_v11 = vpop.f32.mrf.mxu3 }
 0x5d0   : > { %v2855_v49 = vadd.f32 %v2854_v11, %v2696_v24 }
 0x5d2   : > { %v2885_v51 = vmul.f32 0.125, %v2855_v49 }
 0x5d3   : > { %v7358_v37 = vpop.f32.mrf.mxu0  ;;  %2921 = vmax.xlane.f32.xlu1 %v7356_v15 }
 0x5d4   : > { %v7368_v59 = vsel %vm8510_vm10, %v2885_v51, -1e+30 }
 0x5d5   : > { %2923 = vmax.xlane.f32.xlu2 %v7368_v59 }
 0x5d7   : > { %v2856_v53 = vpop.f32.mrf.mxu3 }
 0x5da   : > { %2715 = vrot.lane.b32.xlu0 %v2647_v54, %s8509_s13 }
 0x5db   : > { %v7370_v20 = vpop.f32.mrf.mxu0 }
 0x5dc   : > { %8511 = vst [vmem:[#allocation19_spill] sm:$0xff] %v7370_v20 }
 0x5e3   : > { %v7374_v13 = vpop.f32.mrf.mxu0 }
 0x5e4   : > { %8512 = vst [vmem:[#allocation20_spill] sm:$0xff] %v7374_v13 }
 0x5eb   : > { %v2037_v3 = vpop.xlane.xlu0 %2036  ;;  %v7380_v12 = vpop.f32.mrf.mxu0 }
 0x5ec   : > { %8513 = vst [vmem:[#allocation21_spill] sm:$0xff] %v7380_v12  ;;  %5852 = vrcp.f32 %v2037_v3  ;;  %v2274_v8 = vand.u32 2147483648, %v2037_v3  ;;  %vm2268_vm12 = vweird.f32 %v2037_v3  ;;  %v2272_v39 = vand.u32 2147483647, %v2037_v3 }
 0x5ee   : > { %v2275_v27 = vor.u32 1.1754944e-38, %v2274_v8  ;;  %vm2273_vm15 = vcmp.eq.f32.partialorder %v2272_v39, 8.507059e+37  ;;  %v7513_v8 = vld [vmem:[%s6123_s25 + $0xd8] sm:$0xff]  }
 0x5f2   : > { %v2912_v5 = vpop.xlane.xlu2 %2911  ;;  %v5853_v21 = vpop.eup %5852 }
 0x5f3   : > { %v2943_v30 = vsub.f32 %v7262_v25, %v2912_v5  ;;  %v7387_v9 = vpop.f32.mrf.mxu0  ;;  %v2264_v41 = vmul.f32 %v5853_v21, %v2037_v3  ;;  %v2914_v55 = vpop.xlane.xlu0 %2913  ;;  %vm2269_vm11 = vweird.f32 %v5853_v21 }
 0x5f4   : > { %8514 = vst [vmem:[#allocation22_spill] sm:$0xff] %v7387_v9  ;;  %v2944_v25 = vsub.f32 %v7268_v43, %v2914_v55  ;;  %vm7395_vm13 = vmor %vm2268_vm12, %vm2269_vm11 }
 0x5f5   : > { %v2959_v4 = vmul.f32 1.442695, %v2943_v30  ;;  %v2265_v22 = vsub.f32 1.0, %v2264_v41 }
 0x5f6   : > { %v2961_v49 = vmul.f32 1.442695, %v2944_v25  ;;  %v5422_v25 = vld [vmem:[%s6116_s18 + $0xf0] sm:$0xff] }
 0x5f7   : > { %5854 = vpow2.f32 %v2959_v4  ;;  %v2266_v18 = vmul.f32 %v5853_v21, %v2265_v22 }
 0x5f9   : > { %v2267_v34 = vadd.f32 %v5853_v21, %v2266_v18 }
 0x5fa   : > { %v2035_v10 = vpop.xlane.xlu2 %2034 }
 0x5fb   : > { %5856 = vrcp.f32 %v2035_v10  ;;  %v7391_v23 = vpop.f32.mrf.mxu0  ;;  %v2259_v54 = vand.u32 2147483648, %v2035_v10  ;;  %v2257_v32 = vand.u32 2147483647, %v2035_v10  ;;  %v2271_v57 = vsel %vm7395_vm13, %v5853_v21, %v2267_v34  ;;  %v7420_v34 = vld [vmem:[%s6123_s25 + $0xc0] sm:$0xff]  }
 0x5fc   : > { %vm2253_vm8 = vweird.f32 %v2035_v10  ;;  %5858 = vpow2.f32 %v2961_v49  ;;  %v2276_v21 = vsel %vm2273_vm15, %v2275_v27, %v2271_v57  ;;  %v7444_v49 = vld [vmem:[%s6123_s25 + $0xc8] sm:$0xff]  }
 0x5fd   : > { %v7389_v31 = vpop.eup %5854  ;;  %v2260_v30 = vor.u32 1.1754944e-38, %v2259_v54  ;;  %vm2258_vm10 = vcmp.eq.f32.partialorder %v2257_v32, 8.507059e+37  ;;  %v2277_v18 = vmul.f32 %v7246_v60, %v2276_v21  ;;  %v5539_v60 = vunpack.c.h.bf16 %v7420_v34  ;;  %v7449_v54 = vld [vmem:[%s8396_s4 + $0x2] ss:$0 sm:$0xff] }
 0x5fe   : > { %2991 = vadd.xlane.f32.xlu2 %v7389_v31  ;;  %v8522_v32 = vunpack.c.h.bf16 %v7114_v36  ;;  %v5542_v27 = vunpack.c.l.bf16 %v7444_v49  ;;  %v3807_v21 = vsel %vm546_vm0, %v5421_v1, 0  ;;  %v5419_v1 = vld [vmem:[%s6116_s18 + $0xd8] sm:$0xff] }
 0x600   : > { %v2447_v57 = vadd.f32 %v7449_v54, %v8522_v32 }
 0x601   : > { %v5857_v45 = vpop.eup %5856 }
 0x602   : > { %v2249_v40 = vmul.f32 %v5857_v45, %v2035_v10  ;;  %v2701_v19 = vpop.permute.xlu2 %2700  ;;  %vm2254_vm14 = vweird.f32 %v5857_v45 }
 0x603   : > { %v2857_v48 = vadd.f32 %v2856_v53, %v2701_v19  ;;  %v7399_v46 = vpop.f32.mrf.mxu0  ;;  %vm2255_vm9 = vmor %vm2253_vm8, %vm2254_vm14  ;;  %v7415_v53 = vpop.eup %5858 }
 0x604   : > { %v2250_v11 = vsub.f32 1.0, %v2249_v40  ;;  %8517 = vst [vmem:[#allocation23_spill] sm:$0xff] %v7399_v46  ;;  %v3810_v40 = vsel %vm546_vm0, %v5422_v25, 0  ;;  %v7478_v25 = vld [vmem:[%s6123_s25 + $0xd0] sm:$0xff]  }
 0x605   : > { %v2886_v51 = vmul.f32 0.125, %v2857_v48  ;;  %3816 = vmatpush.bf16.xpose.msra.mxu1 %v3810_v40  ;;  %v5546_v32 = vunpack.c.l.bf16 %v7478_v25 }
 0x606   : > { %v2251_v43 = vmul.f32 %v5857_v45, %v2250_v11 }
 0x607   : > { %v7407_v3 = vsel %vm377_vm6, %v2886_v51, -1e+30  ;;  %v8521_v51 = vunpack.c.l.bf16 %v7114_v36 }
 0x608   : > { %v2252_v5 = vadd.f32 %v5857_v45, %v2251_v43  ;;  %2925 = vmax.xlane.f32.xlu0 %v7407_v3 }
 0x609   : > { %v2446_v43 = vadd.f32 %v7449_v54, %v8521_v51 }
 0x60a   : > { %v2256_v4 = vsel %vm2255_vm9, %v5857_v45, %v2252_v5  ;;  %v7428_v45 = vld [vmem:[%s8397_s5 + $0x3] ss:$0 sm:$0xff]  ;;  %v5543_v5 = vunpack.c.h.bf16 %v7444_v49 }
 0x60b   : > { %v2261_v41 = vsel %vm2258_vm10, %v2260_v30, %v2256_v4  ;;  %v7413_v55 = vpop.f32.mrf.mxu0  ;;  %v3453_v39 = vadd.f32 %v7428_v45, %v5539_v60  ;;  %v2458_v58 = vpack.c.bf16 %v2447_v57, %v2446_v43  ;;  %v3454_v36 = vadd.f32 %v7428_v45, %v5542_v27  ;;  %v7510_v4 = vld [vmem:[%s6123_s25 + $0xb8] sm:$0xff]  }
 0x60c   : > { %v2262_v22 = vmul.f32 %v7297_v6, %v2261_v41  ;;  %8518 = vst [vmem:[#allocation24_spill] sm:$0xff] %v7413_v55  ;;  %v5538_v6 = vunpack.c.l.bf16 %v7420_v34  ;;  %v3455_v41 = vadd.f32 %v7428_v45, %v5543_v5  ;;  %v5547_v57 = vunpack.c.h.bf16 %v7478_v25  ;;  %v5413_v34 = vld [vmem:[%s6419_s28 + $0xa8] sm:$0xff] }
 0x60d   : > { %5108 = vmatmul.msk.bf16.gmra.mxu3 %vm546_vm0, %v2458_v58  ;;  %3817 = vmatpush.bf16.xpose.msra.mxu1 %v3807_v21  ;;  %v3456_v21 = vadd.f32 %v7428_v45, %v5546_v32 }
 0x60e   : > { %v2285_v10 = vpack.c.bf16 %v2277_v18, %v2262_v22  ;;  %v3452_v48 = vadd.f32 %v7428_v45, %v5538_v6  ;;  %v3469_v22 = vpack.c.bf16 %v3455_v41, %v3454_v36  ;;  %v5420_v18 = vld [vmem:[%s6116_s18 + $0xe0] sm:$0xff]  ;;  %v3457_v36 = vadd.f32 %v7428_v45, %v5547_v57 }
 0x60f   : > { %v3801_v41 = vsel %vm546_vm0, %v5419_v1, 0  ;;  %v8445_v1 = vunpack.c.l.bf16 %v7510_v4 }
 0x610   : > { %2394 = vmatmul.bf16.gmra.mxu0 %v2285_v10  ;;  %2993 = vadd.xlane.f32.xlu0 %v7415_v53  ;;  %v3468_v11 = vpack.c.bf16 %v3453_v39, %v3452_v48  ;;  %v7475_v10 = vld [vmem:[%s6123_s25 + $0xb0] sm:$0xff]   ;;  %v3804_v39 = vsel %vm546_vm0, %v5420_v18, 0  ;;  %v8524_v18 = vunpack.c.l.bf16 %v7165_v33 }
 0x611   : > { %v8443_v40 = vunpack.c.l.bf16 %v7475_v10  ;;  %v8442_v48 = vunpack.c.h.bf16 %v7475_v10 }
 0x613   : > { %v7430_v19 = vpop.f32.mrf.mxu0 }
 0x614   : > { %8519 = vst [vmem:[#allocation25_spill] sm:$0xff] %v7430_v19 }
 0x615   : > { %3818 = vmatpush.bf16.xpose.msra.mxu1 %v3804_v39  ;;  %v2448_v39 = vadd.f32 %v7449_v54, %v8524_v18  ;;  %v8451_v18 = vunpack.c.l.bf16 %v7513_v8 }
 0x61b   : > { %v7440_v24 = vpop.f32.mrf.mxu0 }
 0x61c   : > { %8520 = vst [vmem:[#allocation26_spill] sm:$0xff] %v7440_v24 }
 0x61d   : > { %3819 = vmatpush.bf16.xpose.msra.mxu1 %v3801_v41 }
 0x620   : > { %5242 = vmatmul.msk.bf16.vlgmr.msra.gmra.mxu0 %vm546_vm0, %v3468_v11  ;;  %v5985_v11 = vld [vmem:[%s8397_s5 + $0x2] ss:$0 sm:$0xff] }
 0x621   : > { %v2479_v51 = vadd.f32 %v5985_v11, %v8443_v40  ;;  %v2480_v43 = vadd.f32 %v5985_v11, %v8442_v48  ;;  %v5417_v48 = vld [vmem:[%s6116_s18 + $0xc8] sm:$0xff] }
 0x623   : > { %v7460_v30 = vpop.f32.mrf.mxu0  ;;  %v2489_v58 = vpack.c.bf16 %v2480_v43, %v2479_v51  ;;  %v8525_v51 = vunpack.c.h.bf16 %v7165_v33 }
 0x624   : > { %8523 = vst [vmem:[#allocation27_spill] sm:$0xff] %v7460_v30 }
 0x625   : > { %5070 = vmatmul.msk.bf16.gmra.mxu1 %vm546_vm0, %v2489_v58  ;;  %v2449_v43 = vadd.f32 %v7449_v54, %v8525_v51  ;;  %v5418_v58 = vld [vmem:[%s6116_s18 + $0xd0] sm:$0xff]  ;;  %v8450_v51 = vunpack.c.h.bf16 %v7513_v8 }
 0x626   : > { %v3798_v41 = vsel %vm546_vm0, %v5418_v58, 0 }
 0x627   : > { %3820 = vmatpush.bf16.xpose.msra.mxu1 %v3798_v41 }
 0x630   : > { %5243 = vmatmul.msk.bf16.gmra.mxu0 %vm546_vm0, %v3469_v22  ;;  %v3470_v22 = vpack.c.bf16 %v3457_v36, %v3456_v21  ;;  %v8444_v21 = vunpack.c.h.bf16 %v7510_v4  ;;  %v2459_v36 = vpack.c.bf16 %v2449_v43, %v2448_v39  ;;  %v3458_v39 = vadd.f32 %v7428_v45, %v8451_v18 }
 0x631   : > { %v3459_v43 = vadd.f32 %v7428_v45, %v8450_v51 }
 0x632   : > { %v2482_v33 = vadd.f32 %v5985_v11, %v8444_v21  ;;  %5109 = vmatmul.msk.bf16.gmra.mxu3 %vm546_vm0, %v2459_v36  ;;  %v7536_v36 = vld [vmem:[%s6123_s25 + $0xe0] sm:$0xff]  }
 0x633   : > { %v3471_v58 = vpack.c.bf16 %v3459_v43, %v3458_v39  ;;  %v8447_v41 = vunpack.c.l.bf16 %v7536_v36  ;;  %v7551_v43 = vld [vmem:[%s8396_s4 + $0x3] ss:$0 sm:$0xff] }
 0x634   : > { %v3424_v21 = vadd.f32 %v7551_v43, %v5539_v60 }
 0x640   : > { %5244 = vmatmul.msk.bf16.gmra.mxu0 %vm546_vm0, %v3470_v22  ;;  %v2481_v22 = vadd.f32 %v5985_v11, %v8445_v1  ;;  %v3795_v11 = vsel %vm546_vm0, %v5417_v48, 0  ;;  %v5415_v1 = vld [vmem:[%s6419_s28 + $0xb8] sm:$0xff] }
 0x641   : > { %3821 = vmatpush.bf16.xpose.msra.mxu1 %v3795_v11  ;;  %3336 = vmatpush.bf16.msra.mxu2 %v5415_v1 }
 0x642   : > { %v2490_v40 = vpack.c.bf16 %v2482_v33, %v2481_v22  ;;  %v5416_v22 = vld [vmem:[%s6116_s18 + $0xc0] sm:$0xff]  ;;  %v3460_v33 = vadd.f32 %v7428_v45, %v8447_v41  ;;  %s8534_s18 = smov 297  }
 0x643   : > { %v3792_v39 = vsel %vm546_vm0, %v5416_v22, 0  ;;  %v7560_v22 = vpop.permute.xlu2 %2705 }
 0x644   : > { %5071 = vmatmul.msk.bf16.gmra.mxu1 %vm546_vm0, %v2490_v40  ;;  %v8446_v40 = vunpack.c.h.bf16 %v7536_v36 }
 0x646   : > { %v3461_v48 = vadd.f32 %v7428_v45, %v8446_v40  ;;  %v2649_v40 = vpop.f32.mrf.mxu1 }
 0x647   : > { %2720 = vrot.lane.b32.xlu1 %v2649_v40, %s8473_s15  ;;  %v7578_v40 = vpop.xlane.xlu0 %2917 }
 0x648   : > { %v3472_v11 = vpack.c.bf16 %v3461_v48, %v3460_v33  ;;  %v7566_v33 = vld [vmem:[%s6123_s25 + $0xe8] sm:$0xff]  }
 0x649   : > { %3822 = vmatpush.bf16.xpose.msra.mxu1 %v3792_v39  ;;  %v8448_v60 = vunpack.c.l.bf16 %v7566_v33  ;;  %v5412_v39 = vld [vmem:[%s6419_s28 + $0xa0] sm:$0xff] }
 0x64b   : > { %v3462_v1 = vadd.f32 %v7428_v45, %v8448_v60  ;;  %v7580_v48 = vpop.xlane.xlu2 %2923 }
 0x650   : > { %5245 = vmatmul.msk.bf16.gmra.mxu0 %vm546_vm0, %v3471_v58  ;;  %v3423_v58 = vadd.f32 %v7551_v43, %v5538_v6  ;;  %v5414_v6 = vld [vmem:[%s6419_s28 + $0xb0] sm:$0xff] }
 0x651   : > { %3337 = vmatpush.bf16.msra.mxu2 %v5414_v6  ;;  %v3426_v6 = vadd.f32 %v7551_v43, %v5543_v5  ;;  %v5409_v5 = vld [vmem:[%s6419_s28 + $0x88] sm:$0xff] }
 0x652   : > { %v3439_v41 = vpack.c.bf16 %v3424_v21, %v3423_v58  ;;  %v8449_v21 = vunpack.c.h.bf16 %v7566_v33  ;;  %v3425_v58 = vadd.f32 %v7551_v43, %v5542_v27 }
 0x654   : > { %5282 = vmatmul.msk.bf16.vlgmr.msra.gmra.mxu1 %vm546_vm0, %v3439_v41  ;;  %v3463_v41 = vadd.f32 %v7428_v45, %v8449_v21  ;;  %v3440_v60 = vpack.c.bf16 %v3426_v6, %v3425_v58  ;;  %v7592_v21 = vpop.permute.xlu0 %2715  ;;  %v5408_v58 = vld [vmem:[%s6419_s28 + $0x80] sm:$0xff]  ;;  %v3427_v6 = vadd.f32 %v7551_v43, %v5546_v32 }
 0x655   : > { %3338 = vmatpush.bf16.msra.mxu2 %v5413_v34  ;;  %v5411_v34 = vld [vmem:[%s6419_s28 + $0x98] sm:$0xff] }
 0x659   : > { %3339 = vmatpush.bf16.msra.mxu2 %v5412_v39  ;;  %v7595_v39 = vld [vmem:[%s6123_s25 + $0xf0] sm:$0xff]  }
 0x65a   : > { %v8452_v27 = vunpack.c.l.bf16 %v7595_v39  ;;  %v8453_v49 = vunpack.c.h.bf16 %v7595_v39 }
 0x65d   : > { %3340 = vmatpush.bf16.msra.mxu2 %v5411_v34  ;;  %v3428_v34 = vadd.f32 %v7551_v43, %v5547_v57 }
 0x65f   : > { %v3441_v51 = vpack.c.bf16 %v3428_v34, %v3427_v6 }
 0x660   : > { %5246 = vmatmul.msk.bf16.gmra.mxu0 %vm546_vm0, %v3472_v11  ;;  %v3473_v11 = vpack.c.bf16 %v3463_v41, %v3462_v1  ;;  %v5410_v1 = vld [vmem:[%s6419_s28 + $0x90] sm:$0xff] }
 0x661   : > { %3341 = vmatpush.bf16.msra.mxu2 %v5410_v1  ;;  %v7614_v1 = vpop.f32.mrf.mxu0 }
 0x662   : > { %8526 = vst [vmem:[#allocation28_spill] sm:$0xff] %v7614_v1 }
 0x664   : > { %5283 = vmatmul.msk.bf16.gmra.mxu1 %vm546_vm0, %v3440_v60  ;;  %v3464_v60 = vadd.f32 %v7428_v45, %v8452_v27 }
 0x665   : > { %3342 = vmatpush.bf16.msra.mxu2 %v5409_v5 }
 0x669   : > { %3343 = vmatpush.bf16.msra.mxu2 %v5408_v58  ;;  %v7625_v1 = vpop.f32.mrf.mxu0  ;;  %v8528_v58 = vunpack.c.l.bf16 %v7513_v8 }
 0x66a   : > { %8527 = vst [vmem:[#allocation29_spill] sm:$0xff] %v7625_v1 }
 0x670   : > { %5247 = vmatmul.msk.bf16.gmra.mxu0 %vm546_vm0, %v3473_v11  ;;  %v3465_v11 = vadd.f32 %v7428_v45, %v8453_v49  ;;  %v7621_v49 = vld [vmem:[%s6123_s25 + $0xf8] sm:$0xff]   ;;  %s8535_s25 = smov 305  }
 0x671   : > { %v2992_v41 = vpop.xlane.xlu2 %2991  ;;  %v8458_v25 = vunpack.c.l.bf16 %v7621_v49  ;;  %v5567_v57 = vunpack.c.h.bf16 %v7621_v49 }
 0x672   : > { %5860 = vrcp.f32 %v2992_v41  ;;  %v3474_v27 = vpack.c.bf16 %v3465_v11, %v3464_v60  ;;  %v3429_v60 = vadd.f32 %v7551_v43, %v8528_v58  ;;  %v8529_v11 = vunpack.c.h.bf16 %v7513_v8 }
 0x673   : > { %v3467_v6 = vadd.f32 %v7428_v45, %v5567_v57  ;;  %v3034_v55 = vand.u32 2147483648, %v2992_v41  ;;  %vm3028_vm12 = vweird.f32 %v2992_v41  ;;  %v3032_v8 = vand.u32 2147483647, %v2992_v41 }
 0x674   : > { %5284 = vmatmul.msk.bf16.gmra.mxu1 %vm546_vm0, %v3441_v51 }
 0x675   : > { %v3035_v46 = vor.u32 1.1754944e-38, %v3034_v55  ;;  %vm3033_vm15 = vcmp.eq.f32.partialorder %v3032_v8, 8.507059e+37 }
 0x678   : > { %v5861_v18 = vpop.eup %5860 }
 0x679   : > { %v3024_v9 = vmul.f32 %v5861_v18, %v2992_v41  ;;  %vm3029_vm11 = vweird.f32 %v5861_v18 }
 0x67a   : > { %vm3030_vm13 = vmor %vm3028_vm12, %vm3029_vm11  ;;  %vm8540_vm11 = vcmp.ge.s32.totalorder %v6324_v44, %v6238_v2 }
 0x67b   : > { %v7616_v5 = vpop.xlane.xlu0 %2925  ;;  %v3025_v32 = vsub.f32 1.0, %v3024_v9  ;;  %v3466_v9 = vadd.f32 %v7428_v45, %v8458_v25 }
 0x67d   : > { %v3026_v51 = vmul.f32 %v5861_v18, %v3025_v32  ;;  %v3475_v58 = vpack.c.bf16 %v3467_v6, %v3466_v9  ;;  %v8533_v6 = vunpack.c.h.bf16 %v7566_v33 }
 0x67f   : > { %v3027_v1 = vadd.f32 %v5861_v18, %v3026_v51 }
 0x680   : > { %5248 = vmatmul.msk.bf16.gmra.mxu0 %vm546_vm0, %v3474_v27  ;;  %v3430_v27 = vadd.f32 %v7551_v43, %v8529_v11 }
 0x681   : > { %v3031_v13 = vsel %vm3030_vm13, %v5861_v18, %v3027_v1  ;;  %v8530_v1 = vunpack.c.l.bf16 %v7536_v36 }
 0x682   : > { %v3442_v34 = vpack.c.bf16 %v3430_v27, %v3429_v60  ;;  %v3036_v60 = vsel %vm3033_vm15, %v3035_v46, %v3031_v13  ;;  %v8531_v13 = vunpack.c.h.bf16 %v7536_v36  ;;  %v3434_v36 = vadd.f32 %v7551_v43, %v8533_v6 }
 0x683   : > { %v2994_v12 = vpop.xlane.xlu0 %2993  ;;  %v3037_v51 = vmul.f32 %v7389_v31, %v3036_v60 }
 0x684   : > { %5862 = vrcp.f32 %v2994_v12  ;;  %v3049_v32 = vand.u32 2147483648, %v2994_v12  ;;  %v3047_v20 = vand.u32 2147483647, %v2994_v12  ;;  %5285 = vmatmul.msk.bf16.gmra.mxu1 %vm546_vm0, %v3442_v34  ;;  %vm3043_vm8 = vweird.f32 %v2994_v12 }
 0x686   : > { %v3050_v41 = vor.u32 1.1754944e-38, %v3049_v32  ;;  %vm3048_vm10 = vcmp.eq.f32.partialorder %v3047_v20, 8.507059e+37 }
 0x68a   : > { %v5863_v24 = vpop.eup %5862 }
 0x68b   : > { %v3039_v30 = vmul.f32 %v5863_v24, %v2994_v12  ;;  %vm3044_vm14 = vweird.f32 %v5863_v24  ;;  %v3432_v12 = vadd.f32 %v7551_v43, %v8531_v13 }
 0x68c   : > { %vm3045_vm9 = vmor %vm3043_vm8, %vm3044_vm14  ;;  %vm8552_vm8 = vcmp.ge.s32.totalorder %v6440_v0, %v6238_v2 }
 0x68d   : > { %v3040_v19 = vsub.f32 1.0, %v3039_v30  ;;  %v7639_v11 = vpop.f32.mrf.mxu0 }
 0x68f   : > { %v3041_v25 = vmul.f32 %v5863_v24, %v3040_v19 }
 0x690   : > { %5249 = vmatmul.msk.bf16.gmra.mxu0 %vm546_vm0, %v3475_v58 }
 0x691   : > { %v3042_v45 = vadd.f32 %v5863_v24, %v3041_v25  ;;  %v3431_v25 = vadd.f32 %v7551_v43, %v8530_v1 }
 0x693   : > { %v3046_v30 = vsel %vm3045_vm9, %v5863_v24, %v3042_v45  ;;  %v3443_v20 = vpack.c.bf16 %v3432_v12, %v3431_v25 }
 0x694   : > { %v3051_v27 = vsel %vm3048_vm10, %v3050_v41, %v3046_v30  ;;  %v8536_v30 = vunpack.c.l.bf16 %v7595_v39 }
 0x695   : > { %v3052_v19 = vmul.f32 %v7415_v53, %v3051_v27  ;;  %v7645_v18 = vpop.f32.mrf.mxu0  ;;  %5286 = vmatmul.msk.bf16.gmra.mxu1 %vm546_vm0, %v3443_v20  ;;  %v8532_v53 = vunpack.c.l.bf16 %v7566_v33  ;;  %v8539_v20 = vunpack.c.l.bf16 %v7621_v49  ;;  %v7699_v49 = vpop.f32.mrf.mxu3 }
 0x696   : > { %v5675_v55 = vpack.i.bf16 %v7645_v18, %v7639_v11  ;;  %v3435_v27 = vadd.f32 %v7551_v43, %v8536_v30  ;;  %v2860_v44 = vadd.f32 %v7699_v49, %v7560_v22 }
 0x697   : > { %v3263_v46 = vpack.c.bf16 %v3052_v19, %v3037_v51  ;;  %v3433_v9 = vadd.f32 %v7551_v43, %v8532_v53  ;;  %v8537_v51 = vunpack.c.h.bf16 %v7595_v39  ;;  %v3438_v39 = vadd.f32 %v7551_v43, %v5567_v57 }
 0x699   : > { %3344 = vmatmul.bf16.vlgmr.msra.gmra.mxu2 %v3263_v46  ;;  %v3444_v34 = vpack.c.bf16 %v3434_v36, %v3433_v9  ;;  %v3436_v19 = vadd.f32 %v7551_v43, %v8537_v51 }
 0x69b   : > { %v3445_v1 = vpack.c.bf16 %v3436_v19, %v3435_v27 }
 0x69d   : > { %v3607_v24 = vpop.f32.mrf.mxu0  ;;  %v2861_v51 = vpop.f32.mrf.mxu3 }
 0x69e   : > { %3650 = vrot.lane.b32.xlu1 %v3607_v24, %s6010_s8  ;;  %s8538_s8 = smov 313   ;;  %v3437_v24 = vadd.f32 %v7551_v43, %v8539_v20 }
 0x6a0   : > { %v3446_v9 = vpack.c.bf16 %v3438_v39, %v3437_v24 }
 0x6a2   : > { %v7668_v45 = vpop.f32.mrf.mxu1 }
 0x6a5   : > { %v3609_v31 = vpop.f32.mrf.mxu0  ;;  %5287 = vmatmul.msk.bf16.gmra.mxu1 %vm546_vm0, %v3444_v34 }
 0x6a6   : > { %3655 = vrot.lane.b32.xlu2 %v3609_v31, %s6011_s9  ;;  %v2916_v31 = vpop.xlane.xlu1 %2915  ;;  %s6026_s9 = smov 64  }
 0x6a7   : > { %v2945_v24 = vsub.f32 %v7305_v47, %v2916_v31  ;;  %v8541_v31 = vunpack.c.l.bf16 %v7475_v10 }
 0x6aa   : > { %v7671_v33 = vpop.f32.mrf.mxu1 }
 0x6ad   : > { %v3612_v58 = vpop.f32.mrf.mxu0 }
 0x6ae   : > { %3660 = vrot.lane.b32.xlu0 %v3612_v58, %s6012_s10  ;;  %v2711_v36 = vpop.permute.xlu1 %2710  ;;  %s5343_s10 = sshll.u32 %s8618_s21, 7 }
 0x6b5   : > { %v3614_v8 = vpop.f32.mrf.mxu0  ;;  %5288 = vmatmul.msk.bf16.gmra.mxu1 %vm546_vm0, %v3445_v1 }
 0x6b6   : > { %3665 = vrot.lane.b32.xlu1 %v3614_v8, %s6013_s11 }
 0x6bd   : > { %v3617_v32 = vpop.f32.mrf.mxu0 }
 0x6be   : > { %3670 = vrot.lane.b32.xlu0 %v3617_v32, %s6014_s12  ;;  %v7696_v32 = vpop.xlane.xlu1 %2919 }
 0x6c1   : > { %v7681_v25 = vpop.f32.mrf.mxu1 }
 0x6c5   : > { %v3619_v60 = vpop.f32.mrf.mxu0  ;;  %5289 = vmatmul.msk.bf16.gmra.mxu1 %vm546_vm0, %v3446_v9 }
 0x6c6   : > { %3675 = vrot.lane.b32.xlu2 %v3619_v60, %s8534_s18  ;;  %v7702_v60 = vpop.xlane.xlu1 %2921 }
 0x6c9   : > { %v7685_v46 = vpop.f32.mrf.mxu1 }
 0x6cd   : > { %v3622_v41 = vpop.f32.mrf.mxu0 }
 0x6ce   : > { %3680 = vrot.lane.b32.xlu0 %v3622_v41, %s8535_s25  ;;  %v7710_v20 = vpop.permute.xlu1 %2720 }
 0x6d1   : > { %v3824_v6 = vpop.f32.mrf.mxu1 }
 0x6d5   : > { %v3624_v13 = vpop.f32.mrf.mxu0 }
 0x6d6   : > { %3685 = vrot.lane.b32.xlu0 %v3624_v13, %s8538_s8  ;;  %v2862_v13 = vadd.f32 %v2861_v51, %v2711_v36 }
 0x6d8   : > { %v2888_v39 = vmul.f32 0.125, %v2862_v13 }
 0x6d9   : > { %v3826_v58 = vpop.f32.mrf.mxu1 }
 0x6da   : > { %v7718_v36 = vsel %vm8540_vm11, %v2888_v39, -1e+30 }
 0x6dd   : > { %v3627_v12 = vpop.f32.mrf.mxu0 }
 0x6de   : > { %3690 = vrot.lane.b32.xlu1 %v3627_v12, %s8508_s7 }
 0x6e1   : > { %v3829_v43 = vpop.f32.mrf.mxu1 }
 0x6e5   : > { %v3629_v53 = vpop.f32.mrf.mxu0 }
 0x6e6   : > { %3695 = vrot.lane.b32.xlu2 %v3629_v53, %s8507_s14  ;;  %v2963_v53 = vmul.f32 1.442695, %v2945_v24  ;;  %s8298_s14 = scalar_lea.vmem %s8398_s6, %s5343_s10 }
 0x6e8   : > { %5864 = vpow2.f32 %v2963_v53 }
 0x6e9   : > { %v3831_v1 = vpop.f32.mrf.mxu1 }
 0x6ed   : > { %v3632_v34 = vpop.f32.mrf.mxu0 }
 0x6ee   : > { %3700 = vrot.lane.b32.xlu2 %v3632_v34, %s8509_s13  ;;  %v7734_v13 = vpop.eup %5864 }
 0x6f1   : > { %v3834_v62 = vpop.f32.mrf.mxu1 }
 0x6f5   : > { %v3634_v8 = vpop.f32.mrf.mxu0 }
 0x6f6   : > { %3705 = vrot.lane.b32.xlu0 %v3634_v8, %s8473_s15 }
 0x6fd   : > { %v3637_v57 = vpop.f32.mrf.mxu0 }
 0x6fe   : > { %3710 = vrot.lane.b32.xlu0 %v3637_v57, %s8476_s29  ;;  %v2450_v57 = vadd.f32 %v7449_v54, %v8541_v31 }
 0x700   : > { %v3656_v41 = vpop.permute.xlu2 %3655 }
 0x701   : > { %v3827_v30 = vadd.f32 %v3826_v58, %v3656_v41  ;;  %v2946_v58 = vsub.f32 %v7342_v26, %v7578_v40  ;;  %v8542_v41 = vunpack.c.h.bf16 %v7475_v10  ;;  %v3836_v26 = vpop.f32.mrf.mxu1 }
 0x703   : > { %v3865_v27 = vmul.f32 0.125, %v3827_v30  ;;  %v2451_v30 = vadd.f32 %v7449_v54, %v8542_v41 }
 0x705   : > { %v3639_v19 = vpop.f32.mrf.mxu0  ;;  %v7708_v12 = vsel %vm371_vm1, %v3865_v27, -1e+30  ;;  %v2965_v27 = vmul.f32 1.442695, %v2946_v58  ;;  %vm8543_vm1 = vcmp.ge.s32.totalorder %v6335_v50, %v6238_v2 }
 0x706   : > { %3715 = vrot.lane.b32.xlu0 %v3639_v19, %s8478_s26  ;;  %v2460_v19 = vpack.c.bf16 %v2451_v30, %v2450_v57 }
 0x707   : > { %5866 = vpow2.f32 %v2965_v27 }
 0x708   : > { %3898 = vmax.xlane.f32.xlu1 %v7708_v12  ;;  %5110 = vmatmul.msk.bf16.gmra.mxu3 %vm546_vm0, %v2460_v19 }
 0x709   : > { %v3839_v40 = vpop.f32.mrf.mxu1 }
 0x70d   : > { %v3642_v9 = vpop.f32.mrf.mxu0  ;;  %v7739_v10 = vpop.eup %5866 }
 0x70e   : > { %3720 = vrot.lane.b32.xlu0 %v3642_v9, %s8487_s30 }
 0x710   : > { %v3651_v34 = vpop.permute.xlu1 %3650  ;;  %2929 = vmax.xlane.f32.xlu1 %v7718_v36 }
 0x711   : > { %v3825_v8 = vadd.f32 %v3824_v6, %v3651_v34  ;;  %v3841_v24 = vpop.f32.mrf.mxu1 }
 0x713   : > { %v3864_v47 = vmul.f32 0.125, %v3825_v8 }
 0x715   : > { %v7732_v51 = vsel %vm370_vm2, %v3864_v47, -1e+30  ;;  %v3644_v61 = vpop.f32.mrf.mxu0  ;;  %vm8544_vm2 = vmmov %vm8540_vm11 }
 0x717   : > { %3896 = vmax.xlane.f32.xlu2 %v7732_v51 }
 0x718   : > { %2995 = vadd.xlane.f32.xlu1 %v7734_v13 }
 0x719   : > { %v3844_v31 = vpop.f32.mrf.mxu1 }
 0x720   : > { %2997 = vadd.xlane.f32.xlu1 %v7739_v10  ;;  %v3661_v6 = vpop.permute.xlu0 %3660 }
 0x721   : > { %v3830_v39 = vadd.f32 %v3829_v43, %v3661_v6  ;;  %v3676_v43 = vpop.permute.xlu2 %3675  ;;  %v3846_v41 = vpop.f32.mrf.mxu1 }
 0x723   : > { %v3866_v34 = vmul.f32 0.125, %v3830_v39 }
 0x725   : > { %v7752_v47 = vsel %vm372_vm3, %v3866_v34, -1e+30  ;;  %vm8545_vm3 = vcmp.ge.s32.totalorder %v6312_v38, %v6238_v2 }
 0x728   : > { %v3666_v6 = vpop.permute.xlu1 %3665 }
 0x72f   : > { %3725 = vrot.lane.b32.xlu2 %v3644_v61, %s8486_s20  ;;  %v3832_v61 = vadd.f32 %v3831_v1, %v3666_v6 }
 0x730   : > { %v3671_v53 = vpop.permute.xlu0 %3670 }
 0x731   : > { %v3835_v9 = vadd.f32 %v3834_v62, %v3671_v53  ;;  %v3867_v39 = vmul.f32 0.125, %v3832_v61  ;;  %v3849_v53 = vpop.f32.mrf.mxu1 }
 0x733   : > { %v3868_v58 = vmul.f32 0.125, %v3835_v9  ;;  %v7772_v50 = vsel %vm373_vm4, %v3867_v39, -1e+30  ;;  %vm8546_vm4 = vcmp.ge.s32.totalorder %v6374_v14, %v6238_v2 }
 0x735   : > { %v7746_v8 = vsel %vm374_vm5, %v3868_v58, -1e+30  ;;  %vm8547_vm5 = vcmp.ge.s32.totalorder %v6397_v35, %v6238_v2 }
 0x736   : > { %3904 = vmax.xlane.f32.xlu1 %v7746_v8 }
 0x738   : > { %3900 = vmax.xlane.f32.xlu0 %v7752_v47 }
 0x739   : > { %v3851_v34 = vpop.f32.mrf.mxu1 }
 0x740   : > { %v3681_v57 = vpop.permute.xlu0 %3680  ;;  %v3696_v30 = vpop.permute.xlu2 %3695 }
 0x741   : > { %v3840_v62 = vadd.f32 %v3839_v40, %v3681_v57  ;;  %v3847_v19 = vadd.f32 %v3846_v41, %v3696_v30  ;;  %v3854_v58 = vpop.f32.mrf.mxu1  ;;  %v2887_v57 = vmul.f32 0.125, %v2860_v44  ;;  %v3837_v30 = vadd.f32 %v3836_v26, %v3676_v43 }
 0x743   : > { %v3870_v27 = vmul.f32 0.125, %v3840_v62  ;;  %v3873_v7 = vmul.f32 0.125, %v3847_v19  ;;  %v3869_v49 = vmul.f32 0.125, %v3837_v30 }
 0x745   : > { %v7758_v17 = vsel %vm8543_vm1, %v3870_v27, -1e+30  ;;  %v7766_v40 = vsel %vm8544_vm2, %v3873_v7, -1e+30  ;;  %v7782_v27 = vsel %vm8545_vm3, %v2887_v57, -1e+30  ;;  %vm8555_vm2 = vcmp.ge.s32.totalorder %v6470_v56, %v6238_v2 }
 0x746   : > { %3908 = vmax.xlane.f32.xlu1 %v7758_v17  ;;  %v7794_v61 = vsel %vm375_vm7, %v3869_v49, -1e+30  ;;  %vm8548_vm7 = vcmp.ge.s32.totalorder %v6424_v42, %v6238_v2 }
 0x748   : > { %v3686_v9 = vpop.permute.xlu0 %3685  ;;  %v3701_v44 = vpop.permute.xlu2 %3700 }
 0x749   : > { %v3856_v22 = vpop.f32.mrf.mxu1  ;;  %v3842_v43 = vadd.f32 %v3841_v24, %v3686_v9  ;;  %v3850_v57 = vadd.f32 %v3849_v53, %v3701_v44 }
 0x74b   : > { %v3874_v9 = vmul.f32 0.125, %v3850_v57 }
 0x74c   : > { %2730 = vrot.lane.b32.xlu0 %v7671_v33, %s8478_s26 }
 0x74d   : > { %v7815_v30 = vsel %vm8548_vm7, %v3874_v9, -1e+30 }
 0x74e   : > { %3914 = vmax.xlane.f32.xlu1 %v7766_v40 }
 0x750   : > { %v3691_v41 = vpop.permute.xlu1 %3690 }
 0x751   : > { %v3845_v53 = vadd.f32 %v3844_v31, %v3691_v41 }
 0x753   : > { %v3872_v49 = vmul.f32 0.125, %v3845_v53 }
 0x758   : > { %3902 = vmax.xlane.f32.xlu2 %v7772_v50 }
 0x768   : > { %v3706_v33 = vpop.permute.xlu0 %3705 }
 0x770   : > { %2725 = vrot.lane.b32.xlu2 %v7668_v45, %s8476_s29  ;;  %v3711_v1 = vpop.permute.xlu0 %3710 }
 0x771   : > { %v3855_v62 = vadd.f32 %v3854_v58, %v3711_v1  ;;  %v3871_v58 = vmul.f32 0.125, %v3842_v43  ;;  %v3852_v43 = vadd.f32 %v3851_v34, %v3706_v33 }
 0x773   : > { %v3876_v16 = vmul.f32 0.125, %v3855_v62  ;;  %v7808_v29 = vsel %vm377_vm6, %v3871_v58, -1e+30  ;;  %vm8549_vm6 = vmmov %vm8545_vm3 }
 0x774   : > { %v7824_v58 = vsel %vm8549_vm6, %v3872_v49, -1e+30 }
 0x775   : > { %v7787_v19 = vsel %vm8546_vm4, %v3876_v16, -1e+30  ;;  %vm8558_vm4 = vmmov %vm8552_vm8 }
 0x776   : > { %2927 = vmax.xlane.f32.xlu0 %v7782_v27  ;;  %3920 = vmax.xlane.f32.xlu1 %v7787_v19 }
 0x778   : > { %v3716_v45 = vpop.permute.xlu0 %3715 }
 0x779   : > { %v3857_v7 = vadd.f32 %v3856_v22, %v3716_v45 }
 0x77b   : > { %v3877_v6 = vmul.f32 0.125, %v3857_v7  ;;  %v3899_v26 = vpop.xlane.xlu1 %3898 }
 0x77c   : > { %v3929_v24 = vsub.f32 %v7708_v12, %v3899_v26 }
 0x77d   : > { %v7799_v39 = vsel %vm8547_vm5, %v3877_v6, -1e+30 }
 0x77e   : > { %3906 = vmax.xlane.f32.xlu0 %v7794_v61  ;;  %3922 = vmax.xlane.f32.xlu1 %v7799_v39  ;;  %v3946_v62 = vmul.f32 1.442695, %v3929_v24  ;;  %v3875_v24 = vmul.f32 0.125, %v3852_v43 }
 0x783   : > { %v7803_v1 = vpop.xlane.xlu1 %2929 }
 0x786   : > { %3910 = vmax.xlane.f32.xlu0 %v7808_v29 }
 0x78a   : > { %v3897_v6 = vpop.xlane.xlu2 %3896 }
 0x78b   : > { %v2996_v16 = vpop.xlane.xlu1 %2995  ;;  %v3928_v41 = vsub.f32 %v7732_v51, %v3897_v6  ;;  %v7837_v6 = vsel %vm8552_vm8, %v3875_v24, -1e+30 }
 0x78c   : > { %5868 = vrcp.f32 %v2996_v16  ;;  %v3064_v9 = vand.u32 2147483648, %v2996_v16  ;;  %vm3058_vm13 = vweird.f32 %v2996_v16 }
 0x78d   : > { %5870 = vpow2.f32 %v3946_v62  ;;  %v3062_v62 = vand.u32 2147483647, %v2996_v16 }
 0x78e   : > { %3916 = vmax.xlane.f32.xlu0 %v7815_v30 }
 0x78f   : > { %vm3063_vm9 = vcmp.eq.f32.partialorder %v3062_v62, 8.507059e+37 }
 0x792   : > { %v5869_v28 = vpop.eup %5868 }
 0x793   : > { %v3054_v22 = vmul.f32 %v5869_v28, %v2996_v16  ;;  %v2998_v45 = vpop.xlane.xlu1 %2997  ;;  %v7818_v7 = vpop.eup %5870  ;;  %vm3059_vm12 = vweird.f32 %v5869_v28 }
 0x794   : > { %5872 = vrcp.f32 %v2998_v45  ;;  %vm7828_vm14 = vmor %vm3058_vm13, %vm3059_vm12  ;;  %v3079_v38 = vand.u32 2147483648, %v2998_v45  ;;  %v3077_v49 = vand.u32 2147483647, %v2998_v45  ;;  %vm3073_vm10 = vweird.f32 %v2998_v45 }
 0x795   : > { %v3055_v12 = vsub.f32 1.0, %v3054_v22  ;;  %v3944_v22 = vmul.f32 1.442695, %v3928_v41  ;;  %v3721_v41 = vpop.permute.xlu0 %3720  ;;  %vm8559_vm12 = vcmp.ge.s32.totalorder %v6397_v35, %v6238_v2 }
 0x796   : > { %3978 = vadd.xlane.f32.xlu0 %v7818_v7  ;;  %vm3078_vm1 = vcmp.eq.f32.partialorder %v3077_v49, 8.507059e+37 }
 0x797   : > { %v3056_v26 = vmul.f32 %v5869_v28, %v3055_v12  ;;  %v3065_v12 = vor.u32 1.1754944e-38, %v3064_v9  ;;  %5874 = vpow2.f32 %v3944_v22 }
 0x799   : > { %3912 = vmax.xlane.f32.xlu2 %v7824_v58  ;;  %v3057_v44 = vadd.f32 %v5869_v28, %v3056_v26  ;;  %v3080_v26 = vor.u32 1.1754944e-38, %v3079_v38 }
 0x79a   : > { %v5873_v31 = vpop.eup %5872 }
 0x79b   : > { %v3069_v57 = vmul.f32 %v5873_v31, %v2998_v45  ;;  %vm3074_vm15 = vweird.f32 %v5873_v31  ;;  %v3061_v51 = vsel %vm7828_vm14, %v5869_v28, %v3057_v44 }
 0x79c   : > { %vm3075_vm11 = vmor %vm3073_vm10, %vm3074_vm15  ;;  %v3066_v43 = vsel %vm3063_vm9, %v3065_v12, %v3061_v51  ;;  %vm8560_vm10 = vcmp.ge.s32.totalorder %v6374_v14, %v6238_v2  ;;  %v2949_v14 = vsub.f32 %v7368_v59, %v7580_v48 }
 0x79d   : > { %v3070_v53 = vsub.f32 1.0, %v3069_v57  ;;  %v3067_v28 = vmul.f32 %v7734_v13, %v3066_v43  ;;  %v7842_v24 = vpop.eup %5874 }
 0x79f   : > { %v3071_v33 = vmul.f32 %v5873_v31, %v3070_v53 }
 0x7a1   : > { %v3072_v16 = vadd.f32 %v5873_v31, %v3071_v33  ;;  %3918 = vmax.xlane.f32.xlu2 %v7837_v6  ;;  %v8553_v33 = vunpack.c.l.bf16 %v7510_v4 }
 0x7a3   : > { %v3076_v57 = vsel %vm3075_vm11, %v5873_v31, %v3072_v16  ;;  %v2452_v13 = vadd.f32 %v7449_v54, %v8553_v33  ;;  %vm8561_vm11 = vcmp.ge.s32.totalorder %v6424_v42, %v6238_v2  ;;  %v2952_v42 = vsub.f32 %v7718_v36, %v7803_v1 }
 0x7a4   : > { %v3081_v53 = vsel %vm3078_vm1, %v3080_v26, %v3076_v57 }
 0x7a5   : > { %v3082_v44 = vmul.f32 %v7739_v10, %v3081_v53  ;;  %v8554_v10 = vunpack.c.h.bf16 %v7510_v4  ;;  %v3726_v4 = vpop.permute.xlu2 %3725 }
 0x7a7   : > { %v3264_v9 = vpack.c.bf16 %v3082_v44, %v3067_v28  ;;  %v2453_v49 = vadd.f32 %v7449_v54, %v8554_v10 }
 0x7a9   : > { %3349 = vmatmul.bf16.gmra.mxu2 %v3264_v9  ;;  %v3905_v62 = vpop.xlane.xlu1 %3904  ;;  %3976 = vadd.xlane.f32.xlu2 %v7842_v24  ;;  %v2461_v51 = vpack.c.bf16 %v2453_v49, %v2452_v13 }
 0x7aa   : > { %v3932_v45 = vsub.f32 %v7746_v8, %v3905_v62 }
 0x7ab   : > { %v3901_v22 = vpop.xlane.xlu0 %3900  ;;  %5111 = vmatmul.msk.bf16.gmra.mxu3 %vm546_vm0, %v2461_v51 }
 0x7ac   : > { %v3952_v34 = vmul.f32 1.442695, %v3932_v45  ;;  %v3930_v38 = vsub.f32 %v7752_v47, %v3901_v22 }
 0x7ae   : > { %5876 = vpow2.f32 %v3952_v34  ;;  %v3948_v31 = vmul.f32 1.442695, %v3930_v38  ;;  %v3859_v34 = vpop.f32.mrf.mxu1 }
 0x7af   : > { %v3860_v10 = vadd.f32 %v3859_v34, %v3721_v41  ;;  %v8556_v34 = vld [vmem:[#allocation2_spill] sm:$0xff] }
 0x7b0   : > { %5878 = vpow2.f32 %v3948_v31  ;;  %v5438_v31 = vld [vmem:[%s6419_s28 + $0xf0] sm:$0xff]  ;;  %vm8557_vm3 = vcmp.ge.s32.totalorder %v8556_v34, %v6238_v2 }
 0x7b1   : > { %v3878_v49 = vmul.f32 0.125, %v3860_v10 }
 0x7b3   : > { %v7894_v41 = vsel %vm8555_vm2, %v3878_v49, -1e+30 }
 0x7b4   : > { %v7854_v12 = vpop.eup %5876 }
 0x7b5   : > { %3984 = vadd.xlane.f32.xlu1 %v7854_v12 }
 0x7b6   : > { %v7857_v8 = vpop.eup %5878  ;;  %v3861_v51 = vpop.f32.mrf.mxu1 }
 0x7b7   : > { %3980 = vadd.xlane.f32.xlu0 %v7857_v8 }
 0x7b9   : > { %v3909_v47 = vpop.xlane.xlu1 %3908 }
 0x7ba   : > { %v3934_v16 = vsub.f32 %v7758_v17, %v3909_v47 }
 0x7bc   : > { %v3956_v26 = vmul.f32 1.442695, %v3934_v16 }
 0x7be   : > { %5880 = vpow2.f32 %v3956_v26  ;;  %v7870_v17 = vpop.permute.xlu0 %2730 }
 0x7c4   : > { %v7861_v54 = vpop.eup %5880 }
 0x7c5   : > { %3988 = vadd.xlane.f32.xlu1 %v7861_v54 }
 0x7cb   : > { %v3903_v43 = vpop.xlane.xlu2 %3902 }
 0x7cc   : > { %v3931_v57 = vsub.f32 %v7772_v50, %v3903_v43  ;;  %v5439_v50 = vld [vmem:[%s6419_s28 + $0xf8] sm:$0xff]  ;;  %v3862_v43 = vadd.f32 %v3861_v51, %v3726_v4 }
 0x7cd   : > { %4321 = vmatpush.bf16.msra.mxu3 %v5439_v50 }
 0x7ce   : > { %v3950_v53 = vmul.f32 1.442695, %v3931_v57  ;;  %v5435_v57 = vld [vmem:[%s6419_s28 + $0xd8] sm:$0xff] }
 0x7d0   : > { %5882 = vpow2.f32 %v3950_v53  ;;  %v3879_v53 = vmul.f32 0.125, %v3862_v43 }
 0x7d1   : > { %4322 = vmatpush.bf16.msra.mxu3 %v5438_v31  ;;  %v5433_v31 = vld [vmem:[%s6419_s28 + $0xc8] sm:$0xff] }
 0x7d3   : > { %v7889_v26 = vpop.permute.xlu2 %2725 }
 0x7d6   : > { %v7865_v28 = vpop.eup %5882 }
 0x7d7   : > { %3982 = vadd.xlane.f32.xlu0 %v7865_v28 }
 0x7de   : > { %2735 = vrot.lane.b32.xlu1 %v7681_v25, %s8487_s30  ;;  %v5437_v25 = vld [vmem:[%s6419_s28 + $0xe8] sm:$0xff] }
 0x7df   : > { %4323 = vmatpush.bf16.msra.mxu3 %v5437_v25 }
 0x7e9   : > { %v7872_v44 = vpop.xlane.xlu0 %2927 }
 0x7f1   : > { %v3907_v9 = vpop.xlane.xlu0 %3906 }
 0x7f2   : > { %v3933_v62 = vsub.f32 %v7794_v61, %v3907_v9  ;;  %v7882_v61 = vpop.f32.mrf.mxu3 }
 0x7f4   : > { %v3954_v45 = vmul.f32 1.442695, %v3933_v62  ;;  %v5434_v62 = vld [vmem:[%s6419_s28 + $0xd0] sm:$0xff] }
 0x7f6   : > { %5884 = vpow2.f32 %v3954_v45 }
 0x7f9   : > { %v3911_v22 = vpop.xlane.xlu0 %3910 }
 0x7fa   : > { %v3935_v38 = vsub.f32 %v7808_v29, %v3911_v22  ;;  %v5436_v29 = vld [vmem:[%s6419_s28 + $0xe0] sm:$0xff]  ;;  %v2866_v9 = vpop.f32.mrf.mxu3 }
 0x7fb   : > { %4324 = vmatpush.bf16.msra.mxu3 %v5436_v29  ;;  %v2867_v4 = vadd.f32 %v2866_v9, %v7710_v20 }
 0x7fc   : > { %v3958_v33 = vmul.f32 1.442695, %v3935_v38  ;;  %v7879_v13 = vpop.eup %5884  ;;  %v7907_v38 = vsel %vm8557_vm3, %v3879_v53, -1e+30  ;;  %v2948_v53 = vsub.f32 %v7356_v15, %v7702_v60 }
 0x7fd   : > { %3986 = vadd.xlane.f32.xlu0 %v7879_v13  ;;  %v2890_v10 = vmul.f32 0.125, %v2867_v4 }
 0x7fe   : > { %5886 = vpow2.f32 %v3958_v33  ;;  %v2947_v33 = vsub.f32 %v7348_v63, %v7696_v32  ;;  %v3915_v63 = vpop.xlane.xlu1 %3914 }
 0x7ff   : > { %4325 = vmatpush.bf16.msra.mxu3 %v5435_v57  ;;  %v7921_v57 = vsel %vm8558_vm4, %v2890_v10, -1e+30  ;;  %vm8564_vm4 = vcmp.ge.s32.totalorder %v6470_v56, %v6238_v2 }
 0x800   : > { %v2967_v49 = vmul.f32 1.442695, %v2947_v33  ;;  %v3937_v33 = vsub.f32 %v7766_v40, %v3915_v63 }
 0x801   : > { %v7884_v47 = vpop.xlane.xlu0 %3916 }
 0x802   : > { %v7914_v20 = vpop.f32.mrf.mxu3 }
 0x803   : > { %4326 = vmatpush.bf16.msra.mxu3 %v5434_v62  ;;  %v2870_v35 = vadd.f32 %v7914_v20, %v7889_v26 }
 0x804   : > { %v7887_v16 = vpop.eup %5886 }
 0x805   : > { %3990 = vadd.xlane.f32.xlu2 %v7887_v16  ;;  %3924 = vmax.xlane.f32.xlu0 %v7894_v41 }
 0x807   : > { %4327 = vmatpush.bf16.msra.mxu3 %v5433_v31  ;;  %v3921_v31 = vpop.xlane.xlu1 %3920 }
 0x808   : > { %v3940_v10 = vsub.f32 %v7787_v19, %v3921_v31 }
 0x809   : > { %v7900_v45 = vpop.xlane.xlu0 %3978 }
 0x80a   : > { %5888 = vrcp.f32 %v7900_v45  ;;  %vm4028_vm7 = vweird.f32 %v7900_v45  ;;  %v4032_v40 = vand.u32 2147483647, %v7900_v45 }
 0x80c   : > { %v3913_v50 = vpop.xlane.xlu2 %3912  ;;  %vm4033_vm14 = vcmp.eq.f32.partialorder %v4032_v40, 8.507059e+37 }
 0x80d   : > { %v3936_v22 = vsub.f32 %v7824_v58, %v3913_v50  ;;  %3926 = vmax.xlane.f32.xlu0 %v7907_v38  ;;  %v5432_v58 = vld [vmem:[%s6419_s28 + $0xc0] sm:$0xff]  ;;  %v2871_v50 = vpop.f32.mrf.mxu3 }
 0x80e   : > { %4328 = vmatpush.bf16.msra.mxu3 %v5432_v58  ;;  %v2872_v60 = vadd.f32 %v2871_v50, %v7870_v17 }
 0x80f   : > { %v3960_v25 = vmul.f32 1.442695, %v3936_v22 }
 0x810   : > { %v5889_v29 = vpop.eup %5888 }
 0x811   : > { %5890 = vpow2.f32 %v3960_v25  ;;  %v4024_v62 = vmul.f32 %v5889_v29, %v7900_v45  ;;  %vm4029_vm5 = vweird.f32 %v5889_v29 }
 0x812   : > { %5892 = vpow2.f32 %v2967_v49  ;;  %v2892_v49 = vmul.f32 0.125, %v2872_v60  ;;  %vm4030_vm6 = vmor %vm4028_vm7, %vm4029_vm5 }
 0x813   : > { %v4025_v0 = vsub.f32 1.0, %v4024_v62  ;;  %v4034_v62 = vand.u32 2147483648, %v7900_v45 }
 0x814   : > { %v3919_v51 = vpop.xlane.xlu2 %3918  ;;  %v7950_v63 = vsel %vm8559_vm12, %v2892_v49, -1e+30 }
 0x815   : > { %v3939_v43 = vsub.f32 %v7837_v6, %v3919_v51  ;;  %2933 = vmax.xlane.f32.xlu0 %v7921_v57  ;;  %v2969_v6 = vmul.f32 1.442695, %v2948_v53  ;;  %v4026_v25 = vmul.f32 %v5889_v29, %v4025_v0  ;;  %v3962_v51 = vmul.f32 1.442695, %v3937_v33 }
 0x816   : > { %v4035_v31 = vor.u32 1.1754944e-38, %v4034_v62  ;;  %v2865_v62 = vadd.f32 %v7882_v61, %v7592_v21 }
 0x817   : > { %v7924_v32 = vpop.eup %5890  ;;  %v3966_v9 = vmul.f32 1.442695, %v3939_v43  ;;  %v4027_v43 = vadd.f32 %v5889_v29, %v4026_v25 }
 0x818   : > { %3992 = vadd.xlane.f32.xlu1 %v7924_v32  ;;  %v7930_v22 = vpop.eup %5892 }
 0x819   : > { %5894 = vpow2.f32 %v3966_v9  ;;  %v3968_v9 = vmul.f32 1.442695, %v3940_v10 }
 0x81c   : > { %v3977_v4 = vpop.xlane.xlu2 %3976 }
 0x81d   : > { %5896 = vrcp.f32 %v3977_v4  ;;  %2740 = vrot.lane.b32.xlu2 %v7685_v46, %s8486_s20  ;;  %2999 = vadd.xlane.f32.xlu0 %v7930_v22  ;;  %v4019_v19 = vand.u32 2147483648, %v3977_v4  ;;  %v4017_v0 = vand.u32 2147483647, %v3977_v4  ;;  %vm4013_vm15 = vweird.f32 %v3977_v4 }
 0x81e   : > { %5898 = vpow2.f32 %v2969_v6  ;;  %v4031_v6 = vsel %vm4030_vm6, %v5889_v29, %v4027_v43 }
 0x81f   : > { %v7935_v15 = vpop.eup %5894  ;;  %5900 = vpow2.f32 %v3962_v51  ;;  %v4036_v60 = vsel %vm4033_vm14, %v4035_v31, %v4031_v6  ;;  %v4020_v33 = vor.u32 1.1754944e-38, %v4019_v19  ;;  %vm4018_vm9 = vcmp.eq.f32.partialorder %v4017_v0, 8.507059e+37 }
 0x820   : > { %3998 = vadd.xlane.f32.xlu1 %v7935_v15  ;;  %5902 = vpow2.f32 %v3968_v9  ;;  %v4037_v49 = vmul.f32 %v7818_v7, %v4036_v60  ;;  %v2950_v7 = vsub.f32 %v7407_v3, %v7616_v5  ;;  %v2971_v5 = vmul.f32 1.442695, %v2949_v14 }
 0x823   : > { %v5897_v58 = vpop.eup %5896 }
 0x824   : > { %v4009_v46 = vmul.f32 %v5897_v58, %v3977_v4  ;;  %v7941_v53 = vpop.eup %5898  ;;  %vm4014_vm13 = vweird.f32 %v5897_v58  ;;  %v3938_v4 = vsub.f32 %v7815_v30, %v7884_v47  ;;  %v2973_v30 = vmul.f32 1.442695, %v2950_v7 }
 0x825   : > { %3001 = vadd.xlane.f32.xlu0 %v7941_v53  ;;  %vm4015_vm8 = vmor %vm4013_vm15, %vm4014_vm13  ;;  %v7953_v10 = vpop.eup %5900 }
 0x826   : > { %v4010_v17 = vsub.f32 1.0, %v4009_v46  ;;  %v7960_v43 = vpop.eup %5902  ;;  %v2891_v46 = vmul.f32 0.125, %v2870_v35  ;;  %v3964_v9 = vmul.f32 1.442695, %v3938_v4  ;;  %v2977_v35 = vmul.f32 1.442695, %v2952_v42 }
 0x828   : > { %v4011_v50 = vmul.f32 %v5897_v58, %v4010_v17  ;;  %2937 = vmax.xlane.f32.xlu1 %v7950_v63  ;;  %v7968_v26 = vsel %vm8560_vm10, %v2891_v46, -1e+30  ;;  %5904 = vpow2.f32 %v3964_v9  ;;  %v2889_v17 = vmul.f32 0.125, %v2865_v62 }
 0x82a   : > { %v4012_v45 = vadd.f32 %v5897_v58, %v4011_v50  ;;  %v3981_v20 = vpop.xlane.xlu0 %3980  ;;  %v7987_v6 = vsel %vm8561_vm11, %v2889_v17, -1e+30 }
 0x82b   : > { %5906 = vrcp.f32 %v3981_v20  ;;  %vm4043_vm2 = vweird.f32 %v3981_v20  ;;  %v4047_v36 = vand.u32 2147483647, %v3981_v20 }
 0x82c   : > { %v4016_v25 = vsel %vm4015_vm8, %v5897_v58, %v4012_v45  ;;  %5908 = vpow2.f32 %v2973_v30 }
 0x82d   : > { %v4021_v29 = vsel %vm4018_vm9, %v4020_v33, %v4016_v25  ;;  %3994 = vadd.xlane.f32.xlu0 %v7953_v10  ;;  %5910 = vpow2.f32 %v2971_v5  ;;  %v2951_v33 = vsub.f32 %v7782_v27, %v7872_v44  ;;  %vm4048_vm7 = vcmp.eq.f32.partialorder %v4047_v36, 8.507059e+37 }
 0x82e   : > { %v4022_v51 = vmul.f32 %v7842_v24, %v4021_v29  ;;  %v3923_v24 = vpop.xlane.xlu1 %3922  ;;  %v7973_v47 = vpop.eup %5904 }
 0x82f   : > { %v3941_v59 = vsub.f32 %v7799_v39, %v3923_v24  ;;  %v2874_v60 = vpop.f32.mrf.mxu3  ;;  %v2975_v4 = vmul.f32 1.442695, %v2951_v33 }
 0x830   : > { %4000 = vadd.xlane.f32.xlu1 %v7960_v43  ;;  %v4248_v58 = vpack.c.bf16 %v4037_v49, %v4022_v51 }
 0x831   : > { %v5907_v3 = vpop.eup %5906  ;;  %v3970_v0 = vmul.f32 1.442695, %v3941_v59 }
 0x832   : > { %4329 = vmatmul.bf16.vlgmr.msra.gmra.mxu3 %v4248_v58  ;;  %v7982_v19 = vpop.eup %5908  ;;  %v4039_v21 = vmul.f32 %v5907_v3, %v3981_v20  ;;  %vm4044_vm1 = vweird.f32 %v5907_v3  ;;  %v4049_v58 = vand.u32 2147483648, %v3981_v20 }
 0x833   : > { %v7994_v31 = vpop.eup %5910  ;;  %vm8003_vm3 = vmor %vm4043_vm2, %vm4044_vm1 }
 0x834   : > { %v4040_v61 = vsub.f32 1.0, %v4039_v21  ;;  %v4050_v62 = vor.u32 1.1754944e-38, %v4049_v58 }
 0x835   : > { %2935 = vmax.xlane.f32.xlu0 %v7968_v26 }
 0x836   : > { %v7980_v40 = vpop.xlane.xlu1 %3984  ;;  %v4041_v45 = vmul.f32 %v5907_v3, %v4040_v61 }
 0x837   : > { %vm4073_vm15 = vweird.f32 %v7980_v40  ;;  %v4077_v58 = vand.u32 2147483647, %v7980_v40 }
 0x838   : > { %v4042_v49 = vadd.f32 %v5907_v3, %v4041_v45 }
 0x839   : > { %vm4078_vm10 = vcmp.eq.f32.partialorder %v4077_v58, 8.507059e+37 }
 0x83a   : > { %v4046_v20 = vsel %vm8003_vm3, %v5907_v3, %v4042_v49  ;;  %vm8567_vm3 = vcmp.ge.s32.totalorder %v8556_v34, %v6238_v2 }
 0x83b   : > { %v4051_v56 = vsel %vm4048_vm7, %v4050_v62, %v4046_v20 }
 0x83c   : > { %v4052_v61 = vmul.f32 %v7857_v8, %v4051_v56 }
 0x83d   : > { %3996 = vadd.xlane.f32.xlu0 %v7973_v47 }
 0x83e   : > { %v7992_v48 = vpop.xlane.xlu1 %3988 }
 0x845   : > { %3005 = vadd.xlane.f32.xlu0 %v7982_v19 }
 0x846   : > { %2931 = vmax.xlane.f32.xlu2 %v7987_v6 }
 0x84a   : > { %v3983_v50 = vpop.xlane.xlu0 %3982 }
 0x84b   : > { %5912 = vrcp.f32 %v3983_v50  ;;  %v4064_v27 = vand.u32 2147483648, %v3983_v50  ;;  %v4062_v30 = vand.u32 2147483647, %v3983_v50  ;;  %vm4058_vm6 = vweird.f32 %v3983_v50 }
 0x84c   : > { %5914 = vpow2.f32 %v3970_v0 }
 0x84d   : > { %5916 = vpow2.f32 %v2977_v35  ;;  %v4065_v17 = vor.u32 1.1754944e-38, %v4064_v27  ;;  %vm4063_vm13 = vcmp.eq.f32.partialorder %v4062_v30, 8.507059e+37 }
 0x84e   : > { %3003 = vadd.xlane.f32.xlu2 %v7994_v31  ;;  %5918 = vpow2.f32 %v2975_v4 }
 0x84f   : > { %5920 = vrcp.f32 %v7980_v40 }
 0x850   : > { %v2736_v39 = vpop.permute.xlu1 %2735 }
 0x851   : > { %v5913_v25 = vpop.eup %5912  ;;  %v2875_v29 = vadd.f32 %v2874_v60, %v2736_v39 }
 0x852   : > { %v4054_v51 = vmul.f32 %v5913_v25, %v3983_v50  ;;  %v8001_v9 = vpop.eup %5914  ;;  %vm4059_vm5 = vweird.f32 %v5913_v25 }
 0x853   : > { %v2893_v46 = vmul.f32 0.125, %v2875_v29  ;;  %vm4060_vm12 = vmor %vm4058_vm6, %vm4059_vm5  ;;  %v8016_v21 = vpop.eup %5916 }
 0x854   : > { %v4055_v1 = vsub.f32 1.0, %v4054_v51  ;;  %v8020_v42 = vpop.eup %5918  ;;  %v4079_v51 = vand.u32 2147483648, %v7980_v40 }
 0x855   : > { %v8010_v44 = vsel %vm8564_vm4, %v2893_v46, -1e+30  ;;  %v5921_v50 = vpop.eup %5920 }
 0x856   : > { %v4056_v24 = vmul.f32 %v5913_v25, %v4055_v1  ;;  %4002 = vadd.xlane.f32.xlu2 %v8001_v9  ;;  %2939 = vmax.xlane.f32.xlu0 %v8010_v44  ;;  %v4069_v45 = vmul.f32 %v5921_v50, %v7980_v40  ;;  %vm4074_vm14 = vweird.f32 %v5921_v50  ;;  %v4080_v30 = vor.u32 1.1754944e-38, %v4079_v51 }
 0x857   : > { %vm8034_vm8 = vmor %vm4073_vm15, %vm4074_vm14 }
 0x858   : > { %v4057_v14 = vadd.f32 %v5913_v25, %v4056_v24  ;;  %v4070_v60 = vsub.f32 1.0, %v4069_v45 }
 0x85a   : > { %v4061_v5 = vsel %vm4060_vm12, %v5913_v25, %v4057_v14  ;;  %v4071_v39 = vmul.f32 %v5921_v50, %v4070_v60  ;;  %vm4103_vm12 = vweird.f32 %v7992_v48 }
 0x85b   : > { %v4066_v59 = vsel %vm4063_vm13, %v4065_v17, %v4061_v5  ;;  %v2876_v17 = vpop.f32.mrf.mxu3 }
 0x85c   : > { %v4067_v0 = vmul.f32 %v7865_v28, %v4066_v59  ;;  %v4072_v28 = vadd.f32 %v5921_v50, %v4071_v39 }
 0x85e   : > { %3007 = vadd.xlane.f32.xlu2 %v8020_v42  ;;  %3009 = vadd.xlane.f32.xlu0 %v8016_v21  ;;  %v4249_v3 = vpack.c.bf16 %v4067_v0, %v4052_v61  ;;  %v4076_v1 = vsel %vm8034_vm8, %v5921_v50, %v4072_v28 }
 0x85f   : > { %v4081_v59 = vsel %vm4078_vm10, %v4080_v30, %v4076_v1 }
 0x860   : > { %4334 = vmatmul.bf16.gmra.mxu3 %v4249_v3 }
 0x870   : > { %v3987_v33 = vpop.xlane.xlu0 %3986 }
 0x871   : > { %5922 = vrcp.f32 %v3987_v33  ;;  %v4094_v36 = vand.u32 2147483648, %v3987_v33  ;;  %v4092_v24 = vand.u32 2147483647, %v3987_v33  ;;  %vm4088_vm11 = vweird.f32 %v3987_v33 }
 0x872   : > { %5924 = vrcp.f32 %v7992_v48 }
 0x873   : > { %v4095_v40 = vor.u32 1.1754944e-38, %v4094_v36  ;;  %vm4093_vm2 = vcmp.eq.f32.partialorder %v4092_v24, 8.507059e+37 }
 0x877   : > { %v5923_v8 = vpop.eup %5922 }
 0x878   : > { %v8027_v25 = vpop.xlane.xlu2 %3990  ;;  %v4084_v35 = vmul.f32 %v5923_v8, %v3987_v33  ;;  %v3925_v29 = vpop.xlane.xlu0 %3924  ;;  %vm4089_vm9 = vweird.f32 %v5923_v8 }
 0x879   : > { %5926 = vrcp.f32 %v8027_v25  ;;  %v8030_v49 = vpop.eup %5924  ;;  %v3942_v14 = vsub.f32 %v7894_v41, %v3925_v29  ;;  %vm4090_vm1 = vmor %vm4088_vm11, %vm4089_vm9  ;;  %v4082_v41 = vmul.f32 %v7854_v12, %v4081_v59  ;;  %v4124_v12 = vand.u32 2147483648, %v8027_v25 }
 0x87a   : > { %v4085_v46 = vsub.f32 1.0, %v4084_v35  ;;  %v4099_v7 = vmul.f32 %v8030_v49, %v7992_v48  ;;  %vm4104_vm5 = vweird.f32 %v8030_v49  ;;  %vm4118_vm7 = vweird.f32 %v8027_v25 }
 0x87b   : > { %v3972_v28 = vmul.f32 1.442695, %v3942_v14  ;;  %v4122_v2 = vand.u32 2147483647, %v8027_v25  ;;  %vm4105_vm13 = vmor %vm4103_vm12, %vm4104_vm5 }
 0x87c   : > { %v4086_v27 = vmul.f32 %v5923_v8, %v4085_v46  ;;  %v4100_v61 = vsub.f32 1.0, %v4099_v7  ;;  %v4109_v46 = vand.u32 2147483648, %v7992_v48  ;;  %v4107_v7 = vand.u32 2147483647, %v7992_v48 }
 0x87d   : > { %vm4123_vm14 = vcmp.eq.f32.partialorder %v4122_v2, 8.507059e+37 }
 0x87e   : > { %v4087_v62 = vadd.f32 %v5923_v8, %v4086_v27  ;;  %v4101_v4 = vmul.f32 %v8030_v49, %v4100_v61  ;;  %vm4108_vm15 = vcmp.eq.f32.partialorder %v4107_v7, 8.507059e+37 }
 0x87f   : > { %v5927_v20 = vpop.eup %5926 }
 0x880   : > { %v4114_v56 = vmul.f32 %v5927_v20, %v8027_v25  ;;  %v2741_v5 = vpop.permute.xlu2 %2740  ;;  %v3927_v3 = vpop.xlane.xlu0 %3926  ;;  %v4091_v50 = vsel %vm4090_vm1, %v5923_v8, %v4087_v62  ;;  %vm4119_vm4 = vweird.f32 %v5927_v20  ;;  %v4125_v25 = vor.u32 1.1754944e-38, %v4124_v12 }
 0x881   : > { %v2877_v0 = vadd.f32 %v2876_v17, %v2741_v5  ;;  %v3943_v60 = vsub.f32 %v7907_v38, %v3927_v3  ;;  %v4096_v39 = vsel %vm4093_vm2, %v4095_v40, %v4091_v50  ;;  %vm8061_vm6 = vmor %vm4118_vm7, %vm4119_vm4 }
 0x882   : > { %v4115_v45 = vsub.f32 1.0, %v4114_v56  ;;  %v4097_v35 = vmul.f32 %v7879_v13, %v4096_v39  ;;  %v4102_v13 = vadd.f32 %v8030_v49, %v4101_v4 }
 0x883   : > { %v2894_v33 = vmul.f32 0.125, %v2877_v0  ;;  %v3974_v51 = vmul.f32 1.442695, %v3943_v60 }
 0x884   : > { %v4116_v29 = vmul.f32 %v5927_v20, %v4115_v45  ;;  %v4250_v8 = vpack.c.bf16 %v4097_v35, %v4082_v41  ;;  %v4106_v14 = vsel %vm4105_vm13, %v8030_v49, %v4102_v13 }
 0x885   : > { %v8052_v58 = vsel %vm8567_vm3, %v2894_v33, -1e+30  ;;  %5928 = vpow2.f32 %v3974_v51 }
 0x886   : > { %2941 = vmax.xlane.f32.xlu1 %v8052_v58  ;;  %v4117_v38 = vadd.f32 %v5927_v20, %v4116_v29  ;;  %5930 = vpow2.f32 %v3972_v28  ;;  %4339 = vmatmul.bf16.gmra.mxu3 %v4250_v8 }
 0x888   : > { %v2934_v34 = vpop.xlane.xlu0 %2933  ;;  %v4121_v27 = vsel %vm8061_vm6, %v5927_v20, %v4117_v38 }
 0x889   : > { %v2954_v1 = vsub.f32 %v7921_v57, %v2934_v34  ;;  %v4110_v57 = vor.u32 1.1754944e-38, %v4109_v46  ;;  %v4126_v40 = vsel %vm4123_vm14, %v4125_v25, %v4121_v27 }
 0x88a   : > { %v4127_v17 = vmul.f32 %v7887_v16, %v4126_v40 }
 0x88b   : > { %v8070_v24 = vpop.eup %5928  ;;  %v2981_v30 = vmul.f32 1.442695, %v2954_v1  ;;  %v4111_v48 = vsel %vm4108_vm15, %v4110_v57, %v4106_v14  ;;  %v8078_v56 = vpop.xlane.xlu1 %3992 }
 0x88c   : > { %v8072_v62 = vpop.eup %5930  ;;  %4006 = vadd.xlane.f32.xlu2 %v8070_v24  ;;  %v4112_v5 = vmul.f32 %v7861_v54, %v4111_v48  ;;  %vm4133_vm7 = vweird.f32 %v8078_v56 }
 0x88d   : > { %5932 = vpow2.f32 %v2981_v30 }
 0x88e   : > { %4004 = vadd.xlane.f32.xlu1 %v8072_v62  ;;  %v4251_v49 = vpack.c.bf16 %v4127_v17, %v4112_v5  ;;  %v4139_v17 = vand.u32 2147483648, %v8078_v56 }
 0x890   : > { %v3000_v20 = vpop.xlane.xlu0 %2999 }
 0x891   : > { %5934 = vrcp.f32 %v3000_v20  ;;  %v3094_v29 = vand.u32 2147483648, %v3000_v20  ;;  %vm3088_vm9 = vweird.f32 %v3000_v20  ;;  %v3092_v51 = vand.u32 2147483647, %v3000_v20 }
 0x892   : > { %5936 = vrcp.f32 %v8078_v56 }
 0x893   : > { %v8081_v59 = vpop.eup %5932  ;;  %v8089_v28 = vpop.xlane.xlu1 %3998  ;;  %v3095_v46 = vor.u32 1.1754944e-38, %v3094_v29  ;;  %vm3093_vm1 = vcmp.eq.f32.partialorder %v3092_v51, 8.507059e+37 }
 0x896   : > { %3013 = vadd.xlane.f32.xlu1 %v8081_v59  ;;  %4344 = vmatmul.bf16.gmra.mxu3 %v4251_v49 }
 0x897   : > { %v5935_v61 = vpop.eup %5934 }
 0x898   : > { %v3084_v0 = vmul.f32 %v5935_v61, %v3000_v20  ;;  %v3002_v3 = vpop.xlane.xlu0 %3001  ;;  %v8085_v50 = vpop.eup %5936  ;;  %vm3089_vm8 = vweird.f32 %v5935_v61 }
 0x899   : > { %5938 = vrcp.f32 %v3002_v3  ;;  %v4129_v60 = vmul.f32 %v8085_v50, %v8078_v56  ;;  %vm8091_vm10 = vmor %vm3088_vm9, %vm3089_vm8  ;;  %v3109_v38 = vand.u32 2147483648, %v3002_v3  ;;  %v3107_v13 = vand.u32 2147483647, %v3002_v3 }
 0x89a   : > { %v3085_v16 = vsub.f32 1.0, %v3084_v0  ;;  %vm3103_vm2 = vweird.f32 %v3002_v3  ;;  %vm4134_vm5 = vweird.f32 %v8085_v50  ;;  %v4137_v0 = vand.u32 2147483647, %v8078_v56 }
 0x89b   : > { %v4130_v35 = vsub.f32 1.0, %v4129_v60  ;;  %v3110_v7 = vor.u32 1.1754944e-38, %v3109_v38  ;;  %vm3108_vm4 = vcmp.eq.f32.partialorder %v3107_v13, 8.507059e+37  ;;  %vm8109_vm6 = vmor %vm4133_vm7, %vm4134_vm5  ;;  %v4140_v56 = vor.u32 1.1754944e-38, %v4139_v17 }
 0x89c   : > { %v3086_v45 = vmul.f32 %v5935_v61, %v3085_v16  ;;  %vm4138_vm14 = vcmp.eq.f32.partialorder %v4137_v0, 8.507059e+37 }
 0x89d   : > { %v4131_v34 = vmul.f32 %v8085_v50, %v4130_v35 }
 0x89e   : > { %v3087_v39 = vadd.f32 %v5935_v61, %v3086_v45 }
 0x89f   : > { %v5939_v54 = vpop.eup %5938  ;;  %v4132_v40 = vadd.f32 %v8085_v50, %v4131_v34 }
 0x8a0   : > { %v3099_v33 = vmul.f32 %v5939_v54, %v3002_v3  ;;  %v3995_v41 = vpop.xlane.xlu0 %3994  ;;  %vm3104_vm11 = vweird.f32 %v5939_v54  ;;  %v3091_v2 = vsel %vm8091_vm10, %v5935_v61, %v3087_v39  ;;  %v2938_v39 = vpop.xlane.xlu1 %2937  ;;  %vm4178_vm10 = vweird.f32 %v8089_v28 }
 0x8a1   : > { %5940 = vrcp.f32 %v3995_v41  ;;  %vm3105_vm3 = vmor %vm3103_vm2, %vm3104_vm11  ;;  %v3096_v27 = vsel %vm3093_vm1, %v3095_v46, %v3091_v2  ;;  %vm4148_vm13 = vweird.f32 %v3995_v41 }
 0x8a2   : > { %v3100_v4 = vsub.f32 1.0, %v3099_v33  ;;  %5942 = vrcp.f32 %v8089_v28  ;;  %v3097_v49 = vmul.f32 %v7930_v22, %v3096_v27  ;;  %v4152_v22 = vand.u32 2147483647, %v3995_v41 }
 0x8a4   : > { %v3101_v12 = vmul.f32 %v5939_v54, %v3100_v4  ;;  %vm4153_vm8 = vcmp.eq.f32.partialorder %v4152_v22, 8.507059e+37 }
 0x8a6   : > { %v3102_v36 = vadd.f32 %v5939_v54, %v3101_v12 }
 0x8a7   : > { %v5941_v1 = vpop.eup %5940 }
 0x8a8   : > { %v4144_v25 = vmul.f32 %v5941_v1, %v3995_v41  ;;  %v2936_v30 = vpop.xlane.xlu0 %2935  ;;  %v3106_v14 = vsel %vm3105_vm3, %v5939_v54, %v3102_v36  ;;  %v8099_v57 = vpop.eup %5942  ;;  %vm4149_vm12 = vweird.f32 %v5941_v1 }
 0x8a9   : > { %v2955_v48 = vsub.f32 %v7968_v26, %v2936_v30  ;;  %v3111_v20 = vsel %vm3108_vm4, %v3110_v7, %v3106_v14  ;;  %v4154_v26 = vand.u32 2147483648, %v3995_v41  ;;  %v4174_v54 = vmul.f32 %v8099_v57, %v8089_v28  ;;  %vm4150_vm15 = vmor %vm4148_vm13, %vm4149_vm12  ;;  %v8124_v46 = vpop.xlane.xlu1 %4000 }
 0x8aa   : > { %v4145_v5 = vsub.f32 1.0, %v4144_v25  ;;  %v3112_v61 = vmul.f32 %v7941_v53, %v3111_v20  ;;  %v4136_v53 = vsel %vm8109_vm6, %v8085_v50, %v4132_v40  ;;  %vm4179_vm9 = vweird.f32 %v8099_v57 }
 0x8ab   : > { %v2983_v3 = vmul.f32 1.442695, %v2955_v48  ;;  %v4155_v35 = vor.u32 1.1754944e-38, %v4154_v26  ;;  %v4141_v51 = vsel %vm4138_vm14, %v4140_v56, %v4136_v53  ;;  %v4175_v8 = vsub.f32 1.0, %v4174_v54  ;;  %vm8136_vm11 = vmor %vm4178_vm10, %vm4179_vm9 }
 0x8ac   : > { %v4146_v45 = vmul.f32 %v5941_v1, %v4145_v5  ;;  %v3265_v60 = vpack.c.bf16 %v3112_v61, %v3097_v49  ;;  %v4142_v13 = vmul.f32 %v7924_v32, %v4141_v51  ;;  %v4184_v32 = vand.u32 2147483648, %v8089_v28 }
 0x8ad   : > { %5944 = vpow2.f32 %v2983_v3  ;;  %v4176_v41 = vmul.f32 %v8099_v57, %v4175_v8  ;;  %v4182_v30 = vand.u32 2147483647, %v8089_v28  ;;  %vm4193_vm9 = vweird.f32 %v8124_v46 }
 0x8ae   : > { %v4147_v33 = vadd.f32 %v5941_v1, %v4146_v45  ;;  %3354 = vmatmul.bf16.gmra.mxu2 %v3265_v60  ;;  %v4185_v17 = vor.u32 1.1754944e-38, %v4184_v32 }
 0x8af   : > { %v4177_v27 = vadd.f32 %v8099_v57, %v4176_v41  ;;  %vm4183_vm3 = vcmp.eq.f32.partialorder %v4182_v30, 8.507059e+37 }
 0x8b0   : > { %v3997_v29 = vpop.xlane.xlu0 %3996  ;;  %v4151_v4 = vsel %vm4150_vm15, %v5941_v1, %v4147_v33 }
 0x8b1   : > { %5946 = vrcp.f32 %v3997_v29  ;;  %v4156_v38 = vsel %vm4153_vm8, %v4155_v35, %v4151_v4  ;;  %v4169_v48 = vand.u32 2147483648, %v3997_v29  ;;  %v4167_v5 = vand.u32 2147483647, %v3997_v29 }
 0x8b2   : > { %v4157_v50 = vmul.f32 %v7953_v10, %v4156_v38  ;;  %v4181_v49 = vsel %vm8136_vm11, %v8099_v57, %v4177_v27  ;;  %vm4163_vm2 = vweird.f32 %v3997_v29 }
 0x8b3   : > { %v8118_v12 = vpop.eup %5944  ;;  %v4170_v3 = vor.u32 1.1754944e-38, %v4169_v48  ;;  %v4186_v60 = vsel %vm4183_vm3, %v4185_v17, %v4181_v49  ;;  %vm4168_vm5 = vcmp.eq.f32.partialorder %v4167_v5, 8.507059e+37  ;;  %v4199_v49 = vand.u32 2147483648, %v8124_v46 }
 0x8b4   : > { %3015 = vadd.xlane.f32.xlu2 %v8118_v12  ;;  %v4252_v2 = vpack.c.bf16 %v4157_v50, %v4142_v13  ;;  %v4187_v53 = vmul.f32 %v7935_v15, %v4186_v60 }
 0x8b6   : > { %4349 = vmatmul.bf16.gmra.mxu3 %v4252_v2 }
 0x8b7   : > { %v5947_v34 = vpop.eup %5946 }
 0x8b8   : > { %v4159_v36 = vmul.f32 %v5947_v34, %v3997_v29  ;;  %v8126_v1 = vpop.xlane.xlu0 %3005  ;;  %vm4164_vm1 = vweird.f32 %v5947_v34 }
 0x8b9   : > { %v2932_v7 = vpop.xlane.xlu2 %2931  ;;  %5948 = vrcp.f32 %v8126_v1  ;;  %vm4165_vm4 = vmor %vm4163_vm2, %vm4164_vm1  ;;  %vm3133_vm6 = vweird.f32 %v8126_v1  ;;  %v3139_v41 = vand.u32 2147483648, %v8126_v1 }
 0x8ba   : > { %5950 = vrcp.f32 %v8124_v46  ;;  %v4160_v10 = vsub.f32 1.0, %v4159_v36  ;;  %v2953_v25 = vsub.f32 %v7987_v6, %v2932_v7  ;;  %v2956_v6 = vsub.f32 %v7950_v63, %v2938_v39 }
 0x8bb   : > { %v3140_v14 = vor.u32 1.1754944e-38, %v3139_v41 }
 0x8bc   : > { %v4161_v40 = vmul.f32 %v5947_v34, %v4160_v10  ;;  %v2979_v20 = vmul.f32 1.442695, %v2953_v25  ;;  %v2985_v57 = vmul.f32 1.442695, %v2956_v6 }
 0x8be   : > { %v4162_v61 = vadd.f32 %v5947_v34, %v4161_v40  ;;  %5952 = vpow2.f32 %v2979_v20 }
 0x8bf   : > { %v8144_v28 = vpop.eup %5948 }
 0x8c0   : > { %v8146_v0 = vpop.eup %5950  ;;  %v3129_v16 = vmul.f32 %v8144_v28, %v8126_v1  ;;  %v4166_v26 = vsel %vm4165_vm4, %v5947_v34, %v4162_v61  ;;  %vm3134_vm7 = vweird.f32 %v8144_v28  ;;  %v3137_v34 = vand.u32 2147483647, %v8126_v1 }
 0x8c1   : > { %v3004_v45 = vpop.xlane.xlu2 %3003  ;;  %v4171_v54 = vsel %vm4168_vm5, %v4170_v3, %v4166_v26  ;;  %v4189_v39 = vmul.f32 %v8146_v0, %v8124_v46  ;;  %vm8170_vm13 = vmor %vm3133_vm6, %vm3134_vm7  ;;  %vm4194_vm15 = vweird.f32 %v8146_v0  ;;  %v4197_v3 = vand.u32 2147483647, %v8124_v46 }
 0x8c2   : > { %5954 = vrcp.f32 %v3004_v45  ;;  %v3130_v63 = vsub.f32 1.0, %v3129_v16  ;;  %v4172_v22 = vmul.f32 %v7973_v47, %v4171_v54  ;;  %vm3118_vm14 = vweird.f32 %v3004_v45  ;;  %vm8191_vm11 = vmor %vm4193_vm9, %vm4194_vm15 }
 0x8c3   : > { %5956 = vpow2.f32 %v2985_v57  ;;  %v4190_v51 = vsub.f32 1.0, %v4189_v39  ;;  %v3124_v32 = vand.u32 2147483648, %v3004_v45  ;;  %v3122_v10 = vand.u32 2147483647, %v3004_v45 }
 0x8c4   : > { %v8154_v56 = vpop.eup %5952  ;;  %v4253_v33 = vpack.c.bf16 %v4187_v53, %v4172_v22  ;;  %v3131_v35 = vmul.f32 %v8144_v28, %v3130_v63  ;;  %vm3138_vm10 = vcmp.eq.f32.partialorder %v3137_v34, 8.507059e+37  ;;  %v4200_v22 = vor.u32 1.1754944e-38, %v4199_v49  ;;  %v8583_v49 = vld [vmem:[#allocation19_spill] sm:$0xff] }
 0x8c5   : > { %3011 = vadd.xlane.f32.xlu0 %v8154_v56  ;;  %v4191_v50 = vmul.f32 %v8146_v0, %v4190_v51  ;;  %v3125_v6 = vor.u32 1.1754944e-38, %v3124_v32  ;;  %vm3123_vm1 = vcmp.eq.f32.partialorder %v3122_v10, 8.507059e+37  ;;  %vm4198_vm3 = vcmp.eq.f32.partialorder %v4197_v3, 8.507059e+37  ;;  %v8585_v3 = vld [vmem:[#allocation25_spill] sm:$0xff] }
 0x8c6   : > { %4354 = vmatmul.bf16.gmra.mxu3 %v4253_v33  ;;  %v3132_v47 = vadd.f32 %v8144_v28, %v3131_v35 }
 0x8c7   : > { %v4192_v1 = vadd.f32 %v8146_v0, %v4191_v50 }
 0x8c8   : > { %v5955_v29 = vpop.eup %5954  ;;  %v3136_v25 = vsel %vm8170_vm13, %v8144_v28, %v3132_v47 }
 0x8c9   : > { %v3114_v4 = vmul.f32 %v5955_v29, %v3004_v45  ;;  %v8158_v8 = vpop.xlane.xlu2 %4002  ;;  %v2940_v38 = vpop.xlane.xlu0 %2939  ;;  %vm3119_vm12 = vweird.f32 %v5955_v29  ;;  %v3141_v61 = vsel %vm3138_vm10, %v3140_v14, %v3136_v25  ;;  %v4196_v57 = vsel %vm8191_vm11, %v8146_v0, %v4192_v1 }
 0x8ca   : > { %5958 = vrcp.f32 %v8158_v8  ;;  %v2957_v13 = vsub.f32 %v8010_v44, %v2940_v38  ;;  %v8167_v2 = vpop.eup %5956  ;;  %vm8180_vm8 = vmor %vm3118_vm14, %vm3119_vm12  ;;  %v4212_v45 = vand.u32 2147483647, %v8158_v8  ;;  %v4214_v26 = vand.u32 2147483648, %v8158_v8 }
 0x8cb   : > { %v3115_v15 = vsub.f32 1.0, %v3114_v4  ;;  %v3142_v46 = vmul.f32 %v7982_v19, %v3141_v61  ;;  %vm4208_vm4 = vweird.f32 %v8158_v8  ;;  %v4201_v0 = vsel %vm4198_vm3, %v4200_v22, %v4196_v57 }
 0x8cc   : > { %v2987_v7 = vmul.f32 1.442695, %v2957_v13  ;;  %vm4213_vm7 = vcmp.eq.f32.partialorder %v4212_v45, 8.507059e+37  ;;  %v8589_v45 = vld [vmem:[#allocation26_spill] sm:$0xff] }
 0x8cd   : > { %v3116_v36 = vmul.f32 %v5955_v29, %v3115_v15  ;;  %3017 = vadd.xlane.f32.xlu0 %v8167_v2  ;;  %v4202_v15 = vmul.f32 %v7960_v43, %v4201_v0  ;;  %v5640_v43 = vpack.i.bf16 %v7358_v37, %v7350_v52  ;;  %v4330_v37 = vpop.f32.mrf.mxu3 }
 0x8ce   : > { %5960 = vpow2.f32 %v2987_v7 }
 0x8cf   : > { %v3117_v44 = vadd.f32 %v5955_v29, %v3116_v36 }
 0x8d0   : > { %v5959_v30 = vpop.eup %5958 }
 0x8d1   : > { %v4204_v48 = vmul.f32 %v5959_v30, %v8158_v8  ;;  %v3008_v20 = vpop.xlane.xlu2 %3007  ;;  %v8186_v17 = vpop.xlane.xlu0 %3009  ;;  %v3121_v5 = vsel %vm8180_vm8, %v5955_v29, %v3117_v44  ;;  %vm4209_vm2 = vweird.f32 %v5959_v30  ;;  %v4215_v29 = vor.u32 1.1754944e-38, %v4214_v26 }
 0x8d2   : > { %5962 = vrcp.f32 %v3008_v20  ;;  %v3126_v60 = vsel %vm3123_vm1, %v3125_v6, %v3121_v5  ;;  %vm4210_vm5 = vmor %vm4208_vm4, %vm4209_vm2  ;;  %v3152_v50 = vand.u32 2147483647, %v3008_v20  ;;  %v3154_v8 = vand.u32 2147483648, %v3008_v20  ;;  %v8582_v5 = vld [vmem:[#allocation23_spill] sm:$0xff]  ;;  %v8584_v6 = vld [vmem:[#allocation20_spill] sm:$0xff] }
 0x8d3   : > { %v4205_v16 = vsub.f32 1.0, %v4204_v48  ;;  %5964 = vrcp.f32 %v8186_v17  ;;  %v3127_v39 = vmul.f32 %v7994_v31, %v3126_v60  ;;  %v3169_v36 = vand.u32 2147483648, %v8186_v17 }
 0x8d4   : > { %v8202_v63 = vpop.eup %5960  ;;  %v3167_v32 = vand.u32 2147483647, %v8186_v17  ;;  %vm3148_vm13 = vweird.f32 %v3008_v20  ;;  %vm3163_vm15 = vweird.f32 %v8186_v17  ;;  %vm3153_vm8 = vcmp.eq.f32.partialorder %v3152_v50, 8.507059e+37 }
 0x8d5   : > { %v4206_v54 = vmul.f32 %v5959_v30, %v4205_v16  ;;  %3019 = vadd.xlane.f32.xlu1 %v8202_v63  ;;  %v3266_v33 = vpack.c.bf16 %v3142_v46, %v3127_v39  ;;  %v3170_v25 = vor.u32 1.1754944e-38, %v3169_v36  ;;  %v5645_v61 = vpack.i.bf16 %v8584_v6, %v8583_v49  ;;  %v4332_v28 = vpop.f32.mrf.mxu3 }
 0x8d6   : > { %vm3168_vm10 = vcmp.eq.f32.partialorder %v3167_v32, 8.507059e+37  ;;  %v5680_v39 = vpack.i.bf16 %v4332_v28, %v4330_v37 }
 0x8d7   : > { %v4207_v53 = vadd.f32 %v5959_v30, %v4206_v54  ;;  %3359 = vmatmul.bf16.gmra.mxu2 %v3266_v33 }
 0x8d8   : > { %v5963_v35 = vpop.eup %5962 }
 0x8d9   : > { %v5965_v51 = vpop.eup %5964  ;;  %v3144_v4 = vmul.f32 %v5963_v35, %v3008_v20  ;;  %v4211_v38 = vsel %vm4210_vm5, %v5959_v30, %v4207_v53  ;;  %vm3149_vm6 = vweird.f32 %v5963_v35 }
 0x8da   : > { %v3159_v31 = vmul.f32 %v5965_v51, %v8186_v17  ;;  %v4216_v19 = vsel %vm4213_vm7, %v4215_v29, %v4211_v38  ;;  %vm3164_vm12 = vweird.f32 %v5965_v51  ;;  %vm3150_vm14 = vmor %vm3148_vm13, %vm3149_vm6  ;;  %v5655_v17 = vpack.i.bf16 %v8582_v5, %v7391_v23 }
 0x8db   : > { %v3145_v47 = vsub.f32 1.0, %v3144_v4  ;;  %v4217_v13 = vmul.f32 %v8001_v9, %v4216_v19  ;;  %v3155_v9 = vor.u32 1.1754944e-38, %v3154_v8  ;;  %vm3165_vm9 = vmor %vm3163_vm15, %vm3164_vm12 }
 0x8dc   : > { %v3160_v41 = vsub.f32 1.0, %v3159_v31 }
 0x8dd   : > { %v3146_v34 = vmul.f32 %v5963_v35, %v3145_v47  ;;  %v4254_v7 = vpack.c.bf16 %v4217_v13, %v4202_v15 }
 0x8de   : > { %v3161_v27 = vmul.f32 %v5965_v51, %v3160_v41 }
 0x8df   : > { %v3147_v44 = vadd.f32 %v5963_v35, %v3146_v34  ;;  %4359 = vmatmul.bf16.gmra.mxu3 %v4254_v7 }
 0x8e0   : > { %v3162_v10 = vadd.f32 %v5965_v51, %v3161_v27 }
 0x8e1   : > { %v3151_v30 = vsel %vm3150_vm14, %v5963_v35, %v3147_v44  ;;  %5641 = vrot.lane.b32.xlu0 %v5640_v43, %s6026_s9 }
 0x8e2   : > { %v3156_v1 = vsel %vm3153_vm8, %v3155_v9, %v3151_v30  ;;  %v3166_v14 = vsel %vm3165_vm9, %v5965_v51, %v3162_v10  ;;  %v8592_v30 = vld [vmem:[#allocation22_spill] sm:$0xff] }
 0x8e3   : > { %v3157_v40 = vmul.f32 %v8020_v42, %v3156_v1  ;;  %v3171_v48 = vsel %vm3168_vm10, %v3170_v25, %v3166_v14  ;;  %v8586_v42 = vld [vmem:[#allocation24_spill] sm:$0xff]  ;;  %v4335_v23 = vpop.f32.mrf.mxu3  ;;  %v8591_v25 = vld [vmem:[#allocation21_spill] sm:$0xff] }
 0x8e4   : > { %v3172_v52 = vmul.f32 %v8016_v21, %v3171_v48  ;;  %v8587_v16 = vpack.i.bf16 %v8585_v3, %v8586_v42  ;;  %v8588_v21 = vld [vmem:[#allocation27_spill] sm:$0xff]  ;;  %v5650_v1 = vpack.i.bf16 %v8592_v30, %v8591_v25  ;;  %v8594_v48 = vld [vmem:[#allocation29_spill] sm:$0xff] }
 0x8e5   : > { %v8590_v26 = vpack.i.bf16 %v8588_v21, %v8589_v45 }
 0x8e6   : > { %v3267_v20 = vpack.c.bf16 %v3172_v52, %v3157_v40  ;;  %v8593_v40 = vld [vmem:[#allocation28_spill] sm:$0xff] }
 0x8e7   : > { %v5670_v52 = vpack.i.bf16 %v8594_v48, %v8593_v40 }
 0x8e8   : > { %3364 = vmatmul.bf16.gmra.mxu2 %v3267_v20 }
 0x8e9   : > { %5656 = vrot.lane.b32.xlu0 %v5655_v17, %s6026_s9 }
 0x8eb   : > { %v4337_v53 = vpop.f32.mrf.mxu3 }
 0x8ee   : > { %5646 = vrot.lane.b32.xlu1 %v5645_v61, %s6026_s9 }
 0x8f1   : > { %5661 = vrot.lane.b32.xlu0 %v8587_v16, %s6026_s9 }
 0x8f6   : > { %5666 = vrot.lane.b32.xlu1 %v8590_v26, %s6026_s9 }
 0x8f9   : > { %v2942_v60 = vpop.xlane.xlu1 %2941  ;;  %5676 = vrot.lane.b32.xlu0 %v5675_v55, %s6026_s9 }
 0x8fa   : > { %v2958_v57 = vsub.f32 %v8052_v58, %v2942_v60 }
 0x8fc   : > { %v2989_v54 = vmul.f32 1.442695, %v2958_v57 }
 0x8fe   : > { %5966 = vpow2.f32 %v2989_v54  ;;  %5681 = vrot.lane.b32.xlu1 %v5680_v39, %s6026_s9 }
 0x8ff   : > { %v4007_v46 = vpop.xlane.xlu2 %4006 }
 0x900   : > { %5968 = vrcp.f32 %v4007_v46  ;;  %v4244_v55 = vand.u32 2147483648, %v4007_v46  ;;  %v4242_v38 = vand.u32 2147483647, %v4007_v46  ;;  %vm4238_vm2 = vweird.f32 %v4007_v46 }
 0x901   : > { %v4005_v22 = vpop.xlane.xlu1 %4004 }
 0x902   : > { %5970 = vrcp.f32 %v4005_v22  ;;  %v4229_v31 = vand.u32 2147483648, %v4005_v22  ;;  %v4227_v47 = vand.u32 2147483647, %v4005_v22  ;;  %v4245_v13 = vor.u32 1.1754944e-38, %v4244_v55 }
 0x903   : > { %vm4223_vm4 = vweird.f32 %v4005_v22  ;;  %vm4243_vm5 = vcmp.eq.f32.partialorder %v4242_v38, 8.507059e+37 }
 0x904   : > { %v8239_v33 = vpop.eup %5966  ;;  %v4230_v8 = vor.u32 1.1754944e-38, %v4229_v31  ;;  %vm4228_vm6 = vcmp.eq.f32.partialorder %v4227_v47, 8.507059e+37 }
 0x905   : > { %3021 = vadd.xlane.f32.xlu2 %v8239_v33 }
 0x906   : > { %v5969_v58 = vpop.eup %5968 }
 0x907   : > { %v4234_v29 = vmul.f32 %v5969_v58, %v4007_v46  ;;  %vm4239_vm11 = vweird.f32 %v5969_v58 }
 0x908   : > { %v5971_v35 = vpop.eup %5970  ;;  %vm4240_vm3 = vmor %vm4238_vm2, %vm4239_vm11 }
 0x909   : > { %v4219_v0 = vmul.f32 %v5971_v35, %v4005_v22  ;;  %v4235_v11 = vsub.f32 1.0, %v4234_v29  ;;  %v4340_v18 = vpop.f32.mrf.mxu3  ;;  %vm4224_vm1 = vweird.f32 %v5971_v35 }
 0x90a   : > { %vm4225_vm7 = vmor %vm4223_vm4, %vm4224_vm1 }
 0x90b   : > { %v4220_v51 = vsub.f32 1.0, %v4219_v0  ;;  %v4236_v4 = vmul.f32 %v5969_v58, %v4235_v11 }
 0x90d   : > { %v4221_v19 = vmul.f32 %v5971_v35, %v4220_v51  ;;  %v4237_v15 = vadd.f32 %v5969_v58, %v4236_v4 }
 0x90f   : > { %v4222_v50 = vadd.f32 %v5971_v35, %v4221_v19  ;;  %v4241_v41 = vsel %vm4240_vm3, %v5969_v58, %v4237_v15 }
 0x910   : > { %v4246_v36 = vsel %vm4243_vm5, %v4245_v13, %v4241_v41 }
 0x911   : > { %v4226_v34 = vsel %vm4225_vm7, %v5971_v35, %v4222_v50  ;;  %v4342_v7 = vpop.f32.mrf.mxu3  ;;  %v4247_v43 = vmul.f32 %v8070_v24, %v4246_v36  ;;  %v3014_v24 = vpop.xlane.xlu1 %3013 }
 0x912   : > { %v4231_v27 = vsel %vm4228_vm6, %v4230_v8, %v4226_v34  ;;  %v5690_v32 = vpack.i.bf16 %v4342_v7, %v4340_v18  ;;  %5972 = vrcp.f32 %v3014_v24  ;;  %v3199_v26 = vand.u32 2147483648, %v3014_v24  ;;  %v3345_v8 = vpop.f32.mrf.mxu2 }
 0x913   : > { %v4232_v44 = vmul.f32 %v8072_v62, %v4231_v27  ;;  %v5685_v62 = vpack.i.bf16 %v4337_v53, %v4335_v23  ;;  %vm3193_vm13 = vweird.f32 %v3014_v24  ;;  %v3197_v57 = vand.u32 2147483647, %v3014_v24 }
 0x914   : > { %5691 = vrot.lane.b32.xlu0 %v5690_v32, %s6026_s9  ;;  %v3200_v29 = vor.u32 1.1754944e-38, %v3199_v26 }
 0x915   : > { %v4255_v9 = vpack.c.bf16 %v4247_v43, %v4232_v44  ;;  %vm3198_vm9 = vcmp.eq.f32.partialorder %v3197_v57, 8.507059e+37 }
 0x917   : > { %4364 = vmatmul.bf16.gmra.mxu3 %v4255_v9 }
 0x918   : > { %v5973_v20 = vpop.eup %5972 }
 0x919   : > { %v4345_v10 = vpop.f32.mrf.mxu3  ;;  %v3189_v5 = vmul.f32 %v5973_v20, %v3014_v24  ;;  %vm3194_vm12 = vweird.f32 %v5973_v20 }
 0x91a   : > { %vm8258_vm14 = vmor %vm3193_vm13, %vm3194_vm12 }
 0x91b   : > { %v3190_v49 = vsub.f32 1.0, %v3189_v5 }
 0x91d   : > { %5651 = vrot.lane.b32.xlu2 %v5650_v1, %s6026_s9  ;;  %v3191_v28 = vmul.f32 %v5973_v20, %v3190_v49 }
 0x91f   : > { %v3192_v21 = vadd.f32 %v5973_v20, %v3191_v28 }
 0x921   : > { %v4347_v14 = vpop.f32.mrf.mxu3  ;;  %v3196_v35 = vsel %vm8258_vm14, %v5973_v20, %v3192_v21 }
 0x922   : > { %v5695_v37 = vpack.i.bf16 %v4347_v14, %v4345_v10  ;;  %v3201_v4 = vsel %vm3198_vm9, %v3200_v29, %v3196_v35  ;;  %v3347_v14 = vpop.f32.mrf.mxu2 }
 0x923   : > { %v3202_v13 = vmul.f32 %v8081_v59, %v3201_v4 }
 0x924   : > { %5696 = vrot.lane.b32.xlu1 %v5695_v37, %s6026_s9 }
 0x925   : > { %5671 = vrot.lane.b32.xlu2 %v5670_v52, %s6026_s9 }
 0x927   : > { %v8253_v6 = vpop.xlane.xlu2 %3015 }
 0x928   : > { %v3214_v44 = vand.u32 2147483648, %v8253_v6  ;;  %vm3208_vm5 = vweird.f32 %v8253_v6  ;;  %v3212_v59 = vand.u32 2147483647, %v8253_v6 }
 0x92a   : > { %v3215_v30 = vor.u32 1.1754944e-38, %v3214_v44  ;;  %vm3213_vm12 = vcmp.eq.f32.partialorder %v3212_v59, 8.507059e+37 }
 0x92d   : > { %5686 = vrot.lane.b32.xlu2 %v5685_v62, %s6026_s9  ;;  %v8279_v62 = vpop.f32.mrf.mxu2 }
 0x938   : > { %v3012_v17 = vpop.xlane.xlu0 %3011 }
 0x939   : > { %5974 = vrcp.f32 %v3012_v17  ;;  %v4350_v61 = vpop.f32.mrf.mxu3  ;;  %v3184_v22 = vand.u32 2147483648, %v3012_v17  ;;  %v3182_v58 = vand.u32 2147483647, %v3012_v17  ;;  %vm3178_vm8 = vweird.f32 %v3012_v17 }
 0x93a   : > { %5976 = vrcp.f32 %v8253_v6 }
 0x93b   : > { %v3185_v18 = vor.u32 1.1754944e-38, %v3184_v22  ;;  %vm3183_vm11 = vcmp.eq.f32.partialorder %v3182_v58, 8.507059e+37 }
 0x93f   : > { %v5975_v3 = vpop.eup %5974 }
 0x940   : > { %v3174_v42 = vmul.f32 %v5975_v3, %v3012_v17  ;;  %v3018_v16 = vpop.xlane.xlu0 %3017  ;;  %v8256_v45 = vpop.eup %5976  ;;  %vm3179_vm15 = vweird.f32 %v5975_v3 }
 0x941   : > { %5978 = vrcp.f32 %v3018_v16  ;;  %v4352_v60 = vpop.f32.mrf.mxu3  ;;  %v3204_v53 = vmul.f32 %v8256_v45, %v8253_v6  ;;  %vm3180_vm10 = vmor %vm3178_vm8, %vm3179_vm15  ;;  %v3229_v7 = vand.u32 2147483648, %v3018_v16  ;;  %vm3209_vm2 = vweird.f32 %v8256_v45  ;;  %v8285_v6 = vpop.f32.mrf.mxu2 }
 0x942   : > { %v3175_v23 = vsub.f32 1.0, %v3174_v42  ;;  %v5700_v54 = vpack.i.bf16 %v4352_v60, %v4350_v61  ;;  %vm3223_vm3 = vweird.f32 %v3018_v16  ;;  %v3227_v32 = vand.u32 2147483647, %v3018_v16  ;;  %vm3210_vm7 = vmor %vm3208_vm5, %vm3209_vm2  ;;  %v8597_v60 = vld [vmem:[#allocation4_spill] sm:$0xff] }
 0x943   : > { %v3205_v38 = vsub.f32 1.0, %v3204_v53  ;;  %v3230_v10 = vor.u32 1.1754944e-38, %v3229_v7 }
 0x944   : > { %v3176_v46 = vmul.f32 %v5975_v3, %v3175_v23  ;;  %5701 = vrot.lane.b32.xlu2 %v5700_v54, %s6026_s9  ;;  %vm3228_vm6 = vcmp.eq.f32.partialorder %v3227_v32, 8.507059e+37  ;;  %v8598_v54 = vld [vmem:[#allocation3_spill] sm:$0xff] }
 0x945   : > { %v3206_v41 = vmul.f32 %v8256_v45, %v3205_v38 }
 0x946   : > { %v3177_v0 = vadd.f32 %v5975_v3, %v3176_v46 }
 0x947   : > { %v5979_v11 = vpop.eup %5978  ;;  %v3207_v27 = vadd.f32 %v8256_v45, %v3206_v41 }
 0x948   : > { %v3219_v55 = vmul.f32 %v5979_v11, %v3018_v16  ;;  %v3181_v51 = vsel %vm3180_vm10, %v5975_v3, %v3177_v0  ;;  %vm3224_vm1 = vweird.f32 %v5979_v11  ;;  %v3020_v40 = vpop.xlane.xlu1 %3019 }
 0x949   : > { %v4355_v19 = vpop.f32.mrf.mxu3  ;;  %v3186_v47 = vsel %vm3183_vm11, %v3185_v18, %v3181_v51  ;;  %vm3225_vm4 = vmor %vm3223_vm3, %vm3224_vm1  ;;  %v3211_v25 = vsel %vm3210_vm7, %v8256_v45, %v3207_v27  ;;  %5980 = vrcp.f32 %v3020_v40  ;;  %v3355_v21 = vpop.f32.mrf.mxu2  ;;  %v3244_v38 = vand.u32 2147483648, %v3020_v40 }
 0x94a   : > { %v3220_v31 = vsub.f32 1.0, %v3219_v55  ;;  %v3187_v15 = vmul.f32 %v8154_v56, %v3186_v47  ;;  %v3216_v48 = vsel %vm3213_vm12, %v3215_v30, %v3211_v25  ;;  %vm3238_vm14 = vweird.f32 %v3020_v40  ;;  %v8599_v30 = vld [vmem:[#allocation8_spill] sm:$0xff] }
 0x94b   : > { %v3217_v37 = vmul.f32 %v8118_v12, %v3216_v48  ;;  %v3242_v47 = vand.u32 2147483647, %v3020_v40  ;;  %v8600_v48 = vld [vmem:[#allocation7_spill] sm:$0xff] }
 0x94c   : > { %v3221_v50 = vmul.f32 %v5979_v11, %v3220_v31  ;;  %v3268_v34 = vpack.c.bf16 %v3202_v13, %v3187_v15 }
 0x94d   : > { %vm3243_vm9 = vcmp.eq.f32.partialorder %v3242_v47, 8.507059e+37 }
 0x94e   : > { %v3222_v36 = vadd.f32 %v5979_v11, %v3221_v50  ;;  %3369 = vmatmul.bf16.gmra.mxu2 %v3268_v34 }
 0x94f   : > { %v5981_v12 = vpop.eup %5980 }
 0x950   : > { %v3226_v9 = vsel %vm3225_vm4, %v5979_v11, %v3222_v36  ;;  %v3234_v23 = vmul.f32 %v5981_v12, %v3020_v40  ;;  %vm3239_vm13 = vweird.f32 %v5981_v12 }
 0x951   : > { %v4357_v56 = vpop.f32.mrf.mxu3  ;;  %v3231_v1 = vsel %vm3228_vm6, %v3230_v10, %v3226_v9  ;;  %v3357_v18 = vpop.f32.mrf.mxu2  ;;  %vm3240_vm15 = vmor %vm3238_vm14, %vm3239_vm13 }
 0x952   : > { %v5705_v43 = vpack.i.bf16 %v4357_v56, %v4355_v19  ;;  %v3232_v52 = vmul.f32 %v8167_v2, %v3231_v1  ;;  %v3235_v29 = vsub.f32 1.0, %v3234_v23 }
 0x953   : > { %v5642_v20 = vpop.permute.xlu0 %5641 }
 0x954   : > { %5706 = vrot.lane.b32.xlu0 %v5705_v43, %s6026_s9  ;;  %v3269_v24 = vpack.c.bf16 %v3232_v52, %v3217_v37  ;;  %v5644_v3 = vunpack.i.h.bf16 %v5642_v20  ;;  %v5643_v42 = vunpack.i.l.bf16 %v5642_v20  ;;  %v3236_v11 = vmul.f32 %v5981_v12, %v3235_v29 }
 0x956   : > { %v4499_v57 = vsel %vm546_vm0, %v8597_v60, %v5644_v3  ;;  %v4498_v39 = vsel %vm546_vm0, %v8598_v54, %v5643_v42  ;;  %v3237_v51 = vadd.f32 %v5981_v12, %v3236_v11  ;;  %v8604_v11 = vld [vmem:[#allocation9_spill] sm:$0xff] }
 0x958   : > { %v3241_v50 = vsel %vm3240_vm15, %v5981_v12, %v3237_v51 }
 0x95a   : > { %v3360_v41 = vpop.f32.mrf.mxu2 }
 0x95b   : > { %v8287_v28 = vpop.permute.xlu0 %5656 }
 0x95e   : > { %3374 = vmatmul.bf16.gmra.mxu2 %v3269_v24 }
 0x960   : > { %v8281_v5 = vpop.permute.xlu1 %5646 }
 0x961   : > { %v5648_v3 = vunpack.i.l.bf16 %v8281_v5 }
 0x962   : > { %v4360_v17 = vpop.f32.mrf.mxu3  ;;  %v3362_v12 = vpop.f32.mrf.mxu2 }
 0x963   : > { %v8302_v53 = vpop.permute.xlu0 %5661 }
 0x968   : > { %v8283_v49 = vpop.permute.xlu1 %5666 }
 0x96a   : > { %v4362_v61 = vpop.f32.mrf.mxu3 }
 0x96b   : > { %v5710_v2 = vpack.i.bf16 %v4362_v61, %v4360_v17  ;;  %v8306_v4 = vpop.permute.xlu0 %5676 }
 0x96d   : > { %5711 = vrot.lane.b32.xlu1 %v5710_v2, %s6026_s9 }
 0x970   : > { %v5682_v16 = vpop.permute.xlu1 %5681 }
 0x971   : > { %v5684_v45 = vunpack.i.h.bf16 %v5682_v16  ;;  %v5683_v26 = vunpack.i.l.bf16 %v5682_v16 }
 0x973   : > { %v4515_v46 = vsel %vm546_vm0, %v3347_v14, %v5684_v45  ;;  %v4514_v22 = vsel %vm546_vm0, %v3345_v8, %v5683_v26  ;;  %v3245_v8 = vor.u32 1.1754944e-38, %v3244_v38  ;;  %v8601_v26 = vld [vmem:[#allocation6_spill] sm:$0xff] }
 0x974   : > { %v4530_v58 = vpack.c.bf16 %v4514_v22, %v4498_v39  ;;  %v4531_v35 = vpack.c.bf16 %v4515_v46, %v4499_v57  ;;  %v5658_v46 = vunpack.i.l.bf16 %v8287_v28 }
 0x975   : > { %v3246_v44 = vsel %vm3243_vm9, %v3245_v8, %v3241_v50  ;;  %v8605_v50 = vld [vmem:[#allocation12_spill] sm:$0xff] }
 0x976   : > { %4546 = vst [vmem:[%s8298_s14] sm:$0xff] %v4530_v58  ;;  %v3247_v14 = vmul.f32 %v8202_v63, %v3246_v44  ;;  %v5649_v63 = vunpack.i.h.bf16 %v8281_v5  ;;  %v5659_v5 = vunpack.i.h.bf16 %v8287_v28  ;;  %v3365_v58 = vpop.f32.mrf.mxu2 }
 0x977   : > { %4547 = vst [vmem:[%s8298_s14 + $0x8] sm:$0xff] %v4531_v35 }
 0x978   : > { %v3022_v0 = vpop.xlane.xlu2 %3021 }
 0x979   : > { %5982 = vrcp.f32 %v3022_v0  ;;  %v3259_v13 = vand.u32 2147483648, %v3022_v0  ;;  %v3257_v36 = vand.u32 2147483647, %v3022_v0  ;;  %vm3253_vm10 = vweird.f32 %v3022_v0 }
 0x97b   : > { %v3260_v56 = vor.u32 1.1754944e-38, %v3259_v13  ;;  %vm3258_vm1 = vcmp.eq.f32.partialorder %v3257_v36, 8.507059e+37 }
 0x97f   : > { %v5983_v55 = vpop.eup %5982 }
 0x980   : > { %v3249_v31 = vmul.f32 %v5983_v55, %v3022_v0  ;;  %v5652_v19 = vpop.permute.xlu2 %5651  ;;  %vm3254_vm8 = vweird.f32 %v5983_v55  ;;  %v8603_v0 = vld [vmem:[#allocation10_spill] sm:$0xff] }
 0x981   : > { %v5654_v7 = vunpack.i.h.bf16 %v5652_v19  ;;  %v5653_v32 = vunpack.i.l.bf16 %v5652_v19  ;;  %vm3255_vm11 = vmor %vm3253_vm10, %vm3254_vm8  ;;  %v5663_v19 = vunpack.i.l.bf16 %v8302_v53 }
 0x982   : > { %v3250_v15 = vsub.f32 1.0, %v3249_v31  ;;  %v5664_v31 = vunpack.i.h.bf16 %v8302_v53 }
 0x983   : > { %v4503_v1 = vsel %vm546_vm0, %v8599_v30, %v5654_v7  ;;  %v4502_v52 = vsel %vm546_vm0, %v8600_v48, %v5653_v32  ;;  %v8607_v30 = vld [vmem:[#allocation13_spill] sm:$0xff]  ;;  %v5669_v48 = vunpack.i.h.bf16 %v8283_v49 }
 0x984   : > { %v3251_v34 = vmul.f32 %v5983_v55, %v3250_v15  ;;  %v4507_v8 = vsel %vm546_vm0, %v8605_v50, %v5664_v31 }
 0x986   : > { %v3252_v27 = vadd.f32 %v5983_v55, %v3251_v34  ;;  %v5692_v59 = vpop.permute.xlu0 %5691  ;;  %v3367_v34 = vpop.f32.mrf.mxu2 }
 0x987   : > { %v5694_v43 = vunpack.i.h.bf16 %v5692_v59  ;;  %v5693_v9 = vunpack.i.l.bf16 %v5692_v59 }
 0x988   : > { %v8308_v10 = vpop.permute.xlu2 %5671  ;;  %v3256_v25 = vsel %vm3255_vm11, %v5983_v55, %v3252_v27 }
 0x989   : > { %v3261_v40 = vsel %vm3258_vm1, %v3260_v56, %v3256_v25  ;;  %v4519_v37 = vsel %vm546_vm0, %v3357_v18, %v5694_v43  ;;  %v4518_v24 = vsel %vm546_vm0, %v3355_v21, %v5693_v9  ;;  %v4501_v21 = vsel %vm546_vm0, %v8601_v26, %v5649_v63 }
 0x98a   : > { %v3262_v20 = vmul.f32 %v8239_v33, %v3261_v40  ;;  %v4535_v17 = vpack.c.bf16 %v4519_v37, %v4503_v1  ;;  %v4534_v61 = vpack.c.bf16 %v4518_v24, %v4502_v52  ;;  %v8602_v33 = vld [vmem:[#allocation5_spill] sm:$0xff]  ;;  %v5668_v43 = vunpack.i.l.bf16 %v8283_v49  ;;  %v8608_v24 = vld [vmem:[#allocation14_spill] sm:$0xff] }
 0x98b   : > { %v4500_v23 = vsel %vm546_vm0, %v8602_v33, %v5648_v3  ;;  %v5674_v26 = vunpack.i.h.bf16 %v8308_v10 }
 0x98c   : > { %v3270_v2 = vpack.c.bf16 %v3262_v20, %v3247_v14  ;;  %4551 = vst [vmem:[%s8298_s14 + $0x28] sm:$0xff] %v4535_v17  ;;  %v4508_v1 = vsel %vm546_vm0, %v8607_v30, %v5668_v43  ;;  %v4509_v20 = vsel %vm546_vm0, %v8608_v24, %v5669_v48 }
 0x98d   : > { %4550 = vst [vmem:[%s8298_s14 + $0x20] sm:$0xff] %v4534_v61 }
 0x98e   : > { %3379 = vmatmul.bf16.gmra.mxu2 %v3270_v2 }
 0x990   : > { %v5687_v42 = vpop.permute.xlu2 %5686 }
 0x991   : > { %v5689_v16 = vunpack.i.h.bf16 %v5687_v42  ;;  %v5688_v45 = vunpack.i.l.bf16 %v5687_v42  ;;  %v8609_v42 = vld [vmem:[#allocation15_spill] sm:$0xff] }
 0x993   : > { %v4517_v60 = vsel %vm546_vm0, %v8285_v6, %v5689_v16  ;;  %v4516_v57 = vsel %vm546_vm0, %v8279_v62, %v5688_v45  ;;  %v4505_v6 = vsel %vm546_vm0, %v8603_v0, %v5659_v5  ;;  %v4504_v62 = vsel %vm546_vm0, %v8604_v11, %v5658_v46 }
 0x994   : > { %v4532_v54 = vpack.c.bf16 %v4516_v57, %v4500_v23  ;;  %v4533_v39 = vpack.c.bf16 %v4517_v60, %v4501_v21  ;;  %v8610_v23 = vld [vmem:[#allocation16_spill] sm:$0xff]  ;;  %v5678_v5 = vunpack.i.l.bf16 %v8306_v4  ;;  %v5679_v0 = vunpack.i.h.bf16 %v8306_v4 }
 0x995   : > { %v4511_v60 = vsel %vm546_vm0, %v8610_v23, %v5674_v26 }
 0x996   : > { %4548 = vst [vmem:[%s8298_s14 + $0x10] sm:$0xff] %v4532_v54  ;;  %v5697_v22 = vpop.permute.xlu1 %5696 }
 0x997   : > { %4549 = vst [vmem:[%s8298_s14 + $0x18] sm:$0xff] %v4533_v39  ;;  %v5699_v35 = vunpack.i.h.bf16 %v5697_v22  ;;  %v5698_v29 = vunpack.i.l.bf16 %v5697_v22 }
 0x999   : > { %v4521_v18 = vsel %vm546_vm0, %v3362_v12, %v5699_v35  ;;  %v4520_v55 = vsel %vm546_vm0, %v3360_v41, %v5698_v29  ;;  %v8606_v41 = vld [vmem:[#allocation11_spill] sm:$0xff]  ;;  %v5673_v12 = vunpack.i.l.bf16 %v8308_v10 }
 0x99a   : > { %v4365_v51 = vpop.f32.mrf.mxu3  ;;  %v4536_v38 = vpack.c.bf16 %v4520_v55, %v4504_v62  ;;  %v4537_v28 = vpack.c.bf16 %v4521_v18, %v4505_v6  ;;  %v4506_v7 = vsel %vm546_vm0, %v8606_v41, %v5663_v19  ;;  %v8612_v62 = vld [vmem:[#allocation18_spill] sm:$0xff] }
 0x99b   : > { %v4510_v16 = vsel %vm546_vm0, %v8609_v42, %v5673_v12  ;;  %v4513_v18 = vsel %vm546_vm0, %v8612_v62, %v5679_v0 }
 0x99c   : > { %4552 = vst [vmem:[%s8298_s14 + $0x30] sm:$0xff] %v4536_v38 }
 0x99d   : > { %4553 = vst [vmem:[%s8298_s14 + $0x38] sm:$0xff] %v4537_v28 }
 0x99e   : > { %v5702_v47 = vpop.permute.xlu2 %5701 }
 0x99f   : > { %v5704_v15 = vunpack.i.h.bf16 %v5702_v47  ;;  %v5703_v13 = vunpack.i.l.bf16 %v5702_v47 }
 0x9a1   : > { %v4522_v27 = vsel %vm546_vm0, %v3365_v58, %v5703_v13  ;;  %v4523_v32 = vsel %vm546_vm0, %v3367_v34, %v5704_v15  ;;  %v8611_v58 = vld [vmem:[#allocation17_spill] sm:$0xff] }
 0x9a2   : > { %v4367_v36 = vpop.f32.mrf.mxu3  ;;  %v4538_v56 = vpack.c.bf16 %v4522_v27, %v4506_v7  ;;  %v4539_v59 = vpack.c.bf16 %v4523_v32, %v4507_v8  ;;  %v4512_v35 = vsel %vm546_vm0, %v8611_v58, %v5678_v5 }
 0x9a3   : > { %v5715_v44 = vpack.i.bf16 %v4367_v36, %v4365_v51 }
 0x9a4   : > { %4554 = vst [vmem:[%s8298_s14 + $0x40] sm:$0xff] %v4538_v56 }
 0x9a5   : > { %5716 = vrot.lane.b32.xlu2 %v5715_v44, %s6026_s9  ;;  %4555 = vst [vmem:[%s8298_s14 + $0x48] sm:$0xff] %v4539_v59 }
 0x9c6   : > { %v5707_v53 = vpop.permute.xlu0 %5706 }
 0x9c7   : > { %v5708_v9 = vunpack.i.l.bf16 %v5707_v53  ;;  %v5709_v52 = vunpack.i.h.bf16 %v5707_v53 }
 0x9d1   : > { %v3370_v25 = vpop.f32.mrf.mxu2 }
 0x9d2   : > { %v4524_v14 = vsel %vm546_vm0, %v3370_v25, %v5708_v9 }
 0x9d3   : > { %v4540_v40 = vpack.c.bf16 %v4524_v14, %v4508_v1 }
 0x9d5   : > { %4556 = vst [vmem:[%s8298_s14 + $0x50] sm:$0xff] %v4540_v40 }
 0x9d9   : > { %v3372_v37 = vpop.f32.mrf.mxu2 }
 0x9da   : > { %v4525_v17 = vsel %vm546_vm0, %v3372_v37, %v5709_v52 }
 0x9db   : > { %v4541_v61 = vpack.c.bf16 %v4525_v17, %v4509_v20 }
 0x9dd   : > { %4557 = vst [vmem:[%s8298_s14 + $0x58] sm:$0xff] %v4541_v61 }
 0x9df   : > { %v5712_v2 = vpop.permute.xlu1 %5711 }
 0x9e0   : > { %v5713_v63 = vunpack.i.l.bf16 %v5712_v2  ;;  %v5714_v21 = vunpack.i.h.bf16 %v5712_v2 }
 0x9e1   : > { %v3375_v3 = vpop.f32.mrf.mxu2 }
 0x9e2   : > { %v4526_v49 = vsel %vm546_vm0, %v3375_v3, %v5713_v63 }
 0x9e3   : > { %v4542_v45 = vpack.c.bf16 %v4526_v49, %v4510_v16 }
 0x9e5   : > { %4558 = vst [vmem:[%s8298_s14 + $0x60] sm:$0xff] %v4542_v45 }
 0x9e9   : > { %v3377_v33 = vpop.f32.mrf.mxu2 }
 0x9ea   : > { %v4527_v57 = vsel %vm546_vm0, %v3377_v33, %v5714_v21 }
 0x9eb   : > { %v4543_v54 = vpack.c.bf16 %v4527_v57, %v4511_v60 }
 0x9ed   : > { %4559 = vst [vmem:[%s8298_s14 + $0x68] sm:$0xff] %v4543_v54 }
 0x9ff   : > { %v5717_v39 = vpop.permute.xlu2 %5716 }
 0xa00   : > { %v5718_v46 = vunpack.i.l.bf16 %v5717_v39  ;;  %v5719_v6 = vunpack.i.h.bf16 %v5717_v39 }
 0xa11   : > { %v3380_v22 = vpop.f32.mrf.mxu2 }
 0xa12   : > { %v4528_v10 = vsel %vm546_vm0, %v3380_v22, %v5718_v46 }
 0xa13   : > { %v4544_v29 = vpack.c.bf16 %v4528_v10, %v4512_v35 }
 0xa15   : > { %4560 = vst [vmem:[%s8298_s14 + $0x70] sm:$0xff] %v4544_v29 }
 0xa19   : > { %v3382_v11 = vpop.f32.mrf.mxu2 }
 0xa1a   : > { %v4529_v55 = vsel %vm546_vm0, %v3382_v11, %v5719_v6 }
 0xa1b   : > { %v4545_v51 = vpack.c.bf16 %v4529_v55, %v4513_v18 }
 0xa1d   : > { %4561 = vst [vmem:[%s8298_s14 + $0x78] sm:$0xff] %v4545_v51 }
 0xa1e PF: > { %s16_s23 = sadd.s32 1, %s6008_s23   ;;  %s8613_s21 = smov %s6004_s22 }
 0xa1f   : > { %p13_p5 = scmp.ge.s32.totalorder %s16_s23, 4   ;;  %s8614_s22 = smov %s8616_s24 }
 0xa21   :  { %15 = sbr.rel (!%p13_p5) target bundleno = 2 (0x2), region = 98 }

</bundles_post_ra>
